<compile_context>
chip_gen: v7x
topology: tpu7x:2x2x1
jax: 0.10.0
libtpu: 0.0.40
codegen_flags: <defaults>
</compile_context>

<pallas_src>
import functools

import jax
import jax.numpy as jnp
from jax.experimental import pallas as pl
from jax.experimental.pallas import tpu as pltpu

LANE = 128  # one full lane group; all matmuls / stores are 128-lane dense


# ---------------------------------------------------------------------------
# Pallas kernel: fused  upsample(x1) -> pad -> concat([x2, x1]) -> DoubleConv
# ---------------------------------------------------------------------------
def _up_double_conv_kernel(x1_ref, x2_ref, m_ref, e1_ref, e2_ref,
                           w1_ref, s1_ref, b1_ref, g1_ref,
                           w2_ref, s2_ref, b2_ref, g2_ref,
                           o_ref, xpad_ref, mid_ref,
                           *, H, W, h, w, C1, C2, Ho, Wo, py0, px0, Wp):
    # x1_ref : (1, h, w, C1)     low-res feature map (to be upsampled)
    # x2_ref : (1, H, W, C2)     skip connection
    # m_ref  : (Ho*Wo, h*w)      bf16 kron(U, V) bilinear operator (align_corners)
    # e1/e2  : (C1,128)/(C2,128) f32 lane-embed: channel c -> lanes k*Cin(+C2)+c
    # w1_ref : (128, 128)        bf16 conv1 weights, dense rows k*Cin+cin,
    #                            columns replicated as k2*Cmid+cmid
    # s1,b1  : (1, 128)          f32 folded BN1 scale/shift (lane-replicated)
    # g1_ref : (9, 128)          f32 tap-group masks for conv1 patch assembly
    # w2_ref : (128, 128)        bf16 conv2 weights, dense rows k*Cmid+cmid
    # s2,b2  : (1, 128)          f32 folded BN2 scale/shift (lanes [0,Cout))
    # g2_ref : (9, 128)          f32 tap-group masks for conv2 patch assembly
    # o_ref  : (1, H*W, 128)     lane-dense output slab
    # xpad_ref, mid_ref : (H+2, Wp, 128) f32 VMEM scratch (1-px halo, Wp%8==0)
    f32, bf16 = jnp.float32, jnp.bfloat16

    # Zero only the 1-pixel halo (+ right alignment pad) of the scratch tiles;
    # interiors are fully overwritten below.  Done every grid step (not gated
    # on program_id==0) so it stays correct when the batch axis is sharded
    # across TensorCores ("parallel", v7x megacore).
    def zero_halo(ref):
        ref[0:1, :, :] = jnp.zeros((1, Wp, LANE), f32)
        ref[H + 1:H + 2, :, :] = jnp.zeros((1, Wp, LANE), f32)
        ref[:, 0:1, :] = jnp.zeros((H + 2, 1, LANE), f32)
        ref[:, W + 1:Wp, :] = jnp.zeros((H + 2, Wp - W - 1, LANE), f32)

    zero_halo(xpad_ref)
    zero_halo(mid_ref)

    # ---- torch.cat([x2, x1], channel dim) in the lane-REPLICATED layout:
    #      lane (k*Cin + c) <- concat channel c, for every tap group k=0..8.
    x2_lane = jnp.dot(x2_ref[0].reshape(H * W, C2), e2_ref[...],
                      preferred_element_type=f32)                # (H*W, 128)

    # ---- bilinear upsample (align_corners=True): embed channels into the
    #      128-lane layout FIRST (tiny dot), then ONE lane-dense kron(U,V)
    #      matmul on the MXU (bf16 operands, f32 accumulation).
    x1_lane = jnp.dot(x1_ref[0].reshape(h * w, C1), e1_ref[...],
                      preferred_element_type=f32)                # (h*w, 128)
    x1_up = jnp.dot(m_ref[...], x1_lane.astype(bf16),
                    preferred_element_type=f32)                  # (Ho*Wo, 128)
    if (py0, px0, Ho, Wo) == (0, 0, H, W):
        x1_full = x1_up                                          # (H*W, 128)
    else:
        # F.pad with zeros: place the upsampled map inside the HxW frame.
        frame = jnp.zeros((H, W, LANE), f32)
        frame = jax.lax.dynamic_update_slice(
            frame, x1_up.reshape(Ho, Wo, LANE), (py0, px0, 0))
        x1_full = frame.reshape(H * W, LANE)

    # disjoint lane groups -> plain add realizes the channel concat
    xpad_ref[1:H + 1, 1:W + 1, :] = (x2_lane + x1_full).reshape(H, W, LANE)

    # ---- conv3x3(pad=1, no bias) + folded BN + ReLU with a DENSE 128-wide
    #      contraction: patches[p, k*Cin+c] = src[y+dy_k, x+dx_k, c] assembled
    #      from the lane-replicated scratch by 9 VPU mask-multiply-adds, then
    #      ONE (H*W,128)x(128,128) MXU dot (no 9*Cin-of-1152 zero waste).
    def conv_bn_relu(src_ref, g_ref, w_ref, s_ref, b_ref):
        patches = jnp.zeros((H * W, LANE), f32)
        for k in range(9):
            dy, dx = divmod(k, 3)
            tap = src_ref[dy:dy + H, dx:dx + W, :].reshape(H * W, LANE)
            patches = patches + tap * g_ref[k:k + 1, :]
        acc = jnp.dot(patches.astype(bf16), w_ref[...],
                      preferred_element_type=f32)                # (H*W, 128)
        return jnp.maximum(acc * s_ref[...] + b_ref[...], 0.0)   # f32 epilogue

    mid = conv_bn_relu(xpad_ref, g1_ref, w1_ref, s1_ref, b1_ref)
    mid_ref[1:H + 1, 1:W + 1, :] = mid.reshape(H, W, LANE)
    out = conv_bn_relu(mid_ref, g2_ref, w2_ref, s2_ref, b2_ref)

    # lane-dense, unmasked store of the whole output slab
    o_ref[...] = out.reshape(1, H * W, LANE)


# ---------------------------------------------------------------------------
# Wrapper: builds the interpolation operator, runs the fused Pallas kernel.
# ---------------------------------------------------------------------------
def interp_matrix(n_out, n_in):
    """1-D interpolation matrix of nn.Upsample(mode='bilinear', align_corners=True)."""
    if n_in == 1:
        return jnp.ones((n_out, 1), jnp.float32)
    pos = jnp.linspace(0.0, n_in - 1.0, n_out)
    lo = jnp.clip(jnp.floor(pos).astype(jnp.int32), 0, n_in - 2)
    frac = pos - lo.astype(jnp.float32)
    eye = jnp.eye(n_in, dtype=jnp.float32)
    return (1.0 - frac)[:, None] * eye[lo] + frac[:, None] * eye[lo + 1]


def up_forward(x1_nchw, x2_nchw, params, *, out_channels, scale=2,
               single_buffer_consts=True):
    """Equivalent of Up.forward(x1, x2) with bilinear=True (eval-mode BN)."""
    # NCHW -> NHWC kept only for PyTorch interface parity (see header TODO).
    x1 = jnp.transpose(x1_nchw, (0, 2, 3, 1))
    x2 = jnp.transpose(x2_nchw, (0, 2, 3, 1))
    B, h, w, C1 = x1.shape
    _, H, W, C2 = x2.shape
    Ho, Wo = h * scale, w * scale
    diffY, diffX = H - Ho, W - Wo
    assert diffY >= 0 and diffX >= 0  # TODO(synk): negative diff (crop) unsupported
    py0, px0 = diffY // 2, diffX // 2
    Wp = (W + 2 + 7) // 8 * 8  # scratch sublane dim rounded to a multiple of 8

    # fail loudly if params were built for a different channel split
    assert params["e1"].shape[0] == C1 and params["e2"].shape[0] == C2

    # Combined 2-D bilinear operator (bf16 MXU operand):
    #   up(y, x, c) = sum_ij M[y*Wo+x, i*w+j] * x1[i, j, c]
    M = jnp.kron(interp_matrix(Ho, h), interp_matrix(Wo, w)).astype(jnp.bfloat16)

    kernel = functools.partial(
        _up_double_conv_kernel, H=H, W=W, h=h, w=w, C1=C1, C2=C2,
        Ho=Ho, Wo=Wo, py0=py0, px0=px0, Wp=Wp)

    def const_spec(shape):
        # grid-invariant operand: constant index_map, single-buffered
        zeros = (0,) * len(shape)
        if single_buffer_consts:
            return pl.BlockSpec(shape, lambda b, _z=zeros: _z,
                                pipeline_mode=pl.Buffered(1))
        return pl.BlockSpec(shape, lambda b, _z=zeros: _z)

    out_flat = pl.pallas_call(
        kernel,
        out_shape=jax.ShapeDtypeStruct((B, H * W, LANE), jnp.float32),
        grid=(B,),
        in_specs=[
            pl.BlockSpec((1, h, w, C1), lambda b: (b, 0, 0, 0)),   # x1
            pl.BlockSpec((1, H, W, C2), lambda b: (b, 0, 0, 0)),   # x2
            const_spec((Ho * Wo, h * w)),                          # M (upsample op)
            const_spec((C1, LANE)),                                # e1
            const_spec((C2, LANE)),                                # e2
            const_spec((LANE, LANE)),                              # w1
            const_spec((1, LANE)),                                 # s1
            const_spec((1, LANE)),                                 # b1
            const_spec((9, LANE)),                                 # g1 (tap masks)
            const_spec((LANE, LANE)),                              # w2
            const_spec((1, LANE)),                                 # s2
            const_spec((1, LANE)),                                 # b2
            const_spec((9, LANE)),                                 # g2 (tap masks)
        ],
        out_specs=pl.BlockSpec((1, H * W, LANE), lambda b: (b, 0, 0)),
        scratch_shapes=[
            pltpu.VMEM((H + 2, Wp, LANE), jnp.float32),   # padded concat input
            pltpu.VMEM((H + 2, Wp, LANE), jnp.float32),   # padded mid activation
        ],
        compiler_params=pltpu.CompilerParams(
            dimension_semantics=("parallel",)),   # batch across TCs on v7x
    )(x1, x2, M, params["e1"], params["e2"],
      params["w1"], params["s1"], params["b1"], params["g1"],
      params["w2"], params["s2"], params["b2"], params["g2"])

    out = out_flat.reshape(B, H, W, LANE)[..., :out_channels]
    return jnp.transpose(out, (0, 3, 1, 2))  # back to NCHW


# ---------------------------------------------------------------------------
# Deterministic parameter construction (Up(in_channels=8, out_channels=8))
# ---------------------------------------------------------------------------
def make_params(c1, c2, out_channels):
    in_channels = c1 + c2
    mid_channels = in_channels // 2
    # dense 9-tap K packing only valid for small-channel configs (see TODO)
    assert 9 * in_channels <= LANE, "dense tap packing needs 9*(C1+C2) <= 128"
    assert 9 * mid_channels <= LANE, "dense tap packing needs 9*mid <= 128"
    assert out_channels <= LANE
    eps = 1e-5
    keys = jax.random.split(jax.random.PRNGKey(0), 10)

    # PyTorch conv weight layout: (Cout, Cin, 3, 3), no bias.
    W1 = 0.1 * jax.random.normal(keys[0], (mid_channels, in_channels, 3, 3),
                                 jnp.float32)
    W2 = 0.1 * jax.random.normal(keys[1], (out_channels, mid_channels, 3, 3),
                                 jnp.float32)

    g1 = jax.random.uniform(keys[2], (mid_channels,), jnp.float32, 0.5, 1.5)
    be1 = 0.1 * jax.random.normal(keys[3], (mid_channels,), jnp.float32)
    m1 = 0.1 * jax.random.normal(keys[4], (mid_channels,), jnp.float32)
    v1 = jax.random.uniform(keys[5], (mid_channels,), jnp.float32, 0.5, 1.5)

    g2 = jax.random.uniform(keys[6], (out_channels,), jnp.float32, 0.5, 1.5)
    be2 = 0.1 * jax.random.normal(keys[7], (out_channels,), jnp.float32)
    m2 = 0.1 * jax.random.normal(keys[8], (out_channels,), jnp.float32)
    v2 = jax.random.uniform(keys[9], (out_channels,), jnp.float32, 0.5, 1.5)

    s1 = g1 / jnp.sqrt(v1 + eps)
    b1 = be1 - m1 * s1
    s2 = g2 / jnp.sqrt(v2 + eps)
    b2 = be2 - m2 * s2

    # conv1: dense-K rows (tap*Cin + cin); columns replicated across the 9 tap
    # groups conv2's dense-K patch assembly reads (col = tap2*Cmid + cmid).
    w1_kic = jnp.transpose(W1, (2, 3, 1, 0)).reshape(9 * in_channels, mid_channels)
    w1p = (jnp.zeros((LANE, LANE), jnp.float32)
           .at[:9 * in_channels, :9 * mid_channels].set(jnp.tile(w1_kic, (1, 9)))
           .astype(jnp.bfloat16))
    # conv2: dense-K rows (tap*Cmid + cmid); output channels at lanes [0, Cout).
    w2_kic = jnp.transpose(W2, (2, 3, 1, 0)).reshape(9 * mid_channels, out_channels)
    w2p = (jnp.zeros((LANE, LANE), jnp.float32)
           .at[:9 * mid_channels, :out_channels].set(w2_kic)
           .astype(jnp.bfloat16))

    def padvec(v, rep):
        vv = jnp.tile(v, rep) if rep > 1 else v
        return jnp.zeros((1, LANE), jnp.float32).at[0, :vv.shape[0]].set(vv)

    s1p, b1p = padvec(s1, 9), padvec(b1, 9)      # replicated like w1 columns
    s2p, b2p = padvec(s2, 1), padvec(b2, 1)

    # lane-embed matrices for cat([x2, x1]): channel c of x2 -> lane k*Cin + c,
    # channel c of x1 -> lane k*Cin + C2 + c, replicated for every tap k.
    e2 = jnp.zeros((c2, LANE), jnp.float32)
    e1 = jnp.zeros((c1, LANE), jnp.float32)
    for k in range(9):
        e2 = e2.at[jnp.arange(c2), k * in_channels + jnp.arange(c2)].set(1.0)
        e1 = e1.at[jnp.arange(c1), k * in_channels + c2 + jnp.arange(c1)].set(1.0)

    # tap-group select masks for the dense-K patch assembly
    def group_mask(cin):
        m = jnp.zeros((9, LANE), jnp.float32)
        for k in range(9):
            m = m.at[k, k * cin:(k + 1) * cin].set(1.0)
        return m

    params = dict(w1=w1p, s1=s1p, b1=b1p, g1=group_mask(in_channels),
                  w2=w2p, s2=s2p, b2=b2p, g2=group_mask(mid_channels),
                  e1=e1, e2=e2)
    ref = dict(W1=W1, W2=W2, s1=s1, b1=b1, s2=s2, b2=b2)
    return params, ref


# ---------------------------------------------------------------------------
# Plain-XLA f32 reference (for the self-check)
# ---------------------------------------------------------------------------
def upsample_bilinear_align_corners(x, scale):
    B, H, W, C = x.shape
    Ho, Wo = H * scale, W * scale
    ys = jnp.linspace(0.0, float(H - 1), Ho)
    xs = jnp.linspace(0.0, float(W - 1), Wo)
    y0 = jnp.floor(ys).astype(jnp.int32)
    x0 = jnp.floor(xs).astype(jnp.int32)
    y1 = jnp.minimum(y0 + 1, H - 1)
    x1 = jnp.minimum(x0 + 1, W - 1)
    wy = (ys - y0.astype(ys.dtype))[None, :, None, None]
    wx = (xs - x0.astype(xs.dtype))[None, None, :, None]
    top = x[:, y0][:, :, x0] * (1.0 - wx) + x[:, y0][:, :, x1] * wx
    bot = x[:, y1][:, :, x0] * (1.0 - wx) + x[:, y1][:, :, x1] * wx
    return top * (1.0 - wy) + bot * wy


def reference_double_conv(x_nhwc, ref):
    def conv(x, Wt):  # Wt: (Cout, Cin, 3, 3) -> HWIO
        w_ = jnp.transpose(Wt, (2, 3, 1, 0))
        return jax.lax.conv_general_dilated(
            x, w_, (1, 1), 'SAME',
            dimension_numbers=('NHWC', 'HWIO', 'NHWC'))
    y = jnp.maximum(conv(x_nhwc, ref["W1"]) * ref["s1"] + ref["b1"], 0.0)
    y = jnp.maximum(conv(y, ref["W2"]) * ref["s2"] + ref["b2"], 0.0)
    return y


if __name__ == "__main__":
    C1, C2 = 4, 4                           # Up(in_channels=8, out_channels=8)
    out_channels = 8
    B, H2s, W2s = 2, 16, 16                 # x2 spatial; x1 is half-resolution

    k1, k2 = jax.random.split(jax.random.PRNGKey(0))
    x1 = jax.random.normal(k1, (B, C1, H2s // 2, W2s // 2), jnp.float32)  # (2,4,8,8)
    x2 = jax.random.normal(k2, (B, C2, H2s, W2s), jnp.float32)            # (2,4,16,16)

    params, ref_p = make_params(C1, C2, out_channels)

    up_fn = jax.jit(functools.partial(up_forward, out_channels=out_channels))
    try:
        out = jax.block_until_ready(up_fn(x1, x2, params))
    except Exception:
        # TODO(synk): this JAX/libtpu build rejects pl.Buffered(1) single
        # buffering of grid-invariant operands; fall back to default buffering.
        up_fn = jax.jit(functools.partial(up_forward, out_channels=out_channels,
                                          single_buffer_consts=False))
        out = jax.block_until_ready(up_fn(x1, x2, params))
    assert out.shape == (B, out_channels, H2s, W2s), out.shape

    # cross-check the fused Pallas path against a plain-XLA f32 reference.
    # MXU operands are bf16 in the kernel (f32 accumulation), so the tolerance
    # is relaxed vs the pure-f32 comparison.
    x1n = jnp.transpose(x1, (0, 2, 3, 1))
    x2n = jnp.transpose(x2, (0, 2, 3, 1))
    x_cat = jnp.concatenate(
        [x2n, upsample_bilinear_align_corners(x1n, 2)], axis=-1)
    ref_out = jnp.transpose(reference_double_conv(x_cat, ref_p), (0, 3, 1, 2))
    err_max = float(jnp.max(jnp.abs(out - ref_out)))
    err_mean = float(jnp.mean(jnp.abs(out - ref_out)))
    assert err_max < 6e-2 and err_mean < 1e-2, (err_max, err_mean)

    print("KERNEL_OK")
</pallas_src>

<mosaic_0001>
module attributes {stable_mosaic.version = 11 : i64} {
  func.func @_up_double_conv_kernel(%arg0: i32, %arg1: memref<1x8x8x4xf32, #tpu.memory_space<vmem>>, %arg2: memref<1x16x16x4xf32, #tpu.memory_space<vmem>>, %arg3: memref<256x64xbf16, #tpu.memory_space<vmem>>, %arg4: memref<4x128xf32, #tpu.memory_space<vmem>>, %arg5: memref<4x128xf32, #tpu.memory_space<vmem>>, %arg6: memref<128x128xbf16, #tpu.memory_space<vmem>>, %arg7: memref<1x128xf32, #tpu.memory_space<vmem>>, %arg8: memref<1x128xf32, #tpu.memory_space<vmem>>, %arg9: memref<9x128xf32, #tpu.memory_space<vmem>>, %arg10: memref<128x128xbf16, #tpu.memory_space<vmem>>, %arg11: memref<1x128xf32, #tpu.memory_space<vmem>>, %arg12: memref<1x128xf32, #tpu.memory_space<vmem>>, %arg13: memref<9x128xf32, #tpu.memory_space<vmem>>, %arg14: memref<1x256x128xf32, #tpu.memory_space<vmem>>, %arg15: memref<18x24x128xf32, #tpu.memory_space<vmem>>, %arg16: memref<18x24x128xf32, #tpu.memory_space<vmem>>) attributes {dimension_semantics = [#tpu.dimension_semantics<parallel>], iteration_bounds = array<i64: 2>, scalar_prefetch = 0 : i64, scratch_operands = 2 : i64, tpu.core_type = #tpu.core_type<tc>, window_params = [{transform_indices = @transform_0, window_bounds = array<i64: 1, 8, 8, 4>}, {transform_indices = @transform_1, window_bounds = array<i64: 1, 16, 16, 4>}, {pipeline_mode = #tpu.pipeline_mode<synchronous>, transform_indices = @transform_2, window_bounds = array<i64: 256, 64>}, {pipeline_mode = #tpu.pipeline_mode<synchronous>, transform_indices = @transform_3, window_bounds = array<i64: 4, 128>}, {pipeline_mode = #tpu.pipeline_mode<synchronous>, transform_indices = @transform_4, window_bounds = array<i64: 4, 128>}, {pipeline_mode = #tpu.pipeline_mode<synchronous>, transform_indices = @transform_5, window_bounds = array<i64: 128, 128>}, {pipeline_mode = #tpu.pipeline_mode<synchronous>, transform_indices = @transform_6, window_bounds = array<i64: 1, 128>}, {pipeline_mode = #tpu.pipeline_mode<synchronous>, transform_indices = @transform_7, window_bounds = array<i64: 1, 128>}, {pipeline_mode = #tpu.pipeline_mode<synchronous>, transform_indices = @transform_8, window_bounds = array<i64: 9, 128>}, {pipeline_mode = #tpu.pipeline_mode<synchronous>, transform_indices = @transform_9, window_bounds = array<i64: 128, 128>}, {pipeline_mode = #tpu.pipeline_mode<synchronous>, transform_indices = @transform_10, window_bounds = array<i64: 1, 128>}, {pipeline_mode = #tpu.pipeline_mode<synchronous>, transform_indices = @transform_11, window_bounds = array<i64: 1, 128>}, {pipeline_mode = #tpu.pipeline_mode<synchronous>, transform_indices = @transform_12, window_bounds = array<i64: 9, 128>}, {transform_indices = @transform_13, window_bounds = array<i64: 1, 256, 128>}]} {
    %cst = arith.constant 0.000000e+00 : f32
    %0 = vector.broadcast %cst : f32 to vector<1x24x128xf32>
    %c0 = arith.constant 0 : index
    %c0_0 = arith.constant 0 : index
    %c0_1 = arith.constant 0 : index
    %1 = vector.load %arg15[%c0, %c0_0, %c0_1] : memref<18x24x128xf32, #tpu.memory_space<vmem>>, vector<1x24x128xf32>
    tpu.vector_store %arg15[%c0, %c0_0, %c0_1], %0 {strides = array<i32>} : memref<18x24x128xf32, #tpu.memory_space<vmem>>, vector<1x24x128xf32>,
    %cst_2 = arith.constant 0.000000e+00 : f32
    %2 = vector.broadcast %cst_2 : f32 to vector<1x24x128xf32>
    %c17 = arith.constant 17 : index
    %c0_3 = arith.constant 0 : index
    %c0_4 = arith.constant 0 : index
    %3 = vector.load %arg15[%c17, %c0_3, %c0_4] : memref<18x24x128xf32, #tpu.memory_space<vmem>>, vector<1x24x128xf32>
    tpu.vector_store %arg15[%c17, %c0_3, %c0_4], %2 {strides = array<i32>} : memref<18x24x128xf32, #tpu.memory_space<vmem>>, vector<1x24x128xf32>,
    %cst_5 = arith.constant 0.000000e+00 : f32
    %4 = vector.broadcast %cst_5 : f32 to vector<18x1x128xf32>
    %c0_6 = arith.constant 0 : index
    %c0_7 = arith.constant 0 : index
    %c0_8 = arith.constant 0 : index
    %5 = vector.load %arg15[%c0_6, %c0_7, %c0_8] : memref<18x24x128xf32, #tpu.memory_space<vmem>>, vector<18x1x128xf32>
    tpu.vector_store %arg15[%c0_6, %c0_7, %c0_8], %4 {strides = array<i32>} : memref<18x24x128xf32, #tpu.memory_space<vmem>>, vector<18x1x128xf32>,
    %cst_9 = arith.constant 0.000000e+00 : f32
    %6 = vector.broadcast %cst_9 : f32 to vector<18x7x128xf32>
    %c0_10 = arith.constant 0 : index
    %c17_11 = arith.constant 17 : index
    %c0_12 = arith.constant 0 : index
    %7 = vector.load %arg15[%c0_10, %c17_11, %c0_12] : memref<18x24x128xf32, #tpu.memory_space<vmem>>, vector<18x7x128xf32>
    tpu.vector_store %arg15[%c0_10, %c17_11, %c0_12], %6 {strides = array<i32>} : memref<18x24x128xf32, #tpu.memory_space<vmem>>, vector<18x7x128xf32>,
    %cst_13 = arith.constant 0.000000e+00 : f32
    %8 = vector.broadcast %cst_13 : f32 to vector<1x24x128xf32>
    %c0_14 = arith.constant 0 : index
    %c0_15 = arith.constant 0 : index
    %c0_16 = arith.constant 0 : index
    %9 = vector.load %arg16[%c0_14, %c0_15, %c0_16] : memref<18x24x128xf32, #tpu.memory_space<vmem>>, vector<1x24x128xf32>
    tpu.vector_store %arg16[%c0_14, %c0_15, %c0_16], %8 {strides = array<i32>} : memref<18x24x128xf32, #tpu.memory_space<vmem>>, vector<1x24x128xf32>,
    %cst_17 = arith.constant 0.000000e+00 : f32
    %10 = vector.broadcast %cst_17 : f32 to vector<1x24x128xf32>
    %c17_18 = arith.constant 17 : index
    %c0_19 = arith.constant 0 : index
    %c0_20 = arith.constant 0 : index
    %11 = vector.load %arg16[%c17_18, %c0_19, %c0_20] : memref<18x24x128xf32, #tpu.memory_space<vmem>>, vector<1x24x128xf32>
    tpu.vector_store %arg16[%c17_18, %c0_19, %c0_20], %10 {strides = array<i32>} : memref<18x24x128xf32, #tpu.memory_space<vmem>>, vector<1x24x128xf32>,
    %cst_21 = arith.constant 0.000000e+00 : f32
    %12 = vector.broadcast %cst_21 : f32 to vector<18x1x128xf32>
    %c0_22 = arith.constant 0 : index
    %c0_23 = arith.constant 0 : index
    %c0_24 = arith.constant 0 : index
    %13 = vector.load %arg16[%c0_22, %c0_23, %c0_24] : memref<18x24x128xf32, #tpu.memory_space<vmem>>, vector<18x1x128xf32>
    tpu.vector_store %arg16[%c0_22, %c0_23, %c0_24], %12 {strides = array<i32>} : memref<18x24x128xf32, #tpu.memory_space<vmem>>, vector<18x1x128xf32>,
    %cst_25 = arith.constant 0.000000e+00 : f32
    %14 = vector.broadcast %cst_25 : f32 to vector<18x7x128xf32>
    %c0_26 = arith.constant 0 : index
    %c17_27 = arith.constant 17 : index
    %c0_28 = arith.constant 0 : index
    %15 = vector.load %arg16[%c0_26, %c17_27, %c0_28] : memref<18x24x128xf32, #tpu.memory_space<vmem>>, vector<18x7x128xf32>
    tpu.vector_store %arg16[%c0_26, %c17_27, %c0_28], %14 {strides = array<i32>} : memref<18x24x128xf32, #tpu.memory_space<vmem>>, vector<18x7x128xf32>,
    %c0_29 = arith.constant 0 : index
    %c0_30 = arith.constant 0 : index
    %c0_31 = arith.constant 0 : index
    %c0_32 = arith.constant 0 : index
    %16 = vector.load %arg2[%c0_29, %c0_30, %c0_31, %c0_32] : memref<1x16x16x4xf32, #tpu.memory_space<vmem>>, vector<1x16x16x4xf32>
    %17 = vector.shape_cast %16 : vector<1x16x16x4xf32> to vector<16x16x4xf32>
    %18 = vector.shape_cast %17 : vector<16x16x4xf32> to vector<256x4xf32>
    %c0_33 = arith.constant 0 : index
    %c0_34 = arith.constant 0 : index
    %19 = vector.load %arg5[%c0_33, %c0_34] : memref<4x128xf32, #tpu.memory_space<vmem>>, vector<4x128xf32>
    %cst_35 = arith.constant dense<0.000000e+00> : vector<256x128xf32>
    %20 = tpu.matmul %18, %19, %cst_35 {dimension_numbers = #tpu.dot_dimension_numbers<[1], [0], [0], [1], [0, 0, 1, 1], [], []>} : vector<256x4xf32>, vector<4x128xf32>, vector<256x128xf32> -> vector<256x128xf32>
    %c0_36 = arith.constant 0 : index
    %c0_37 = arith.constant 0 : index
    %c0_38 = arith.constant 0 : index
    %c0_39 = arith.constant 0 : index
    %21 = vector.load %arg1[%c0_36, %c0_37, %c0_38, %c0_39] : memref<1x8x8x4xf32, #tpu.memory_space<vmem>>, vector<1x8x8x4xf32>
    %22 = vector.shape_cast %21 : vector<1x8x8x4xf32> to vector<8x8x4xf32>
    %23 = vector.shape_cast %22 : vector<8x8x4xf32> to vector<64x4xf32>
    %c0_40 = arith.constant 0 : index
    %c0_41 = arith.constant 0 : index
    %24 = vector.load %arg4[%c0_40, %c0_41] : memref<4x128xf32, #tpu.memory_space<vmem>>, vector<4x128xf32>
    %cst_42 = arith.constant dense<0.000000e+00> : vector<64x128xf32>
    %25 = tpu.matmul %23, %24, %cst_42 {dimension_numbers = #tpu.dot_dimension_numbers<[1], [0], [0], [1], [0, 0, 1, 1], [], []>} : vector<64x4xf32>, vector<4x128xf32>, vector<64x128xf32> -> vector<64x128xf32>
    %c0_43 = arith.constant 0 : index
    %c0_44 = arith.constant 0 : index
    %26 = vector.load %arg3[%c0_43, %c0_44] : memref<256x64xbf16, #tpu.memory_space<vmem>>, vector<256x64xbf16>
    %27 = arith.truncf %25 : vector<64x128xf32> to vector<64x128xbf16>
    %cst_45 = arith.constant dense<0.000000e+00> : vector<256x128xf32>
    %28 = tpu.matmul %26, %27, %cst_45 {dimension_numbers = #tpu.dot_dimension_numbers<[1], [0], [0], [1], [0, 0, 1, 1], [], []>} : vector<256x64xbf16>, vector<64x128xbf16>, vector<256x128xf32> -> vector<256x128xf32>
    %29 = arith.addf %20, %28 : vector<256x128xf32>
    %30 = vector.shape_cast %29 : vector<256x128xf32> to vector<16x16x128xf32>
    %c1 = arith.constant 1 : index
    %c1_46 = arith.constant 1 : index
    %c0_47 = arith.constant 0 : index
    %31 = vector.load %arg15[%c1, %c1_46, %c0_47] : memref<18x24x128xf32, #tpu.memory_space<vmem>>, vector<16x16x128xf32>
    tpu.vector_store %arg15[%c1, %c1_46, %c0_47], %30 {strides = array<i32>} : memref<18x24x128xf32, #tpu.memory_space<vmem>>, vector<16x16x128xf32>,
    %cst_48 = arith.constant 0.000000e+00 : f32
    %32 = vector.broadcast %cst_48 : f32 to vector<256x128xf32>
    %c0_49 = arith.constant 0 : index
    %c0_50 = arith.constant 0 : index
    %c0_51 = arith.constant 0 : index
    %33 = vector.load %arg15[%c0_49, %c0_50, %c0_51] : memref<18x24x128xf32, #tpu.memory_space<vmem>>, vector<16x16x128xf32>
    %34 = vector.shape_cast %33 : vector<16x16x128xf32> to vector<256x128xf32>
    %c0_52 = arith.constant 0 : index
    %c0_53 = arith.constant 0 : index
    %35 = vector.load %arg9[%c0_52, %c0_53] : memref<9x128xf32, #tpu.memory_space<vmem>>, vector<1x128xf32>
    %36 = vector.broadcast %35 : vector<1x128xf32> to vector<256x128xf32>
    %37 = arith.mulf %34, %36 : vector<256x128xf32>
    %38 = arith.addf %32, %37 : vector<256x128xf32>
    %c0_54 = arith.constant 0 : index
    %c1_55 = arith.constant 1 : index
    %c0_56 = arith.constant 0 : index
    %39 = vector.load %arg15[%c0_54, %c1_55, %c0_56] : memref<18x24x128xf32, #tpu.memory_space<vmem>>, vector<16x16x128xf32>
    %40 = vector.shape_cast %39 : vector<16x16x128xf32> to vector<256x128xf32>
    %c1_57 = arith.constant 1 : index
    %c0_58 = arith.constant 0 : index
    %41 = vector.load %arg9[%c1_57, %c0_58] : memref<9x128xf32, #tpu.memory_space<vmem>>, vector<1x128xf32>
    %42 = vector.broadcast %41 : vector<1x128xf32> to vector<256x128xf32>
    %43 = arith.mulf %40, %42 : vector<256x128xf32>
    %44 = arith.addf %38, %43 : vector<256x128xf32>
    %c0_59 = arith.constant 0 : index
    %c2 = arith.constant 2 : index
    %c0_60 = arith.constant 0 : index
    %45 = vector.load %arg15[%c0_59, %c2, %c0_60] : memref<18x24x128xf32, #tpu.memory_space<vmem>>, vector<16x16x128xf32>
    %46 = vector.shape_cast %45 : vector<16x16x128xf32> to vector<256x128xf32>
    %c2_61 = arith.constant 2 : index
    %c0_62 = arith.constant 0 : index
    %47 = vector.load %arg9[%c2_61, %c0_62] : memref<9x128xf32, #tpu.memory_space<vmem>>, vector<1x128xf32>
    %48 = vector.broadcast %47 : vector<1x128xf32> to vector<256x128xf32>
    %49 = arith.mulf %46, %48 : vector<256x128xf32>
    %50 = arith.addf %44, %49 : vector<256x128xf32>
    %c1_63 = arith.constant 1 : index
    %c0_64 = arith.constant 0 : index
    %c0_65 = arith.constant 0 : index
    %51 = vector.load %arg15[%c1_63, %c0_64, %c0_65] : memref<18x24x128xf32, #tpu.memory_space<vmem>>, vector<16x16x128xf32>
    %52 = vector.shape_cast %51 : vector<16x16x128xf32> to vector<256x128xf32>
    %c3 = arith.constant 3 : index
    %c0_66 = arith.constant 0 : index
    %53 = vector.load %arg9[%c3, %c0_66] : memref<9x128xf32, #tpu.memory_space<vmem>>, vector<1x128xf32>
    %54 = vector.broadcast %53 : vector<1x128xf32> to vector<256x128xf32>
    %55 = arith.mulf %52, %54 : vector<256x128xf32>
    %56 = arith.addf %50, %55 : vector<256x128xf32>
    %c1_67 = arith.constant 1 : index
    %c1_68 = arith.constant 1 : index
    %c0_69 = arith.constant 0 : index
    %57 = vector.load %arg15[%c1_67, %c1_68, %c0_69] : memref<18x24x128xf32, #tpu.memory_space<vmem>>, vector<16x16x128xf32>
    %58 = vector.shape_cast %57 : vector<16x16x128xf32> to vector<256x128xf32>
    %c4 = arith.constant 4 : index
    %c0_70 = arith.constant 0 : index
    %59 = vector.load %arg9[%c4, %c0_70] : memref<9x128xf32, #tpu.memory_space<vmem>>, vector<1x128xf32>
    %60 = vector.broadcast %59 : vector<1x128xf32> to vector<256x128xf32>
    %61 = arith.mulf %58, %60 : vector<256x128xf32>
    %62 = arith.addf %56, %61 : vector<256x128xf32>
    %c1_71 = arith.constant 1 : index
    %c2_72 = arith.constant 2 : index
    %c0_73 = arith.constant 0 : index
    %63 = vector.load %arg15[%c1_71, %c2_72, %c0_73] : memref<18x24x128xf32, #tpu.memory_space<vmem>>, vector<16x16x128xf32>
    %64 = vector.shape_cast %63 : vector<16x16x128xf32> to vector<256x128xf32>
    %c5 = arith.constant 5 : index
    %c0_74 = arith.constant 0 : index
    %65 = vector.load %arg9[%c5, %c0_74] : memref<9x128xf32, #tpu.memory_space<vmem>>, vector<1x128xf32>
    %66 = vector.broadcast %65 : vector<1x128xf32> to vector<256x128xf32>
    %67 = arith.mulf %64, %66 : vector<256x128xf32>
    %68 = arith.addf %62, %67 : vector<256x128xf32>
    %c2_75 = arith.constant 2 : index
    %c0_76 = arith.constant 0 : index
    %c0_77 = arith.constant 0 : index
    %69 = vector.load %arg15[%c2_75, %c0_76, %c0_77] : memref<18x24x128xf32, #tpu.memory_space<vmem>>, vector<16x16x128xf32>
    %70 = vector.shape_cast %69 : vector<16x16x128xf32> to vector<256x128xf32>
    %c6 = arith.constant 6 : index
    %c0_78 = arith.constant 0 : index
    %71 = vector.load %arg9[%c6, %c0_78] : memref<9x128xf32, #tpu.memory_space<vmem>>, vector<1x128xf32>
    %72 = vector.broadcast %71 : vector<1x128xf32> to vector<256x128xf32>
    %73 = arith.mulf %70, %72 : vector<256x128xf32>
    %74 = arith.addf %68, %73 : vector<256x128xf32>
    %c2_79 = arith.constant 2 : index
    %c1_80 = arith.constant 1 : index
    %c0_81 = arith.constant 0 : index
    %75 = vector.load %arg15[%c2_79, %c1_80, %c0_81] : memref<18x24x128xf32, #tpu.memory_space<vmem>>, vector<16x16x128xf32>
    %76 = vector.shape_cast %75 : vector<16x16x128xf32> to vector<256x128xf32>
    %c7 = arith.constant 7 : index
    %c0_82 = arith.constant 0 : index
    %77 = vector.load %arg9[%c7, %c0_82] : memref<9x128xf32, #tpu.memory_space<vmem>>, vector<1x128xf32>
    %78 = vector.broadcast %77 : vector<1x128xf32> to vector<256x128xf32>
    %79 = arith.mulf %76, %78 : vector<256x128xf32>
    %80 = arith.addf %74, %79 : vector<256x128xf32>
    %c2_83 = arith.constant 2 : index
    %c2_84 = arith.constant 2 : index
    %c0_85 = arith.constant 0 : index
    %81 = vector.load %arg15[%c2_83, %c2_84, %c0_85] : memref<18x24x128xf32, #tpu.memory_space<vmem>>, vector<16x16x128xf32>
    %82 = vector.shape_cast %81 : vector<16x16x128xf32> to vector<256x128xf32>
    %c8 = arith.constant 8 : index
    %c0_86 = arith.constant 0 : index
    %83 = vector.load %arg9[%c8, %c0_86] : memref<9x128xf32, #tpu.memory_space<vmem>>, vector<1x128xf32>
    %84 = vector.broadcast %83 : vector<1x128xf32> to vector<256x128xf32>
    %85 = arith.mulf %82, %84 : vector<256x128xf32>
    %86 = arith.addf %80, %85 : vector<256x128xf32>
    %87 = arith.truncf %86 : vector<256x128xf32> to vector<256x128xbf16>
    %c0_87 = arith.constant 0 : index
    %c0_88 = arith.constant 0 : index
    %88 = vector.load %arg6[%c0_87, %c0_88] : memref<128x128xbf16, #tpu.memory_space<vmem>>, vector<128x128xbf16>
    %cst_89 = arith.constant dense<0.000000e+00> : vector<256x128xf32>
    %89 = tpu.matmul %87, %88, %cst_89 {dimension_numbers = #tpu.dot_dimension_numbers<[1], [0], [0], [1], [0, 0, 1, 1], [], []>} : vector<256x128xbf16>, vector<128x128xbf16>, vector<256x128xf32> -> vector<256x128xf32>
    %c0_90 = arith.constant 0 : index
    %c0_91 = arith.constant 0 : index
    %90 = vector.load %arg7[%c0_90, %c0_91] : memref<1x128xf32, #tpu.memory_space<vmem>>, vector<1x128xf32>
    %91 = vector.broadcast %90 : vector<1x128xf32> to vector<256x128xf32>
    %92 = arith.mulf %89, %91 : vector<256x128xf32>
    %c0_92 = arith.constant 0 : index
    %c0_93 = arith.constant 0 : index
    %93 = vector.load %arg8[%c0_92, %c0_93] : memref<1x128xf32, #tpu.memory_space<vmem>>, vector<1x128xf32>
    %94 = vector.broadcast %93 : vector<1x128xf32> to vector<256x128xf32>
    %95 = arith.addf %92, %94 : vector<256x128xf32>
    %cst_94 = arith.constant 0.000000e+00 : f32
    %96 = vector.broadcast %cst_94 : f32 to vector<256x128xf32>
    %97 = arith.maximumf %95, %96 : vector<256x128xf32>
    %98 = vector.shape_cast %97 : vector<256x128xf32> to vector<16x16x128xf32>
    %c1_95 = arith.constant 1 : index
    %c1_96 = arith.constant 1 : index
    %c0_97 = arith.constant 0 : index
    %99 = vector.load %arg16[%c1_95, %c1_96, %c0_97] : memref<18x24x128xf32, #tpu.memory_space<vmem>>, vector<16x16x128xf32>
    tpu.vector_store %arg16[%c1_95, %c1_96, %c0_97], %98 {strides = array<i32>} : memref<18x24x128xf32, #tpu.memory_space<vmem>>, vector<16x16x128xf32>,
    %cst_98 = arith.constant 0.000000e+00 : f32
    %100 = vector.broadcast %cst_98 : f32 to vector<256x128xf32>
    %c0_99 = arith.constant 0 : index
    %c0_100 = arith.constant 0 : index
    %c0_101 = arith.constant 0 : index
    %101 = vector.load %arg16[%c0_99, %c0_100, %c0_101] : memref<18x24x128xf32, #tpu.memory_space<vmem>>, vector<16x16x128xf32>
    %102 = vector.shape_cast %101 : vector<16x16x128xf32> to vector<256x128xf32>
    %c0_102 = arith.constant 0 : index
    %c0_103 = arith.constant 0 : index
    %103 = vector.load %arg13[%c0_102, %c0_103] : memref<9x128xf32, #tpu.memory_space<vmem>>, vector<1x128xf32>
    %104 = vector.broadcast %103 : vector<1x128xf32> to vector<256x128xf32>
    %105 = arith.mulf %102, %104 : vector<256x128xf32>
    %106 = arith.addf %100, %105 : vector<256x128xf32>
    %c0_104 = arith.constant 0 : index
    %c1_105 = arith.constant 1 : index
    %c0_106 = arith.constant 0 : index
    %107 = vector.load %arg16[%c0_104, %c1_105, %c0_106] : memref<18x24x128xf32, #tpu.memory_space<vmem>>, vector<16x16x128xf32>
    %108 = vector.shape_cast %107 : vector<16x16x128xf32> to vector<256x128xf32>
    %c1_107 = arith.constant 1 : index
    %c0_108 = arith.constant 0 : index
    %109 = vector.load %arg13[%c1_107, %c0_108] : memref<9x128xf32, #tpu.memory_space<vmem>>, vector<1x128xf32>
    %110 = vector.broadcast %109 : vector<1x128xf32> to vector<256x128xf32>
    %111 = arith.mulf %108, %110 : vector<256x128xf32>
    %112 = arith.addf %106, %111 : vector<256x128xf32>
    %c0_109 = arith.constant 0 : index
    %c2_110 = arith.constant 2 : index
    %c0_111 = arith.constant 0 : index
    %113 = vector.load %arg16[%c0_109, %c2_110, %c0_111] : memref<18x24x128xf32, #tpu.memory_space<vmem>>, vector<16x16x128xf32>
    %114 = vector.shape_cast %113 : vector<16x16x128xf32> to vector<256x128xf32>
    %c2_112 = arith.constant 2 : index
    %c0_113 = arith.constant 0 : index
    %115 = vector.load %arg13[%c2_112, %c0_113] : memref<9x128xf32, #tpu.memory_space<vmem>>, vector<1x128xf32>
    %116 = vector.broadcast %115 : vector<1x128xf32> to vector<256x128xf32>
    %117 = arith.mulf %114, %116 : vector<256x128xf32>
    %118 = arith.addf %112, %117 : vector<256x128xf32>
    %c1_114 = arith.constant 1 : index
    %c0_115 = arith.constant 0 : index
    %c0_116 = arith.constant 0 : index
    %119 = vector.load %arg16[%c1_114, %c0_115, %c0_116] : memref<18x24x128xf32, #tpu.memory_space<vmem>>, vector<16x16x128xf32>
    %120 = vector.shape_cast %119 : vector<16x16x128xf32> to vector<256x128xf32>
    %c3_117 = arith.constant 3 : index
    %c0_118 = arith.constant 0 : index
    %121 = vector.load %arg13[%c3_117, %c0_118] : memref<9x128xf32, #tpu.memory_space<vmem>>, vector<1x128xf32>
    %122 = vector.broadcast %121 : vector<1x128xf32> to vector<256x128xf32>
    %123 = arith.mulf %120, %122 : vector<256x128xf32>
    %124 = arith.addf %118, %123 : vector<256x128xf32>
    %c1_119 = arith.constant 1 : index
    %c1_120 = arith.constant 1 : index
    %c0_121 = arith.constant 0 : index
    %125 = vector.load %arg16[%c1_119, %c1_120, %c0_121] : memref<18x24x128xf32, #tpu.memory_space<vmem>>, vector<16x16x128xf32>
    %126 = vector.shape_cast %125 : vector<16x16x128xf32> to vector<256x128xf32>
    %c4_122 = arith.constant 4 : index
    %c0_123 = arith.constant 0 : index
    %127 = vector.load %arg13[%c4_122, %c0_123] : memref<9x128xf32, #tpu.memory_space<vmem>>, vector<1x128xf32>
    %128 = vector.broadcast %127 : vector<1x128xf32> to vector<256x128xf32>
    %129 = arith.mulf %126, %128 : vector<256x128xf32>
    %130 = arith.addf %124, %129 : vector<256x128xf32>
    %c1_124 = arith.constant 1 : index
    %c2_125 = arith.constant 2 : index
    %c0_126 = arith.constant 0 : index
    %131 = vector.load %arg16[%c1_124, %c2_125, %c0_126] : memref<18x24x128xf32, #tpu.memory_space<vmem>>, vector<16x16x128xf32>
    %132 = vector.shape_cast %131 : vector<16x16x128xf32> to vector<256x128xf32>
    %c5_127 = arith.constant 5 : index
    %c0_128 = arith.constant 0 : index
    %133 = vector.load %arg13[%c5_127, %c0_128] : memref<9x128xf32, #tpu.memory_space<vmem>>, vector<1x128xf32>
    %134 = vector.broadcast %133 : vector<1x128xf32> to vector<256x128xf32>
    %135 = arith.mulf %132, %134 : vector<256x128xf32>
    %136 = arith.addf %130, %135 : vector<256x128xf32>
    %c2_129 = arith.constant 2 : index
    %c0_130 = arith.constant 0 : index
    %c0_131 = arith.constant 0 : index
    %137 = vector.load %arg16[%c2_129, %c0_130, %c0_131] : memref<18x24x128xf32, #tpu.memory_space<vmem>>, vector<16x16x128xf32>
    %138 = vector.shape_cast %137 : vector<16x16x128xf32> to vector<256x128xf32>
    %c6_132 = arith.constant 6 : index
    %c0_133 = arith.constant 0 : index
    %139 = vector.load %arg13[%c6_132, %c0_133] : memref<9x128xf32, #tpu.memory_space<vmem>>, vector<1x128xf32>
    %140 = vector.broadcast %139 : vector<1x128xf32> to vector<256x128xf32>
    %141 = arith.mulf %138, %140 : vector<256x128xf32>
    %142 = arith.addf %136, %141 : vector<256x128xf32>
    %c2_134 = arith.constant 2 : index
    %c1_135 = arith.constant 1 : index
    %c0_136 = arith.constant 0 : index
    %143 = vector.load %arg16[%c2_134, %c1_135, %c0_136] : memref<18x24x128xf32, #tpu.memory_space<vmem>>, vector<16x16x128xf32>
    %144 = vector.shape_cast %143 : vector<16x16x128xf32> to vector<256x128xf32>
    %c7_137 = arith.constant 7 : index
    %c0_138 = arith.constant 0 : index
    %145 = vector.load %arg13[%c7_137, %c0_138] : memref<9x128xf32, #tpu.memory_space<vmem>>, vector<1x128xf32>
    %146 = vector.broadcast %145 : vector<1x128xf32> to vector<256x128xf32>
    %147 = arith.mulf %144, %146 : vector<256x128xf32>
    %148 = arith.addf %142, %147 : vector<256x128xf32>
    %c2_139 = arith.constant 2 : index
    %c2_140 = arith.constant 2 : index
    %c0_141 = arith.constant 0 : index
    %149 = vector.load %arg16[%c2_139, %c2_140, %c0_141] : memref<18x24x128xf32, #tpu.memory_space<vmem>>, vector<16x16x128xf32>
    %150 = vector.shape_cast %149 : vector<16x16x128xf32> to vector<256x128xf32>
    %c8_142 = arith.constant 8 : index
    %c0_143 = arith.constant 0 : index
    %151 = vector.load %arg13[%c8_142, %c0_143] : memref<9x128xf32, #tpu.memory_space<vmem>>, vector<1x128xf32>
    %152 = vector.broadcast %151 : vector<1x128xf32> to vector<256x128xf32>
    %153 = arith.mulf %150, %152 : vector<256x128xf32>
    %154 = arith.addf %148, %153 : vector<256x128xf32>
    %155 = arith.truncf %154 : vector<256x128xf32> to vector<256x128xbf16>
    %c0_144 = arith.constant 0 : index
    %c0_145 = arith.constant 0 : index
    %156 = vector.load %arg10[%c0_144, %c0_145] : memref<128x128xbf16, #tpu.memory_space<vmem>>, vector<128x128xbf16>
    %cst_146 = arith.constant dense<0.000000e+00> : vector<256x128xf32>
    %157 = tpu.matmul %155, %156, %cst_146 {dimension_numbers = #tpu.dot_dimension_numbers<[1], [0], [0], [1], [0, 0, 1, 1], [], []>} : vector<256x128xbf16>, vector<128x128xbf16>, vector<256x128xf32> -> vector<256x128xf32>
    %c0_147 = arith.constant 0 : index
    %c0_148 = arith.constant 0 : index
    %158 = vector.load %arg11[%c0_147, %c0_148] : memref<1x128xf32, #tpu.memory_space<vmem>>, vector<1x128xf32>
    %159 = vector.broadcast %158 : vector<1x128xf32> to vector<256x128xf32>
    %160 = arith.mulf %157, %159 : vector<256x128xf32>
    %c0_149 = arith.constant 0 : index
    %c0_150 = arith.constant 0 : index
    %161 = vector.load %arg12[%c0_149, %c0_150] : memref<1x128xf32, #tpu.memory_space<vmem>>, vector<1x128xf32>
    %162 = vector.broadcast %161 : vector<1x128xf32> to vector<256x128xf32>
    %163 = arith.addf %160, %162 : vector<256x128xf32>
    %cst_151 = arith.constant 0.000000e+00 : f32
    %164 = vector.broadcast %cst_151 : f32 to vector<256x128xf32>
    %165 = arith.maximumf %163, %164 : vector<256x128xf32>
    %166 = vector.shape_cast %165 : vector<256x128xf32> to vector<1x256x128xf32>
    %c0_152 = arith.constant 0 : index
    %c0_153 = arith.constant 0 : index
    %c0_154 = arith.constant 0 : index
    %167 = vector.load %arg14[%c0_152, %c0_153, %c0_154] : memref<1x256x128xf32, #tpu.memory_space<vmem>>, vector<1x256x128xf32>
    tpu.vector_store %arg14[%c0_152, %c0_153, %c0_154], %166 {strides = array<i32>} : memref<1x256x128xf32, #tpu.memory_space<vmem>>, vector<1x256x128xf32>,
    return
  }
  func.func @transform_0(%arg0: i32) -> (i32, i32, i32, i32) {
    %c0_i32 = arith.constant 0 : i32
    %c0_i32_0 = arith.constant 0 : i32
    %c0_i32_1 = arith.constant 0 : i32
    %c0_i32_2 = arith.constant 0 : i32
    return %arg0, %c0_i32, %c0_i32_0, %c0_i32_1 : i32, i32, i32, i32
  }
  func.func @transform_1(%arg0: i32) -> (i32, i32, i32, i32) {
    %c0_i32 = arith.constant 0 : i32
    %c0_i32_0 = arith.constant 0 : i32
    %c0_i32_1 = arith.constant 0 : i32
    %c0_i32_2 = arith.constant 0 : i32
    return %arg0, %c0_i32, %c0_i32_0, %c0_i32_1 : i32, i32, i32, i32
  }
  func.func @transform_2(%arg0: i32) -> (i32, i32) {
    %c0_i32 = arith.constant 0 : i32
    %c0_i32_0 = arith.constant 0 : i32
    %c0_i32_1 = arith.constant 0 : i32
    return %c0_i32, %c0_i32_0 : i32, i32
  }
  func.func @transform_3(%arg0: i32) -> (i32, i32) {
    %c0_i32 = arith.constant 0 : i32
    %c0_i32_0 = arith.constant 0 : i32
    %c0_i32_1 = arith.constant 0 : i32
    return %c0_i32, %c0_i32_0 : i32, i32
  }
  func.func @transform_4(%arg0: i32) -> (i32, i32) {
    %c0_i32 = arith.constant 0 : i32
    %c0_i32_0 = arith.constant 0 : i32
    %c0_i32_1 = arith.constant 0 : i32
    return %c0_i32, %c0_i32_0 : i32, i32
  }
  func.func @transform_5(%arg0: i32) -> (i32, i32) {
    %c0_i32 = arith.constant 0 : i32
    %c0_i32_0 = arith.constant 0 : i32
    %c0_i32_1 = arith.constant 0 : i32
    return %c0_i32, %c0_i32_0 : i32, i32
  }
  func.func @transform_6(%arg0: i32) -> (i32, i32) {
    %c0_i32 = arith.constant 0 : i32
    %c0_i32_0 = arith.constant 0 : i32
    %c0_i32_1 = arith.constant 0 : i32
    return %c0_i32, %c0_i32_0 : i32, i32
  }
  func.func @transform_7(%arg0: i32) -> (i32, i32) {
    %c0_i32 = arith.constant 0 : i32
    %c0_i32_0 = arith.constant 0 : i32
    %c0_i32_1 = arith.constant 0 : i32
    return %c0_i32, %c0_i32_0 : i32, i32
  }
  func.func @transform_8(%arg0: i32) -> (i32, i32) {
    %c0_i32 = arith.constant 0 : i32
    %c0_i32_0 = arith.constant 0 : i32
    %c0_i32_1 = arith.constant 0 : i32
    return %c0_i32, %c0_i32_0 : i32, i32
  }
  func.func @transform_9(%arg0: i32) -> (i32, i32) {
    %c0_i32 = arith.constant 0 : i32
    %c0_i32_0 = arith.constant 0 : i32
    %c0_i32_1 = arith.constant 0 : i32
    return %c0_i32, %c0_i32_0 : i32, i32
  }
  func.func @transform_10(%arg0: i32) -> (i32, i32) {
    %c0_i32 = arith.constant 0 : i32
    %c0_i32_0 = arith.constant 0 : i32
    %c0_i32_1 = arith.constant 0 : i32
    return %c0_i32, %c0_i32_0 : i32, i32
  }
  func.func @transform_11(%arg0: i32) -> (i32, i32) {
    %c0_i32 = arith.constant 0 : i32
    %c0_i32_0 = arith.constant 0 : i32
    %c0_i32_1 = arith.constant 0 : i32
    return %c0_i32, %c0_i32_0 : i32, i32
  }
  func.func @transform_12(%arg0: i32) -> (i32, i32) {
    %c0_i32 = arith.constant 0 : i32
    %c0_i32_0 = arith.constant 0 : i32
    %c0_i32_1 = arith.constant 0 : i32
    return %c0_i32, %c0_i32_0 : i32, i32
  }
  func.func @transform_13(%arg0: i32) -> (i32, i32, i32) {
    %c0_i32 = arith.constant 0 : i32
    %c0_i32_0 = arith.constant 0 : i32
    %c0_i32_1 = arith.constant 0 : i32
    return %arg0, %c0_i32, %c0_i32_0 : i32, i32, i32
  }
}

module attributes {stable_mosaic.version = 11 : i64} {
  func.func @_up_double_conv_kernel(%arg0: i32, %arg1: memref<1x8x8x4xf32, #tpu.memory_space<vmem>>, %arg2: memref<1x16x16x4xf32, #tpu.memory_space<vmem>>, %arg3: memref<256x64xbf16, #tpu.memory_space<vmem>>, %arg4: memref<4x128xf32, #tpu.memory_space<vmem>>, %arg5: memref<4x128xf32, #tpu.memory_space<vmem>>, %arg6: memref<128x128xbf16, #tpu.memory_space<vmem>>, %arg7: memref<1x128xf32, #tpu.memory_space<vmem>>, %arg8: memref<1x128xf32, #tpu.memory_space<vmem>>, %arg9: memref<9x128xf32, #tpu.memory_space<vmem>>, %arg10: memref<128x128xbf16, #tpu.memory_space<vmem>>, %arg11: memref<1x128xf32, #tpu.memory_space<vmem>>, %arg12: memref<1x128xf32, #tpu.memory_space<vmem>>, %arg13: memref<9x128xf32, #tpu.memory_space<vmem>>, %arg14: memref<1x256x128xf32, #tpu.memory_space<vmem>>, %arg15: memref<18x24x128xf32, #tpu.memory_space<vmem>>, %arg16: memref<18x24x128xf32, #tpu.memory_space<vmem>>) attributes {dimension_semantics = [#tpu.dimension_semantics<parallel>], iteration_bounds = array<i64: 2>, scalar_prefetch = 0 : i64, scratch_operands = 2 : i64, tpu.core_type = #tpu.core_type<tc>, window_params = [{transform_indices = @transform_0, window_bounds = array<i64: 1, 8, 8, 4>}, {transform_indices = @transform_1, window_bounds = array<i64: 1, 16, 16, 4>}, {pipeline_mode = #tpu.pipeline_mode<synchronous>, transform_indices = @transform_2, window_bounds = array<i64: 256, 64>}, {pipeline_mode = #tpu.pipeline_mode<synchronous>, transform_indices = @transform_3, window_bounds = array<i64: 4, 128>}, {pipeline_mode = #tpu.pipeline_mode<synchronous>, transform_indices = @transform_4, window_bounds = array<i64: 4, 128>}, {pipeline_mode = #tpu.pipeline_mode<synchronous>, transform_indices = @transform_5, window_bounds = array<i64: 128, 128>}, {pipeline_mode = #tpu.pipeline_mode<synchronous>, transform_indices = @transform_6, window_bounds = array<i64: 1, 128>}, {pipeline_mode = #tpu.pipeline_mode<synchronous>, transform_indices = @transform_7, window_bounds = array<i64: 1, 128>}, {pipeline_mode = #tpu.pipeline_mode<synchronous>, transform_indices = @transform_8, window_bounds = array<i64: 9, 128>}, {pipeline_mode = #tpu.pipeline_mode<synchronous>, transform_indices = @transform_9, window_bounds = array<i64: 128, 128>}, {pipeline_mode = #tpu.pipeline_mode<synchronous>, transform_indices = @transform_10, window_bounds = array<i64: 1, 128>}, {pipeline_mode = #tpu.pipeline_mode<synchronous>, transform_indices = @transform_11, window_bounds = array<i64: 1, 128>}, {pipeline_mode = #tpu.pipeline_mode<synchronous>, transform_indices = @transform_12, window_bounds = array<i64: 9, 128>}, {transform_indices = @transform_13, window_bounds = array<i64: 1, 256, 128>}]} {
    %cst = arith.constant 0.000000e+00 : f32
    %0 = vector.broadcast %cst : f32 to vector<1x24x128xf32>
    %c0 = arith.constant 0 : index
    %c0_0 = arith.constant 0 : index
    %c0_1 = arith.constant 0 : index
    %1 = vector.load %arg15[%c0, %c0_0, %c0_1] : memref<18x24x128xf32, #tpu.memory_space<vmem>>, vector<1x24x128xf32>
    tpu.vector_store %arg15[%c0, %c0_0, %c0_1], %0 {strides = array<i32>} : memref<18x24x128xf32, #tpu.memory_space<vmem>>, vector<1x24x128xf32>,
    %cst_2 = arith.constant 0.000000e+00 : f32
    %2 = vector.broadcast %cst_2 : f32 to vector<1x24x128xf32>
    %c17 = arith.constant 17 : index
    %c0_3 = arith.constant 0 : index
    %c0_4 = arith.constant 0 : index
    %3 = vector.load %arg15[%c17, %c0_3, %c0_4] : memref<18x24x128xf32, #tpu.memory_space<vmem>>, vector<1x24x128xf32>
    tpu.vector_store %arg15[%c17, %c0_3, %c0_4], %2 {strides = array<i32>} : memref<18x24x128xf32, #tpu.memory_space<vmem>>, vector<1x24x128xf32>,
    %cst_5 = arith.constant 0.000000e+00 : f32
    %4 = vector.broadcast %cst_5 : f32 to vector<18x1x128xf32>
    %c0_6 = arith.constant 0 : index
    %c0_7 = arith.constant 0 : index
    %c0_8 = arith.constant 0 : index
    %5 = vector.load %arg15[%c0_6, %c0_7, %c0_8] : memref<18x24x128xf32, #tpu.memory_space<vmem>>, vector<18x1x128xf32>
    tpu.vector_store %arg15[%c0_6, %c0_7, %c0_8], %4 {strides = array<i32>} : memref<18x24x128xf32, #tpu.memory_space<vmem>>, vector<18x1x128xf32>,
    %cst_9 = arith.constant 0.000000e+00 : f32
    %6 = vector.broadcast %cst_9 : f32 to vector<18x7x128xf32>
    %c0_10 = arith.constant 0 : index
    %c17_11 = arith.constant 17 : index
    %c0_12 = arith.constant 0 : index
    %7 = vector.load %arg15[%c0_10, %c17_11, %c0_12] : memref<18x24x128xf32, #tpu.memory_space<vmem>>, vector<18x7x128xf32>
    tpu.vector_store %arg15[%c0_10, %c17_11, %c0_12], %6 {strides = array<i32>} : memref<18x24x128xf32, #tpu.memory_space<vmem>>, vector<18x7x128xf32>,
    %cst_13 = arith.constant 0.000000e+00 : f32
    %8 = vector.broadcast %cst_13 : f32 to vector<1x24x128xf32>
    %c0_14 = arith.constant 0 : index
    %c0_15 = arith.constant 0 : index
    %c0_16 = arith.constant 0 : index
    %9 = vector.load %arg16[%c0_14, %c0_15, %c0_16] : memref<18x24x128xf32, #tpu.memory_space<vmem>>, vector<1x24x128xf32>
    tpu.vector_store %arg16[%c0_14, %c0_15, %c0_16], %8 {strides = array<i32>} : memref<18x24x128xf32, #tpu.memory_space<vmem>>, vector<1x24x128xf32>,
    %cst_17 = arith.constant 0.000000e+00 : f32
    %10 = vector.broadcast %cst_17 : f32 to vector<1x24x128xf32>
    %c17_18 = arith.constant 17 : index
    %c0_19 = arith.constant 0 : index
    %c0_20 = arith.constant 0 : index
    %11 = vector.load %arg16[%c17_18, %c0_19, %c0_20] : memref<18x24x128xf32, #tpu.memory_space<vmem>>, vector<1x24x128xf32>
    tpu.vector_store %arg16[%c17_18, %c0_19, %c0_20], %10 {strides = array<i32>} : memref<18x24x128xf32, #tpu.memory_space<vmem>>, vector<1x24x128xf32>,
    %cst_21 = arith.constant 0.000000e+00 : f32
    %12 = vector.broadcast %cst_21 : f32 to vector<18x1x128xf32>
    %c0_22 = arith.constant 0 : index
    %c0_23 = arith.constant 0 : index
    %c0_24 = arith.constant 0 : index
    %13 = vector.load %arg16[%c0_22, %c0_23, %c0_24] : memref<18x24x128xf32, #tpu.memory_space<vmem>>, vector<18x1x128xf32>
    tpu.vector_store %arg16[%c0_22, %c0_23, %c0_24], %12 {strides = array<i32>} : memref<18x24x128xf32, #tpu.memory_space<vmem>>, vector<18x1x128xf32>,
    %cst_25 = arith.constant 0.000000e+00 : f32
    %14 = vector.broadcast %cst_25 : f32 to vector<18x7x128xf32>
    %c0_26 = arith.constant 0 : index
    %c17_27 = arith.constant 17 : index
    %c0_28 = arith.constant 0 : index
    %15 = vector.load %arg16[%c0_26, %c17_27, %c0_28] : memref<18x24x128xf32, #tpu.memory_space<vmem>>, vector<18x7x128xf32>
    tpu.vector_store %arg16[%c0_26, %c17_27, %c0_28], %14 {strides = array<i32>} : memref<18x24x128xf32, #tpu.memory_space<vmem>>, vector<18x7x128xf32>,
    %c0_29 = arith.constant 0 : index
    %c0_30 = arith.constant 0 : index
    %c0_31 = arith.constant 0 : index
    %c0_32 = arith.constant 0 : index
    %16 = vector.load %arg2[%c0_29, %c0_30, %c0_31, %c0_32] : memref<1x16x16x4xf32, #tpu.memory_space<vmem>>, vector<1x16x16x4xf32>
    %17 = vector.shape_cast %16 : vector<1x16x16x4xf32> to vector<16x16x4xf32>
    %18 = vector.shape_cast %17 : vector<16x16x4xf32> to vector<256x4xf32>
    %c0_33 = arith.constant 0 : index
    %c0_34 = arith.constant 0 : index
    %19 = vector.load %arg5[%c0_33, %c0_34] : memref<4x128xf32, #tpu.memory_space<vmem>>, vector<4x128xf32>
    %cst_35 = arith.constant dense<0.000000e+00> : vector<256x128xf32>
    %20 = tpu.matmul %18, %19, %cst_35 {dimension_numbers = #tpu.dot_dimension_numbers<[1], [0], [0], [1], [0, 0, 1, 1], [], []>} : vector<256x4xf32>, vector<4x128xf32>, vector<256x128xf32> -> vector<256x128xf32>
    %c0_36 = arith.constant 0 : index
    %c0_37 = arith.constant 0 : index
    %c0_38 = arith.constant 0 : index
    %c0_39 = arith.constant 0 : index
    %21 = vector.load %arg1[%c0_36, %c0_37, %c0_38, %c0_39] : memref<1x8x8x4xf32, #tpu.memory_space<vmem>>, vector<1x8x8x4xf32>
    %22 = vector.shape_cast %21 : vector<1x8x8x4xf32> to vector<8x8x4xf32>
    %23 = vector.shape_cast %22 : vector<8x8x4xf32> to vector<64x4xf32>
    %c0_40 = arith.constant 0 : index
    %c0_41 = arith.constant 0 : index
    %24 = vector.load %arg4[%c0_40, %c0_41] : memref<4x128xf32, #tpu.memory_space<vmem>>, vector<4x128xf32>
    %cst_42 = arith.constant dense<0.000000e+00> : vector<64x128xf32>
    %25 = tpu.matmul %23, %24, %cst_42 {dimension_numbers = #tpu.dot_dimension_numbers<[1], [0], [0], [1], [0, 0, 1, 1], [], []>} : vector<64x4xf32>, vector<4x128xf32>, vector<64x128xf32> -> vector<64x128xf32>
    %c0_43 = arith.constant 0 : index
    %c0_44 = arith.constant 0 : index
    %26 = vector.load %arg3[%c0_43, %c0_44] : memref<256x64xbf16, #tpu.memory_space<vmem>>, vector<256x64xbf16>
    %27 = arith.truncf %25 : vector<64x128xf32> to vector<64x128xbf16>
    %cst_45 = arith.constant dense<0.000000e+00> : vector<256x128xf32>
    %28 = tpu.matmul %26, %27, %cst_45 {dimension_numbers = #tpu.dot_dimension_numbers<[1], [0], [0], [1], [0, 0, 1, 1], [], []>} : vector<256x64xbf16>, vector<64x128xbf16>, vector<256x128xf32> -> vector<256x128xf32>
    %29 = arith.addf %20, %28 : vector<256x128xf32>
    %30 = vector.shape_cast %29 : vector<256x128xf32> to vector<16x16x128xf32>
    %c1 = arith.constant 1 : index
    %c1_46 = arith.constant 1 : index
    %c0_47 = arith.constant 0 : index
    %31 = vector.load %arg15[%c1, %c1_46, %c0_47] : memref<18x24x128xf32, #tpu.memory_space<vmem>>, vector<16x16x128xf32>
    tpu.vector_store %arg15[%c1, %c1_46, %c0_47], %30 {strides = array<i32>} : memref<18x24x128xf32, #tpu.memory_space<vmem>>, vector<16x16x128xf32>,
    %cst_48 = arith.constant 0.000000e+00 : f32
    %32 = vector.broadcast %cst_48 : f32 to vector<256x128xf32>
    %c0_49 = arith.constant 0 : index
    %c0_50 = arith.constant 0 : index
    %c0_51 = arith.constant 0 : index
    %33 = vector.load %arg15[%c0_49, %c0_50, %c0_51] : memref<18x24x128xf32, #tpu.memory_space<vmem>>, vector<16x16x128xf32>
    %34 = vector.shape_cast %33 : vector<16x16x128xf32> to vector<256x128xf32>
    %c0_52 = arith.constant 0 : index
    %c0_53 = arith.constant 0 : index
    %35 = vector.load %arg9[%c0_52, %c0_53] : memref<9x128xf32, #tpu.memory_space<vmem>>, vector<1x128xf32>
    %36 = vector.broadcast %35 : vector<1x128xf32> to vector<256x128xf32>
    %37 = arith.mulf %34, %36 : vector<256x128xf32>
    %38 = arith.addf %32, %37 : vector<256x128xf32>
    %c0_54 = arith.constant 0 : index
    %c1_55 = arith.constant 1 : index
    %c0_56 = arith.constant 0 : index
    %39 = vector.load %arg15[%c0_54, %c1_55, %c0_56] : memref<18x24x128xf32, #tpu.memory_space<vmem>>, vector<16x16x128xf32>
    %40 = vector.shape_cast %39 : vector<16x16x128xf32> to vector<256x128xf32>
    %c1_57 = arith.constant 1 : index
    %c0_58 = arith.constant 0 : index
    %41 = vector.load %arg9[%c1_57, %c0_58] : memref<9x128xf32, #tpu.memory_space<vmem>>, vector<1x128xf32>
    %42 = vector.broadcast %41 : vector<1x128xf32> to vector<256x128xf32>
    %43 = arith.mulf %40, %42 : vector<256x128xf32>
    %44 = arith.addf %38, %43 : vector<256x128xf32>
    %c0_59 = arith.constant 0 : index
    %c2 = arith.constant 2 : index
    %c0_60 = arith.constant 0 : index
    %45 = vector.load %arg15[%c0_59, %c2, %c0_60] : memref<18x24x128xf32, #tpu.memory_space<vmem>>, vector<16x16x128xf32>
    %46 = vector.shape_cast %45 : vector<16x16x128xf32> to vector<256x128xf32>
    %c2_61 = arith.constant 2 : index
    %c0_62 = arith.constant 0 : index
    %47 = vector.load %arg9[%c2_61, %c0_62] : memref<9x128xf32, #tpu.memory_space<vmem>>, vector<1x128xf32>
    %48 = vector.broadcast %47 : vector<1x128xf32> to vector<256x128xf32>
    %49 = arith.mulf %46, %48 : vector<256x128xf32>
    %50 = arith.addf %44, %49 : vector<256x128xf32>
    %c1_63 = arith.constant 1 : index
    %c0_64 = arith.constant 0 : index
    %c0_65 = arith.constant 0 : index
    %51 = vector.load %arg15[%c1_63, %c0_64, %c0_65] : memref<18x24x128xf32, #tpu.memory_space<vmem>>, vector<16x16x128xf32>
    %52 = vector.shape_cast %51 : vector<16x16x128xf32> to vector<256x128xf32>
    %c3 = arith.constant 3 : index
    %c0_66 = arith.constant 0 : index
    %53 = vector.load %arg9[%c3, %c0_66] : memref<9x128xf32, #tpu.memory_space<vmem>>, vector<1x128xf32>
    %54 = vector.broadcast %53 : vector<1x128xf32> to vector<256x128xf32>
    %55 = arith.mulf %52, %54 : vector<256x128xf32>
    %56 = arith.addf %50, %55 : vector<256x128xf32>
    %c1_67 = arith.constant 1 : index
    %c1_68 = arith.constant 1 : index
    %c0_69 = arith.constant 0 : index
    %57 = vector.load %arg15[%c1_67, %c1_68, %c0_69] : memref<18x24x128xf32, #tpu.memory_space<vmem>>, vector<16x16x128xf32>
    %58 = vector.shape_cast %57 : vector<16x16x128xf32> to vector<256x128xf32>
    %c4 = arith.constant 4 : index
    %c0_70 = arith.constant 0 : index
    %59 = vector.load %arg9[%c4, %c0_70] : memref<9x128xf32, #tpu.memory_space<vmem>>, vector<1x128xf32>
    %60 = vector.broadcast %59 : vector<1x128xf32> to vector<256x128xf32>
    %61 = arith.mulf %58, %60 : vector<256x128xf32>
    %62 = arith.addf %56, %61 : vector<256x128xf32>
    %c1_71 = arith.constant 1 : index
    %c2_72 = arith.constant 2 : index
    %c0_73 = arith.constant 0 : index
    %63 = vector.load %arg15[%c1_71, %c2_72, %c0_73] : memref<18x24x128xf32, #tpu.memory_space<vmem>>, vector<16x16x128xf32>
    %64 = vector.shape_cast %63 : vector<16x16x128xf32> to vector<256x128xf32>
    %c5 = arith.constant 5 : index
    %c0_74 = arith.constant 0 : index
    %65 = vector.load %arg9[%c5, %c0_74] : memref<9x128xf32, #tpu.memory_space<vmem>>, vector<1x128xf32>
    %66 = vector.broadcast %65 : vector<1x128xf32> to vector<256x128xf32>
    %67 = arith.mulf %64, %66 : vector<256x128xf32>
    %68 = arith.addf %62, %67 : vector<256x128xf32>
    %c2_75 = arith.constant 2 : index
    %c0_76 = arith.constant 0 : index
    %c0_77 = arith.constant 0 : index
    %69 = vector.load %arg15[%c2_75, %c0_76, %c0_77] : memref<18x24x128xf32, #tpu.memory_space<vmem>>, vector<16x16x128xf32>
    %70 = vector.shape_cast %69 : vector<16x16x128xf32> to vector<256x128xf32>
    %c6 = arith.constant 6 : index
    %c0_78 = arith.constant 0 : index
    %71 = vector.load %arg9[%c6, %c0_78] : memref<9x128xf32, #tpu.memory_space<vmem>>, vector<1x128xf32>
    %72 = vector.broadcast %71 : vector<1x128xf32> to vector<256x128xf32>
    %73 = arith.mulf %70, %72 : vector<256x128xf32>
    %74 = arith.addf %68, %73 : vector<256x128xf32>
    %c2_79 = arith.constant 2 : index
    %c1_80 = arith.constant 1 : index
    %c0_81 = arith.constant 0 : index
    %75 = vector.load %arg15[%c2_79, %c1_80, %c0_81] : memref<18x24x128xf32, #tpu.memory_space<vmem>>, vector<16x16x128xf32>
    %76 = vector.shape_cast %75 : vector<16x16x128xf32> to vector<256x128xf32>
    %c7 = arith.constant 7 : index
    %c0_82 = arith.constant 0 : index
    %77 = vector.load %arg9[%c7, %c0_82] : memref<9x128xf32, #tpu.memory_space<vmem>>, vector<1x128xf32>
    %78 = vector.broadcast %77 : vector<1x128xf32> to vector<256x128xf32>
    %79 = arith.mulf %76, %78 : vector<256x128xf32>
    %80 = arith.addf %74, %79 : vector<256x128xf32>
    %c2_83 = arith.constant 2 : index
    %c2_84 = arith.constant 2 : index
    %c0_85 = arith.constant 0 : index
    %81 = vector.load %arg15[%c2_83, %c2_84, %c0_85] : memref<18x24x128xf32, #tpu.memory_space<vmem>>, vector<16x16x128xf32>
    %82 = vector.shape_cast %81 : vector<16x16x128xf32> to vector<256x128xf32>
    %c8 = arith.constant 8 : index
    %c0_86 = arith.constant 0 : index
    %83 = vector.load %arg9[%c8, %c0_86] : memref<9x128xf32, #tpu.memory_space<vmem>>, vector<1x128xf32>
    %84 = vector.broadcast %83 : vector<1x128xf32> to vector<256x128xf32>
    %85 = arith.mulf %82, %84 : vector<256x128xf32>
    %86 = arith.addf %80, %85 : vector<256x128xf32>
    %87 = arith.truncf %86 : vector<256x128xf32> to vector<256x128xbf16>
    %c0_87 = arith.constant 0 : index
    %c0_88 = arith.constant 0 : index
    %88 = vector.load %arg6[%c0_87, %c0_88] : memref<128x128xbf16, #tpu.memory_space<vmem>>, vector<128x128xbf16>
    %cst_89 = arith.constant dense<0.000000e+00> : vector<256x128xf32>
    %89 = tpu.matmul %87, %88, %cst_89 {dimension_numbers = #tpu.dot_dimension_numbers<[1], [0], [0], [1], [0, 0, 1, 1], [], []>} : vector<256x128xbf16>, vector<128x128xbf16>, vector<256x128xf32> -> vector<256x128xf32>
    %c0_90 = arith.constant 0 : index
    %c0_91 = arith.constant 0 : index
    %90 = vector.load %arg7[%c0_90, %c0_91] : memref<1x128xf32, #tpu.memory_space<vmem>>, vector<1x128xf32>
    %91 = vector.broadcast %90 : vector<1x128xf32> to vector<256x128xf32>
    %92 = arith.mulf %89, %91 : vector<256x128xf32>
    %c0_92 = arith.constant 0 : index
    %c0_93 = arith.constant 0 : index
    %93 = vector.load %arg8[%c0_92, %c0_93] : memref<1x128xf32, #tpu.memory_space<vmem>>, vector<1x128xf32>
    %94 = vector.broadcast %93 : vector<1x128xf32> to vector<256x128xf32>
    %95 = arith.addf %92, %94 : vector<256x128xf32>
    %cst_94 = arith.constant 0.000000e+00 : f32
    %96 = vector.broadcast %cst_94 : f32 to vector<256x128xf32>
    %97 = arith.maximumf %95, %96 : vector<256x128xf32>
    %98 = vector.shape_cast %97 : vector<256x128xf32> to vector<16x16x128xf32>
    %c1_95 = arith.constant 1 : index
    %c1_96 = arith.constant 1 : index
    %c0_97 = arith.constant 0 : index
    %99 = vector.load %arg16[%c1_95, %c1_96, %c0_97] : memref<18x24x128xf32, #tpu.memory_space<vmem>>, vector<16x16x128xf32>
    tpu.vector_store %arg16[%c1_95, %c1_96, %c0_97], %98 {strides = array<i32>} : memref<18x24x128xf32, #tpu.memory_space<vmem>>, vector<16x16x128xf32>,
    %cst_98 = arith.constant 0.000000e+00 : f32
    %100 = vector.broadcast %cst_98 : f32 to vector<256x128xf32>
    %c0_99 = arith.constant 0 : index
    %c0_100 = arith.constant 0 : index
    %c0_101 = arith.constant 0 : index
    %101 = vector.load %arg16[%c0_99, %c0_100, %c0_101] : memref<18x24x128xf32, #tpu.memory_space<vmem>>, vector<16x16x128xf32>
    %102 = vector.shape_cast %101 : vector<16x16x128xf32> to vector<256x128xf32>
    %c0_102 = arith.constant 0 : index
    %c0_103 = arith.constant 0 : index
    %103 = vector.load %arg13[%c0_102, %c0_103] : memref<9x128xf32, #tpu.memory_space<vmem>>, vector<1x128xf32>
    %104 = vector.broadcast %103 : vector<1x128xf32> to vector<256x128xf32>
    %105 = arith.mulf %102, %104 : vector<256x128xf32>
    %106 = arith.addf %100, %105 : vector<256x128xf32>
    %c0_104 = arith.constant 0 : index
    %c1_105 = arith.constant 1 : index
    %c0_106 = arith.constant 0 : index
    %107 = vector.load %arg16[%c0_104, %c1_105, %c0_106] : memref<18x24x128xf32, #tpu.memory_space<vmem>>, vector<16x16x128xf32>
    %108 = vector.shape_cast %107 : vector<16x16x128xf32> to vector<256x128xf32>
    %c1_107 = arith.constant 1 : index
    %c0_108 = arith.constant 0 : index
    %109 = vector.load %arg13[%c1_107, %c0_108] : memref<9x128xf32, #tpu.memory_space<vmem>>, vector<1x128xf32>
    %110 = vector.broadcast %109 : vector<1x128xf32> to vector<256x128xf32>
    %111 = arith.mulf %108, %110 : vector<256x128xf32>
    %112 = arith.addf %106, %111 : vector<256x128xf32>
    %c0_109 = arith.constant 0 : index
    %c2_110 = arith.constant 2 : index
    %c0_111 = arith.constant 0 : index
    %113 = vector.load %arg16[%c0_109, %c2_110, %c0_111] : memref<18x24x128xf32, #tpu.memory_space<vmem>>, vector<16x16x128xf32>
    %114 = vector.shape_cast %113 : vector<16x16x128xf32> to vector<256x128xf32>
    %c2_112 = arith.constant 2 : index
    %c0_113 = arith.constant 0 : index
    %115 = vector.load %arg13[%c2_112, %c0_113] : memref<9x128xf32, #tpu.memory_space<vmem>>, vector<1x128xf32>
    %116 = vector.broadcast %115 : vector<1x128xf32> to vector<256x128xf32>
    %117 = arith.mulf %114, %116 : vector<256x128xf32>
    %118 = arith.addf %112, %117 : vector<256x128xf32>
    %c1_114 = arith.constant 1 : index
    %c0_115 = arith.constant 0 : index
    %c0_116 = arith.constant 0 : index
    %119 = vector.load %arg16[%c1_114, %c0_115, %c0_116] : memref<18x24x128xf32, #tpu.memory_space<vmem>>, vector<16x16x128xf32>
    %120 = vector.shape_cast %119 : vector<16x16x128xf32> to vector<256x128xf32>
    %c3_117 = arith.constant 3 : index
    %c0_118 = arith.constant 0 : index
    %121 = vector.load %arg13[%c3_117, %c0_118] : memref<9x128xf32, #tpu.memory_space<vmem>>, vector<1x128xf32>
    %122 = vector.broadcast %121 : vector<1x128xf32> to vector<256x128xf32>
    %123 = arith.mulf %120, %122 : vector<256x128xf32>
    %124 = arith.addf %118, %123 : vector<256x128xf32>
    %c1_119 = arith.constant 1 : index
    %c1_120 = arith.constant 1 : index
    %c0_121 = arith.constant 0 : index
    %125 = vector.load %arg16[%c1_119, %c1_120, %c0_121] : memref<18x24x128xf32, #tpu.memory_space<vmem>>, vector<16x16x128xf32>
    %126 = vector.shape_cast %125 : vector<16x16x128xf32> to vector<256x128xf32>
    %c4_122 = arith.constant 4 : index
    %c0_123 = arith.constant 0 : index
    %127 = vector.load %arg13[%c4_122, %c0_123] : memref<9x128xf32, #tpu.memory_space<vmem>>, vector<1x128xf32>
    %128 = vector.broadcast %127 : vector<1x128xf32> to vector<256x128xf32>
    %129 = arith.mulf %126, %128 : vector<256x128xf32>
    %130 = arith.addf %124, %129 : vector<256x128xf32>
    %c1_124 = arith.constant 1 : index
    %c2_125 = arith.constant 2 : index
    %c0_126 = arith.constant 0 : index
    %131 = vector.load %arg16[%c1_124, %c2_125, %c0_126] : memref<18x24x128xf32, #tpu.memory_space<vmem>>, vector<16x16x128xf32>
    %132 = vector.shape_cast %131 : vector<16x16x128xf32> to vector<256x128xf32>
    %c5_127 = arith.constant 5 : index
    %c0_128 = arith.constant 0 : index
    %133 = vector.load %arg13[%c5_127, %c0_128] : memref<9x128xf32, #tpu.memory_space<vmem>>, vector<1x128xf32>
    %134 = vector.broadcast %133 : vector<1x128xf32> to vector<256x128xf32>
    %135 = arith.mulf %132, %134 : vector<256x128xf32>
    %136 = arith.addf %130, %135 : vector<256x128xf32>
    %c2_129 = arith.constant 2 : index
    %c0_130 = arith.constant 0 : index
    %c0_131 = arith.constant 0 : index
    %137 = vector.load %arg16[%c2_129, %c0_130, %c0_131] : memref<18x24x128xf32, #tpu.memory_space<vmem>>, vector<16x16x128xf32>
    %138 = vector.shape_cast %137 : vector<16x16x128xf32> to vector<256x128xf32>
    %c6_132 = arith.constant 6 : index
    %c0_133 = arith.constant 0 : index
    %139 = vector.load %arg13[%c6_132, %c0_133] : memref<9x128xf32, #tpu.memory_space<vmem>>, vector<1x128xf32>
    %140 = vector.broadcast %139 : vector<1x128xf32> to vector<256x128xf32>
    %141 = arith.mulf %138, %140 : vector<256x128xf32>
    %142 = arith.addf %136, %141 : vector<256x128xf32>
    %c2_134 = arith.constant 2 : index
    %c1_135 = arith.constant 1 : index
    %c0_136 = arith.constant 0 : index
    %143 = vector.load %arg16[%c2_134, %c1_135, %c0_136] : memref<18x24x128xf32, #tpu.memory_space<vmem>>, vector<16x16x128xf32>
    %144 = vector.shape_cast %143 : vector<16x16x128xf32> to vector<256x128xf32>
    %c7_137 = arith.constant 7 : index
    %c0_138 = arith.constant 0 : index
    %145 = vector.load %arg13[%c7_137, %c0_138] : memref<9x128xf32, #tpu.memory_space<vmem>>, vector<1x128xf32>
    %146 = vector.broadcast %145 : vector<1x128xf32> to vector<256x128xf32>
    %147 = arith.mulf %144, %146 : vector<256x128xf32>
    %148 = arith.addf %142, %147 : vector<256x128xf32>
    %c2_139 = arith.constant 2 : index
    %c2_140 = arith.constant 2 : index
    %c0_141 = arith.constant 0 : index
    %149 = vector.load %arg16[%c2_139, %c2_140, %c0_141] : memref<18x24x128xf32, #tpu.memory_space<vmem>>, vector<16x16x128xf32>
    %150 = vector.shape_cast %149 : vector<16x16x128xf32> to vector<256x128xf32>
    %c8_142 = arith.constant 8 : index
    %c0_143 = arith.constant 0 : index
    %151 = vector.load %arg13[%c8_142, %c0_143] : memref<9x128xf32, #tpu.memory_space<vmem>>, vector<1x128xf32>
    %152 = vector.broadcast %151 : vector<1x128xf32> to vector<256x128xf32>
    %153 = arith.mulf %150, %152 : vector<256x128xf32>
    %154 = arith.addf %148, %153 : vector<256x128xf32>
    %155 = arith.truncf %154 : vector<256x128xf32> to vector<256x128xbf16>
    %c0_144 = arith.constant 0 : index
    %c0_145 = arith.constant 0 : index
    %156 = vector.load %arg10[%c0_144, %c0_145] : memref<128x128xbf16, #tpu.memory_space<vmem>>, vector<128x128xbf16>
    %cst_146 = arith.constant dense<0.000000e+00> : vector<256x128xf32>
    %157 = tpu.matmul %155, %156, %cst_146 {dimension_numbers = #tpu.dot_dimension_numbers<[1], [0], [0], [1], [0, 0, 1, 1], [], []>} : vector<256x128xbf16>, vector<128x128xbf16>, vector<256x128xf32> -> vector<256x128xf32>
    %c0_147 = arith.constant 0 : index
    %c0_148 = arith.constant 0 : index
    %158 = vector.load %arg11[%c0_147, %c0_148] : memref<1x128xf32, #tpu.memory_space<vmem>>, vector<1x128xf32>
    %159 = vector.broadcast %158 : vector<1x128xf32> to vector<256x128xf32>
    %160 = arith.mulf %157, %159 : vector<256x128xf32>
    %c0_149 = arith.constant 0 : index
    %c0_150 = arith.constant 0 : index
    %161 = vector.load %arg12[%c0_149, %c0_150] : memref<1x128xf32, #tpu.memory_space<vmem>>, vector<1x128xf32>
    %162 = vector.broadcast %161 : vector<1x128xf32> to vector<256x128xf32>
    %163 = arith.addf %160, %162 : vector<256x128xf32>
    %cst_151 = arith.constant 0.000000e+00 : f32
    %164 = vector.broadcast %cst_151 : f32 to vector<256x128xf32>
    %165 = arith.maximumf %163, %164 : vector<256x128xf32>
    %166 = vector.shape_cast %165 : vector<256x128xf32> to vector<1x256x128xf32>
    %c0_152 = arith.constant 0 : index
    %c0_153 = arith.constant 0 : index
    %c0_154 = arith.constant 0 : index
    %167 = vector.load %arg14[%c0_152, %c0_153, %c0_154] : memref<1x256x128xf32, #tpu.memory_space<vmem>>, vector<1x256x128xf32>
    tpu.vector_store %arg14[%c0_152, %c0_153, %c0_154], %166 {strides = array<i32>} : memref<1x256x128xf32, #tpu.memory_space<vmem>>, vector<1x256x128xf32>,
    return
  }
  func.func @transform_0(%arg0: i32) -> (i32, i32, i32, i32) {
    %c0_i32 = arith.constant 0 : i32
    %c0_i32_0 = arith.constant 0 : i32
    %c0_i32_1 = arith.constant 0 : i32
    %c0_i32_2 = arith.constant 0 : i32
    return %arg0, %c0_i32, %c0_i32_0, %c0_i32_1 : i32, i32, i32, i32
  }
  func.func @transform_1(%arg0: i32) -> (i32, i32, i32, i32) {
    %c0_i32 = arith.constant 0 : i32
    %c0_i32_0 = arith.constant 0 : i32
    %c0_i32_1 = arith.constant 0 : i32
    %c0_i32_2 = arith.constant 0 : i32
    return %arg0, %c0_i32, %c0_i32_0, %c0_i32_1 : i32, i32, i32, i32
  }
  func.func @transform_2(%arg0: i32) -> (i32, i32) {
    %c0_i32 = arith.constant 0 : i32
    %c0_i32_0 = arith.constant 0 : i32
    %c0_i32_1 = arith.constant 0 : i32
    return %c0_i32, %c0_i32_0 : i32, i32
  }
  func.func @transform_3(%arg0: i32) -> (i32, i32) {
    %c0_i32 = arith.constant 0 : i32
    %c0_i32_0 = arith.constant 0 : i32
    %c0_i32_1 = arith.constant 0 : i32
    return %c0_i32, %c0_i32_0 : i32, i32
  }
  func.func @transform_4(%arg0: i32) -> (i32, i32) {
    %c0_i32 = arith.constant 0 : i32
    %c0_i32_0 = arith.constant 0 : i32
    %c0_i32_1 = arith.constant 0 : i32
    return %c0_i32, %c0_i32_0 : i32, i32
  }
  func.func @transform_5(%arg0: i32) -> (i32, i32) {
    %c0_i32 = arith.constant 0 : i32
    %c0_i32_0 = arith.constant 0 : i32
    %c0_i32_1 = arith.constant 0 : i32
    return %c0_i32, %c0_i32_0 : i32, i32
  }
  func.func @transform_6(%arg0: i32) -> (i32, i32) {
    %c0_i32 = arith.constant 0 : i32
    %c0_i32_0 = arith.constant 0 : i32
    %c0_i32_1 = arith.constant 0 : i32
    return %c0_i32, %c0_i32_0 : i32, i32
  }
  func.func @transform_7(%arg0: i32) -> (i32, i32) {
    %c0_i32 = arith.constant 0 : i32
    %c0_i32_0 = arith.constant 0 : i32
    %c0_i32_1 = arith.constant 0 : i32
    return %c0_i32, %c0_i32_0 : i32, i32
  }
  func.func @transform_8(%arg0: i32) -> (i32, i32) {
    %c0_i32 = arith.constant 0 : i32
    %c0_i32_0 = arith.constant 0 : i32
    %c0_i32_1 = arith.constant 0 : i32
    return %c0_i32, %c0_i32_0 : i32, i32
  }
  func.func @transform_9(%arg0: i32) -> (i32, i32) {
    %c0_i32 = arith.constant 0 : i32
    %c0_i32_0 = arith.constant 0 : i32
    %c0_i32_1 = arith.constant 0 : i32
    return %c0_i32, %c0_i32_0 : i32, i32
  }
  func.func @transform_10(%arg0: i32) -> (i32, i32) {
    %c0_i32 = arith.constant 0 : i32
    %c0_i32_0 = arith.constant 0 : i32
    %c0_i32_1 = arith.constant 0 : i32
    return %c0_i32, %c0_i32_0 : i32, i32
  }
  func.func @transform_11(%arg0: i32) -> (i32, i32) {
    %c0_i32 = arith.constant 0 : i32
    %c0_i32_0 = arith.constant 0 : i32
    %c0_i32_1 = arith.constant 0 : i32
    return %c0_i32, %c0_i32_0 : i32, i32
  }
  func.func @transform_12(%arg0: i32) -> (i32, i32) {
    %c0_i32 = arith.constant 0 : i32
    %c0_i32_0 = arith.constant 0 : i32
    %c0_i32_1 = arith.constant 0 : i32
    return %c0_i32, %c0_i32_0 : i32, i32
  }
  func.func @transform_13(%arg0: i32) -> (i32, i32, i32) {
    %c0_i32 = arith.constant 0 : i32
    %c0_i32_0 = arith.constant 0 : i32
    %c0_i32_1 = arith.constant 0 : i32
    return %arg0, %c0_i32, %c0_i32_0 : i32, i32, i32
  }
}

</mosaic_0001>

<bundles_post_ra>
// kernel: up_forward.1
= control target key start
LH: loop header
LB: loop body
LE: loop exit
PB: predicated region body
PF: predicated region fallthrough
CT: control target
= control target key end

     0   :  { %s4641_s25 = smov 0   ;;  %s6595_s0 = inlined_call_operand.vmem [shape: f32[2,8,8,4], index: 0, kind: input, shape index: {}]   ;;  %s6596_s1 = inlined_call_operand.vmem [shape: f32[2,16,16,4], index: 1, kind: input, shape index: {}]   ;;  %s6597_s2 = inlined_call_operand.vmem [shape: bf16[256,64], index: 2, kind: input, shape index: {}]   ;;  %s6598_s3 = inlined_call_operand.vmem [shape: f32[4,128], index: 3, kind: input, shape index: {}]   ;;  %s6599_s4 = inlined_call_operand.vmem [shape: f32[4,128], index: 4, kind: input, shape index: {}]   ;;  %s6600_s5 = inlined_call_operand.vmem [shape: bf16[128,128], index: 5, kind: input, shape index: {}]   ;;  %s6601_s6 = inlined_call_operand.vmem [shape: f32[1,128], index: 6, kind: input, shape index: {}]   ;;  %s6602_s7 = inlined_call_operand.vmem [shape: f32[1,128], index: 7, kind: input, shape index: {}]   ;;  %s6603_s8 = inlined_call_operand.vmem [shape: f32[9,128], index: 8, kind: input, shape index: {}]   ;;  %s6604_s9 = inlined_call_operand.vmem [shape: bf16[128,128], index: 9, kind: input, shape index: {}]   ;;  %s6605_s10 = inlined_call_operand.vmem [shape: f32[1,128], index: 10, kind: input, shape index: {}]   ;;  %s6606_s11 = inlined_call_operand.vmem [shape: f32[1,128], index: 11, kind: input, shape index: {}]   ;;  %s6607_s12 = inlined_call_operand.vmem [shape: f32[9,128], index: 12, kind: input, shape index: {}]   ;;  %s6608_s13 = inlined_call_operand.vmem [shape: f32[2,256,128], index: 13, kind: output, shape index: {}]  }
   0x1 LB: > { %s4061_s26 = sadd.s32 4294967295, %s4568_s25   ;;  %p4065_p0 = scmp.ge.s32.totalorder %s4568_s25, 1  ;;  %s4568_s25 = sphi %s4641_s25, %s23_s25  }
   0x2   : > { %p397_p1 = scmp.lt.s32.totalorder %s4568_s25, 3 }
   0x4   : > { %p398_p2 = pnand %p4065_p0, %p397_p1 }
   0x6   : > { %401 = sbr.rel (%p398_p2) target bundleno = 1113 (0x459), region = 72 }
   0xd   : > { %v589_v0 = vld [vmem:[%s6598_s3] sm:$0xf]  ;;  %vm615_vm0 = vcmask 1043456   ;;  %p446_p3 = scmp.lt.s32.totalorder %s4061_s26, 1  ;;  %vm590_vm1 = vcmask 31744   ;;  %vm840_vm2 = vcmask 523264  }
   0xe   : > { %4299 = vmatprep.subr.msk.mxu0 %vm615_vm0, %v589_v0  ;;  %v580_v9 = vld [vmem:[%s6599_s4] sm:$0xf]  ;;  %v4509_v56 = vld [vmem:[%s6597_s2 + $0x8] sm:$0xff]   ;;  %v4510_v57 = vld [vmem:[%s6597_s2 + $0x10] sm:$0xff]  }
   0xf   : > { %4300 = vmatpush3.msk.msra.mxu0 %vm615_vm0, %v589_v0  ;;  %s6644_s26 = smov (!%p446_p3, %s4061_s26), 1  ;;  %v4508_v13 = vld [vmem:[%s6597_s2] sm:$0xff]   ;;  %v4525_v58 = vld [vmem:[%s6600_s5 + $0x8] sm:$0xff]   ;;  %v4526_v59 = vld [vmem:[%s6600_s5 + $0x10] sm:$0xff]  }
  0x10   : > { %s4186_s29 = sshll.u32 %s6644_s26, 6  ;;  %s4187_s18 = sshll.u32 %s6644_s26, 8  ;;  %4353 = vmatprep.subr.msk.mxu0 %vm615_vm0, %v580_v9  ;;  %4321 = vmatprep.mubr.msk.bf16.mxu1 %vm840_vm2, %v4508_v13  ;;  %v4524_v55 = vld [vmem:[%s6600_s5] sm:$0xff]   ;;  %v4511_v60 = vld [vmem:[%s6597_s2 + $0x18] sm:$0xff]   ;;  %v4513_v63 = vld [vmem:[%s6597_s2 + $0x28] sm:$0xff]   ;;  %v4570_v13 = vmov 0.0  }
  0x11   : > { %s450_s15 = scalar_lea.vmem %s6595_s0, %s4186_s29  ;;  %s4679_s21 = scalar_lea.vmem %s6596_s1, %s4187_s18  ;;  %v4512_v61 = vld [vmem:[%s6597_s2 + $0x20] sm:$0xff]   ;;  %v4527_v62 = vld [vmem:[%s6600_s5 + $0x18] sm:$0xff]   ;;  %v4514_v0 = vld [vmem:[%s6597_s2 + $0x30] sm:$0xff]   ;;  %462 = vst [vmem:[#allocation2] sm:$0xff] %v4570_v13 }
  0x12   : > { %v581_v1 = vld [vmem:[%s450_s15] sm:$0xff]  ;;  %v582_v2 = vld [vmem:[%s450_s15 + $0x8] sm:$0xff]  ;;  %v583_v3 = vld [vmem:[%s450_s15 + $0x10] sm:$0xff]  ;;  %463 = vst [vmem:[#allocation2 + $0x8] sm:$0xff] %v4570_v13  ;;  %s6498_s17 = scalar_lea.vmem %s6608_s13, %s4187_s18 }
  0x13   : > { %4301 = vmatprep.mubr.msk.f32.mxu0 %vm590_vm1, %v581_v1  ;;  %v584_v4 = vld [vmem:[%s450_s15 + $0x18] sm:$0xff]  ;;  %v585_v5 = vld [vmem:[%s450_s15 + $0x20] sm:$0xff]  ;;  %v586_v6 = vld [vmem:[%s450_s15 + $0x28] sm:$0xff]  ;;  %464 = vst [vmem:[#allocation2 + $0x10] sm:$0xff] %v4570_v13 }
  0x14   : > { %4302 = vmatmul.mubr.msk.f32.vlgmr.msra.gmra.mrb[0].mxu0 %vm590_vm1, %v582_v2  ;;  %v587_v7 = vld [vmem:[%s450_s15 + $0x30] sm:$0xff]  ;;  %v588_v8 = vld [vmem:[%s450_s15 + $0x38] sm:$0xff]  ;;  %v548_v10 = vld [vmem:[%s4679_s21] sm:$0xff]  ;;  %470 = vst [vmem:[#allocation2 + $0x18] sm:$0x1] %v4570_v13 }
  0x15   : > { %4304 = vmatprep.mubr.msk.f32.mxu0 %vm590_vm1, %v583_v3  ;;  %4354 = vmatpush3.msk.msra.mxu0 %vm615_vm0, %v580_v9  ;;  %v549_v11 = vld [vmem:[%s4679_s21 + $0x8] sm:$0xff]  ;;  %v550_v12 = vld [vmem:[%s4679_s21 + $0x10] sm:$0xff]  ;;  %v551_v14 = vld [vmem:[%s4679_s21 + $0x18] sm:$0xff]  ;;  %471 = vst [vmem:[#allocation2 + $0x30] sm:$0x1] %v4570_v13 }
  0x16   : > { %v552_v15 = vld [vmem:[%s4679_s21 + $0x20] sm:$0xff]  ;;  %v553_v16 = vld [vmem:[%s4679_s21 + $0x28] sm:$0xff]  ;;  %v554_v17 = vld [vmem:[%s4679_s21 + $0x30] sm:$0xff]  ;;  %488 = vst [vmem:[#allocation2 + $0x29] sm:$0x7f] %v4570_v13 }
  0x17   : > { %v555_v18 = vld [vmem:[%s4679_s21 + $0x38] sm:$0xff]  ;;  %v556_v19 = vld [vmem:[%s4679_s21 + $0x40] sm:$0xff]  ;;  %v557_v20 = vld [vmem:[%s4679_s21 + $0x48] sm:$0xff]  ;;  %489 = vst [vmem:[#allocation2 + $0x41] sm:$0x7f] %v4570_v13 }
  0x18   : > { %4305 = vmatmul.mubr.msk.f32.gmra.mrb[2].mxu0 %vm590_vm1, %v584_v4  ;;  %v558_v21 = vld [vmem:[%s4679_s21 + $0x50] sm:$0xff]  ;;  %v559_v22 = vld [vmem:[%s4679_s21 + $0x58] sm:$0xff]  ;;  %v560_v23 = vld [vmem:[%s4679_s21 + $0x60] sm:$0xff]  ;;  %466 = vst [vmem:[#allocation2 + $0x198] sm:$0xff] %v4570_v13 }
  0x19   : > { %4307 = vmatprep.mubr.msk.f32.mxu0 %vm590_vm1, %v585_v5  ;;  %v561_v24 = vld [vmem:[%s4679_s21 + $0x68] sm:$0xff]  ;;  %v562_v25 = vld [vmem:[%s4679_s21 + $0x70] sm:$0xff]  ;;  %v563_v26 = vld [vmem:[%s4679_s21 + $0x78] sm:$0xff]  ;;  %467 = vst [vmem:[#allocation2 + $0x1a0] sm:$0xff] %v4570_v13 }
  0x1a   : > { %v564_v27 = vld [vmem:[%s4679_s21 + $0x80] sm:$0xff]  ;;  %v565_v28 = vld [vmem:[%s4679_s21 + $0x88] sm:$0xff]  ;;  %v566_v29 = vld [vmem:[%s4679_s21 + $0x90] sm:$0xff]  ;;  %468 = vst [vmem:[#allocation2 + $0x1a8] sm:$0xff] %v4570_v13 }
  0x1b   : > { %v567_v30 = vld [vmem:[%s4679_s21 + $0x98] sm:$0xff]  ;;  %v568_v31 = vld [vmem:[%s4679_s21 + $0xa0] sm:$0xff]  ;;  %v569_v32 = vld [vmem:[%s4679_s21 + $0xa8] sm:$0xff]  ;;  %472 = vst [vmem:[#allocation2 + $0x48] sm:$0x1] %v4570_v13 }
  0x1c   : > { %4308 = vmatmul.mubr.msk.f32.gmra.mrb[4].mxu0 %vm590_vm1, %v586_v6  ;;  %v570_v33 = vld [vmem:[%s4679_s21 + $0xb0] sm:$0xff]  ;;  %v571_v34 = vld [vmem:[%s4679_s21 + $0xb8] sm:$0xff]  ;;  %v572_v35 = vld [vmem:[%s4679_s21 + $0xc0] sm:$0xff]  ;;  %473 = vst [vmem:[#allocation2 + $0x60] sm:$0x1] %v4570_v13 }
  0x1d   : > { %4310 = vmatprep.mubr.msk.f32.mxu0 %vm590_vm1, %v587_v7  ;;  %v573_v36 = vld [vmem:[%s4679_s21 + $0xc8] sm:$0xff]  ;;  %v574_v37 = vld [vmem:[%s4679_s21 + $0xd0] sm:$0xff]  ;;  %v575_v38 = vld [vmem:[%s4679_s21 + $0xd8] sm:$0xff]  ;;  %474 = vst [vmem:[#allocation2 + $0x78] sm:$0x1] %v4570_v13 }
  0x1e   : > { %v576_v39 = vld [vmem:[%s4679_s21 + $0xe0] sm:$0xff]  ;;  %v577_v40 = vld [vmem:[%s4679_s21 + $0xe8] sm:$0xff]  ;;  %v578_v41 = vld [vmem:[%s4679_s21 + $0xf0] sm:$0xff]  ;;  %475 = vst [vmem:[#allocation2 + $0x90] sm:$0x1] %v4570_v13 }
  0x1f   : > { %v579_v42 = vld [vmem:[%s4679_s21 + $0xf8] sm:$0xff]  ;;  %v4516_v2 = vld [vmem:[%s6597_s2 + $0x40] sm:$0xff]   ;;  %v4517_v3 = vld [vmem:[%s6597_s2 + $0x48] sm:$0xff]   ;;  %476 = vst [vmem:[#allocation2 + $0xa8] sm:$0x1] %v4570_v13 }
  0x20   : > { %4311 = vmatmul.mubr.msk.f32.gmra.mrb[6].mxu0 %vm590_vm1, %v588_v8  ;;  %v4515_v1 = vld [vmem:[%s6597_s2 + $0x38] sm:$0xff]   ;;  %v4518_v4 = vld [vmem:[%s6597_s2 + $0x50] sm:$0xff]   ;;  %v4520_v6 = vld [vmem:[%s6597_s2 + $0x60] sm:$0xff]   ;;  %477 = vst [vmem:[#allocation2 + $0xc0] sm:$0x1] %v4570_v13 }
  0x21   : > { %4355 = vmatprep.mubr.msk.f32.mxu0 %vm590_vm1, %v548_v10  ;;  %v4519_v5 = vld [vmem:[%s6597_s2 + $0x58] sm:$0xff]   ;;  %v4521_v7 = vld [vmem:[%s6597_s2 + $0x68] sm:$0xff]   ;;  %v4522_v8 = vld [vmem:[%s6597_s2 + $0x70] sm:$0xff]   ;;  %478 = vst [vmem:[#allocation2 + $0xd8] sm:$0x1] %v4570_v13 }
  0x22   : > { %v4523_v9 = vld [vmem:[%s6597_s2 + $0x78] sm:$0xff]   ;;  %479 = vst [vmem:[#allocation2 + $0xf0] sm:$0x1] %v4570_v13  ;;  %480 = vst [vmem:[#allocation2 + $0x108] sm:$0x1] %v4570_v13 }
  0x23   : > { %481 = vst [vmem:[#allocation2 + $0x120] sm:$0x1] %v4570_v13  ;;  %482 = vst [vmem:[#allocation2 + $0x138] sm:$0x1] %v4570_v13 }
  0x24   : > { %4356 = vmatmul.mubr.msk.f32.vlgmr.msra.gmra.mrb[8].mxu0 %vm590_vm1, %v549_v11  ;;  %483 = vst [vmem:[#allocation2 + $0x150] sm:$0x1] %v4570_v13  ;;  %484 = vst [vmem:[#allocation2 + $0x168] sm:$0x1] %v4570_v13 }
  0x25   : > { %4358 = vmatprep.mubr.msk.f32.mxu0 %vm590_vm1, %v550_v12  ;;  %485 = vst [vmem:[#allocation2 + $0x180] sm:$0x1] %v4570_v13  ;;  %490 = vst [vmem:[#allocation2 + $0x59] sm:$0x7f] %v4570_v13 }
  0x26   : > { %491 = vst [vmem:[#allocation2 + $0x71] sm:$0x7f] %v4570_v13  ;;  %492 = vst [vmem:[#allocation2 + $0x89] sm:$0x7f] %v4570_v13 }
  0x27   : > { %493 = vst [vmem:[#allocation2 + $0xa1] sm:$0x7f] %v4570_v13  ;;  %494 = vst [vmem:[#allocation2 + $0xb9] sm:$0x7f] %v4570_v13 }
  0x28   : > { %4359 = vmatmul.mubr.msk.f32.gmra.mrb[10].mxu0 %vm590_vm1, %v551_v14  ;;  %495 = vst [vmem:[#allocation2 + $0xd1] sm:$0x7f] %v4570_v13  ;;  %496 = vst [vmem:[#allocation2 + $0xe9] sm:$0x7f] %v4570_v13 }
  0x29   : > { %4361 = vmatprep.mubr.msk.f32.mxu0 %vm590_vm1, %v552_v15  ;;  %497 = vst [vmem:[#allocation2 + $0x101] sm:$0x7f] %v4570_v13  ;;  %498 = vst [vmem:[#allocation2 + $0x119] sm:$0x7f] %v4570_v13  ;;  %v4528_v15 = vld [vmem:[%s6600_s5 + $0x20] sm:$0xff]  }
  0x2a   : > { %499 = vst [vmem:[#allocation2 + $0x131] sm:$0x7f] %v4570_v13  ;;  %500 = vst [vmem:[#allocation2 + $0x149] sm:$0x7f] %v4570_v13 }
  0x2b   : > { %501 = vst [vmem:[#allocation2 + $0x161] sm:$0x7f] %v4570_v13  ;;  %502 = vst [vmem:[#allocation2 + $0x179] sm:$0x7f] %v4570_v13 }
  0x2c   : > { %4362 = vmatmul.mubr.msk.f32.gmra.mrb[12].mxu0 %vm590_vm1, %v553_v16  ;;  %503 = vst [vmem:[#allocation2 + $0x191] sm:$0x7f] %v4570_v13  ;;  %505 = vst [vmem:[#allocation3] sm:$0xff] %v4570_v13 }
  0x2d   : > { %4364 = vmatprep.mubr.msk.f32.mxu0 %vm590_vm1, %v554_v17  ;;  %506 = vst [vmem:[#allocation3 + $0x8] sm:$0xff] %v4570_v13  ;;  %507 = vst [vmem:[#allocation3 + $0x10] sm:$0xff] %v4570_v13 }
  0x2e   : > { %509 = vst [vmem:[#allocation3 + $0x198] sm:$0xff] %v4570_v13  ;;  %510 = vst [vmem:[#allocation3 + $0x1a0] sm:$0xff] %v4570_v13 }
  0x2f   : > { %511 = vst [vmem:[#allocation3 + $0x1a8] sm:$0xff] %v4570_v13  ;;  %513 = vst [vmem:[#allocation3 + $0x18] sm:$0x1] %v4570_v13 }
  0x30   : > { %4365 = vmatmul.mubr.msk.f32.gmra.mrb[14].mxu0 %vm590_vm1, %v555_v18  ;;  %514 = vst [vmem:[#allocation3 + $0x30] sm:$0x1] %v4570_v13  ;;  %515 = vst [vmem:[#allocation3 + $0x48] sm:$0x1] %v4570_v13 }
  0x31   : > { %4367 = vmatprep.mubr.msk.f32.mxu0 %vm590_vm1, %v556_v19  ;;  %516 = vst [vmem:[#allocation3 + $0x60] sm:$0x1] %v4570_v13  ;;  %517 = vst [vmem:[#allocation3 + $0x78] sm:$0x1] %v4570_v13 }
  0x32   : > { %518 = vst [vmem:[#allocation3 + $0x90] sm:$0x1] %v4570_v13  ;;  %519 = vst [vmem:[#allocation3 + $0xa8] sm:$0x1] %v4570_v13 }
  0x33   : > { %520 = vst [vmem:[#allocation3 + $0xc0] sm:$0x1] %v4570_v13  ;;  %521 = vst [vmem:[#allocation3 + $0xd8] sm:$0x1] %v4570_v13 }
  0x34   : > { %4368 = vmatmul.mubr.msk.f32.gmra.mrb[16].mxu0 %vm590_vm1, %v557_v20  ;;  %522 = vst [vmem:[#allocation3 + $0xf0] sm:$0x1] %v4570_v13  ;;  %523 = vst [vmem:[#allocation3 + $0x108] sm:$0x1] %v4570_v13  ;;  %v4529_v20 = vld [vmem:[%s6600_s5 + $0x28] sm:$0xff]  }
  0x35   : > { %4370 = vmatprep.mubr.msk.f32.mxu0 %vm590_vm1, %v558_v21  ;;  %524 = vst [vmem:[#allocation3 + $0x120] sm:$0x1] %v4570_v13  ;;  %525 = vst [vmem:[#allocation3 + $0x138] sm:$0x1] %v4570_v13 }
  0x36   : > { %526 = vst [vmem:[#allocation3 + $0x150] sm:$0x1] %v4570_v13  ;;  %527 = vst [vmem:[#allocation3 + $0x168] sm:$0x1] %v4570_v13 }
  0x37   : > { %528 = vst [vmem:[#allocation3 + $0x180] sm:$0x1] %v4570_v13  ;;  %531 = vst [vmem:[#allocation3 + $0x29] sm:$0x7f] %v4570_v13 }
  0x38   : > { %4371 = vmatmul.mubr.msk.f32.gmra.mrb[18].mxu0 %vm590_vm1, %v559_v22  ;;  %532 = vst [vmem:[#allocation3 + $0x41] sm:$0x7f] %v4570_v13  ;;  %533 = vst [vmem:[#allocation3 + $0x59] sm:$0x7f] %v4570_v13 }
  0x39   : > { %4373 = vmatprep.mubr.msk.f32.mxu0 %vm590_vm1, %v560_v23  ;;  %534 = vst [vmem:[#allocation3 + $0x71] sm:$0x7f] %v4570_v13  ;;  %535 = vst [vmem:[#allocation3 + $0x89] sm:$0x7f] %v4570_v13 }
  0x3a   : > { %536 = vst [vmem:[#allocation3 + $0xa1] sm:$0x7f] %v4570_v13  ;;  %537 = vst [vmem:[#allocation3 + $0xb9] sm:$0x7f] %v4570_v13 }
  0x3b   : > { %538 = vst [vmem:[#allocation3 + $0xd1] sm:$0x7f] %v4570_v13  ;;  %539 = vst [vmem:[#allocation3 + $0xe9] sm:$0x7f] %v4570_v13 }
  0x3c   : > { %4374 = vmatmul.mubr.msk.f32.gmra.mrb[20].mxu0 %vm590_vm1, %v561_v24  ;;  %540 = vst [vmem:[#allocation3 + $0x101] sm:$0x7f] %v4570_v13  ;;  %541 = vst [vmem:[#allocation3 + $0x119] sm:$0x7f] %v4570_v13 }
  0x3d   : > { %4376 = vmatprep.mubr.msk.f32.mxu0 %vm590_vm1, %v562_v25  ;;  %542 = vst [vmem:[#allocation3 + $0x131] sm:$0x7f] %v4570_v13  ;;  %543 = vst [vmem:[#allocation3 + $0x149] sm:$0x7f] %v4570_v13  ;;  %v4530_v25 = vld [vmem:[%s6600_s5 + $0x30] sm:$0xff]  }
  0x3e   : > { %544 = vst [vmem:[#allocation3 + $0x161] sm:$0x7f] %v4570_v13  ;;  %545 = vst [vmem:[#allocation3 + $0x179] sm:$0x7f] %v4570_v13 }
  0x3f   : > { %546 = vst [vmem:[#allocation3 + $0x191] sm:$0x7f] %v4570_v13  ;;  %469 = vst [vmem:[#allocation2] sm:$0x1] %v4570_v13 }
  0x40   : > { %4377 = vmatmul.mubr.msk.f32.gmra.mrb[22].mxu0 %vm590_vm1, %v563_v26  ;;  %487 = vst [vmem:[#allocation2 + $0x11] sm:$0x7f] %v4570_v13  ;;  %486 = vst [vmem:[#allocation2 + $0x198] sm:$0x1] %v4570_v13 }
  0x41   : > { %4379 = vmatprep.mubr.msk.f32.mxu0 %vm590_vm1, %v564_v27  ;;  %504 = vst [vmem:[#allocation2 + $0x1a9] sm:$0x7f] %v4570_v13  ;;  %512 = vst [vmem:[#allocation3] sm:$0x1] %v4570_v13 }
  0x42   : > { %529 = vst [vmem:[#allocation3 + $0x198] sm:$0x1] %v4570_v13  ;;  %530 = vst [vmem:[#allocation3 + $0x11] sm:$0x7f] %v4570_v13 }
  0x43   : > { %547 = vst [vmem:[#allocation3 + $0x1a9] sm:$0x7f] %v4570_v13  ;;  %v5016_v13 = vld [vmem:[%s6603_s8 + $0x3] ss:$0 sm:$0xff] }
  0x44   : > { %4380 = vmatmul.mubr.msk.f32.gmra.mrb[24].mxu0 %vm590_vm1, %v565_v28 }
  0x45   : > { %4382 = vmatprep.mubr.msk.f32.mxu0 %vm590_vm1, %v566_v29 }
  0x48   : > { %4383 = vmatmul.mubr.msk.f32.gmra.mrb[26].mxu0 %vm590_vm1, %v567_v30  ;;  %v4531_v30 = vld [vmem:[%s6600_s5 + $0x38] sm:$0xff]  }
  0x49   : > { %4385 = vmatprep.mubr.msk.f32.mxu0 %vm590_vm1, %v568_v31 }
  0x4c   : > { %4386 = vmatmul.mubr.msk.f32.gmra.mrb[28].mxu0 %vm590_vm1, %v569_v32 }
  0x4d   : > { %4388 = vmatprep.mubr.msk.f32.mxu0 %vm590_vm1, %v570_v33 }
  0x50   : > { %4389 = vmatmul.mubr.msk.f32.gmra.mrb[30].mxu0 %vm590_vm1, %v571_v34 }
  0x51   : > { %4391 = vmatprep.mubr.msk.f32.mxu0 %vm590_vm1, %v572_v35 }
  0x54   : > { %4392 = vmatmul.mubr.msk.f32.gmra.mrb[32].mxu0 %vm590_vm1, %v573_v36 }
  0x55   : > { %4394 = vmatprep.mubr.msk.f32.mxu0 %vm590_vm1, %v574_v37 }
  0x58   : > { %4395 = vmatmul.mubr.msk.f32.gmra.mrb[34].mxu0 %vm590_vm1, %v575_v38 }
  0x59   : > { %4397 = vmatprep.mubr.msk.f32.mxu0 %vm590_vm1, %v576_v39 }
  0x5c   : > { %4398 = vmatmul.mubr.msk.f32.gmra.mrb[36].mxu0 %vm590_vm1, %v577_v40 }
  0x5d   : > { %4400 = vmatprep.mubr.msk.f32.mxu0 %vm590_vm1, %v578_v41 }
  0x60   : > { %4401 = vmatmul.mubr.msk.f32.gmra.mrb[38].mxu0 %vm590_vm1, %v579_v42 }
  0xe7   : > { %v4303_v43 = vpop.f32.mrb[0].mxu0 }
  0xe8   : > { %v685_v44 = vpop.f32.mrb[1].mxu0 }
  0xe9   : > { %v756_v45 = vpack.c.bf16 %v4303_v43, %v685_v44 }
  0xeb   : > { %v4306_v46 = vpop.f32.mrb[2].mxu0  ;;  %4313 = vmatprep.subr.bf16.mxu1 %v756_v45 }
  0xec   : > { %v695_v47 = vpop.f32.mrb[3].mxu0  ;;  %4314 = vmatpush3.bf16.msra.mxu1 %v756_v45 }
  0xed   : > { %v757_v48 = vpack.c.bf16 %v4306_v46, %v695_v47  ;;  %v1407_v47 = vld [vmem:[#allocation2] sm:$0xff] }
  0xef   : > { %v4309_v49 = vpop.f32.mrb[4].mxu0  ;;  %4315 = vmatprep.subr.bf16.mxu1 %v757_v48 }
  0xf0   : > { %v705_v50 = vpop.f32.mrb[5].mxu0  ;;  %4316 = vmatpush3.bf16.msra.mxu1 %v757_v48  ;;  %v4982_v48 = vld [vmem:[%s6603_s8] ss:$0 sm:$0xff] }
  0xf1   : > { %v758_v51 = vpack.c.bf16 %v4309_v49, %v705_v50  ;;  %v1508_v49 = vld [vmem:[#allocation2 + $0x1] sm:$0xff]  ;;  %v1509_v50 = vld [vmem:[#allocation2 + $0x9] sm:$0xff] }
  0xf3   : > { %v4312_v52 = vpop.f32.mrb[6].mxu0  ;;  %4317 = vmatprep.subr.bf16.mxu1 %v758_v51 }
  0xf4   : > { %v715_v53 = vpop.f32.mrb[7].mxu0  ;;  %4318 = vmatpush3.bf16.msra.mxu1 %v758_v51  ;;  %v4987_v51 = vld [vmem:[%s6603_s8 + $0x1] ss:$0 sm:$0xff] }
  0xf5   : > { %v759_v54 = vpack.c.bf16 %v4312_v52, %v715_v53  ;;  %6626 = vst [vmem:[#allocation19_spill] sm:$0xff] %v4987_v51  ;;  %v1444_v52 = vmul.f32 %v4982_v48, %v1407_v47  ;;  %v1545_v53 = vmul.f32 %v4987_v51, %v1508_v49 }
  0xf7   : > { %4319 = vmatprep.subr.bf16.mxu1 %v759_v54  ;;  %v4821_v10 = vpop.f32.mrb[8].mxu0 }
  0xf8   : > { %4320 = vmatpush3.bf16.msra.mxu1 %v759_v54  ;;  %v4823_v11 = vpop.f32.mrb[9].mxu0  ;;  %v1445_v54 = vmul.f32 0.0, %v4982_v48 }
  0xf9   : > { %4403 = vmatprep.subr.bf16.mxu1 %v4524_v55 }
  0xfb   : > { %4322 = vmatmul.mubr.msk.bf16.vlgmr.msra.gmra.mrb[0].mxu1 %vm840_vm2, %v4509_v56  ;;  %v4825_v12 = vpop.f32.mrb[10].mxu0 }
  0xfc   : > { %4325 = vmatprep.mubr.msk.bf16.mxu1 %vm840_vm2, %v4510_v57  ;;  %4404 = vmatpush3.bf16.msra.mxu1 %v4524_v55  ;;  %v1225_v14 = vpop.f32.mrb[11].mxu0  ;;  %v1546_v55 = vmul.f32 %v4987_v51, %v1509_v50  ;;  %v1609_v57 = vld [vmem:[#allocation2 + $0x2] sm:$0xff] }
  0xfd   : > { %4405 = vmatprep.subr.bf16.mxu1 %v4525_v58 }
  0xff   : > { %v4914_v16 = vpop.f32.mrb[12].mxu0 }
 0x100   : > { %4406 = vmatpush3.bf16.msra.mxu1 %v4525_v58  ;;  %v4916_v17 = vpop.f32.mrb[13].mxu0  ;;  %v1610_v58 = vld [vmem:[#allocation2 + $0xa] sm:$0xff] }
 0x101   : > { %4407 = vmatprep.subr.bf16.mxu1 %v4526_v59 }
 0x103   : > { %4326 = vmatmul.mubr.msk.bf16.gmra.mrb[4].mxu1 %vm840_vm2, %v4511_v60  ;;  %v4918_v18 = vpop.f32.mrb[14].mxu0 }
 0x104   : > { %4329 = vmatprep.mubr.msk.bf16.mxu1 %vm840_vm2, %v4512_v61  ;;  %4408 = vmatpush3.bf16.msra.mxu1 %v4526_v59  ;;  %v4920_v19 = vpop.f32.mrb[15].mxu0  ;;  %v4996_v59 = vld [vmem:[%s6603_s8 + $0x2] ss:$0 sm:$0xff] }
 0x105   : > { %4409 = vmatprep.subr.bf16.mxu1 %v4527_v62 }
 0x107   : > { %v4925_v21 = vpop.f32.mrb[16].mxu0 }
 0x108   : > { %4410 = vmatpush3.bf16.msra.mxu1 %v4527_v62  ;;  %v4927_v22 = vpop.f32.mrb[17].mxu0 }
 0x109   : > { %4411 = vmatprep.subr.bf16.mxu1 %v4528_v15 }
 0x10b   : > { %4330 = vmatmul.mubr.msk.bf16.gmra.mrb[8].mxu1 %vm840_vm2, %v4513_v63  ;;  %v4929_v23 = vpop.f32.mrb[18].mxu0 }
 0x10c   : > { %4333 = vmatprep.mubr.msk.bf16.mxu1 %vm840_vm2, %v4514_v0  ;;  %4412 = vmatpush3.bf16.msra.mxu1 %v4528_v15  ;;  %v4931_v24 = vpop.f32.mrb[19].mxu0  ;;  %v1577_v0 = vadd.f32 %v1545_v53, %v1444_v52 }
 0x10d   : > { %4413 = vmatprep.subr.bf16.mxu1 %v4529_v20 }
 0x10f   : > { %v4936_v26 = vpop.f32.mrb[20].mxu0 }
 0x110   : > { %4414 = vmatpush3.bf16.msra.mxu1 %v4529_v20  ;;  %v4938_v27 = vpop.f32.mrb[21].mxu0 }
 0x111   : > { %4415 = vmatprep.subr.bf16.mxu1 %v4530_v25 }
 0x113   : > { %4334 = vmatmul.mubr.msk.bf16.gmra.mrb[12].mxu1 %vm840_vm2, %v4515_v1  ;;  %v4940_v28 = vpop.f32.mrb[22].mxu0 }
 0x114   : > { %4337 = vmatprep.mubr.msk.bf16.mxu1 %vm840_vm2, %v4516_v2  ;;  %4416 = vmatpush3.bf16.msra.mxu1 %v4530_v25  ;;  %v4942_v29 = vpop.f32.mrb[23].mxu0 }
 0x115   : > { %4417 = vmatprep.subr.bf16.mxu1 %v4531_v30 }
 0x117   : > { %v4947_v31 = vpop.f32.mrb[24].mxu0 }
 0x118   : > { %6611 = vst [vmem:[#allocation4_spill] sm:$0xff] %v4947_v31  ;;  %v4949_v32 = vpop.f32.mrb[25].mxu0  ;;  %4418 = vmatpush3.bf16.msra.mxu1 %v4531_v30 }
 0x119   : > { %6612 = vst [vmem:[#allocation5_spill] sm:$0xff] %v4949_v32 }
 0x11b   : > { %4338 = vmatmul.mubr.msk.bf16.gmra.mrb[16].mxu1 %vm840_vm2, %v4517_v3  ;;  %v4951_v33 = vpop.f32.mrb[26].mxu0  ;;  %v1578_v3 = vadd.f32 %v1546_v55, %v1445_v54 }
 0x11c   : > { %4341 = vmatprep.mubr.msk.bf16.mxu1 %vm840_vm2, %v4518_v4  ;;  %6613 = vst [vmem:[#allocation6_spill] sm:$0xff] %v4951_v33  ;;  %v4953_v34 = vpop.f32.mrb[27].mxu0  ;;  %v1646_v4 = vmul.f32 %v4996_v59, %v1609_v57 }
 0x11f   : > { %v4955_v35 = vpop.f32.mrb[28].mxu0 }
 0x120   : > { %6614 = vst [vmem:[#allocation7_spill] sm:$0xff] %v4955_v35  ;;  %v4957_v36 = vpop.f32.mrb[29].mxu0 }
 0x121   : > { %6615 = vst [vmem:[#allocation8_spill] sm:$0xff] %v4957_v36 }
 0x123   : > { %4342 = vmatmul.mubr.msk.bf16.gmra.mrb[20].mxu1 %vm840_vm2, %v4519_v5  ;;  %v4959_v37 = vpop.f32.mrb[30].mxu0  ;;  %v1647_v5 = vmul.f32 %v4996_v59, %v1610_v58 }
 0x124   : > { %4345 = vmatprep.mubr.msk.bf16.mxu1 %vm840_vm2, %v4520_v6  ;;  %6616 = vst [vmem:[#allocation9_spill] sm:$0xff] %v4959_v37  ;;  %v4961_v38 = vpop.f32.mrb[31].mxu0 }
 0x125   : > { %6617 = vst [vmem:[#allocation10_spill] sm:$0xff] %v4961_v38 }
 0x127   : > { %v4963_v39 = vpop.f32.mrb[32].mxu0 }
 0x128   : > { %6618 = vst [vmem:[#allocation11_spill] sm:$0xff] %v4963_v39  ;;  %v4965_v40 = vpop.f32.mrb[33].mxu0 }
 0x129   : > { %6619 = vst [vmem:[#allocation12_spill] sm:$0xff] %v4965_v40 }
 0x12b   : > { %4346 = vmatmul.mubr.msk.bf16.gmra.mrb[24].mxu1 %vm840_vm2, %v4521_v7  ;;  %v4967_v41 = vpop.f32.mrb[34].mxu0  ;;  %v5006_v7 = vld [vmem:[%s6603_s8 + $0x4] ss:$0 sm:$0xff] }
 0x12c   : > { %4349 = vmatprep.mubr.msk.bf16.mxu1 %vm840_vm2, %v4522_v8  ;;  %6620 = vst [vmem:[#allocation13_spill] sm:$0xff] %v4967_v41  ;;  %v4969_v42 = vpop.f32.mrb[35].mxu0  ;;  %v5011_v8 = vld [vmem:[%s6603_s8 + $0x7] ss:$0 sm:$0xff] }
 0x12d   : > { %6621 = vst [vmem:[#allocation14_spill] sm:$0xff] %v4969_v42 }
 0x12f   : > { %v4971_v43 = vpop.f32.mrb[36].mxu0 }
 0x130   : > { %6622 = vst [vmem:[#allocation15_spill] sm:$0xff] %v4971_v43  ;;  %v4973_v44 = vpop.f32.mrb[37].mxu0 }
 0x131   : > { %6623 = vst [vmem:[#allocation16_spill] sm:$0xff] %v4973_v44 }
 0x133   : > { %4350 = vmatmul.mubr.msk.bf16.gmra.mrb[28].mxu1 %vm840_vm2, %v4523_v9  ;;  %v4975_v45 = vpop.f32.mrb[38].mxu0  ;;  %v1678_v9 = vadd.f32 %v1646_v4, %v1577_v0 }
 0x134   : > { %6624 = vst [vmem:[#allocation17_spill] sm:$0xff] %v4975_v45  ;;  %v4977_v46 = vpop.f32.mrb[39].mxu0 }
 0x135   : > { %6625 = vst [vmem:[#allocation18_spill] sm:$0xff] %v4977_v46 }
 0x1ce   : > { %v4323_v56 = vpop.f32.mrb[0].mxu1 }
 0x1cf   : > { %v1226_v60 = vadd.f32 %v4323_v56, %v1225_v14  ;;  %v923_v61 = vpop.f32.mrb[1].mxu1  ;;  %v5022_v14 = vld [vmem:[%s6603_s8 + $0x6] ss:$0 sm:$0xff] }
 0x1d0   : > { %v1216_v62 = vadd.f32 %v4823_v11, %v923_v61  ;;  %v4324_v63 = vpop.f32.mrb[2].mxu1  ;;  %v1679_v11 = vadd.f32 %v1647_v5, %v1578_v3 }
 0x1d1   : > { %1377 = vst [vmem:[#allocation2 + $0x31] sm:$0xff] %v1226_v60  ;;  %v1231_v1 = vadd.f32 %v4825_v12, %v4324_v63  ;;  %v926_v2 = vpop.f32.mrb[3].mxu1  ;;  %v5025_v15 = vmul.f32 %v5011_v8, %v1226_v60  ;;  %v5028_v20 = vmul.f32 %v5006_v7, %v1226_v60  ;;  %v5031_v25 = vmul.f32 %v4987_v51, %v1226_v60 }
 0x1d2   : > { %1375 = vst [vmem:[#allocation2 + $0x19] sm:$0xff] %v1216_v62  ;;  %v1221_v6 = vadd.f32 %v4821_v10, %v926_v2  ;;  %v1848_v10 = vmul.f32 %v5006_v7, %v1216_v62  ;;  %v1547_v50 = vmul.f32 %v4987_v51, %v1216_v62  ;;  %v5063_v62 = vld [vmem:[%s6603_s8 + $0x5] ss:$0 sm:$0xff] }
 0x1d3   : > { %1378 = vst [vmem:[#allocation2 + $0x39] sm:$0xff] %v1231_v1  ;;  %v5037_v49 = vmul.f32 %v5011_v8, %v1231_v1  ;;  %v5041_v52 = vmul.f32 %v5006_v7, %v1231_v1  ;;  %v5054_v58 = vmul.f32 %v4987_v51, %v1231_v1 }
 0x1d4   : > { %1376 = vst [vmem:[#allocation2 + $0x21] sm:$0xff] %v1221_v6  ;;  %v1849_v55 = vmul.f32 %v5006_v7, %v1221_v6  ;;  %v1548_v57 = vmul.f32 %v4987_v51, %v1221_v6 }
 0x1d6   : > { %v4327_v12 = vpop.f32.mrb[4].mxu1 }
 0x1d7   : > { %v5034_v30 = vadd.f32 %v4327_v12, %v4920_v19  ;;  %v939_v47 = vpop.f32.mrb[5].mxu1  ;;  %v5050_v19 = vld [vmem:[%s6603_s8 + $0x8] ss:$0 sm:$0xff] }
 0x1d8   : > { %v5044_v53 = vadd.f32 %v4916_v17, %v939_v47  ;;  %v4328_v54 = vpop.f32.mrb[6].mxu1  ;;  %v2014_v56 = vld [vmem:[#allocation2 + $0x30] sm:$0xff] }
 0x1d9   : > { %1381 = vst [vmem:[#allocation2 + $0x61] sm:$0xff] %v5034_v30  ;;  %v5058_v60 = vadd.f32 %v4918_v18, %v4328_v54  ;;  %v942_v17 = vpop.f32.mrb[7].mxu1  ;;  %v1710_v61 = vld [vmem:[#allocation2 + $0x18] sm:$0xff]  ;;  %v2051_v63 = vmul.f32 %v5022_v14, %v2014_v56  ;;  %v1749_v0 = vmul.f32 %v5016_v13, %v2014_v56  ;;  %v1448_v2 = vmul.f32 %v4982_v48, %v2014_v56 }
 0x1da   : > { %1379 = vst [vmem:[#allocation2 + $0x49] sm:$0xff] %v5044_v53  ;;  %v5070_v1 = vadd.f32 %v4914_v16, %v942_v17  ;;  %v1747_v18 = vmul.f32 %v5016_v13, %v1710_v61  ;;  %v2015_v3 = vld [vmem:[#allocation2 + $0x38] sm:$0xff]  ;;  %v1446_v6 = vmul.f32 %v4982_v48, %v1710_v61  ;;  %v5078_v12 = vmul.f32 %v5011_v8, %v5044_v53 }
 0x1db   : > { %v2216_v4 = vld [vmem:[#allocation2 + $0x32] sm:$0xff]  ;;  %v5073_v5 = vld [vmem:[#allocation2 + $0x3a] sm:$0xff]  ;;  %1382 = vst [vmem:[#allocation2 + $0x69] sm:$0xff] %v5058_v60  ;;  %v1913_v56 = vld [vmem:[#allocation2 + $0x22] sm:$0xff]  ;;  %v2052_v16 = vmul.f32 %v5022_v14, %v2015_v3  ;;  %v1750_v45 = vmul.f32 %v5016_v13, %v2015_v3 }
 0x1dc   : > { %v1711_v47 = vld [vmem:[#allocation2 + $0x20] sm:$0xff]  ;;  %v2253_v17 = vmul.f32 %v5050_v19, %v2216_v4  ;;  %v5085_v43 = vmul.f32 %v5050_v19, %v5073_v5  ;;  %1380 = vst [vmem:[#allocation2 + $0x51] sm:$0xff] %v5070_v1  ;;  %v1779_v44 = vadd.f32 %v1747_v18, %v1678_v9  ;;  %v1950_v39 = vmul.f32 %v5063_v62, %v1913_v56 }
 0x1dd   : > { %v1912_v54 = vld [vmem:[#allocation2 + $0x1a] sm:$0xff]  ;;  %v1748_v61 = vmul.f32 %v5016_v13, %v1711_v47  ;;  %v1447_v41 = vmul.f32 %v4982_v48, %v1711_v47  ;;  %v1579_v40 = vadd.f32 %v1547_v50, %v1446_v6  ;;  %v1649_v35 = vmul.f32 %v4996_v59, %v1913_v56 }
 0x1de   : > { %v1949_v46 = vmul.f32 %v5063_v62, %v1912_v54  ;;  %v1648_v42 = vmul.f32 %v4996_v59, %v1912_v54  ;;  %v4331_v37 = vpop.f32.mrb[8].mxu1  ;;  %v1880_v38 = vadd.f32 %v1848_v10, %v1779_v44  ;;  %v1951_v31 = vmul.f32 %v5063_v62, %v2216_v4 }
 0x1df   : > { %v1780_v36 = vadd.f32 %v1748_v61, %v1679_v11  ;;  %v1952_v33 = vmul.f32 %v5063_v62, %v5073_v5  ;;  %v5099_v9 = vadd.f32 %v4331_v37, %v4931_v24  ;;  %v955_v18 = vpop.f32.mrb[9].mxu1  ;;  %v1580_v51 = vadd.f32 %v1548_v57, %v1447_v41 }
 0x1e0   : > { %v1680_v32 = vadd.f32 %v1648_v42, %v1579_v40  ;;  %v5103_v50 = vmul.f32 %v5011_v8, %v5070_v1  ;;  %v5106_v6 = vadd.f32 %v4927_v22, %v955_v18  ;;  %v4332_v11 = vpop.f32.mrb[10].mxu1  ;;  %v1981_v10 = vadd.f32 %v1949_v46, %v1880_v38 }
 0x1e1   : > { %v1881_v44 = vadd.f32 %v1849_v55, %v1780_v36  ;;  %v1449_v47 = vmul.f32 %v4982_v48, %v2015_v3  ;;  %1385 = vst [vmem:[#allocation2 + $0x91] sm:$0xff] %v5099_v9  ;;  %v5111_v24 = vadd.f32 %v4929_v23, %v4332_v11  ;;  %v958_v37 = vpop.f32.mrb[11].mxu1  ;;  %v1681_v41 = vadd.f32 %v1649_v35, %v1580_v51  ;;  %v5113_v42 = vld [vmem:[#allocation2 + $0x48] sm:$0xff] }
 0x1e2   : > { %v1781_v40 = vadd.f32 %v1749_v0, %v1680_v32  ;;  %v1581_v57 = vadd.f32 %v5031_v25, %v1448_v2  ;;  %1383 = vst [vmem:[#allocation2 + $0x79] sm:$0xff] %v5106_v6  ;;  %v5118_v22 = vadd.f32 %v4925_v21, %v958_v37  ;;  %v2083_v38 = vadd.f32 %v2051_v63, %v1981_v10 }
 0x1e3   : > { %v1982_v36 = vadd.f32 %v1950_v39, %v1881_v44  ;;  %v2053_v46 = vmul.f32 %v5022_v14, %v5113_v42  ;;  %1386 = vst [vmem:[#allocation2 + $0x99] sm:$0xff] %v5111_v24  ;;  %v1782_v23 = vadd.f32 %v1750_v45, %v1681_v41  ;;  %v5124_v32 = vld [vmem:[#allocation2 + $0x50] sm:$0xff]  ;;  %v1582_v55 = vadd.f32 %v5054_v58, %v1449_v47 }
 0x1e4   : > { %v1882_v35 = vadd.f32 %v5028_v20, %v1781_v40  ;;  %v5126_v51 = vld [vmem:[#allocation2 + $0x4a] sm:$0xff]  ;;  %v5128_v25 = vld [vmem:[#allocation2 + $0x52] sm:$0xff]  ;;  %v1650_v21 = vmul.f32 %v4996_v59, %v2216_v4  ;;  %1384 = vst [vmem:[#allocation2 + $0x81] sm:$0xff] %v5118_v22  ;;  %v2184_v63 = vadd.f32 %v5025_v15, %v2083_v38  ;;  %v2054_v45 = vmul.f32 %v5022_v14, %v5124_v32  ;;  %v5157_v40 = vld [vmem:[#allocation2 + $0x60] sm:$0xff] }
 0x1e5   : > { %v2084_v39 = vadd.f32 %v2052_v16, %v1982_v36  ;;  %v2255_v20 = vmul.f32 %v5050_v19, %v5126_v51  ;;  %v1883_v0 = vadd.f32 %v5041_v52, %v1782_v23  ;;  %v2256_v3 = vmul.f32 %v5050_v19, %v5128_v25 }
 0x1e6   : > { %v1983_v2 = vadd.f32 %v1951_v31, %v1882_v35  ;;  %v1651_v58 = vmul.f32 %v4996_v59, %v5073_v5  ;;  %v4335_v4 = vpop.f32.mrb[12].mxu1  ;;  %v2285_v56 = vadd.f32 %v2253_v17, %v2184_v63  ;;  %v1682_v15 = vadd.f32 %v1650_v21, %v1581_v57  ;;  %v5170_v35 = vld [vmem:[#allocation2 + $0x62] sm:$0xff] }
 0x1e7   : > { %v2185_v54 = vadd.f32 %v5037_v49, %v2084_v39  ;;  %v1751_v16 = vmul.f32 %v5016_v13, %v5113_v42  ;;  %v1286_v61 = vadd.f32 %v4335_v4, %v4942_v29  ;;  %v971_v18 = vpop.f32.mrb[13].mxu1  ;;  %v1984_v11 = vadd.f32 %v1952_v33, %v1883_v0 }
 0x1e8   : > { %v2085_v52 = vadd.f32 %v2053_v46, %v1983_v2  ;;  %v1683_v31 = vadd.f32 %v1651_v58, %v1582_v55  ;;  %v5148_v44 = vadd.f32 %v4938_v27, %v971_v18  ;;  %v4336_v10 = vpop.f32.mrb[14].mxu1  ;;  %v1752_v49 = vmul.f32 %v5016_v13, %v5124_v32  ;;  %v5159_v27 = vld [vmem:[#allocation2 + $0x68] sm:$0xff] }
 0x1e9   : > { %v2286_v5 = vadd.f32 %v5085_v43, %v2185_v54  ;;  %v1783_v17 = vadd.f32 %v1751_v16, %v1682_v15  ;;  %1389 = vst [vmem:[#allocation2 + $0xc1] sm:$0xff] %v1286_v61  ;;  %v1291_v47 = vadd.f32 %v4940_v28, %v4336_v10  ;;  %v974_v37 = vpop.f32.mrb[15].mxu1  ;;  %v2086_v41 = vadd.f32 %v2054_v45, %v1984_v11  ;;  %v5172_v55 = vld [vmem:[#allocation2 + $0x6a] sm:$0xff] }
 0x1ea   : > { %v2186_v29 = vadd.f32 %v5078_v12, %v2085_v52  ;;  %v1852_v33 = vmul.f32 %v5006_v7, %v5044_v53  ;;  %1387 = vst [vmem:[#allocation2 + $0xa9] sm:$0xff] %v5148_v44  ;;  %v5163_v43 = vadd.f32 %v4936_v26, %v974_v37  ;;  %v1784_v36 = vadd.f32 %v1752_v49, %v1683_v31  ;;  %v6627_v11 = vld [vmem:[#allocation5_spill] sm:$0xff] }
 0x1eb   : > { %v2317_v57 = vpack.c.bf16 %v2286_v5, %v2285_v56  ;;  %v1853_v28 = vmul.f32 %v5006_v7, %v5070_v1  ;;  %1390 = vst [vmem:[#allocation2 + $0xc9] sm:$0xff] %v1291_v47  ;;  %v2187_v12 = vadd.f32 %v5103_v50, %v2086_v41  ;;  %v1953_v23 = vmul.f32 %v5063_v62, %v5126_v51  ;;  %v6628_v5 = vld [vmem:[#allocation19_spill] sm:$0xff] }
 0x1ec   : > { %v2287_v38 = vadd.f32 %v2255_v20, %v2186_v29  ;;  %v1884_v46 = vadd.f32 %v1852_v33, %v1783_v17  ;;  %1388 = vst [vmem:[#allocation2 + $0xb1] sm:$0xff] %v5163_v43  ;;  %v1954_v21 = vmul.f32 %v5063_v62, %v5128_v25  ;;  %v2055_v39 = vmul.f32 %v5022_v14, %v5157_v40  ;;  %v6629_v17 = vld [vmem:[#allocation6_spill] sm:$0xff]  ;;  %v6630_v29 = vld [vmem:[#allocation4_spill] sm:$0xff] }
 0x1ed   : > { %4419 = vmatprep.mubr.bf16.mxu1 %v2317_v57  ;;  %v1885_v26 = vadd.f32 %v1853_v28, %v1784_v36  ;;  %v2056_v50 = vmul.f32 %v5022_v14, %v5159_v27  ;;  %v2288_v63 = vadd.f32 %v2256_v3, %v2187_v12  ;;  %v2156_v20 = vmul.f32 %v5011_v8, %v5034_v30 }
 0x1ee   : > { %v1985_v45 = vadd.f32 %v1953_v23, %v1884_v46  ;;  %v2157_v0 = vmul.f32 %v5011_v8, %v5058_v60  ;;  %v4339_v2 = vpop.f32.mrb[16].mxu1  ;;  %v2257_v4 = vmul.f32 %v5050_v19, %v5170_v35  ;;  %v2258_v54 = vmul.f32 %v5050_v19, %v5172_v55 }
 0x1ef   : > { %v1986_v58 = vadd.f32 %v1954_v21, %v1885_v26  ;;  %v1450_v56 = vmul.f32 %v4982_v48, %v5113_v42  ;;  %v5192_v3 = vadd.f32 %v4339_v2, %v4953_v34  ;;  %v987_v15 = vpop.f32.mrb[17].mxu1  ;;  %v2318_v16 = vpack.c.bf16 %v2288_v63, %v2287_v38  ;;  %v4532_v34 = vld [vmem:[%s6604_s9] sm:$0xff]   ;;  %v5227_v26 = vld [vmem:[#allocation2 + $0x78] sm:$0xff] }
 0x1f0   : > { %v2087_v61 = vadd.f32 %v2055_v39, %v1985_v45  ;;  %v1451_v18 = vmul.f32 %v4982_v48, %v5124_v32  ;;  %v5197_v52 = vadd.f32 %v6627_v11, %v987_v15  ;;  %v4340_v31 = vpop.f32.mrb[18].mxu1  ;;  %v1551_v49 = vmul.f32 %v6628_v5, %v5044_v53  ;;  %4451 = vmatprep.subr.bf16.mxu0 %v4532_v34  ;;  %v5229_v21 = vld [vmem:[#allocation2 + $0x80] sm:$0xff]  ;;  %v4534_v45 = vld [vmem:[%s6604_s9 + $0x10] sm:$0xff]  }
 0x1f1   : > { %v2088_v10 = vadd.f32 %v2056_v50, %v1986_v58  ;;  %v1552_v42 = vmul.f32 %v6628_v5, %v5070_v1  ;;  %1393 = vst [vmem:[#allocation2 + $0xf1] sm:$0xff] %v5192_v3  ;;  %v5208_v47 = vadd.f32 %v6629_v17, %v4340_v31  ;;  %4420 = vmatmul.mubr.bf16.vlgmr.msra.gmra.mrb[32].mxu1 %v2318_v16  ;;  %v990_v32 = vpop.f32.mrb[19].mxu1  ;;  %v4533_v1 = vld [vmem:[%s6604_s9 + $0x8] sm:$0xff]   ;;  %v6632_v11 = vld [vmem:[#allocation8_spill] sm:$0xff]  ;;  %v4535_v17 = vld [vmem:[%s6604_s9 + $0x18] sm:$0xff]  }
 0x1f2   : > { %v2188_v37 = vadd.f32 %v2156_v20, %v2087_v61  ;;  %v1652_v41 = vmul.f32 %v4996_v59, %v5126_v51  ;;  %v1653_v53 = vmul.f32 %v4996_v59, %v5128_v25  ;;  %1391 = vst [vmem:[#allocation2 + $0xd9] sm:$0xff] %v5197_v52  ;;  %v5219_v33 = vadd.f32 %v6630_v29, %v990_v32  ;;  %v6633_v32 = vld [vmem:[#allocation9_spill] sm:$0xff] }
 0x1f3   : > { %v2189_v57 = vadd.f32 %v2157_v0, %v2088_v10  ;;  %v1583_v36 = vadd.f32 %v1551_v49, %v1450_v56  ;;  %v1584_v28 = vadd.f32 %v1552_v42, %v1451_v18  ;;  %1394 = vst [vmem:[#allocation2 + $0xf9] sm:$0xff] %v5208_v47  ;;  %v1753_v51 = vmul.f32 %v5016_v13, %v5157_v40 }
 0x1f4   : > { %v2289_v12 = vadd.f32 %v2257_v4, %v2188_v37  ;;  %4452 = vmatpush3.bf16.msra.mxu0 %v4532_v34  ;;  %1392 = vst [vmem:[#allocation2 + $0xe1] sm:$0xff] %v5219_v33  ;;  %v1754_v23 = vmul.f32 %v5016_v13, %v5159_v27  ;;  %v1854_v39 = vmul.f32 %v5006_v7, %v5034_v30 }
 0x1f5   : > { %v2290_v25 = vadd.f32 %v2258_v54, %v2189_v57  ;;  %v1684_v38 = vadd.f32 %v1652_v41, %v1583_v36  ;;  %v1685_v46 = vadd.f32 %v1653_v53, %v1584_v28  ;;  %4453 = vmatprep.subr.bf16.mxu0 %v4533_v1  ;;  %v1855_v50 = vmul.f32 %v5006_v7, %v5058_v60  ;;  %v6631_v54 = vld [vmem:[#allocation10_spill] sm:$0xff]  ;;  %v2222_v36 = vld [vmem:[#allocation2 + $0x7a] sm:$0xff]  ;;  %v5270_v28 = vld [vmem:[#allocation2 + $0x82] sm:$0xff] }
 0x1f6   : > { %v1955_v63 = vmul.f32 %v5063_v62, %v5170_v35  ;;  %v4343_v0 = vpop.f32.mrb[20].mxu1  ;;  %v1956_v4 = vmul.f32 %v5063_v62, %v5172_v55  ;;  %v2057_v16 = vmul.f32 %v5022_v14, %v5227_v26  ;;  %v2058_v61 = vmul.f32 %v5022_v14, %v5229_v21 }
 0x1f7   : > { %v2319_v20 = vpack.c.bf16 %v2290_v25, %v2289_v12  ;;  %v1785_v2 = vadd.f32 %v1753_v51, %v1684_v38  ;;  %v1786_v58 = vadd.f32 %v1754_v23, %v1685_v46  ;;  %v5243_v56 = vadd.f32 %v4343_v0, %v6631_v54  ;;  %v1003_v15 = vpop.f32.mrb[21].mxu1  ;;  %v6634_v12 = vld [vmem:[#allocation7_spill] sm:$0xff]  ;;  %v5290_v0 = vld [vmem:[#allocation2 + $0x90] sm:$0xff] }
 0x1f8   : > { %v2158_v18 = vmul.f32 %v5011_v8, %v5106_v6  ;;  %4454 = vmatpush3.bf16.msra.mxu0 %v4533_v1  ;;  %v5252_v31 = vadd.f32 %v6632_v11, %v1003_v15  ;;  %v4344_v10 = vpop.f32.mrb[22].mxu1  ;;  %v1452_v34 = vmul.f32 %v4982_v48, %v5157_v40  ;;  %v1453_v53 = vmul.f32 %v4982_v48, %v5159_v27 }
 0x1f9   : > { %4423 = vmatprep.mubr.bf16.mxu1 %v2319_v20  ;;  %v1886_v49 = vadd.f32 %v1854_v39, %v1785_v2  ;;  %v1887_v42 = vadd.f32 %v1855_v50, %v1786_v58  ;;  %1397 = vst [vmem:[#allocation2 + $0x121] sm:$0xff] %v5243_v56  ;;  %v5261_v37 = vadd.f32 %v6633_v32, %v4344_v10  ;;  %v1006_v41 = vpop.f32.mrb[23].mxu1 }
 0x1fa   : > { %v1553_v1 = vmul.f32 %v6628_v5, %v5034_v30  ;;  %v1554_v29 = vmul.f32 %v6628_v5, %v5058_v60  ;;  %4455 = vmatprep.subr.bf16.mxu0 %v4534_v45  ;;  %1395 = vst [vmem:[#allocation2 + $0x109] sm:$0xff] %v5252_v31  ;;  %v5273_v51 = vadd.f32 %v6634_v12, %v1006_v41 }
 0x1fb   : > { %v1987_v40 = vadd.f32 %v1955_v63, %v1886_v49  ;;  %v1988_v57 = vadd.f32 %v1956_v4, %v1887_v42  ;;  %v1654_v27 = vmul.f32 %v4996_v59, %v5170_v35  ;;  %1398 = vst [vmem:[#allocation2 + $0x129] sm:$0xff] %v5261_v37  ;;  %v1655_v60 = vmul.f32 %v4996_v59, %v5172_v55 }
 0x1fc   : > { %v1585_v30 = vadd.f32 %v1553_v1, %v1452_v34  ;;  %v1586_v25 = vadd.f32 %v1554_v29, %v1453_v53  ;;  %v1755_v38 = vmul.f32 %v5016_v13, %v5227_v26  ;;  %4456 = vmatpush3.bf16.msra.mxu0 %v4534_v45  ;;  %v2159_v39 = vmul.f32 %v5011_v8, %v5118_v22  ;;  %v5292_v45 = vld [vmem:[#allocation2 + $0x98] sm:$0xff] }
 0x1fd   : > { %v2089_v46 = vadd.f32 %v2057_v16, %v1987_v40  ;;  %v2090_v23 = vadd.f32 %v2058_v61, %v1988_v57  ;;  %1396 = vst [vmem:[#allocation2 + $0x111] sm:$0xff] %v5273_v51  ;;  %v1756_v35 = vmul.f32 %v5016_v13, %v5229_v21  ;;  %4457 = vmatprep.subr.bf16.mxu0 %v4535_v17  ;;  %v2224_v40 = vld [vmem:[#allocation2 + $0x92] sm:$0xff] }
 0x1fe   : > { %v2259_v50 = vmul.f32 %v5050_v19, %v2222_v36  ;;  %v2260_v55 = vmul.f32 %v5050_v19, %v5270_v28  ;;  %v1686_v63 = vadd.f32 %v1654_v27, %v1585_v30  ;;  %v1687_v20 = vadd.f32 %v1655_v60, %v1586_v25  ;;  %v4347_v15 = vpop.f32.mrb[24].mxu1  ;;  %v6635_v57 = vld [vmem:[#allocation14_spill] sm:$0xff]  ;;  %v2225_v30 = vld [vmem:[#allocation2 + $0x9a] sm:$0xff] }
 0x1ff   : > { %v2190_v2 = vadd.f32 %v2158_v18, %v2089_v46  ;;  %v2191_v58 = vadd.f32 %v2159_v39, %v2090_v23  ;;  %v1856_v4 = vmul.f32 %v5006_v7, %v5106_v6  ;;  %v1857_v54 = vmul.f32 %v5006_v7, %v5118_v22  ;;  %v1019_v49 = vpop.f32.mrb[25].mxu1  ;;  %v6636_v25 = vld [vmem:[#allocation12_spill] sm:$0xff] }
 0x200   : > { %v1787_v16 = vadd.f32 %v1755_v38, %v1686_v63  ;;  %v1788_v61 = vadd.f32 %v1756_v35, %v1687_v20  ;;  %v1957_v11 = vmul.f32 %v5063_v62, %v2222_v36  ;;  %v1958_v10 = vmul.f32 %v5063_v62, %v5270_v28  ;;  %4458 = vmatpush3.bf16.msra.mxu0 %v4535_v17  ;;  %v4348_v41 = vpop.f32.mrb[26].mxu1  ;;  %v6637_v38 = vld [vmem:[#allocation13_spill] sm:$0xff] }
 0x201   : > { %v2291_v42 = vadd.f32 %v2259_v50, %v2190_v2  ;;  %v2292_v34 = vadd.f32 %v2260_v55, %v2191_v58  ;;  %v2059_v18 = vmul.f32 %v5022_v14, %v5290_v0  ;;  %v2060_v32 = vmul.f32 %v5022_v14, %v5292_v45  ;;  %v1022_v27 = vpop.f32.mrb[27].mxu1 }
 0x202   : > { %v1888_v53 = vadd.f32 %v1856_v4, %v1787_v16  ;;  %v1889_v1 = vadd.f32 %v1857_v54, %v1788_v61  ;;  %v2160_v29 = vmul.f32 %v5011_v8, %v5099_v9  ;;  %v5308_v12 = vadd.f32 %v4347_v15, %v6635_v57 }
 0x203   : > { %v2320_v17 = vpack.c.bf16 %v2292_v34, %v2291_v42  ;;  %v5311_v60 = vadd.f32 %v6636_v25, %v1019_v49  ;;  %v5314_v46 = vadd.f32 %v6637_v38, %v4348_v41  ;;  %v1454_v23 = vmul.f32 %v4982_v48, %v5227_v26  ;;  %v5344_v34 = vld [vmem:[#allocation2 + $0xb0] sm:$0xff] }
 0x204   : > { %v1989_v39 = vadd.f32 %v1957_v11, %v1888_v53  ;;  %v1990_v35 = vadd.f32 %v1958_v10, %v1889_v1  ;;  %1401 = vst [vmem:[#allocation2 + $0x151] sm:$0xff] %v5308_v12  ;;  %v1455_v50 = vmul.f32 %v4982_v48, %v5229_v21  ;;  %v1555_v55 = vmul.f32 %v6628_v5, %v5106_v6  ;;  %v5338_v11 = vld [vmem:[#allocation2 + $0xa8] sm:$0xff] }
 0x205   : > { %4424 = vmatmul.mubr.bf16.gmra.mrb[36].mxu1 %v2320_v17  ;;  %v2161_v63 = vmul.f32 %v5011_v8, %v5111_v24  ;;  %v2261_v20 = vmul.f32 %v5050_v19, %v2224_v40  ;;  %1399 = vst [vmem:[#allocation2 + $0x139] sm:$0xff] %v5311_v60  ;;  %1402 = vst [vmem:[#allocation2 + $0x159] sm:$0xff] %v5314_v46  ;;  %v1556_v26 = vmul.f32 %v6628_v5, %v5118_v22 }
 0x206   : > { %v1656_v2 = vmul.f32 %v4996_v59, %v2222_v36  ;;  %v2091_v58 = vadd.f32 %v2059_v18, %v1989_v39  ;;  %v2092_v21 = vadd.f32 %v2060_v32, %v1990_v35  ;;  %v2262_v4 = vmul.f32 %v5050_v19, %v2225_v30  ;;  %v5340_v22 = vpop.f32.mrb[28].mxu1 }
 0x207   : > { %v1587_v6 = vadd.f32 %v1555_v55, %v1454_v23  ;;  %v1588_v54 = vadd.f32 %v1556_v26, %v1455_v50  ;;  %v1657_v15 = vmul.f32 %v4996_v59, %v5270_v28  ;;  %v1757_v16 = vmul.f32 %v5016_v13, %v5290_v0  ;;  %v1035_v18 = vpop.f32.mrb[29].mxu1  ;;  %v6638_v50 = vld [vmem:[#allocation11_spill] sm:$0xff] }
 0x208   : > { %v1758_v61 = vmul.f32 %v5016_v13, %v5292_v45  ;;  %v2192_v36 = vadd.f32 %v2160_v29, %v2091_v58  ;;  %v2193_v10 = vadd.f32 %v2161_v63, %v2092_v21  ;;  %v1858_v42 = vmul.f32 %v5006_v7, %v5099_v9  ;;  %v4352_v1 = vpop.f32.mrb[30].mxu1  ;;  %v2226_v21 = vld [vmem:[#allocation2 + $0xaa] sm:$0xff] }
 0x209   : > { %v1688_v49 = vadd.f32 %v1656_v2, %v1587_v6  ;;  %v1689_v28 = vadd.f32 %v1657_v15, %v1588_v54  ;;  %v1859_v32 = vmul.f32 %v5006_v7, %v5111_v24  ;;  %v1959_v41 = vmul.f32 %v5063_v62, %v2224_v40  ;;  %v5352_v38 = vpop.f32.mrb[31].mxu1 }
 0x20a   : > { %v1960_v53 = vmul.f32 %v5063_v62, %v2225_v30  ;;  %v2293_v57 = vadd.f32 %v2261_v20, %v2192_v36  ;;  %v2294_v17 = vadd.f32 %v2262_v4, %v2193_v10  ;;  %v2061_v25 = vmul.f32 %v5022_v14, %v5338_v11  ;;  %v2227_v4 = vld [vmem:[#allocation2 + $0xb2] sm:$0xff] }
 0x20b   : > { %v1789_v29 = vadd.f32 %v1757_v16, %v1688_v49  ;;  %v1790_v23 = vadd.f32 %v1758_v61, %v1689_v28  ;;  %v2062_v39 = vmul.f32 %v5022_v14, %v5344_v34  ;;  %v2162_v35 = vmul.f32 %v5011_v8, %v5148_v44  ;;  %v5378_v49 = vld [vmem:[#allocation2 + $0xc0] sm:$0xff] }
 0x20c   : > { %v5359_v55 = vadd.f32 %v6638_v50, %v1022_v27  ;;  %v2321_v63 = vpack.c.bf16 %v2294_v17, %v2293_v57  ;;  %v1456_v20 = vmul.f32 %v4982_v48, %v5290_v0  ;;  %v1457_v2 = vmul.f32 %v4982_v48, %v5292_v45  ;;  %v5388_v17 = vld [vmem:[#allocation2 + $0xc1] sm:$0xff] }
 0x20d   : > { %v1890_v26 = vadd.f32 %v1858_v42, %v1789_v29  ;;  %v1891_v58 = vadd.f32 %v1859_v32, %v1790_v23  ;;  %v1557_v6 = vmul.f32 %v6628_v5, %v5099_v9  ;;  %v1558_v27 = vmul.f32 %v6628_v5, %v5111_v24 }
 0x20e   : > { %1400 = vst [vmem:[#allocation2 + $0x141] sm:$0xff] %v5359_v55  ;;  %v1658_v54 = vmul.f32 %v4996_v59, %v2224_v40  ;;  %4427 = vmatprep.mubr.bf16.mxu1 %v2321_v63  ;;  %v2163_v0 = vmul.f32 %v5011_v8, %v5163_v43  ;;  %v1659_v45 = vmul.f32 %v4996_v59, %v2225_v30  ;;  %v5384_v30 = vld [vmem:[#allocation2 + $0xc8] sm:$0xff] }
 0x20f   : > { %v1991_v15 = vadd.f32 %v1959_v41, %v1890_v26  ;;  %v1759_v16 = vmul.f32 %v5016_v13, %v5338_v11  ;;  %v1992_v61 = vadd.f32 %v1960_v53, %v1891_v58  ;;  %v1589_v36 = vadd.f32 %v1557_v6, %v1456_v20  ;;  %v1522_v20 = vld [vmem:[#allocation2 + $0xa9] sm:$0xff] }
 0x210   : > { %v1590_v10 = vadd.f32 %v1558_v27, %v1457_v2  ;;  %v1760_v9 = vmul.f32 %v5016_v13, %v5344_v34  ;;  %v2263_v40 = vmul.f32 %v5050_v19, %v2226_v21  ;;  %v2264_v42 = vmul.f32 %v5050_v19, %v2227_v4  ;;  %v1523_v2 = vld [vmem:[#allocation2 + $0xb1] sm:$0xff]  ;;  %v6640_v27 = vld [vmem:[#allocation16_spill] sm:$0xff] }
 0x211   : > { %v2093_v24 = vadd.f32 %v2061_v25, %v1991_v15  ;;  %v1860_v28 = vmul.f32 %v5006_v7, %v5148_v44  ;;  %v2094_v32 = vadd.f32 %v2062_v39, %v1992_v61  ;;  %v1690_v41 = vadd.f32 %v1658_v54, %v1589_v36  ;;  %v6641_v61 = vld [vmem:[#allocation17_spill] sm:$0xff] }
 0x212   : > { %v1691_v53 = vadd.f32 %v1659_v45, %v1590_v10  ;;  %v1861_v57 = vmul.f32 %v5006_v7, %v5163_v43  ;;  %v1961_v25 = vmul.f32 %v5063_v62, %v2226_v21  ;;  %v1962_v23 = vmul.f32 %v5063_v62, %v2227_v4  ;;  %v2228_v10 = vld [vmem:[#allocation2 + $0xc2] sm:$0xff] }
 0x213   : > { %v2194_v29 = vadd.f32 %v2162_v35, %v2093_v24  ;;  %v2063_v50 = vmul.f32 %v5022_v14, %v5378_v49  ;;  %v2195_v63 = vadd.f32 %v2163_v0, %v2094_v32  ;;  %v1791_v44 = vadd.f32 %v1759_v16, %v1690_v41  ;;  %v6639_v35 = vld [vmem:[#allocation18_spill] sm:$0xff] }
 0x214   : > { %v1792_v26 = vadd.f32 %v1760_v9, %v1691_v53  ;;  %v2064_v39 = vmul.f32 %v5022_v14, %v5384_v30  ;;  %v2164_v43 = vmul.f32 %v5011_v8, %v5388_v17  ;;  %v5400_v6 = vadd.f32 %v5340_v22, %v6639_v35  ;;  %v2128_v16 = vld [vmem:[#allocation2 + $0xc9] sm:$0xff] }
 0x215   : > { %v2295_v58 = vadd.f32 %v2263_v40, %v2194_v29  ;;  %v5403_v54 = vadd.f32 %v6640_v27, %v1035_v18  ;;  %v2296_v15 = vadd.f32 %v2264_v42, %v2195_v63  ;;  %v1892_v0 = vadd.f32 %v1860_v28, %v1791_v44  ;;  %v2229_v9 = vld [vmem:[#allocation2 + $0xca] sm:$0xff] }
 0x216   : > { %v1893_v45 = vadd.f32 %v1861_v57, %v1792_v26  ;;  %v5406_v36 = vadd.f32 %v6641_v61, %v4352_v1  ;;  %1405 = vst [vmem:[#allocation2 + $0x181] sm:$0xff] %v5400_v6  ;;  %v1458_v22 = vmul.f32 %v4982_v48, %v5338_v11  ;;  %v1459_v18 = vmul.f32 %v4982_v48, %v5344_v34 }
 0x217   : > { %1403 = vst [vmem:[#allocation2 + $0x169] sm:$0xff] %v5403_v54  ;;  %v1559_v24 = vmul.f32 %v6628_v5, %v1522_v20  ;;  %v1560_v40 = vmul.f32 %v6628_v5, %v1523_v2  ;;  %v2322_v42 = vpack.c.bf16 %v2296_v15, %v2295_v58  ;;  %v1993_v28 = vadd.f32 %v1961_v25, %v1892_v0  ;;  %v2028_v20 = vld [vmem:[#allocation2 + $0xd8] sm:$0xff]  ;;  %v2029_v2 = vld [vmem:[#allocation2 + $0xe0] sm:$0xff] }
 0x218   : > { %v1994_v1 = vadd.f32 %v1962_v23, %v1893_v45  ;;  %1406 = vst [vmem:[#allocation2 + $0x189] sm:$0xff] %v5406_v36  ;;  %v1660_v32 = vmul.f32 %v4996_v59, %v2226_v21  ;;  %v2165_v41 = vmul.f32 %v5011_v8, %v2128_v16  ;;  %v1661_v11 = vmul.f32 %v4996_v59, %v2227_v4 }
 0x219   : > { %v1591_v53 = vadd.f32 %v1559_v24, %v1458_v22  ;;  %v1592_v57 = vadd.f32 %v1560_v40, %v1459_v18  ;;  %4428 = vmatmul.mubr.bf16.gmra.mrb[40].mxu1 %v2322_v42  ;;  %v2095_v29 = vadd.f32 %v2063_v50, %v1993_v28  ;;  %v2265_v63 = vmul.f32 %v5050_v19, %v2228_v10  ;;  %v6642_v42 = vld [vmem:[#allocation15_spill] sm:$0xff] }
 0x21a   : > { %v2096_v34 = vadd.f32 %v2064_v39, %v1994_v1  ;;  %v2266_v44 = vmul.f32 %v5050_v19, %v2229_v9  ;;  %v1761_v23 = vmul.f32 %v5016_v13, %v5378_v49  ;;  %v1762_v21 = vmul.f32 %v5016_v13, %v5384_v30 }
 0x21b   : > { %v1692_v26 = vadd.f32 %v1660_v32, %v1591_v53  ;;  %v1693_v25 = vadd.f32 %v1661_v11, %v1592_v57  ;;  %v2196_v58 = vadd.f32 %v2164_v43, %v2095_v29  ;;  %v1862_v4 = vmul.f32 %v5006_v7, %v5388_v17  ;;  %v2230_v29 = vld [vmem:[#allocation2 + $0xda] sm:$0xff] }
 0x21c   : > { %v2197_v35 = vadd.f32 %v2165_v41, %v2096_v34  ;;  %v1863_v50 = vmul.f32 %v5006_v7, %v2128_v16  ;;  %v1963_v15 = vmul.f32 %v5063_v62, %v2228_v10  ;;  %v1964_v0 = vmul.f32 %v5063_v62, %v2229_v9  ;;  %v2231_v34 = vld [vmem:[#allocation2 + $0xe2] sm:$0xff] }
 0x21d   : > { %v1793_v39 = vadd.f32 %v1761_v23, %v1692_v26  ;;  %v1794_v27 = vadd.f32 %v1762_v21, %v1693_v25  ;;  %v2297_v45 = vadd.f32 %v2265_v63, %v2196_v58  ;;  %v2065_v22 = vmul.f32 %v5022_v14, %v2028_v20 }
 0x21e   : > { %v2298_v61 = vadd.f32 %v2266_v44, %v2197_v35  ;;  %v2066_v18 = vmul.f32 %v5022_v14, %v2029_v2  ;;  %v2166_v40 = vmul.f32 %v5011_v8, %v5197_v52  ;;  %v5437_v28 = vadd.f32 %v6642_v42, %v5352_v38 }
 0x21f   : > { %v1894_v24 = vadd.f32 %v1862_v4, %v1793_v39  ;;  %v1895_v43 = vadd.f32 %v1863_v50, %v1794_v27  ;;  %v1460_v32 = vmul.f32 %v4982_v48, %v5378_v49  ;;  %v1461_v41 = vmul.f32 %v4982_v48, %v5384_v30 }
 0x220   : > { %v2323_v1 = vpack.c.bf16 %v2298_v61, %v2297_v45  ;;  %v1561_v53 = vmul.f32 %v6628_v5, %v5388_v17  ;;  %1404 = vst [vmem:[#allocation2 + $0x171] sm:$0xff] %v5437_v28  ;;  %v1562_v63 = vmul.f32 %v6628_v5, %v2128_v16  ;;  %v1662_v38 = vmul.f32 %v4996_v59, %v2228_v10  ;;  %v2030_v10 = vld [vmem:[#allocation2 + $0xf0] sm:$0xff] }
 0x221   : > { %v1995_v57 = vadd.f32 %v1963_v15, %v1894_v24  ;;  %v1996_v11 = vadd.f32 %v1964_v0, %v1895_v43  ;;  %v2167_v49 = vmul.f32 %v5011_v8, %v5219_v33  ;;  %v1663_v30 = vmul.f32 %v4996_v59, %v2229_v9  ;;  %v2031_v9 = vld [vmem:[#allocation2 + $0xf8] sm:$0xff] }
 0x222   : > { %4431 = vmatprep.mubr.bf16.mxu1 %v2323_v1  ;;  %v1593_v44 = vadd.f32 %v1561_v53, %v1460_v32  ;;  %v1763_v26 = vmul.f32 %v5016_v13, %v2028_v20  ;;  %v1594_v23 = vadd.f32 %v1562_v63, %v1461_v41  ;;  %v1764_v21 = vmul.f32 %v5016_v13, %v2029_v2 }
 0x223   : > { %v2097_v17 = vadd.f32 %v2065_v22, %v1995_v57  ;;  %v2098_v25 = vadd.f32 %v2066_v18, %v1996_v11  ;;  %v2267_v58 = vmul.f32 %v5050_v19, %v2230_v29  ;;  %v2268_v16 = vmul.f32 %v5050_v19, %v2231_v34  ;;  %v2232_v57 = vld [vmem:[#allocation2 + $0xf2] sm:$0xff]  ;;  %v2233_v11 = vld [vmem:[#allocation2 + $0xfa] sm:$0xff] }
 0x224   : > { %v1694_v35 = vadd.f32 %v1662_v38, %v1593_v44  ;;  %v1695_v39 = vadd.f32 %v1663_v30, %v1594_v23  ;;  %v1864_v27 = vmul.f32 %v5006_v7, %v5197_v52  ;;  %v1865_v0 = vmul.f32 %v5006_v7, %v5219_v33 }
 0x225   : > { %v2198_v4 = vadd.f32 %v2166_v40, %v2097_v17  ;;  %v2199_v50 = vadd.f32 %v2167_v49, %v2098_v25  ;;  %v1965_v45 = vmul.f32 %v5063_v62, %v2230_v29  ;;  %v1966_v61 = vmul.f32 %v5063_v62, %v2231_v34 }
 0x226   : > { %v1795_v15 = vadd.f32 %v1763_v26, %v1694_v35  ;;  %v1796_v24 = vadd.f32 %v1764_v21, %v1695_v39  ;;  %v2067_v43 = vmul.f32 %v5022_v14, %v2030_v10  ;;  %v2068_v42 = vmul.f32 %v5022_v14, %v2031_v9 }
 0x227   : > { %v2299_v22 = vadd.f32 %v2267_v58, %v2198_v4  ;;  %v2300_v18 = vadd.f32 %v2268_v16, %v2199_v50  ;;  %v1462_v1 = vmul.f32 %v4982_v48, %v2028_v20  ;;  %v1463_v32 = vmul.f32 %v4982_v48, %v2029_v2  ;;  %v2032_v4 = vld [vmem:[#allocation2 + $0x108] sm:$0xff] }
 0x228   : > { %v1896_v40 = vadd.f32 %v1864_v27, %v1795_v15  ;;  %v1897_v53 = vadd.f32 %v1865_v0, %v1796_v24  ;;  %v1563_v63 = vmul.f32 %v6628_v5, %v5197_v52  ;;  %v1564_v38 = vmul.f32 %v6628_v5, %v5219_v33 }
 0x229   : > { %v2324_v41 = vpack.c.bf16 %v2300_v18, %v2299_v22  ;;  %v2168_v44 = vmul.f32 %v5011_v8, %v5192_v3  ;;  %v2169_v30 = vmul.f32 %v5011_v8, %v5208_v47  ;;  %v1664_v20 = vmul.f32 %v4996_v59, %v2230_v29  ;;  %v5479_v29 = vld [vmem:[#allocation2 + $0x110] sm:$0xff]  ;;  %v1529_v18 = vld [vmem:[#allocation2 + $0xf9] sm:$0xff] }
 0x22a   : > { %v1997_v49 = vadd.f32 %v1965_v45, %v1896_v40  ;;  %v1998_v2 = vadd.f32 %v1966_v61, %v1897_v53  ;;  %v1595_v26 = vadd.f32 %v1563_v63, %v1462_v1  ;;  %v1596_v17 = vadd.f32 %v1564_v38, %v1463_v32  ;;  %v1528_v22 = vld [vmem:[#allocation2 + $0xf1] sm:$0xff] }
 0x22b   : > { %4432 = vmatmul.mubr.bf16.gmra.mrb[44].mxu1 %v2324_v41  ;;  %v1665_v25 = vmul.f32 %v4996_v59, %v2231_v34  ;;  %v2269_v52 = vmul.f32 %v5050_v19, %v2232_v57  ;;  %v2270_v5 = vmul.f32 %v5050_v19, %v2233_v11  ;;  %v1765_v33 = vmul.f32 %v5016_v13, %v2030_v10  ;;  %v2234_v53 = vld [vmem:[#allocation2 + $0x10a] sm:$0xff] }
 0x22c   : > { %v2099_v23 = vadd.f32 %v2067_v43, %v1997_v49  ;;  %v2100_v21 = vadd.f32 %v2068_v42, %v1998_v2  ;;  %v1696_v58 = vadd.f32 %v1664_v20, %v1595_v26  ;;  %v1766_v35 = vmul.f32 %v5016_v13, %v2031_v9 }
 0x22d   : > { %v1697_v16 = vadd.f32 %v1665_v25, %v1596_v17  ;;  %v1866_v39 = vmul.f32 %v5006_v7, %v5192_v3  ;;  %v1867_v34 = vmul.f32 %v5006_v7, %v5208_v47  ;;  %v1967_v27 = vmul.f32 %v5063_v62, %v2232_v57  ;;  %v5494_v47 = vld [vmem:[%s6603_s8] ss:$0 sm:$0xff] }
 0x22e   : > { %v2200_v50 = vadd.f32 %v2168_v44, %v2099_v23  ;;  %v2201_v15 = vadd.f32 %v2169_v30, %v2100_v21  ;;  %v1797_v0 = vadd.f32 %v1765_v33, %v1696_v58  ;;  %v1968_v61 = vmul.f32 %v5063_v62, %v2233_v11  ;;  %v2235_v30 = vld [vmem:[#allocation2 + $0x112] sm:$0xff]  ;;  %v5525_v58 = vld [vmem:[%s6603_s8 + $0x4] ss:$0 sm:$0xff] }
 0x22f   : > { %v1798_v45 = vadd.f32 %v1766_v35, %v1697_v16  ;;  %v2069_v43 = vmul.f32 %v5022_v14, %v2032_v4  ;;  %v2070_v40 = vmul.f32 %v5022_v14, %v5479_v29  ;;  %v1464_v3 = vmul.f32 %v4982_v48, %v2030_v10  ;;  %v5502_v14 = vld [vmem:[%s6603_s8 + $0x1] ss:$0 sm:$0xff]  ;;  %v2035_v16 = vld [vmem:[#allocation2 + $0x128] sm:$0xff] }
 0x230   : > { %v2301_v24 = vadd.f32 %v2269_v52, %v2200_v50  ;;  %v2302_v42 = vadd.f32 %v2270_v5, %v2201_v15  ;;  %v1898_v1 = vadd.f32 %v1866_v39, %v1797_v0  ;;  %v1465_v32 = vmul.f32 %v5494_v47, %v2031_v9  ;;  %v5510_v9 = vld [vmem:[%s6603_s8 + $0x2] ss:$0 sm:$0xff]  ;;  %v5536_v15 = vld [vmem:[%s6603_s8 + $0x6] ss:$0 sm:$0xff] }
 0x231   : > { %v1899_v7 = vadd.f32 %v1867_v34, %v1798_v45  ;;  %v2170_v41 = vmul.f32 %v5011_v8, %v5252_v31  ;;  %v1565_v48 = vmul.f32 %v5502_v14, %v1528_v22  ;;  %v1566_v10 = vmul.f32 %v5502_v14, %v1529_v18  ;;  %v5519_v5 = vld [vmem:[#allocation2 + $0x120] sm:$0xff] }
 0x232   : > { %v1666_v63 = vmul.f32 %v4996_v59, %v2232_v57  ;;  %v2325_v38 = vpack.c.bf16 %v2302_v42, %v2301_v24  ;;  %v1999_v49 = vadd.f32 %v1967_v27, %v1898_v1  ;;  %v1667_v20 = vmul.f32 %v5510_v9, %v2233_v11 }
 0x233   : > { %v2000_v44 = vadd.f32 %v1968_v61, %v1899_v7  ;;  %v1597_v2 = vadd.f32 %v1565_v48, %v1464_v3  ;;  %v1598_v26 = vadd.f32 %v1566_v10, %v1465_v32  ;;  %v1767_v17 = vmul.f32 %v5016_v13, %v2032_v4  ;;  %v2237_v3 = vld [vmem:[#allocation2 + $0x12a] sm:$0xff]  ;;  %v5549_v7 = vld [vmem:[%s6603_s8 + $0x7] ss:$0 sm:$0xff] }
 0x234   : > { %v1768_v25 = vmul.f32 %v5016_v13, %v5479_v29  ;;  %4435 = vmatprep.mubr.bf16.mxu1 %v2325_v38  ;;  %v2101_v59 = vadd.f32 %v2069_v43, %v1999_v49  ;;  %v2171_v23 = vmul.f32 %v5011_v8, %v5273_v51  ;;  %v2271_v52 = vmul.f32 %v5050_v19, %v2234_v53 }
 0x235   : > { %v2102_v57 = vadd.f32 %v2070_v40, %v2000_v44  ;;  %v2272_v33 = vmul.f32 %v5050_v19, %v2235_v30  ;;  %v1698_v11 = vadd.f32 %v1666_v63, %v1597_v2  ;;  %v1699_v21 = vadd.f32 %v1667_v20, %v1598_v26  ;;  %v2236_v40 = vld [vmem:[#allocation2 + $0x122] sm:$0xff] }
 0x236   : > { %v1868_v13 = vmul.f32 %v5525_v58, %v5252_v31  ;;  %v2202_v35 = vadd.f32 %v2170_v41, %v2101_v59  ;;  %v1869_v8 = vmul.f32 %v5525_v58, %v5273_v51  ;;  %v1969_v39 = vmul.f32 %v5063_v62, %v2234_v53  ;;  %v5561_v63 = vld [vmem:[%s6603_s8 + $0x8] ss:$0 sm:$0xff]  ;;  %v5569_v26 = vld [vmem:[%s6603_s8 + $0x3] ss:$0 sm:$0xff] }
 0x237   : > { %v2203_v50 = vadd.f32 %v2171_v23, %v2102_v57  ;;  %v1799_v34 = vadd.f32 %v1767_v17, %v1698_v11  ;;  %v1800_v19 = vadd.f32 %v1768_v25, %v1699_v21  ;;  %v1970_v27 = vmul.f32 %v5063_v62, %v2235_v30  ;;  %v2036_v25 = vld [vmem:[#allocation2 + $0x138] sm:$0xff]  ;;  %v2037_v59 = vld [vmem:[#allocation2 + $0x140] sm:$0xff] }
 0x238   : > { %v2071_v0 = vmul.f32 %v5536_v15, %v5519_v5  ;;  %v2303_v45 = vadd.f32 %v2271_v52, %v2202_v35  ;;  %v2072_v22 = vmul.f32 %v5536_v15, %v2035_v16  ;;  %v1466_v18 = vmul.f32 %v5494_v47, %v2032_v4 }
 0x239   : > { %v2304_v61 = vadd.f32 %v2272_v33, %v2203_v50  ;;  %v1900_v24 = vadd.f32 %v1868_v13, %v1799_v34  ;;  %v1901_v43 = vadd.f32 %v1869_v8, %v1800_v19  ;;  %v1467_v62 = vmul.f32 %v5494_v47, %v5479_v29  ;;  %v5581_v13 = vld [vmem:[%s6603_s8 + $0x5] ss:$0 sm:$0xff]  ;;  %v1533_v8 = vld [vmem:[#allocation2 + $0x129] sm:$0xff] }
 0x23a   : > { %v1567_v42 = vmul.f32 %v5502_v14, %v5252_v31  ;;  %v2172_v32 = vmul.f32 %v5549_v7, %v5243_v56  ;;  %v1568_v4 = vmul.f32 %v5502_v14, %v5273_v51  ;;  %v1668_v41 = vmul.f32 %v5510_v9, %v2234_v53  ;;  %v1532_v50 = vld [vmem:[#allocation2 + $0x121] sm:$0xff] }
 0x23b   : > { %v2326_v1 = vpack.c.bf16 %v2304_v61, %v2303_v45  ;;  %v2001_v48 = vadd.f32 %v1969_v39, %v1900_v24  ;;  %v2002_v10 = vadd.f32 %v1970_v27, %v1901_v43  ;;  %v2173_v29 = vmul.f32 %v5549_v7, %v5261_v37 }
 0x23c   : > { %v1599_v31 = vadd.f32 %v1567_v42, %v1466_v18  ;;  %v2273_v38 = vmul.f32 %v5561_v63, %v2236_v40  ;;  %v2274_v49 = vmul.f32 %v5561_v63, %v2237_v3  ;;  %v1600_v44 = vadd.f32 %v1568_v4, %v1467_v62  ;;  %v2238_v4 = vld [vmem:[#allocation2 + $0x13a] sm:$0xff] }
 0x23d   : > { %4436 = vmatmul.mubr.bf16.gmra.mrb[48].mxu1 %v2326_v1  ;;  %v1669_v51 = vmul.f32 %v5510_v9, %v2235_v30  ;;  %v2103_v53 = vadd.f32 %v2071_v0, %v2001_v48  ;;  %v2104_v20 = vadd.f32 %v2072_v22, %v2002_v10  ;;  %v1769_v17 = vmul.f32 %v5569_v26, %v5519_v5 }
 0x23e   : > { %v1700_v2 = vadd.f32 %v1668_v41, %v1599_v31  ;;  %v1770_v23 = vmul.f32 %v5569_v26, %v2035_v16  ;;  %v1870_v52 = vmul.f32 %v5525_v58, %v5243_v56  ;;  %v1871_v30 = vmul.f32 %v5525_v58, %v5261_v37  ;;  %v2239_v41 = vld [vmem:[#allocation2 + $0x142] sm:$0xff] }
 0x23f   : > { %v1701_v57 = vadd.f32 %v1669_v51, %v1600_v44  ;;  %v2204_v33 = vadd.f32 %v2172_v32, %v2103_v53  ;;  %v2205_v11 = vadd.f32 %v2173_v29, %v2104_v20  ;;  %v1971_v35 = vmul.f32 %v5581_v13, %v2236_v40  ;;  %v2038_v44 = vld [vmem:[#allocation2 + $0x150] sm:$0xff] }
 0x240   : > { %v1801_v21 = vadd.f32 %v1769_v17, %v1700_v2  ;;  %v1972_v34 = vmul.f32 %v5581_v13, %v2237_v3  ;;  %v2073_v56 = vmul.f32 %v5536_v15, %v2036_v25  ;;  %v2074_v19 = vmul.f32 %v5536_v15, %v2037_v59 }
 0x241   : > { %v1802_v39 = vadd.f32 %v1770_v23, %v1701_v57  ;;  %v2305_v37 = vadd.f32 %v2273_v38, %v2204_v33  ;;  %v2306_v27 = vadd.f32 %v2274_v49, %v2205_v11  ;;  %v1468_v45 = vmul.f32 %v5494_v47, %v5519_v5 }
 0x242   : > { %v1902_v0 = vadd.f32 %v1870_v52, %v1801_v21  ;;  %v1469_v22 = vmul.f32 %v5494_v47, %v2035_v16  ;;  %v1569_v18 = vmul.f32 %v5502_v14, %v1532_v50  ;;  %v1570_v24 = vmul.f32 %v5502_v14, %v1533_v8  ;;  %v2039_v21 = vld [vmem:[#allocation2 + $0x158] sm:$0xff] }
 0x243   : > { %v1903_v61 = vadd.f32 %v1871_v30, %v1802_v39  ;;  %v2327_v43 = vpack.c.bf16 %v2306_v27, %v2305_v37  ;;  %v1670_v42 = vmul.f32 %v5510_v9, %v2236_v40  ;;  %v1671_v1 = vmul.f32 %v5510_v9, %v2237_v3 }
 0x244   : > { %v2003_v62 = vadd.f32 %v1971_v35, %v1902_v0  ;;  %v1601_v48 = vadd.f32 %v1569_v18, %v1468_v45  ;;  %v1602_v10 = vadd.f32 %v1570_v24, %v1469_v22  ;;  %v1771_v5 = vmul.f32 %v5569_v26, %v2036_v25 }
 0x245   : > { %v2004_v32 = vadd.f32 %v1972_v34, %v1903_v61  ;;  %4439 = vmatprep.mubr.bf16.mxu1 %v2327_v43  ;;  %v2174_v16 = vmul.f32 %v5549_v7, %v5311_v60  ;;  %v1772_v31 = vmul.f32 %v5569_v26, %v2037_v59  ;;  %v2175_v40 = vmul.f32 %v5549_v7, %v5359_v55 }
 0x246   : > { %v2105_v29 = vadd.f32 %v2073_v56, %v2003_v62  ;;  %v1702_v49 = vadd.f32 %v1670_v42, %v1601_v48  ;;  %v1703_v3 = vadd.f32 %v1671_v1, %v1602_v10  ;;  %v2275_v53 = vmul.f32 %v5561_v63, %v2238_v4  ;;  %v2240_v56 = vld [vmem:[#allocation2 + $0x152] sm:$0xff] }
 0x247   : > { %v2106_v38 = vadd.f32 %v2074_v19, %v2004_v32  ;;  %v2276_v20 = vmul.f32 %v5561_v63, %v2239_v41  ;;  %v1872_v2 = vmul.f32 %v5525_v58, %v5311_v60  ;;  %v1873_v52 = vmul.f32 %v5525_v58, %v5359_v55 }
 0x248   : > { %v2206_v51 = vadd.f32 %v2174_v16, %v2105_v29  ;;  %v1803_v57 = vadd.f32 %v1771_v5, %v1702_v49  ;;  %v1804_v23 = vadd.f32 %v1772_v31, %v1703_v3  ;;  %v1973_v33 = vmul.f32 %v5581_v13, %v2238_v4  ;;  %v2040_v5 = vld [vmem:[#allocation2 + $0x168] sm:$0xff]  ;;  %v4536_v29 = vld [vmem:[%s6604_s9 + $0x20] sm:$0xff]  }
 0x249   : > { %v2207_v17 = vadd.f32 %v2175_v40, %v2106_v38  ;;  %v1974_v11 = vmul.f32 %v5581_v13, %v2239_v41  ;;  %v2075_v35 = vmul.f32 %v5536_v15, %v2038_v44  ;;  %v1470_v34 = vmul.f32 %v5494_v47, %v2036_v25  ;;  %v2241_v25 = vld [vmem:[#allocation2 + $0x15a] sm:$0xff]  ;;  %4459 = vmatprep.subr.bf16.mxu0 %v4536_v29 }
 0x24a   : > { %v2307_v30 = vadd.f32 %v2275_v53, %v2206_v51  ;;  %v1904_v8 = vadd.f32 %v1872_v2, %v1803_v57  ;;  %v1905_v39 = vadd.f32 %v1873_v52, %v1804_v23  ;;  %v1471_v19 = vmul.f32 %v5494_v47, %v2037_v59  ;;  %v1536_v53 = vld [vmem:[#allocation2 + $0x151] sm:$0xff]  ;;  %4460 = vmatpush3.bf16.msra.mxu0 %v4536_v29 }
 0x24b   : > { %v2308_v50 = vadd.f32 %v2276_v20, %v2207_v17  ;;  %v1571_v37 = vmul.f32 %v5502_v14, %v5311_v60  ;;  %v1572_v27 = vmul.f32 %v5502_v14, %v5359_v55  ;;  %v1672_v0 = vmul.f32 %v5510_v9, %v2238_v4  ;;  %v2041_v57 = vld [vmem:[#allocation2 + $0x170] sm:$0xff] }
 0x24c   : > { %v2005_v61 = vadd.f32 %v1973_v33, %v1904_v8  ;;  %v2006_v22 = vadd.f32 %v1974_v11, %v1905_v39  ;;  %v2076_v18 = vmul.f32 %v5536_v15, %v2039_v21  ;;  %v2176_v24 = vmul.f32 %v5549_v7, %v5308_v12 }
 0x24d   : > { %v2328_v45 = vpack.c.bf16 %v2308_v50, %v2307_v30  ;;  %v1603_v43 = vadd.f32 %v1571_v37, %v1470_v34  ;;  %v1604_v62 = vadd.f32 %v1572_v27, %v1471_v19  ;;  %v1673_v59 = vmul.f32 %v5510_v9, %v2239_v41  ;;  %v2242_v37 = vld [vmem:[#allocation2 + $0x16a] sm:$0xff] }
 0x24e   : > { %v2107_v60 = vadd.f32 %v2075_v35, %v2005_v61  ;;  %v2108_v42 = vadd.f32 %v2076_v18, %v2006_v22  ;;  %v2177_v55 = vmul.f32 %v5549_v7, %v5314_v46  ;;  %v2277_v1 = vmul.f32 %v5561_v63, %v2240_v56 }
 0x24f   : > { %4440 = vmatmul.mubr.bf16.gmra.mrb[52].mxu1 %v2328_v45  ;;  %v1704_v32 = vadd.f32 %v1672_v0, %v1603_v43  ;;  %v1705_v4 = vadd.f32 %v1673_v59, %v1604_v62  ;;  %v1773_v48 = vmul.f32 %v5569_v26, %v2038_v44  ;;  %v1774_v10 = vmul.f32 %v5569_v26, %v2039_v21  ;;  %v2243_v0 = vld [vmem:[#allocation2 + $0x172] sm:$0xff] }
 0x250   : > { %v2208_v41 = vadd.f32 %v2176_v24, %v2107_v60  ;;  %v2209_v16 = vadd.f32 %v2177_v55, %v2108_v42  ;;  %v2278_v31 = vmul.f32 %v5561_v63, %v2241_v25  ;;  %v1874_v38 = vmul.f32 %v5525_v58, %v5308_v12 }
 0x251   : > { %v1805_v40 = vadd.f32 %v1773_v48, %v1704_v32  ;;  %v1806_v49 = vadd.f32 %v1774_v10, %v1705_v4  ;;  %v1875_v3 = vmul.f32 %v5525_v58, %v5314_v46  ;;  %v1975_v51 = vmul.f32 %v5581_v13, %v2240_v56  ;;  %v2042_v48 = vld [vmem:[#allocation2 + $0x180] sm:$0xff] }
 0x252   : > { %v2309_v20 = vadd.f32 %v2277_v1, %v2208_v41  ;;  %v2310_v2 = vadd.f32 %v2278_v31, %v2209_v16  ;;  %v1976_v17 = vmul.f32 %v5581_v13, %v2241_v25  ;;  %v2077_v23 = vmul.f32 %v5536_v15, %v2040_v5  ;;  %v2043_v16 = vld [vmem:[#allocation2 + $0x188] sm:$0xff] }
 0x253   : > { %v1906_v52 = vadd.f32 %v1874_v38, %v1805_v40  ;;  %v1907_v30 = vadd.f32 %v1875_v3, %v1806_v49  ;;  %v1472_v12 = vmul.f32 %v5494_v47, %v2038_v44  ;;  %v1473_v33 = vmul.f32 %v5494_v47, %v2039_v21 }
 0x254   : > { %v2329_v11 = vpack.c.bf16 %v2310_v2, %v2309_v20  ;;  %v1573_v35 = vmul.f32 %v5502_v14, %v1536_v53  ;;  %v1574_v50 = vmul.f32 %v5502_v14, %v5314_v46  ;;  %v1674_v8 = vmul.f32 %v5510_v9, %v2240_v56 }
 0x255   : > { %v2007_v39 = vadd.f32 %v1975_v51, %v1906_v52  ;;  %v2008_v34 = vadd.f32 %v1976_v17, %v1907_v30  ;;  %v2078_v19 = vmul.f32 %v5536_v15, %v2041_v57  ;;  %v1675_v27 = vmul.f32 %v5510_v9, %v2241_v25  ;;  %v2245_v30 = vld [vmem:[#allocation2 + $0x18a] sm:$0xff] }
 0x256   : > { %4443 = vmatprep.mubr.bf16.mxu1 %v2329_v11  ;;  %v1605_v44 = vadd.f32 %v1573_v35, %v1472_v12  ;;  %v1606_v45 = vadd.f32 %v1574_v50, %v1473_v33  ;;  %v1775_v21 = vmul.f32 %v5569_v26, %v2040_v5  ;;  %v1776_v61 = vmul.f32 %v5569_v26, %v2041_v57 }
 0x257   : > { %v2109_v22 = vadd.f32 %v2077_v23, %v2007_v39  ;;  %v2110_v18 = vadd.f32 %v2078_v19, %v2008_v34  ;;  %v2178_v46 = vmul.f32 %v5549_v7, %v5403_v54  ;;  %v2179_v56 = vmul.f32 %v5549_v7, %v5437_v28  ;;  %v2044_v19 = vld [vmem:[#allocation2 + $0x198] sm:$0xff] }
 0x258   : > { %v2279_v24 = vmul.f32 %v5561_v63, %v2242_v37  ;;  %v1706_v43 = vadd.f32 %v1674_v8, %v1605_v44  ;;  %v1707_v25 = vadd.f32 %v1675_v27, %v1606_v45  ;;  %v2280_v60 = vmul.f32 %v5561_v63, %v2243_v0 }
 0x259   : > { %v2210_v62 = vadd.f32 %v2178_v46, %v2109_v22  ;;  %v2211_v59 = vadd.f32 %v2179_v56, %v2110_v18  ;;  %v1876_v42 = vmul.f32 %v5525_v58, %v5403_v54  ;;  %v1877_v32 = vmul.f32 %v5525_v58, %v5437_v28  ;;  %v2145_v22 = vld [vmem:[#allocation2 + $0x199] sm:$0xff] }
 0x25a   : > { %v1807_v55 = vadd.f32 %v1775_v21, %v1706_v43  ;;  %v1808_v1 = vadd.f32 %v1776_v61, %v1707_v25  ;;  %v1977_v4 = vmul.f32 %v5581_v13, %v2242_v37  ;;  %v1978_v41 = vmul.f32 %v5581_v13, %v2243_v0  ;;  %v4549_v25 = vld [vmem:[#allocation2 + $0x8] sm:$0xff] }
 0x25b   : > { %v2311_v10 = vadd.f32 %v2279_v24, %v2210_v62  ;;  %v2312_v29 = vadd.f32 %v2280_v60, %v2211_v59  ;;  %v1474_v31 = vmul.f32 %v5494_v47, %v2040_v5  ;;  %v1475_v49 = vmul.f32 %v5494_v47, %v2041_v57  ;;  %v2244_v5 = vld [vmem:[#allocation2 + $0x182] sm:$0xff] }
 0x25c   : > { %v1908_v38 = vadd.f32 %v1876_v42, %v1807_v55  ;;  %v1909_v40 = vadd.f32 %v1877_v32, %v1808_v1  ;;  %v1575_v3 = vmul.f32 %v5502_v14, %v5403_v54  ;;  %v2079_v53 = vmul.f32 %v5536_v15, %v2042_v48  ;;  %v2146_v24 = vld [vmem:[#allocation2 + $0x1a1] sm:$0xff] }
 0x25d   : > { %v2330_v51 = vpack.c.bf16 %v2312_v29, %v2311_v10  ;;  %v1576_v20 = vmul.f32 %v5502_v14, %v5437_v28  ;;  %v1676_v2 = vmul.f32 %v5510_v9, %v2242_v37  ;;  %v2080_v52 = vmul.f32 %v5536_v15, %v2043_v16  ;;  %v2247_v42 = vld [vmem:[#allocation2 + $0x1a2] sm:$0xff] }
 0x25e   : > { %v2009_v17 = vadd.f32 %v1977_v4, %v1908_v38  ;;  %v2010_v23 = vadd.f32 %v1978_v41, %v1909_v40  ;;  %v1607_v12 = vadd.f32 %v1575_v3, %v1474_v31  ;;  %v2180_v47 = vmul.f32 %v5549_v7, %v5400_v6  ;;  %v4538_v31 = vld [vmem:[%s6604_s9 + $0x30] sm:$0xff]   ;;  %v5705_v40 = vld [vmem:[%s6602_s7] ss:$0 sm:$0xff] }
 0x25f   : > { %4444 = vmatmul.mubr.bf16.gmra.mrb[56].mxu1 %v2330_v51  ;;  %v2181_v54 = vmul.f32 %v5549_v7, %v5406_v36  ;;  %v1608_v57 = vadd.f32 %v1576_v20, %v1475_v49  ;;  %v1677_v33 = vmul.f32 %v5510_v9, %v2243_v0  ;;  %v1777_v35 = vmul.f32 %v5569_v26, %v2042_v48  ;;  %v4537_v9 = vld [vmem:[%s6604_s9 + $0x28] sm:$0xff]   ;;  %v2701_v51 = vld [vmem:[#allocation3] sm:$0xff] }
 0x260   : > { %v2111_v28 = vadd.f32 %v2079_v53, %v2009_v17  ;;  %v2112_v14 = vadd.f32 %v2080_v52, %v2010_v23  ;;  %v1708_v11 = vadd.f32 %v1676_v2, %v1607_v12  ;;  %v2281_v50 = vmul.f32 %v5561_v63, %v2244_v5  ;;  %4461 = vmatprep.subr.bf16.mxu0 %v4537_v9  ;;  %v5711_v53 = vld [vmem:[%s6607_s12] ss:$0 sm:$0xff]  ;;  %v2802_v17 = vld [vmem:[#allocation3 + $0x1] sm:$0xff] }
 0x261   : > { %v2282_v8 = vmul.f32 %v5561_v63, %v2245_v30  ;;  %v1709_v39 = vadd.f32 %v1677_v33, %v1608_v57  ;;  %v1778_v34 = vmul.f32 %v5569_v26, %v2043_v16  ;;  %v1878_v45 = vmul.f32 %v5525_v58, %v5400_v6  ;;  %4462 = vmatpush3.bf16.msra.mxu0 %v4537_v9  ;;  %v2803_v23 = vld [vmem:[#allocation3 + $0x9] sm:$0xff]  ;;  %v5723_v33 = vld [vmem:[%s6607_s12 + $0x1] ss:$0 sm:$0xff] }
 0x262   : > { %v2212_v37 = vadd.f32 %v2180_v47, %v2111_v28  ;;  %v2213_v27 = vadd.f32 %v2181_v54, %v2112_v14  ;;  %v1809_v44 = vadd.f32 %v1777_v35, %v1708_v11  ;;  %v1879_v21 = vmul.f32 %v5525_v58, %v5406_v36  ;;  %v2246_v58 = vld [vmem:[#allocation2 + $0x19a] sm:$0xff]  ;;  %4463 = vmatprep.subr.bf16.mxu0 %v4538_v31 }
 0x263   : > { %v1810_v0 = vadd.f32 %v1778_v34, %v1709_v39  ;;  %v1979_v61 = vmul.f32 %v5581_v13, %v2244_v5  ;;  %v2081_v56 = vmul.f32 %v5536_v15, %v2044_v19  ;;  %v1980_v6 = vmul.f32 %v5581_v13, %v2245_v30  ;;  %v2903_v39 = vld [vmem:[#allocation3 + $0x2] sm:$0xff]  ;;  %v2904_v34 = vld [vmem:[#allocation3 + $0xa] sm:$0xff]  ;;  %v5732_v19 = vld [vmem:[%s6607_s12 + $0x2] ss:$0 sm:$0xff] }
 0x264   : > { %v2313_v18 = vadd.f32 %v2281_v50, %v2212_v37  ;;  %v2314_v26 = vadd.f32 %v2282_v8, %v2213_v27  ;;  %v1910_v46 = vadd.f32 %v1878_v45, %v1809_v44  ;;  %v2082_v62 = vmul.f32 %v4549_v25, %v5536_v15 }
 0x265   : > { %v1911_v43 = vadd.f32 %v1879_v21, %v1810_v0  ;;  %v2182_v36 = vmul.f32 %v5549_v7, %v2145_v22  ;;  %v2183_v1 = vmul.f32 %v5549_v7, %v2146_v24  ;;  %v2283_v48 = vmul.f32 %v5561_v63, %v2246_v58  ;;  %4464 = vmatpush3.bf16.msra.mxu0 %v4538_v31  ;;  %v4539_v7 = vld [vmem:[%s6604_s9 + $0x38] sm:$0xff]   ;;  %v5739_v21 = vld [vmem:[%s6607_s12 + $0x4] ss:$0 sm:$0xff]  ;;  %v5755_v24 = vld [vmem:[%s6607_s12 + $0x6] ss:$0 sm:$0xff] }
 0x266   : > { %v2331_v59 = vpack.c.bf16 %v2314_v26, %v2313_v18  ;;  %v2011_v60 = vadd.f32 %v1979_v61, %v1910_v46  ;;  %v2284_v13 = vmul.f32 %v5561_v63, %v2247_v42  ;;  %4465 = vmatprep.subr.bf16.mxu0 %v4539_v7  ;;  %v5700_v63 = vld [vmem:[%s6601_s6] ss:$0 sm:$0xff]  ;;  %v2738_v54 = vmul.f32 %v5711_v53, %v2701_v51  ;;  %v5744_v61 = vld [vmem:[%s6607_s12 + $0x7] ss:$0 sm:$0xff]  ;;  %v5749_v26 = vld [vmem:[%s6607_s12 + $0x3] ss:$0 sm:$0xff] }
 0x267   : > { %v2012_v55 = vadd.f32 %v1980_v6, %v1911_v43  ;;  %v2739_v57 = vmul.f32 %v4549_v25, %v5711_v53  ;;  %v2839_v11 = vmul.f32 %v5723_v33, %v2802_v17  ;;  %v2840_v35 = vmul.f32 %v5723_v33, %v2803_v23 }
 0x268   : > { %4447 = vmatprep.mubr.bf16.mxu1 %v2331_v59  ;;  %v2113_v32 = vadd.f32 %v2081_v56, %v2011_v60  ;;  %v2940_v9 = vmul.f32 %v5732_v19, %v2903_v39  ;;  %v2941_v0 = vmul.f32 %v5732_v19, %v2904_v34  ;;  %v5770_v60 = vld [vmem:[%s6607_s12 + $0x8] ss:$0 sm:$0xff] }
 0x269   : > { %v2114_v4 = vadd.f32 %v2082_v62, %v2012_v55  ;;  %4466 = vmatpush3.bf16.msra.mxu0 %v4539_v7  ;;  %v2871_v44 = vadd.f32 %v2839_v11, %v2738_v54  ;;  %v2872_v45 = vadd.f32 %v2840_v35, %v2739_v57 }
 0x26a   : > { %v2214_v10 = vadd.f32 %v2182_v36, %v2113_v32  ;;  %v5782_v32 = vld [vmem:[%s6607_s12 + $0x5] ss:$0 sm:$0xff] }
 0x26b   : > { %v2215_v29 = vadd.f32 %v2183_v1, %v2114_v4  ;;  %v2972_v22 = vadd.f32 %v2940_v9, %v2871_v44  ;;  %v2973_v18 = vadd.f32 %v2941_v0, %v2872_v45 }
 0x26c   : > { %v2315_v15 = vadd.f32 %v2283_v48, %v2214_v10 }
 0x26d   : > { %v2316_v41 = vadd.f32 %v2284_v13, %v2215_v29 }
 0x26f   : > { %v2332_v16 = vpack.c.bf16 %v2316_v41, %v2315_v15 }
 0x271   : > { %4448 = vmatmul.mubr.bf16.gmra.mrb[60].mxu1 %v2332_v16 }
 0x2c4   : > { %v4421_v38 = vpop.f32.mrb[32].mxu1 }
 0x2c5   : > { %v2567_v49 = vmul.f32 %v4421_v38, %v5700_v63  ;;  %v2431_v3 = vpop.f32.mrb[33].mxu1 }
 0x2c6   : > { %v2565_v20 = vmul.f32 %v5700_v63, %v2431_v3  ;;  %v4422_v2 = vpop.f32.mrb[34].mxu1 }
 0x2c7   : > { %v2606_v52 = vadd.f32 %v5705_v40, %v2567_v49  ;;  %v2568_v5 = vmul.f32 %v4422_v2, %v5700_v63  ;;  %v2434_v30 = vpop.f32.mrb[35].mxu1 }
 0x2c8   : > { %v2604_v12 = vadd.f32 %v5705_v40, %v2565_v20  ;;  %v2566_v47 = vmul.f32 %v5700_v63, %v2434_v30 }
 0x2c9   : > { %v2638_v28 = vmax.f32 %v2606_v52, 0.0  ;;  %v2607_v14 = vadd.f32 %v5705_v40, %v2568_v5 }
 0x2ca   : > { %v2636_v50 = vmax.f32 %v2604_v12, 0.0  ;;  %v2605_v8 = vadd.f32 %v5705_v40, %v2566_v47 }
 0x2cb   : > { %2671 = vst [vmem:[#allocation3 + $0x31] sm:$0xff] %v2638_v28  ;;  %v2639_v37 = vmax.f32 %v2607_v14, 0.0  ;;  %v5758_v43 = vmul.f32 %v5744_v61, %v2638_v28  ;;  %v3144_v6 = vmul.f32 %v5739_v21, %v2638_v28  ;;  %v5762_v25 = vmul.f32 %v5723_v33, %v2638_v28 }
 0x2cc   : > { %2669 = vst [vmem:[#allocation3 + $0x19] sm:$0xff] %v2636_v50  ;;  %v2637_v27 = vmax.f32 %v2605_v8, 0.0  ;;  %v3142_v46 = vmul.f32 %v5739_v21, %v2636_v50  ;;  %v2841_v36 = vmul.f32 %v5723_v33, %v2636_v50 }
 0x2cd   : > { %2672 = vst [vmem:[#allocation3 + $0x39] sm:$0xff] %v2639_v37  ;;  %v5765_v59 = vmul.f32 %v5744_v61, %v2639_v37  ;;  %v3145_v58 = vmul.f32 %v5739_v21, %v2639_v37  ;;  %v5775_v42 = vmul.f32 %v5723_v33, %v2639_v37 }
 0x2ce   : > { %2670 = vst [vmem:[#allocation3 + $0x21] sm:$0xff] %v2637_v27  ;;  %v3143_v1 = vmul.f32 %v5739_v21, %v2637_v27  ;;  %v2842_v10 = vmul.f32 %v5723_v33, %v2637_v27 }
 0x2d2   : > { %v3308_v56 = vld [vmem:[#allocation3 + $0x30] sm:$0xff] }
 0x2d3   : > { %v3004_v62 = vld [vmem:[#allocation3 + $0x18] sm:$0xff]  ;;  %v3345_v16 = vmul.f32 %v5755_v24, %v3308_v56  ;;  %v3043_v7 = vmul.f32 %v5749_v26, %v3308_v56  ;;  %v2742_v38 = vmul.f32 %v5711_v53, %v3308_v56 }
 0x2d4   : > { %v3041_v55 = vmul.f32 %v5749_v26, %v3004_v62  ;;  %v3309_v4 = vld [vmem:[#allocation3 + $0x38] sm:$0xff]  ;;  %v2740_v13 = vmul.f32 %v5711_v53, %v3004_v62 }
 0x2d5   : > { %v5784_v48 = vld [vmem:[#allocation3 + $0x32] sm:$0xff]  ;;  %v3005_v29 = vld [vmem:[#allocation3 + $0x20] sm:$0xff]  ;;  %v3346_v31 = vmul.f32 %v5755_v24, %v3309_v4  ;;  %v3044_v20 = vmul.f32 %v5749_v26, %v3309_v4 }
 0x2d6   : > { %v3206_v15 = vld [vmem:[#allocation3 + $0x1a] sm:$0xff]  ;;  %v3207_v41 = vld [vmem:[#allocation3 + $0x22] sm:$0xff]  ;;  %v3042_v49 = vmul.f32 %v5749_v26, %v3005_v29  ;;  %v3073_v3 = vadd.f32 %v3041_v55, %v2972_v22  ;;  %v3547_v51 = vmul.f32 %v5770_v60, %v5784_v48  ;;  %v2741_v23 = vmul.f32 %v5711_v53, %v3005_v29 }
 0x2d7   : > { %v3243_v17 = vmul.f32 %v5782_v32, %v3206_v15  ;;  %v2873_v52 = vadd.f32 %v2841_v36, %v2740_v13  ;;  %v2942_v5 = vmul.f32 %v5732_v19, %v3206_v15  ;;  %v3244_v57 = vmul.f32 %v5782_v32, %v3207_v41  ;;  %v3511_v62 = vld [vmem:[#allocation3 + $0x3a] sm:$0xff] }
 0x2d8   : > { %v4425_v2 = vpop.f32.mrb[36].mxu1  ;;  %v3074_v47 = vadd.f32 %v3042_v49, %v2973_v18  ;;  %v3174_v54 = vadd.f32 %v3142_v46, %v3073_v3  ;;  %v2874_v11 = vadd.f32 %v2842_v10, %v2741_v23  ;;  %v2943_v35 = vmul.f32 %v5732_v19, %v3207_v41 }
 0x2d9   : > { %v2571_v30 = vmul.f32 %v4425_v2, %v5700_v63  ;;  %v2447_v12 = vpop.f32.mrb[37].mxu1  ;;  %v2974_v50 = vadd.f32 %v2942_v5, %v2873_v52  ;;  %v2743_v41 = vmul.f32 %v5711_v53, %v3309_v4  ;;  %v3548_v49 = vmul.f32 %v5770_v60, %v3511_v62 }
 0x2da   : > { %v2569_v28 = vmul.f32 %v5700_v63, %v2447_v12  ;;  %v4426_v14 = vpop.f32.mrb[38].mxu1  ;;  %v3175_v37 = vadd.f32 %v3143_v1, %v3074_v47  ;;  %v3275_v27 = vadd.f32 %v3243_v17, %v3174_v54  ;;  %v2975_v9 = vadd.f32 %v2943_v35, %v2874_v11 }
 0x2db   : > { %v2610_v8 = vadd.f32 %v5705_v40, %v2571_v30  ;;  %v2572_v39 = vmul.f32 %v4426_v14, %v5700_v63  ;;  %v2450_v34 = vpop.f32.mrb[39].mxu1  ;;  %v3075_v0 = vadd.f32 %v3043_v7, %v2974_v50  ;;  %v2944_v17 = vmul.f32 %v5732_v19, %v5784_v48 }
 0x2dc   : > { %v2608_v44 = vadd.f32 %v5705_v40, %v2569_v28  ;;  %v2570_v45 = vmul.f32 %v5700_v63, %v2450_v34  ;;  %v3276_v46 = vadd.f32 %v3244_v57, %v3175_v37  ;;  %v3377_v56 = vadd.f32 %v3345_v16, %v3275_v27 }
 0x2dd   : > { %v2642_v22 = vmax.f32 %v2610_v8, 0.0  ;;  %v2611_v18 = vadd.f32 %v5705_v40, %v2572_v39  ;;  %v3076_v13 = vadd.f32 %v3044_v20, %v2975_v9  ;;  %v3176_v10 = vadd.f32 %v3144_v6, %v3075_v0 }
 0x2de   : > { %v2640_v36 = vmax.f32 %v2608_v44, 0.0  ;;  %v2609_v55 = vadd.f32 %v5705_v40, %v2570_v45  ;;  %v3378_v29 = vadd.f32 %v3346_v31, %v3276_v46  ;;  %v3478_v15 = vadd.f32 %v5758_v43, %v3377_v56 }
 0x2df   : > { %2675 = vst [vmem:[#allocation3 + $0x61] sm:$0xff] %v2642_v22  ;;  %v2643_v1 = vmax.f32 %v2611_v18, 0.0  ;;  %v3177_v3 = vadd.f32 %v3145_v58, %v3076_v13  ;;  %v3245_v16 = vmul.f32 %v5782_v32, %v5784_v48  ;;  %v3246_v6 = vmul.f32 %v5782_v32, %v3511_v62 }
 0x2e0   : > { %2673 = vst [vmem:[#allocation3 + $0x49] sm:$0xff] %v2640_v36  ;;  %v2641_v7 = vmax.f32 %v2609_v55, 0.0  ;;  %v3479_v2 = vadd.f32 %v5765_v59, %v3378_v29  ;;  %v2875_v20 = vadd.f32 %v5762_v25, %v2742_v38  ;;  %v2876_v31 = vadd.f32 %v5775_v42, %v2743_v41 }
 0x2e1   : > { %2676 = vst [vmem:[#allocation3 + $0x69] sm:$0xff] %v2643_v1  ;;  %v3277_v43 = vadd.f32 %v3245_v16, %v3176_v10  ;;  %v3448_v4 = vmul.f32 %v5744_v61, %v2640_v36  ;;  %v3579_v58 = vadd.f32 %v3547_v51, %v3478_v15  ;;  %v3278_v52 = vadd.f32 %v3246_v6, %v3177_v3 }
 0x2e2   : > { %2674 = vst [vmem:[#allocation3 + $0x51] sm:$0xff] %v2641_v7  ;;  %v3580_v23 = vadd.f32 %v3548_v49, %v3479_v2  ;;  %v2945_v5 = vmul.f32 %v5732_v19, %v3511_v62  ;;  %v3449_v59 = vmul.f32 %v5744_v61, %v2641_v7  ;;  %v3146_v30 = vmul.f32 %v5739_v21, %v2640_v36 }
 0x2e3   : > { %v3147_v25 = vmul.f32 %v5739_v21, %v2641_v7  ;;  %v5826_v42 = vmul.f32 %v5744_v61, %v2642_v22  ;;  %v2976_v12 = vadd.f32 %v2944_v17, %v2875_v20  ;;  %v5829_v54 = vmul.f32 %v5744_v61, %v2643_v1 }
 0x2e4   : > { %v3611_v38 = vpack.c.bf16 %v3580_v23, %v3579_v58  ;;  %v2977_v47 = vadd.f32 %v2945_v5, %v2876_v31  ;;  %v2845_v51 = vmul.f32 %v5723_v33, %v2640_v36  ;;  %v2846_v57 = vmul.f32 %v5723_v33, %v2641_v7 }
 0x2e5   : > { %v5834_v28 = vmul.f32 %v5739_v21, %v2642_v22  ;;  %v5837_v14 = vmul.f32 %v5739_v21, %v2643_v1  ;;  %v5844_v8 = vmul.f32 %v5723_v33, %v2642_v22  ;;  %v5847_v39 = vmul.f32 %v5723_v33, %v2643_v1 }
 0x2e6   : > { %v3312_v48 = vld [vmem:[#allocation3 + $0x60] sm:$0xff]  ;;  %4467 = vmatprep.mubr.bf16.mxu0 %v3611_v38 }
 0x2e7   : > { %v3310_v11 = vld [vmem:[#allocation3 + $0x48] sm:$0xff]  ;;  %v3349_v35 = vmul.f32 %v5755_v24, %v3312_v48  ;;  %v5841_v50 = vmul.f32 %v5749_v26, %v3312_v48  ;;  %v5859_v0 = vmul.f32 %v5711_v53, %v3312_v48 }
 0x2e8   : > { %v3347_v34 = vmul.f32 %v5755_v24, %v3310_v11  ;;  %v3045_v37 = vmul.f32 %v5749_v26, %v3310_v11  ;;  %v5851_v27 = vld [vmem:[#allocation3 + $0x68] sm:$0xff]  ;;  %v2744_v9 = vmul.f32 %v5711_v53, %v3310_v11 }
 0x2e9   : > { %v5853_v44 = vld [vmem:[#allocation3 + $0x62] sm:$0xff]  ;;  %v5855_v45 = vld [vmem:[#allocation3 + $0x6a] sm:$0xff]  ;;  %v3513_v46 = vld [vmem:[#allocation3 + $0x52] sm:$0xff]  ;;  %v3350_v56 = vmul.f32 %v5755_v24, %v5851_v27  ;;  %v3048_v55 = vmul.f32 %v5749_v26, %v5851_v27 }
 0x2ea   : > { %v3311_v22 = vld [vmem:[#allocation3 + $0x50] sm:$0xff]  ;;  %v3551_v62 = vmul.f32 %v5770_v60, %v5853_v44  ;;  %v5867_v36 = vmul.f32 %v5770_v60, %v5855_v45  ;;  %v3379_v10 = vadd.f32 %v3347_v34, %v3277_v43  ;;  %v3550_v29 = vmul.f32 %v5770_v60, %v3513_v46 }
 0x2eb   : > { %v3512_v18 = vld [vmem:[#allocation3 + $0x4a] sm:$0xff]  ;;  %v3348_v13 = vmul.f32 %v5755_v24, %v3311_v22  ;;  %v3046_v15 = vmul.f32 %v5749_v26, %v3311_v22  ;;  %v3077_v41 = vadd.f32 %v3045_v37, %v2976_v12  ;;  %v3248_v49 = vmul.f32 %v5782_v32, %v3513_v46 }
 0x2ec   : > { %v3549_v1 = vmul.f32 %v5770_v60, %v3512_v18  ;;  %v3247_v7 = vmul.f32 %v5782_v32, %v3512_v18  ;;  %v4429_v3 = vpop.f32.mrb[40].mxu1  ;;  %v3480_v2 = vadd.f32 %v3448_v4, %v3379_v10  ;;  %v2745_v6 = vmul.f32 %v5711_v53, %v3311_v22 }
 0x2ed   : > { %v3380_v16 = vadd.f32 %v3348_v13, %v3278_v52  ;;  %v2877_v20 = vadd.f32 %v2845_v51, %v2744_v9  ;;  %v2575_v31 = vmul.f32 %v4429_v3, %v5700_v63  ;;  %v2463_v43 = vpop.f32.mrb[41].mxu1  ;;  %v3078_v17 = vadd.f32 %v3046_v15, %v2977_v47 }
 0x2ee   : > { %v3178_v58 = vadd.f32 %v3146_v30, %v3077_v41  ;;  %v2946_v23 = vmul.f32 %v5732_v19, %v3512_v18  ;;  %v2573_v5 = vmul.f32 %v5700_v63, %v2463_v43  ;;  %v4430_v38 = vpop.f32.mrb[42].mxu1  ;;  %v3581_v48 = vadd.f32 %v3549_v1, %v3480_v2 }
 0x2ef   : > { %v3481_v12 = vadd.f32 %v3449_v59, %v3380_v16  ;;  %v2878_v11 = vadd.f32 %v2846_v57, %v2745_v6  ;;  %v2614_v34 = vadd.f32 %v5705_v40, %v2575_v31  ;;  %v2576_v4 = vmul.f32 %v4430_v38, %v5700_v63  ;;  %v2466_v52 = vpop.f32.mrb[43].mxu1 }
 0x2f0   : > { %v3179_v37 = vadd.f32 %v3147_v25, %v3078_v17  ;;  %v3279_v51 = vadd.f32 %v3247_v7, %v3178_v58  ;;  %v2612_v9 = vadd.f32 %v5705_v40, %v2573_v5  ;;  %v2574_v47 = vmul.f32 %v5700_v63, %v2466_v52 }
 0x2f1   : > { %v3582_v30 = vadd.f32 %v3550_v29, %v3481_v12  ;;  %v2947_v22 = vmul.f32 %v5732_v19, %v3513_v46  ;;  %v5886_v18 = vmax.f32 %v2614_v34, 0.0  ;;  %v2615_v59 = vadd.f32 %v5705_v40, %v2576_v4 }
 0x2f2   : > { %v3280_v13 = vadd.f32 %v3248_v49, %v3179_v37  ;;  %v3381_v57 = vadd.f32 %v3349_v35, %v3279_v51  ;;  %v2644_v10 = vmax.f32 %v2612_v9, 0.0  ;;  %v2613_v1 = vadd.f32 %v5705_v40, %v2574_v47 }
 0x2f3   : > { %v3612_v15 = vpack.c.bf16 %v3582_v30, %v3581_v48  ;;  %v2978_v41 = vadd.f32 %v2946_v23, %v2877_v20  ;;  %2679 = vst [vmem:[#allocation3 + $0x91] sm:$0xff] %v5886_v18  ;;  %v5891_v25 = vmax.f32 %v2615_v59, 0.0  ;;  %v2979_v3 = vadd.f32 %v2947_v22, %v2878_v11 }
 0x2f4   : > { %v3382_v7 = vadd.f32 %v3350_v56, %v3280_v13  ;;  %v3482_v29 = vadd.f32 %v5826_v42, %v3381_v57  ;;  %2677 = vst [vmem:[#allocation3 + $0x79] sm:$0xff] %v2644_v10  ;;  %v2645_v46 = vmax.f32 %v2613_v1, 0.0  ;;  %v3249_v35 = vmul.f32 %v5782_v32, %v5853_v44 }
 0x2f5   : > { %4468 = vmatmul.mubr.bf16.vlgmr.msra.gmra.mrb[40].mxu0 %v3612_v15  ;;  %v3079_v16 = vadd.f32 %v5841_v50, %v2978_v41  ;;  %v3250_v49 = vmul.f32 %v5782_v32, %v5855_v45  ;;  %2680 = vst [vmem:[#allocation3 + $0x99] sm:$0xff] %v5891_v25  ;;  %v3080_v56 = vadd.f32 %v3048_v55, %v2979_v3 }
 0x2f6   : > { %v3483_v2 = vadd.f32 %v5829_v54, %v3382_v7  ;;  %v3583_v6 = vadd.f32 %v3551_v62, %v3482_v29  ;;  %v3452_v42 = vmul.f32 %v5744_v61, %v2644_v10  ;;  %2678 = vst [vmem:[#allocation3 + $0x81] sm:$0xff] %v2645_v46  ;;  %v3453_v31 = vmul.f32 %v5744_v61, %v2645_v46 }
 0x2f7   : > { %v3180_v20 = vadd.f32 %v5834_v28, %v3079_v16  ;;  %v2747_v50 = vmul.f32 %v5711_v53, %v5851_v27  ;;  %v2879_v43 = vadd.f32 %v5844_v8, %v5859_v0  ;;  %v3181_v58 = vadd.f32 %v5837_v14, %v3080_v56 }
 0x2f8   : > { %v3584_v17 = vadd.f32 %v5867_v36, %v3483_v2  ;;  %v2948_v54 = vmul.f32 %v5732_v19, %v5853_v44  ;;  %v2949_v62 = vmul.f32 %v5732_v19, %v5855_v45  ;;  %v3150_v23 = vmul.f32 %v5739_v21, %v2644_v10 }
 0x2f9   : > { %v3281_v55 = vadd.f32 %v3249_v35, %v3180_v20  ;;  %v2880_v28 = vadd.f32 %v5847_v39, %v2747_v50  ;;  %v3151_v27 = vmul.f32 %v5739_v21, %v2645_v46  ;;  %v3282_v38 = vadd.f32 %v3250_v49, %v3181_v58 }
 0x2fa   : > { %v3613_v5 = vpack.c.bf16 %v3584_v17, %v3583_v6  ;;  %v2980_v8 = vadd.f32 %v2948_v54, %v2879_v43  ;;  %v5919_v0 = vmul.f32 %v5744_v61, %v5886_v18  ;;  %v3316_v36 = vld [vmem:[#allocation3 + $0x90] sm:$0xff]  ;;  %v5923_v44 = vmul.f32 %v5744_v61, %v5891_v25 }
 0x2fb   : > { %v2981_v14 = vadd.f32 %v2949_v62, %v2880_v28  ;;  %v2849_v45 = vmul.f32 %v5723_v33, %v2644_v10  ;;  %v2850_v39 = vmul.f32 %v5723_v33, %v2645_v46  ;;  %v3314_v12 = vld [vmem:[#allocation3 + $0x78] sm:$0xff]  ;;  %v3353_v48 = vmul.f32 %v5755_v24, %v3316_v36 }
 0x2fc   : > { %4471 = vmatprep.mubr.bf16.mxu0 %v3613_v5  ;;  %v5929_v11 = vmul.f32 %v5749_v26, %v3316_v36  ;;  %v5933_v34 = vmul.f32 %v5739_v21, %v5886_v18  ;;  %v5937_v4 = vmul.f32 %v5739_v21, %v5891_v25  ;;  %v3351_v52 = vmul.f32 %v5755_v24, %v3314_v12  ;;  %v5941_v51 = vld [vmem:[#allocation3 + $0x98] sm:$0xff] }
 0x2fd   : > { %v3049_v37 = vmul.f32 %v5749_v26, %v3314_v12  ;;  %v5943_v9 = vld [vmem:[#allocation3 + $0x92] sm:$0xff]  ;;  %v5945_v47 = vld [vmem:[#allocation3 + $0x9a] sm:$0xff]  ;;  %v2748_v30 = vmul.f32 %v5711_v53, %v3314_v12  ;;  %v5949_v22 = vmul.f32 %v5711_v53, %v3316_v36  ;;  %v3517_v10 = vld [vmem:[#allocation3 + $0x82] sm:$0xff]  ;;  %v3354_v1 = vmul.f32 %v5755_v24, %v5941_v51 }
 0x2fe   : > { %v4433_v59 = vpop.f32.mrb[44].mxu1  ;;  %v3315_v13 = vld [vmem:[#allocation3 + $0x80] sm:$0xff]  ;;  %v5955_v15 = vmul.f32 %v5770_v60, %v5943_v9  ;;  %v5959_v41 = vmul.f32 %v5770_v60, %v5945_v47  ;;  %v3052_v7 = vmul.f32 %v5749_v26, %v5941_v51  ;;  %v3383_v16 = vadd.f32 %v3351_v52, %v3281_v55 }
 0x2ff   : > { %v3516_v57 = vld [vmem:[#allocation3 + $0x7a] sm:$0xff]  ;;  %v2579_v29 = vmul.f32 %v4433_v59, %v5700_v63  ;;  %v2479_v3 = vpop.f32.mrb[45].mxu1  ;;  %v3352_v46 = vmul.f32 %v5755_v24, %v3315_v13  ;;  %v3554_v6 = vmul.f32 %v5770_v60, %v3517_v10  ;;  %v3050_v56 = vmul.f32 %v5749_v26, %v3315_v13 }
 0x300   : > { %v3553_v35 = vmul.f32 %v5770_v60, %v3516_v57  ;;  %v2577_v49 = vmul.f32 %v5700_v63, %v2479_v3  ;;  %v4434_v2 = vpop.f32.mrb[46].mxu1  ;;  %v3081_v20 = vadd.f32 %v3049_v37, %v2980_v8  ;;  %v3484_v54 = vadd.f32 %v3452_v42, %v3383_v16 }
 0x301   : > { %v2618_v50 = vadd.f32 %v5705_v40, %v2579_v29  ;;  %v2580_v43 = vmul.f32 %v4434_v2, %v5700_v63  ;;  %v2482_v17 = vpop.f32.mrb[47].mxu1  ;;  %v3384_v58 = vadd.f32 %v3352_v46, %v3282_v38  ;;  %v3082_v28 = vadd.f32 %v3050_v56, %v2981_v14 }
 0x302   : > { %v2616_v62 = vadd.f32 %v5705_v40, %v2577_v49  ;;  %v2578_v55 = vmul.f32 %v5700_v63, %v2482_v17  ;;  %v3182_v5 = vadd.f32 %v3150_v23, %v3081_v20  ;;  %v3585_v59 = vadd.f32 %v3553_v35, %v3484_v54 }
 0x303   : > { %v5973_v36 = vmax.f32 %v2618_v50, 0.0  ;;  %v2619_v12 = vadd.f32 %v5705_v40, %v2580_v43  ;;  %v3485_v52 = vadd.f32 %v3453_v31, %v3384_v58  ;;  %v3183_v29 = vadd.f32 %v3151_v27, %v3082_v28 }
 0x304   : > { %v5976_v8 = vmax.f32 %v2616_v62, 0.0  ;;  %v2617_v37 = vadd.f32 %v5705_v40, %v2578_v55  ;;  %v3251_v38 = vmul.f32 %v5782_v32, %v3516_v57  ;;  %v3252_v23 = vmul.f32 %v5782_v32, %v3517_v10 }
 0x305   : > { %2683 = vst [vmem:[#allocation3 + $0xc1] sm:$0xff] %v5973_v36  ;;  %v5981_v42 = vmax.f32 %v2619_v12, 0.0  ;;  %v3586_v3 = vadd.f32 %v3554_v6, %v3485_v52  ;;  %v2749_v14 = vmul.f32 %v5711_v53, %v3315_v13  ;;  %v2881_v16 = vadd.f32 %v2849_v45, %v2748_v30 }
 0x306   : > { %2681 = vst [vmem:[#allocation3 + $0xa9] sm:$0xff] %v5976_v8  ;;  %v5986_v31 = vmax.f32 %v2617_v37, 0.0  ;;  %v3283_v46 = vadd.f32 %v3251_v38, %v3182_v5  ;;  %v2950_v35 = vmul.f32 %v5732_v19, %v3516_v57  ;;  %v3284_v49 = vadd.f32 %v3252_v23, %v3183_v29 }
 0x307   : > { %2684 = vst [vmem:[#allocation3 + $0xc9] sm:$0xff] %v5981_v42  ;;  %v3614_v27 = vpack.c.bf16 %v3586_v3, %v3585_v59  ;;  %v2882_v2 = vadd.f32 %v2850_v39, %v2749_v14  ;;  %v2951_v56 = vmul.f32 %v5732_v19, %v3517_v10  ;;  %v3253_v13 = vmul.f32 %v5782_v32, %v5943_v9 }
 0x308   : > { %2682 = vst [vmem:[#allocation3 + $0xb1] sm:$0xff] %v5986_v31  ;;  %v3385_v6 = vadd.f32 %v3353_v48, %v3283_v46  ;;  %v2982_v20 = vadd.f32 %v2950_v35, %v2881_v16  ;;  %v3254_v50 = vmul.f32 %v5782_v32, %v5945_v47  ;;  %v3386_v45 = vadd.f32 %v3354_v1, %v3284_v49 }
 0x309   : > { %4472 = vmatmul.mubr.bf16.gmra.mrb[44].mxu0 %v3614_v27  ;;  %v2983_v30 = vadd.f32 %v2951_v56, %v2882_v2  ;;  %v3456_v57 = vmul.f32 %v5744_v61, %v5976_v8  ;;  %v3457_v39 = vmul.f32 %v5744_v61, %v5986_v31  ;;  %v2751_v43 = vmul.f32 %v5711_v53, %v5941_v51 }
 0x30a   : > { %v3486_v10 = vadd.f32 %v5919_v0, %v3385_v6  ;;  %v3083_v48 = vadd.f32 %v5929_v11, %v2982_v20  ;;  %v2851_v17 = vmul.f32 %v5723_v33, %v5886_v18  ;;  %v3487_v58 = vadd.f32 %v5923_v44, %v3386_v45 }
 0x30b   : > { %v3084_v1 = vadd.f32 %v3052_v7, %v2983_v30  ;;  %v2852_v54 = vmul.f32 %v5723_v33, %v5891_v25  ;;  %v2952_v62 = vmul.f32 %v5732_v19, %v5943_v9  ;;  %v2953_v51 = vmul.f32 %v5732_v19, %v5945_v47 }
 0x30c   : > { %v3587_v55 = vadd.f32 %v5955_v15, %v3486_v10  ;;  %v3184_v0 = vadd.f32 %v5933_v34, %v3083_v48  ;;  %v2883_v11 = vadd.f32 %v2851_v17, %v5949_v22  ;;  %v3588_v18 = vadd.f32 %v5959_v41, %v3487_v58  ;;  %v3320_v48 = vld [vmem:[#allocation3 + $0xc0] sm:$0xff] }
 0x30d   : > { %v3185_v44 = vadd.f32 %v5937_v4, %v3084_v1  ;;  %v6018_v7 = vld [vmem:[#allocation3 + $0xa8] sm:$0xff]  ;;  %v2884_v28 = vadd.f32 %v2852_v54, %v2751_v43  ;;  %v3154_v25 = vmul.f32 %v5739_v21, %v5976_v8  ;;  %v3155_v59 = vmul.f32 %v5739_v21, %v5986_v31 }
 0x30e   : > { %v3285_v9 = vadd.f32 %v3253_v13, %v3184_v0  ;;  %v3355_v15 = vmul.f32 %v5755_v24, %v6018_v7  ;;  %v2984_v34 = vadd.f32 %v2952_v62, %v2883_v11  ;;  %v3053_v22 = vmul.f32 %v5749_v26, %v6018_v7  ;;  %v3321_v54 = vld [vmem:[#allocation3 + $0xc8] sm:$0xff] }
 0x30f   : > { %v3615_v5 = vpack.c.bf16 %v3588_v18, %v3587_v55  ;;  %v3286_v47 = vadd.f32 %v3254_v50, %v3185_v44  ;;  %v3319_v12 = vld [vmem:[#allocation3 + $0xb0] sm:$0xff]  ;;  %v2985_v52 = vadd.f32 %v2953_v51, %v2884_v28  ;;  %v3357_v44 = vmul.f32 %v5755_v24, %v3320_v48  ;;  %v3522_v28 = vld [vmem:[#allocation3 + $0xc2] sm:$0xff] }
 0x310   : > { %v6026_v41 = vld [vmem:[#allocation3 + $0xaa] sm:$0xff]  ;;  %v6028_v4 = vld [vmem:[#allocation3 + $0xb2] sm:$0xff]  ;;  %v4437_v37 = vpop.f32.mrb[48].mxu1  ;;  %v3356_v29 = vmul.f32 %v5755_v24, %v3319_v12  ;;  %v3387_v38 = vadd.f32 %v3355_v15, %v3285_v9  ;;  %v3054_v16 = vmul.f32 %v5749_v26, %v3319_v12  ;;  %v3085_v35 = vadd.f32 %v3053_v22, %v2984_v34 }
 0x311   : > { %v3557_v3 = vmul.f32 %v5770_v60, %v6026_v41  ;;  %v3558_v23 = vmul.f32 %v5770_v60, %v6028_v4  ;;  %v2583_v14 = vmul.f32 %v4437_v37, %v5700_v63  ;;  %v2495_v46 = vpop.f32.mrb[49].mxu1  ;;  %4475 = vmatprep.mubr.bf16.mxu0 %v3615_v5  ;;  %v3255_v27 = vmul.f32 %v5782_v32, %v6026_v41 }
 0x312   : > { %v2581_v49 = vmul.f32 %v5700_v63, %v2495_v46  ;;  %v4438_v2 = vpop.f32.mrb[50].mxu1  ;;  %v3388_v56 = vadd.f32 %v3356_v29, %v3286_v47  ;;  %v3488_v6 = vadd.f32 %v3456_v57, %v3387_v38  ;;  %v3256_v20 = vmul.f32 %v5782_v32, %v6028_v4 }
 0x313   : > { %v2622_v13 = vadd.f32 %v5705_v40, %v2583_v14  ;;  %v2584_v50 = vmul.f32 %v4438_v2, %v5700_v63  ;;  %v2498_v45 = vpop.f32.mrb[51].mxu1  ;;  %v3086_v30 = vadd.f32 %v3054_v16, %v2985_v52  ;;  %v3186_v10 = vadd.f32 %v3154_v25, %v3085_v35  ;;  %v3523_v25 = vld [vmem:[#allocation3 + $0xca] sm:$0xff] }
 0x314   : > { %v2620_v43 = vadd.f32 %v5705_v40, %v2581_v49  ;;  %v2582_v17 = vmul.f32 %v5700_v63, %v2498_v45  ;;  %v3489_v58 = vadd.f32 %v3457_v39, %v3388_v56  ;;  %v3589_v1 = vadd.f32 %v3557_v3, %v3488_v6 }
 0x315   : > { %v2654_v62 = vmax.f32 %v2622_v13, 0.0  ;;  %v2623_v57 = vadd.f32 %v5705_v40, %v2584_v50  ;;  %v3187_v55 = vadd.f32 %v3155_v59, %v3086_v30  ;;  %v3287_v0 = vadd.f32 %v3255_v27, %v3186_v10  ;;  %v2819_v30 = vld [vmem:[#allocation3 + $0xc9] sm:$0xff] }
 0x316   : > { %v2652_v11 = vmax.f32 %v2620_v43, 0.0  ;;  %v2621_v51 = vadd.f32 %v5705_v40, %v2582_v17  ;;  %v3590_v18 = vadd.f32 %v3558_v23, %v3489_v58  ;;  %v3358_v39 = vmul.f32 %v5755_v24, %v3321_v54 }
 0x317   : > { %2687 = vst [vmem:[#allocation3 + $0xf1] sm:$0xff] %v2654_v62  ;;  %v2655_v9 = vmax.f32 %v2623_v57, 0.0  ;;  %v3288_v15 = vadd.f32 %v3256_v20, %v3187_v55  ;;  %v3458_v34 = vmul.f32 %v5744_v61, %v5973_v36  ;;  %v3389_v47 = vadd.f32 %v3357_v44, %v3287_v0 }
 0x318   : > { %2685 = vst [vmem:[#allocation3 + $0xd9] sm:$0xff] %v2652_v11  ;;  %v6054_v22 = vmax.f32 %v2621_v51, 0.0  ;;  %v3616_v5 = vpack.c.bf16 %v3590_v18, %v3589_v1  ;;  %v3459_v52 = vmul.f32 %v5744_v61, %v5981_v42  ;;  %v3559_v37 = vmul.f32 %v5770_v60, %v3522_v28 }
 0x319   : > { %2688 = vst [vmem:[#allocation3 + $0xf9] sm:$0xff] %v2655_v9  ;;  %v3390_v59 = vadd.f32 %v3358_v39, %v3288_v15  ;;  %v3560_v29 = vmul.f32 %v5770_v60, %v3523_v25  ;;  %v2752_v38 = vmul.f32 %v5711_v53, %v6018_v7  ;;  %v3490_v3 = vadd.f32 %v3458_v34, %v3389_v47 }
 0x31a   : > { %2686 = vst [vmem:[#allocation3 + $0xe1] sm:$0xff] %v6054_v22  ;;  %4476 = vmatmul.mubr.bf16.gmra.mrb[48].mxu0 %v3616_v5  ;;  %v2753_v23 = vmul.f32 %v5711_v53, %v3319_v12  ;;  %v2853_v14 = vmul.f32 %v5723_v33, %v5976_v8  ;;  %v2854_v46 = vmul.f32 %v5723_v33, %v5986_v31 }
 0x31b   : > { %v3491_v16 = vadd.f32 %v3459_v52, %v3390_v59  ;;  %v2954_v35 = vmul.f32 %v5732_v19, %v6026_v41  ;;  %v2955_v27 = vmul.f32 %v5732_v19, %v6028_v4  ;;  %v3055_v7 = vmul.f32 %v5749_v26, %v3320_v48  ;;  %v2818_v41 = vld [vmem:[#allocation3 + $0xc1] sm:$0xff] }
 0x31c   : > { %v3591_v49 = vadd.f32 %v3559_v37, %v3490_v3  ;;  %v2885_v2 = vadd.f32 %v2853_v14, %v2752_v38  ;;  %v2886_v56 = vadd.f32 %v2854_v46, %v2753_v23  ;;  %v3056_v12 = vmul.f32 %v5749_v26, %v3321_v54 }
 0x31d   : > { %v3592_v6 = vadd.f32 %v3560_v29, %v3491_v16  ;;  %v3156_v8 = vmul.f32 %v5739_v21, %v5973_v36  ;;  %v3157_v31 = vmul.f32 %v5739_v21, %v5981_v42  ;;  %v3257_v20 = vmul.f32 %v5782_v32, %v3522_v28 }
 0x31e   : > { %v2986_v13 = vadd.f32 %v2954_v35, %v2885_v2  ;;  %v2987_v50 = vadd.f32 %v2955_v27, %v2886_v56  ;;  %v3258_v4 = vmul.f32 %v5782_v32, %v3523_v25  ;;  %v3460_v45 = vmul.f32 %v5744_v61, %v2652_v11 }
 0x31f   : > { %v3617_v10 = vpack.c.bf16 %v3592_v6, %v3591_v49  ;;  %v6081_v43 = vld [vmem:[#allocation3 + $0xd8] sm:$0xff]  ;;  %v3461_v17 = vmul.f32 %v5744_v61, %v6054_v22  ;;  %v2754_v36 = vmul.f32 %v5711_v53, %v3320_v48  ;;  %v2755_v42 = vmul.f32 %v5711_v53, %v3321_v54 }
 0x320   : > { %v3087_v58 = vadd.f32 %v3055_v7, %v2986_v13  ;;  %v3088_v1 = vadd.f32 %v3056_v12, %v2987_v50  ;;  %v3359_v62 = vmul.f32 %v5755_v24, %v6081_v43  ;;  %v2855_v57 = vmul.f32 %v5723_v33, %v2818_v41  ;;  %v3121_v56 = vld [vmem:[#allocation3 + $0xd9] sm:$0xff] }
 0x321   : > { %4479 = vmatprep.mubr.bf16.mxu0 %v3617_v10  ;;  %v6090_v55 = vld [vmem:[#allocation3 + $0xe0] sm:$0xff]  ;;  %v2856_v51 = vmul.f32 %v5723_v33, %v2819_v30  ;;  %v2956_v48 = vmul.f32 %v5732_v19, %v3522_v28  ;;  %v2957_v54 = vmul.f32 %v5732_v19, %v3523_v25  ;;  %v3057_v18 = vmul.f32 %v5749_v26, %v6081_v43  ;;  %v6121_v30 = vld [vmem:[#allocation3 + $0xf8] sm:$0xff] }
 0x322   : > { %v6092_v0 = vld [vmem:[#allocation3 + $0xda] sm:$0xff]  ;;  %v6094_v11 = vld [vmem:[#allocation3 + $0xe2] sm:$0xff]  ;;  %v4441_v44 = vpop.f32.mrb[52].mxu1  ;;  %v3188_v9 = vadd.f32 %v3156_v8, %v3087_v58  ;;  %v3189_v15 = vadd.f32 %v3157_v31, %v3088_v1  ;;  %v3360_v39 = vmul.f32 %v5755_v24, %v6090_v55  ;;  %v2887_v52 = vadd.f32 %v2855_v57, %v2754_v36  ;;  %v6128_v58 = vld [vmem:[#allocation3 + $0xf1] sm:$0xff] }
 0x323   : > { %v3561_v34 = vmul.f32 %v5770_v60, %v6092_v0  ;;  %v2587_v5 = vmul.f32 %v4441_v44, %v5700_v63  ;;  %v2511_v47 = vpop.f32.mrb[53].mxu1  ;;  %v3562_v28 = vmul.f32 %v5770_v60, %v6094_v11  ;;  %v2888_v25 = vadd.f32 %v2856_v51, %v2755_v42  ;;  %v6130_v1 = vld [vmem:[#allocation3 + $0xf9] sm:$0xff] }
 0x324   : > { %v2585_v59 = vmul.f32 %v5700_v63, %v2511_v47  ;;  %v4442_v37 = vpop.f32.mrb[54].mxu1  ;;  %v3289_v29 = vadd.f32 %v3257_v20, %v3188_v9  ;;  %v3290_v38 = vadd.f32 %v3258_v4, %v3189_v15  ;;  %v3058_v3 = vmul.f32 %v5749_v26, %v6090_v55  ;;  %v6119_v4 = vld [vmem:[#allocation3 + $0xf0] sm:$0xff]  ;;  %v6139_v51 = vld [vmem:[#allocation3 + $0xfa] sm:$0xff] }
 0x325   : > { %v2626_v23 = vadd.f32 %v5705_v40, %v2587_v5  ;;  %v2588_v14 = vmul.f32 %v4442_v37, %v5700_v63  ;;  %v2514_v46 = vpop.f32.mrb[55].mxu1  ;;  %v2988_v16 = vadd.f32 %v2956_v48, %v2887_v52  ;;  %v2989_v35 = vadd.f32 %v2957_v54, %v2888_v25 }
 0x326   : > { %v2624_v27 = vadd.f32 %v5705_v40, %v2585_v59  ;;  %v2586_v7 = vmul.f32 %v5700_v63, %v2514_v46  ;;  %v3391_v49 = vadd.f32 %v3359_v62, %v3289_v29  ;;  %v3392_v2 = vadd.f32 %v3360_v39, %v3290_v38 }
 0x327   : > { %v2658_v12 = vmax.f32 %v2626_v23, 0.0  ;;  %v2627_v6 = vadd.f32 %v5705_v40, %v2588_v14  ;;  %v3089_v8 = vadd.f32 %v3057_v18, %v2988_v16  ;;  %v3090_v31 = vadd.f32 %v3058_v3, %v2989_v35 }
 0x328   : > { %v6116_v20 = vmax.f32 %v2624_v27, 0.0  ;;  %v2625_v41 = vadd.f32 %v5705_v40, %v2586_v7  ;;  %v3492_v13 = vadd.f32 %v3460_v45, %v3391_v49  ;;  %v3493_v50 = vadd.f32 %v3461_v17, %v3392_v2  ;;  %v6132_v40 = vld [vmem:[#allocation3 + $0xf2] sm:$0xff] }
 0x329   : > { %2691 = vst [vmem:[#allocation3 + $0x121] sm:$0xff] %v2658_v12  ;;  %v2659_v63 = vmax.f32 %v2627_v6, 0.0  ;;  %v3158_v10 = vmul.f32 %v5739_v21, %v3121_v56  ;;  %v3159_v36 = vmul.f32 %v5739_v21, %v6054_v22  ;;  %v3259_v42 = vmul.f32 %v5782_v32, %v6092_v0 }
 0x32a   : > { %2689 = vst [vmem:[#allocation3 + $0x109] sm:$0xff] %v6116_v20  ;;  %v6135_v45 = vmax.f32 %v2625_v41, 0.0  ;;  %v3593_v17 = vadd.f32 %v3561_v34, %v3492_v13  ;;  %v3594_v62 = vadd.f32 %v3562_v28, %v3493_v50  ;;  %v3260_v57 = vmul.f32 %v5782_v32, %v6094_v11 }
 0x32b   : > { %2692 = vst [vmem:[#allocation3 + $0x129] sm:$0xff] %v2659_v63  ;;  %v3190_v48 = vadd.f32 %v3158_v10, %v3089_v8  ;;  %v3191_v54 = vadd.f32 %v3159_v36, %v3090_v31  ;;  %v3361_v18 = vmul.f32 %v5755_v24, %v6119_v4  ;;  %v3362_v44 = vmul.f32 %v5755_v24, %v6121_v30 }
 0x32c   : > { %2690 = vst [vmem:[#allocation3 + $0x111] sm:$0xff] %v6135_v45  ;;  %v3618_v9 = vpack.c.bf16 %v3594_v62, %v3593_v17  ;;  %v3462_v15 = vmul.f32 %v5744_v61, %v6128_v58  ;;  %v3463_v39 = vmul.f32 %v5744_v61, %v6130_v1  ;;  %v3563_v34 = vmul.f32 %v5770_v60, %v6132_v40  ;;  %v6207_v62 = vld [vmem:[%s6602_s7] ss:$0 sm:$0xff] }
 0x32d   : > { %v3291_v5 = vadd.f32 %v3259_v42, %v3190_v48  ;;  %v3292_v47 = vadd.f32 %v3260_v57, %v3191_v54  ;;  %v3564_v28 = vmul.f32 %v5770_v60, %v6139_v51  ;;  %v2756_v52 = vmul.f32 %v5711_v53, %v6081_v43 }
 0x32e   : > { %4480 = vmatmul.mubr.bf16.gmra.mrb[52].mxu0 %v3618_v9  ;;  %v2757_v25 = vmul.f32 %v5711_v53, %v6090_v55  ;;  %v2857_v59 = vmul.f32 %v5723_v33, %v3121_v56  ;;  %v2858_v37 = vmul.f32 %v5723_v33, %v6054_v22  ;;  %v2958_v29 = vmul.f32 %v5732_v19, %v6092_v0 }
 0x32f   : > { %v3393_v38 = vadd.f32 %v3361_v18, %v3291_v5  ;;  %v3394_v3 = vadd.f32 %v3362_v44, %v3292_v47  ;;  %v2959_v23 = vmul.f32 %v5732_v19, %v6094_v11  ;;  %v3059_v43 = vmul.f32 %v5749_v26, %v6119_v4 }
 0x330   : > { %v2889_v14 = vadd.f32 %v2857_v59, %v2756_v52  ;;  %v2890_v46 = vadd.f32 %v2858_v37, %v2757_v25  ;;  %v3060_v53 = vmul.f32 %v5749_v26, %v6121_v30  ;;  %v3160_v55 = vmul.f32 %v5739_v21, %v6128_v58  ;;  %v6234_v59 = vld [vmem:[%s6607_s12 + $0x1] ss:$0 sm:$0xff] }
 0x331   : > { %v3494_v33 = vadd.f32 %v3462_v15, %v3393_v38  ;;  %v3495_v22 = vadd.f32 %v3463_v39, %v3394_v3  ;;  %v3161_v0 = vmul.f32 %v5739_v21, %v6130_v1  ;;  %v3261_v16 = vmul.f32 %v5782_v32, %v6132_v40  ;;  %v6175_v19 = vld [vmem:[#allocation3 + $0x108] sm:$0xff]  ;;  %v6246_v3 = vld [vmem:[%s6607_s12 + $0x2] ss:$0 sm:$0xff] }
 0x332   : > { %v2990_v11 = vadd.f32 %v2958_v29, %v2889_v14  ;;  %v2991_v35 = vadd.f32 %v2959_v23, %v2890_v46  ;;  %v3262_v27 = vmul.f32 %v5782_v32, %v6139_v51  ;;  %v3363_v26 = vmul.f32 %v5755_v24, %v6175_v19  ;;  %v4445_v7 = vpop.f32.mrb[56].mxu1  ;;  %v6194_v32 = vld [vmem:[%s6601_s6] ss:$0 sm:$0xff] }
 0x333   : > { %v3595_v49 = vadd.f32 %v3563_v34, %v3494_v33  ;;  %v3596_v2 = vadd.f32 %v3564_v28, %v3495_v22  ;;  %v6181_v56 = vld [vmem:[#allocation3 + $0x110] sm:$0xff]  ;;  %v3464_v21 = vmul.f32 %v5744_v61, %v6116_v20  ;;  %v3465_v12 = vmul.f32 %v5744_v61, %v6135_v45  ;;  %v2527_v41 = vpop.f32.mrb[57].mxu1  ;;  %v6266_v22 = vld [vmem:[#allocation3 + $0x120] sm:$0xff] }
 0x334   : > { %v6187_v6 = vld [vmem:[#allocation3 + $0x10a] sm:$0xff]  ;;  %v6189_v8 = vld [vmem:[#allocation3 + $0x112] sm:$0xff]  ;;  %v2591_v31 = vmul.f32 %v6194_v32, %v4445_v7  ;;  %v3091_v13 = vadd.f32 %v3059_v43, %v2990_v11  ;;  %v3092_v50 = vadd.f32 %v3060_v53, %v2991_v35  ;;  %v3364_v63 = vmul.f32 %v5755_v24, %v6181_v56  ;;  %v4446_v61 = vpop.f32.mrb[58].mxu1 }
 0x335   : > { %v2589_v10 = vmul.f32 %v6194_v32, %v2527_v41  ;;  %v3619_v36 = vpack.c.bf16 %v3596_v2, %v3595_v49  ;;  %v3565_v42 = vmul.f32 %v5770_v60, %v6187_v6  ;;  %v3566_v17 = vmul.f32 %v5770_v60, %v6189_v8  ;;  %v2530_v48 = vpop.f32.mrb[59].mxu1  ;;  %v6218_v60 = vld [vmem:[%s6607_s12] ss:$0 sm:$0xff]  ;;  %v6276_v35 = vld [vmem:[#allocation3 + $0x128] sm:$0xff] }
 0x336   : > { %v6210_v57 = vadd.f32 %v6207_v62, %v2591_v31  ;;  %v2592_v24 = vmul.f32 %v6194_v32, %v4446_v61  ;;  %v3192_v54 = vadd.f32 %v3160_v55, %v3091_v13  ;;  %v3193_v18 = vadd.f32 %v3161_v0, %v3092_v50  ;;  %v6260_v55 = vld [vmem:[%s6607_s12 + $0x3] ss:$0 sm:$0xff]  ;;  %v6298_v50 = vld [vmem:[%s6607_s12 + $0x6] ss:$0 sm:$0xff] }
 0x337   : > { %v2628_v44 = vadd.f32 %v6207_v62, %v2589_v10  ;;  %v2590_v9 = vmul.f32 %v6194_v32, %v2530_v48  ;;  %4483 = vmatprep.mubr.bf16.mxu0 %v3619_v36  ;;  %v2758_v15 = vmul.f32 %v6218_v60, %v6119_v4  ;;  %v2759_v39 = vmul.f32 %v6218_v60, %v6121_v30  ;;  %v2824_v10 = vld [vmem:[#allocation3 + $0x109] sm:$0xff] }
 0x338   : > { %v2662_v34 = vmax.f32 %v6210_v57, 0.0  ;;  %v6226_v5 = vadd.f32 %v6207_v62, %v2592_v24  ;;  %v3293_v47 = vadd.f32 %v3261_v16, %v3192_v54  ;;  %v3294_v28 = vadd.f32 %v3262_v27, %v3193_v18  ;;  %v6272_v16 = vld [vmem:[%s6607_s12 + $0x4] ss:$0 sm:$0xff]  ;;  %v6278_v27 = vld [vmem:[#allocation3 + $0x121] sm:$0xff]  ;;  %v6313_v48 = vld [vmem:[#allocation3 + $0x12a] sm:$0xff] }
 0x339   : > { %v6228_v52 = vmax.f32 %v2628_v44, 0.0  ;;  %v2629_v25 = vadd.f32 %v6207_v62, %v2590_v9  ;;  %v2859_v4 = vmul.f32 %v6234_v59, %v6128_v58  ;;  %v2860_v30 = vmul.f32 %v6234_v59, %v6130_v1  ;;  %v6318_v44 = vld [vmem:[%s6607_s12 + $0x8] ss:$0 sm:$0xff] }
 0x33a   : > { %2695 = vst [vmem:[#allocation3 + $0x151] sm:$0xff] %v2662_v34  ;;  %v2663_v37 = vmax.f32 %v6226_v5, 0.0  ;;  %v3395_v29 = vadd.f32 %v3363_v26, %v3293_v47  ;;  %v3396_v38 = vadd.f32 %v3364_v63, %v3294_v28  ;;  %v2960_v23 = vmul.f32 %v6246_v3, %v6132_v40  ;;  %v6280_v26 = vld [vmem:[#allocation3 + $0x129] sm:$0xff] }
 0x33b   : > { %2693 = vst [vmem:[#allocation3 + $0x139] sm:$0xff] %v6228_v52  ;;  %v6251_v58 = vmax.f32 %v2629_v25, 0.0  ;;  %v2891_v1 = vadd.f32 %v2859_v4, %v2758_v15  ;;  %v2892_v43 = vadd.f32 %v2860_v30, %v2759_v39  ;;  %v2961_v14 = vmul.f32 %v6246_v3, %v6139_v51 }
 0x33c   : > { %2696 = vst [vmem:[#allocation3 + $0x159] sm:$0xff] %v2663_v37  ;;  %v3496_v46 = vadd.f32 %v3464_v21, %v3395_v29  ;;  %v3497_v53 = vadd.f32 %v3465_v12, %v3396_v38  ;;  %v3061_v40 = vmul.f32 %v6260_v55, %v6175_v19  ;;  %v3062_v33 = vmul.f32 %v6260_v55, %v6181_v56  ;;  %v6287_v21 = vld [vmem:[%s6607_s12 + $0x5] ss:$0 sm:$0xff] }
 0x33d   : > { %2694 = vst [vmem:[#allocation3 + $0x141] sm:$0xff] %v6251_v58  ;;  %v2992_v51 = vadd.f32 %v2960_v23, %v2891_v1  ;;  %v2993_v0 = vadd.f32 %v2961_v14, %v2892_v43  ;;  %v3162_v11 = vmul.f32 %v6272_v16, %v6116_v20  ;;  %v3163_v2 = vmul.f32 %v6272_v16, %v6135_v45  ;;  %v6291_v20 = vld [vmem:[#allocation3 + $0x122] sm:$0xff] }
 0x33e   : > { %v3597_v7 = vadd.f32 %v3565_v42, %v3496_v46  ;;  %v3598_v49 = vadd.f32 %v3566_v17, %v3497_v53  ;;  %v3263_v12 = vmul.f32 %v6287_v21, %v6187_v6  ;;  %v3264_v13 = vmul.f32 %v6287_v21, %v6189_v8  ;;  %v6307_v42 = vld [vmem:[%s6607_s12 + $0x7] ss:$0 sm:$0xff] }
 0x33f   : > { %v3093_v31 = vadd.f32 %v3061_v40, %v2992_v51  ;;  %v3094_v41 = vadd.f32 %v3062_v33, %v2993_v0  ;;  %v3365_v63 = vmul.f32 %v6298_v50, %v6266_v22  ;;  %v3366_v36 = vmul.f32 %v6298_v50, %v6276_v35 }
 0x340   : > { %v3620_v61 = vpack.c.bf16 %v3598_v49, %v3597_v7  ;;  %v3466_v17 = vmul.f32 %v6307_v42, %v6278_v27  ;;  %v3467_v24 = vmul.f32 %v6307_v42, %v6280_v26  ;;  %v3567_v9 = vmul.f32 %v6318_v44, %v6291_v20 }
 0x341   : > { %v3194_v54 = vadd.f32 %v3162_v11, %v3093_v31  ;;  %v3195_v18 = vadd.f32 %v3163_v2, %v3094_v41  ;;  %v2760_v15 = vmul.f32 %v6218_v60, %v6175_v19  ;;  %v2761_v39 = vmul.f32 %v6218_v60, %v6181_v56 }
 0x342   : > { %4484 = vmatmul.mubr.bf16.gmra.mrb[56].mxu0 %v3620_v61  ;;  %v2861_v47 = vmul.f32 %v6234_v59, %v2824_v10  ;;  %v2862_v28 = vmul.f32 %v6234_v59, %v6135_v45  ;;  %v2962_v25 = vmul.f32 %v6246_v3, %v6187_v6  ;;  %v3568_v29 = vmul.f32 %v6318_v44, %v6313_v48  ;;  %v6353_v10 = vld [vmem:[#allocation3 + $0x138] sm:$0xff] }
 0x343   : > { %v3295_v4 = vadd.f32 %v3263_v12, %v3194_v54  ;;  %v3296_v30 = vadd.f32 %v3264_v13, %v3195_v18  ;;  %v2963_v19 = vmul.f32 %v6246_v3, %v6189_v8  ;;  %v3063_v56 = vmul.f32 %v6260_v55, %v6266_v22 }
 0x344   : > { %v2893_v38 = vadd.f32 %v2861_v47, %v2760_v15  ;;  %v2894_v23 = vadd.f32 %v2862_v28, %v2761_v39  ;;  %v3064_v1 = vmul.f32 %v6260_v55, %v6276_v35  ;;  %v4449_v45 = vpop.f32.mrb[60].mxu1  ;;  %v3164_v6 = vmul.f32 %v6272_v16, %v6278_v27 }
 0x345   : > { %v3397_v43 = vadd.f32 %v3365_v63, %v3295_v4  ;;  %v3398_v14 = vadd.f32 %v3366_v36, %v3296_v30  ;;  %v3165_v46 = vmul.f32 %v6272_v16, %v6280_v26  ;;  %v2595_v53 = vmul.f32 %v6194_v32, %v4449_v45  ;;  %v2543_v8 = vpop.f32.mrb[61].mxu1 }
 0x346   : > { %v2994_v40 = vadd.f32 %v2962_v25, %v2893_v38  ;;  %v2995_v33 = vadd.f32 %v2963_v19, %v2894_v23  ;;  %v3265_v51 = vmul.f32 %v6287_v21, %v6291_v20  ;;  %v2593_v0 = vmul.f32 %v6194_v32, %v2543_v8  ;;  %v4450_v11 = vpop.f32.mrb[62].mxu1  ;;  %v3532_v38 = vld [vmem:[#allocation3 + $0x13a] sm:$0xff] }
 0x347   : > { %v3498_v7 = vadd.f32 %v3466_v17, %v3397_v43  ;;  %v3499_v49 = vadd.f32 %v3467_v24, %v3398_v14  ;;  %v3266_v2 = vmul.f32 %v6287_v21, %v6313_v48  ;;  %v6350_v12 = vadd.f32 %v6207_v62, %v2595_v53  ;;  %v2546_v41 = vpop.f32.mrb[63].mxu1  ;;  %v3331_v24 = vld [vmem:[#allocation3 + $0x140] sm:$0xff] }
 0x348   : > { %v2596_v31 = vmul.f32 %v6194_v32, %v4450_v11  ;;  %v3095_v13 = vadd.f32 %v3063_v56, %v2994_v40  ;;  %v3096_v63 = vadd.f32 %v3064_v1, %v2995_v33  ;;  %v2632_v61 = vadd.f32 %v6207_v62, %v2593_v0  ;;  %v3533_v1 = vld [vmem:[#allocation3 + $0x142] sm:$0xff] }
 0x349   : > { %v2594_v36 = vmul.f32 %v6194_v32, %v2546_v41  ;;  %v3599_v54 = vadd.f32 %v3567_v9, %v3498_v7  ;;  %v3600_v17 = vadd.f32 %v3568_v29, %v3499_v49  ;;  %v2666_v18 = vmax.f32 %v6350_v12, 0.0  ;;  %v3332_v49 = vld [vmem:[#allocation3 + $0x150] sm:$0xff] }
 0x34a   : > { %v6359_v15 = vadd.f32 %v6207_v62, %v2596_v31  ;;  %v3196_v39 = vadd.f32 %v3164_v6, %v3095_v13  ;;  %v3197_v47 = vadd.f32 %v3165_v46, %v3096_v63  ;;  %v6361_v28 = vmax.f32 %v2632_v61, 0.0  ;;  %v2828_v61 = vld [vmem:[#allocation3 + $0x139] sm:$0xff] }
 0x34b   : > { %v2633_v25 = vadd.f32 %v6207_v62, %v2594_v36  ;;  %v3621_v4 = vpack.c.bf16 %v3600_v17, %v3599_v54  ;;  %v3367_v30 = vmul.f32 %v6298_v50, %v6353_v10  ;;  %2699 = vst [vmem:[#allocation3 + $0x181] sm:$0xff] %v2666_v18  ;;  %v3368_v19 = vmul.f32 %v6298_v50, %v3331_v24 }
 0x34c   : > { %v2667_v32 = vmax.f32 %v6359_v15, 0.0  ;;  %v3297_v9 = vadd.f32 %v3265_v51, %v3196_v39  ;;  %v3298_v29 = vadd.f32 %v3266_v2, %v3197_v47  ;;  %2697 = vst [vmem:[#allocation3 + $0x169] sm:$0xff] %v6361_v28  ;;  %v3468_v62 = vmul.f32 %v6307_v42, %v6228_v52  ;;  %v3333_v2 = vld [vmem:[#allocation3 + $0x158] sm:$0xff] }
 0x34d   : > { %v6371_v23 = vmax.f32 %v2633_v25, 0.0  ;;  %4487 = vmatprep.mubr.bf16.mxu0 %v3621_v4  ;;  %v3469_v56 = vmul.f32 %v6307_v42, %v6251_v58  ;;  %v2762_v14 = vmul.f32 %v6218_v60, %v6266_v22  ;;  %v2763_v6 = vmul.f32 %v6218_v60, %v6276_v35  ;;  %v3534_v47 = vld [vmem:[#allocation3 + $0x152] sm:$0xff] }
 0x34e   : > { %2700 = vst [vmem:[#allocation3 + $0x189] sm:$0xff] %v2667_v32  ;;  %v3399_v45 = vadd.f32 %v3367_v30, %v3297_v9  ;;  %v3400_v43 = vadd.f32 %v3368_v19, %v3298_v29  ;;  %v3569_v46 = vmul.f32 %v6318_v44, %v3532_v38  ;;  %v2863_v53 = vmul.f32 %v6234_v59, %v6278_v27  ;;  %v3535_v30 = vld [vmem:[#allocation3 + $0x15a] sm:$0xff] }
 0x34f   : > { %2698 = vst [vmem:[#allocation3 + $0x171] sm:$0xff] %v6371_v23  ;;  %v2864_v8 = vmul.f32 %v6234_v59, %v6280_v26  ;;  %v2964_v40 = vmul.f32 %v6246_v3, %v6291_v20  ;;  %v3570_v22 = vmul.f32 %v6318_v44, %v3533_v1  ;;  %v2965_v35 = vmul.f32 %v6246_v3, %v6313_v48 }
 0x350   : > { %v3500_v33 = vadd.f32 %v3468_v62, %v3399_v45  ;;  %v3501_v51 = vadd.f32 %v3469_v56, %v3400_v43  ;;  %v2895_v0 = vadd.f32 %v2863_v53, %v2762_v14  ;;  %v3065_v7 = vmul.f32 %v6260_v55, %v6353_v10  ;;  %v3131_v14 = vld [vmem:[#allocation3 + $0x151] sm:$0xff] }
 0x351   : > { %v2896_v11 = vadd.f32 %v2864_v8, %v2763_v6  ;;  %v3066_v27 = vmul.f32 %v6260_v55, %v3331_v24  ;;  %v3166_v20 = vmul.f32 %v6272_v16, %v6228_v52  ;;  %v3167_v63 = vmul.f32 %v6272_v16, %v6251_v58 }
 0x352   : > { %v3601_v26 = vadd.f32 %v3569_v46, %v3500_v33  ;;  %v3602_v31 = vadd.f32 %v3570_v22, %v3501_v51  ;;  %v2996_v41 = vadd.f32 %v2964_v40, %v2895_v0  ;;  %v3267_v48 = vmul.f32 %v6287_v21, %v3532_v38  ;;  %v3135_v12 = vld [vmem:[#allocation3 + $0x181] sm:$0xff] }
 0x353   : > { %v2997_v13 = vadd.f32 %v2965_v35, %v2896_v11  ;;  %v3268_v54 = vmul.f32 %v6287_v21, %v3533_v1  ;;  %v3369_v17 = vmul.f32 %v6298_v50, %v3332_v49  ;;  %v3370_v39 = vmul.f32 %v6298_v50, %v3333_v2  ;;  %v3334_v33 = vld [vmem:[#allocation3 + $0x168] sm:$0xff] }
 0x354   : > { %v3622_v36 = vpack.c.bf16 %v3602_v31, %v3601_v26  ;;  %v3097_v25 = vadd.f32 %v3065_v7, %v2996_v41  ;;  %v3470_v52 = vmul.f32 %v6307_v42, %v2662_v34  ;;  %v2764_v9 = vmul.f32 %v6218_v60, %v6353_v10  ;;  %v3132_v10 = vld [vmem:[#allocation3 + $0x159] sm:$0xff] }
 0x355   : > { %v3098_v4 = vadd.f32 %v3066_v27, %v2997_v13  ;;  %v2765_v29 = vmul.f32 %v6218_v60, %v3331_v24  ;;  %v2865_v19 = vmul.f32 %v6234_v59, %v2828_v61  ;;  %v2866_v62 = vmul.f32 %v6234_v59, %v6251_v58 }
 0x356   : > { %4488 = vmatmul.mubr.bf16.gmra.mrb[60].mxu0 %v3622_v36  ;;  %v2966_v56 = vmul.f32 %v6246_v3, %v3532_v38  ;;  %v3198_v45 = vadd.f32 %v3166_v20, %v3097_v25  ;;  %v3471_v57 = vmul.f32 %v6307_v42, %v2663_v37  ;;  %v3571_v34 = vmul.f32 %v6318_v44, %v3534_v47  ;;  %v3335_v5 = vld [vmem:[#allocation3 + $0x170] sm:$0xff] }
 0x357   : > { %v3199_v43 = vadd.f32 %v3167_v63, %v3098_v4  ;;  %v3572_v6 = vmul.f32 %v6318_v44, %v3535_v30  ;;  %v2897_v24 = vadd.f32 %v2865_v19, %v2764_v9  ;;  %v2898_v46 = vadd.f32 %v2866_v62, %v2765_v29  ;;  %v3536_v19 = vld [vmem:[#allocation3 + $0x16a] sm:$0xff]  ;;  %v3537_v62 = vld [vmem:[#allocation3 + $0x172] sm:$0xff] }
 0x358   : > { %v2967_v53 = vmul.f32 %v6246_v3, %v3533_v1  ;;  %v3299_v8 = vadd.f32 %v3267_v48, %v3198_v45  ;;  %v3067_v38 = vmul.f32 %v6260_v55, %v3332_v49  ;;  %v3068_v40 = vmul.f32 %v6260_v55, %v3333_v2 }
 0x359   : > { %v3300_v58 = vadd.f32 %v3268_v54, %v3199_v43  ;;  %v2998_v51 = vadd.f32 %v2966_v56, %v2897_v24  ;;  %v3168_v22 = vmul.f32 %v6272_v16, %v3131_v14  ;;  %v3169_v35 = vmul.f32 %v6272_v16, %v3132_v10 }
 0x35a   : > { %v2999_v37 = vadd.f32 %v2967_v53, %v2898_v46  ;;  %v3401_v0 = vadd.f32 %v3369_v17, %v3299_v8  ;;  %v3269_v7 = vmul.f32 %v6287_v21, %v3534_v47  ;;  %v3270_v1 = vmul.f32 %v6287_v21, %v3535_v30 }
 0x35b   : > { %v3402_v11 = vadd.f32 %v3370_v39, %v3300_v58  ;;  %v3099_v27 = vadd.f32 %v3067_v38, %v2998_v51  ;;  %v3371_v31 = vmul.f32 %v6298_v50, %v3334_v33  ;;  %v3372_v20 = vmul.f32 %v6298_v50, %v3335_v5  ;;  %v3336_v38 = vld [vmem:[#allocation3 + $0x180] sm:$0xff] }
 0x35c   : > { %v3100_v26 = vadd.f32 %v3068_v40, %v2999_v37  ;;  %v3502_v41 = vadd.f32 %v3470_v52, %v3401_v0  ;;  %v3472_v63 = vmul.f32 %v6307_v42, %v6361_v28  ;;  %v2766_v48 = vmul.f32 %v6218_v60, %v3332_v49 }
 0x35d   : > { %v3503_v13 = vadd.f32 %v3471_v57, %v3402_v11  ;;  %v3200_v61 = vadd.f32 %v3168_v22, %v3099_v27  ;;  %v2767_v54 = vmul.f32 %v6218_v60, %v3333_v2  ;;  %v2867_v17 = vmul.f32 %v6234_v59, %v3131_v14 }
 0x35e   : > { %v3201_v36 = vadd.f32 %v3169_v35, %v3100_v26  ;;  %v3603_v39 = vadd.f32 %v3571_v34, %v3502_v41  ;;  %v2868_v4 = vmul.f32 %v6234_v59, %v3132_v10  ;;  %v2968_v9 = vmul.f32 %v6246_v3, %v3534_v47 }
 0x35f   : > { %v3604_v25 = vadd.f32 %v3572_v6, %v3503_v13  ;;  %v3301_v29 = vadd.f32 %v3269_v7, %v3200_v61  ;;  %v2899_v56 = vadd.f32 %v2867_v17, %v2766_v48  ;;  %v2969_v45 = vmul.f32 %v6246_v3, %v3535_v30  ;;  %v3337_v7 = vld [vmem:[#allocation3 + $0x188] sm:$0xff] }
 0x360   : > { %v3302_v52 = vadd.f32 %v3270_v1, %v3201_v36  ;;  %v2900_v43 = vadd.f32 %v2868_v4, %v2767_v54  ;;  %v3069_v57 = vmul.f32 %v6260_v55, %v3334_v33  ;;  %v3070_v2 = vmul.f32 %v6260_v55, %v3335_v5  ;;  %v3136_v4 = vld [vmem:[#allocation3 + $0x189] sm:$0xff] }
 0x361   : > { %v3623_v49 = vpack.c.bf16 %v3604_v25, %v3603_v39  ;;  %v3403_v14 = vadd.f32 %v3371_v31, %v3301_v29  ;;  %v3473_v10 = vmul.f32 %v6307_v42, %v6371_v23  ;;  %v3000_v6 = vadd.f32 %v2968_v9, %v2899_v56 }
 0x362   : > { %v3404_v34 = vadd.f32 %v3372_v20, %v3302_v52  ;;  %v3573_v47 = vmul.f32 %v6318_v44, %v3536_v19  ;;  %v3574_v24 = vmul.f32 %v6318_v44, %v3537_v62  ;;  %v3001_v46 = vadd.f32 %v2969_v45, %v2900_v43 }
 0x363   : > { %4491 = vmatprep.mubr.bf16.mxu0 %v3623_v49  ;;  %v3504_v53 = vadd.f32 %v3472_v63, %v3403_v14  ;;  %v3101_v8 = vadd.f32 %v3069_v57, %v3000_v6  ;;  %v3170_v58 = vmul.f32 %v6272_v16, %v6361_v28  ;;  %v3171_v51 = vmul.f32 %v6272_v16, %v6371_v23 }
 0x364   : > { %v3505_v30 = vadd.f32 %v3473_v10, %v3404_v34  ;;  %v3102_v40 = vadd.f32 %v3070_v2, %v3001_v46  ;;  %v3271_v37 = vmul.f32 %v6287_v21, %v3536_v19  ;;  %v3272_v11 = vmul.f32 %v6287_v21, %v3537_v62  ;;  %v3439_v34 = vld [vmem:[#allocation3 + $0x199] sm:$0xff] }
 0x365   : > { %v3605_v22 = vadd.f32 %v3573_v47, %v3504_v53  ;;  %v3202_v0 = vadd.f32 %v3170_v58, %v3101_v8  ;;  %v3373_v27 = vmul.f32 %v6298_v50, %v3336_v38  ;;  %v2768_v26 = vmul.f32 %v6218_v60, %v3334_v33  ;;  %v3541_v8 = vld [vmem:[#allocation3 + $0x1a2] sm:$0xff] }
 0x366   : > { %v3606_v35 = vadd.f32 %v3574_v24, %v3505_v30  ;;  %v3203_v1 = vadd.f32 %v3171_v51, %v3102_v40  ;;  %v2769_v31 = vmul.f32 %v6218_v60, %v3335_v5  ;;  %v2869_v13 = vmul.f32 %v6234_v59, %v6361_v28  ;;  %v3538_v60 = vld [vmem:[#allocation3 + $0x182] sm:$0xff]  ;;  %v3539_v5 = vld [vmem:[#allocation3 + $0x18a] sm:$0xff]  ;;  %v4561_v24 = vld [vmem:[#allocation2 + $0x8] sm:$0xff] }
 0x367   : > { %v3303_v41 = vadd.f32 %v3271_v37, %v3202_v0  ;;  %v2870_v63 = vmul.f32 %v6234_v59, %v6371_v23  ;;  %v3374_v61 = vmul.f32 %v6298_v50, %v3337_v7  ;;  %v3474_v36 = vmul.f32 %v6307_v42, %v2666_v18  ;;  %v3540_v30 = vld [vmem:[#allocation3 + $0x19a] sm:$0xff] }
 0x368   : > { %v3624_v20 = vpack.c.bf16 %v3606_v35, %v3605_v22  ;;  %v3304_v48 = vadd.f32 %v3272_v11, %v3203_v1  ;;  %v2970_v54 = vmul.f32 %v6246_v3, %v3536_v19  ;;  %v2901_v17 = vadd.f32 %v2869_v13, %v2768_v26  ;;  %v6482_v1 = vld [vmem:[%s6605_s10] ss:$0 sm:$0xff] }
 0x369   : > { %v3405_v33 = vadd.f32 %v3373_v27, %v3303_v41  ;;  %v2902_v39 = vadd.f32 %v2870_v63, %v2769_v31  ;;  %v2971_v28 = vmul.f32 %v6246_v3, %v3537_v62  ;;  %v3475_v59 = vmul.f32 %v6307_v42, %v2667_v32  ;;  %v3338_v3 = vld [vmem:[#allocation3 + $0x198] sm:$0xff]  ;;  %v6487_v27 = vld [vmem:[%s6606_s11] ss:$0 sm:$0xff] }
 0x36a   : > { %4492 = vmatmul.mubr.bf16.gmra.mrb[64].mxu0 %v3624_v20  ;;  %v3406_v25 = vadd.f32 %v3374_v61, %v3304_v48  ;;  %v3071_v23 = vmul.f32 %v6260_v55, %v3336_v38  ;;  %v3002_v9 = vadd.f32 %v2970_v54, %v2901_v17  ;;  %v3072_v52 = vmul.f32 %v6260_v55, %v3337_v7  ;;  %v3440_v55 = vld [vmem:[#allocation3 + $0x1a1] sm:$0xff] }
 0x36b   : > { %v3506_v18 = vadd.f32 %v3474_v36, %v3405_v33  ;;  %v3003_v29 = vadd.f32 %v2971_v28, %v2902_v39  ;;  %v3575_v56 = vmul.f32 %v6318_v44, %v3538_v60  ;;  %v3576_v45 = vmul.f32 %v6318_v44, %v3539_v5 }
 0x36c   : > { %v3507_v19 = vadd.f32 %v3475_v59, %v3406_v25  ;;  %v3103_v62 = vadd.f32 %v3071_v23, %v3002_v9  ;;  %v3172_v15 = vmul.f32 %v6272_v16, %v3135_v12  ;;  %v3173_v32 = vmul.f32 %v6272_v16, %v3136_v4 }
 0x36d   : > { %v3104_v49 = vadd.f32 %v3072_v52, %v3003_v29  ;;  %v3607_v43 = vadd.f32 %v3575_v56, %v3506_v18  ;;  %v3273_v2 = vmul.f32 %v6287_v21, %v3538_v60  ;;  %v3274_v14 = vmul.f32 %v6287_v21, %v3539_v5 }
 0x36e   : > { %v3608_v57 = vadd.f32 %v3576_v45, %v3507_v19  ;;  %v3204_v10 = vadd.f32 %v3172_v15, %v3103_v62  ;;  %v3375_v47 = vmul.f32 %v6298_v50, %v3338_v3  ;;  %v3376_v46 = vmul.f32 %v4561_v24, %v6298_v50 }
 0x36f   : > { %v3205_v6 = vadd.f32 %v3173_v32, %v3104_v49  ;;  %v3476_v38 = vmul.f32 %v6307_v42, %v3439_v34  ;;  %v3477_v40 = vmul.f32 %v6307_v42, %v3440_v55  ;;  %v3577_v37 = vmul.f32 %v6318_v44, %v3540_v30 }
 0x370   : > { %v3625_v53 = vpack.c.bf16 %v3608_v57, %v3607_v43  ;;  %v3305_v58 = vadd.f32 %v3273_v2, %v3204_v10  ;;  %v3578_v22 = vmul.f32 %v6318_v44, %v3541_v8 }
 0x371   : > { %v3306_v16 = vadd.f32 %v3274_v14, %v3205_v6 }
 0x372   : > { %4495 = vmatprep.mubr.bf16.mxu0 %v3625_v53  ;;  %v3407_v21 = vadd.f32 %v3375_v47, %v3305_v58 }
 0x373   : > { %v3408_v51 = vadd.f32 %v3376_v46, %v3306_v16 }
 0x374   : > { %v3508_v35 = vadd.f32 %v3476_v38, %v3407_v21 }
 0x375   : > { %v3509_v0 = vadd.f32 %v3477_v40, %v3408_v51 }
 0x376   : > { %v3609_v50 = vadd.f32 %v3577_v37, %v3508_v35 }
 0x377   : > { %v3610_v11 = vadd.f32 %v3578_v22, %v3509_v0 }
 0x379   : > { %v3626_v7 = vpack.c.bf16 %v3610_v11, %v3609_v50 }
 0x37b   : > { %4496 = vmatmul.mubr.bf16.gmra.mrb[68].mxu0 %v3626_v7 }
 0x3c8   : > { %v4469_v42 = vpop.f32.mrb[40].mxu0 }
 0x3c9   : > { %v3861_v44 = vmul.f32 %v4469_v42, %v6482_v1  ;;  %v3725_v26 = vpop.f32.mrb[41].mxu0 }
 0x3ca   : > { %v3859_v31 = vmul.f32 %v6482_v1, %v3725_v26  ;;  %v4470_v20 = vpop.f32.mrb[42].mxu0 }
 0x3cb   : > { %v3900_v41 = vadd.f32 %v6487_v27, %v3861_v44  ;;  %v3862_v13 = vmul.f32 %v4470_v20, %v6482_v1  ;;  %v3728_v63 = vpop.f32.mrb[43].mxu0 }
 0x3cc   : > { %v3898_v48 = vadd.f32 %v6487_v27, %v3859_v31  ;;  %v3860_v61 = vmul.f32 %v6482_v1, %v3728_v63 }
 0x3cd   : > { %v3932_v36 = vmax.f32 %v3900_v41, 0.0  ;;  %v3901_v54 = vadd.f32 %v6487_v27, %v3862_v13 }
 0x3ce   : > { %v3930_v33 = vmax.f32 %v3898_v48, 0.0  ;;  %v3899_v60 = vadd.f32 %v6487_v27, %v3860_v61 }
 0x3cf   : > { %3964 = vst [vmem:[%s6498_s17 + $0x10] sm:$0xff] %v3932_v36  ;;  %v3933_v5 = vmax.f32 %v3901_v54, 0.0 }
 0x3d0   : > { %3962 = vst [vmem:[%s6498_s17] sm:$0xff] %v3930_v33  ;;  %v3931_v17 = vmax.f32 %v3899_v60, 0.0 }
 0x3d1   : > { %3965 = vst [vmem:[%s6498_s17 + $0x18] sm:$0xff] %v3933_v5 }
 0x3d2   : > { %3963 = vst [vmem:[%s6498_s17 + $0x8] sm:$0xff] %v3931_v17 }
 0x3dc   : > { %v4473_v39 = vpop.f32.mrb[44].mxu0 }
 0x3dd   : > { %v3865_v28 = vmul.f32 %v4473_v39, %v6482_v1  ;;  %v3741_v25 = vpop.f32.mrb[45].mxu0 }
 0x3de   : > { %v3863_v59 = vmul.f32 %v6482_v1, %v3741_v25  ;;  %v4474_v23 = vpop.f32.mrb[46].mxu0 }
 0x3df   : > { %v3904_v12 = vadd.f32 %v6487_v27, %v3865_v28  ;;  %v3866_v4 = vmul.f32 %v4474_v23, %v6482_v1  ;;  %v3744_v18 = vpop.f32.mrb[47].mxu0 }
 0x3e0   : > { %v3902_v9 = vadd.f32 %v6487_v27, %v3863_v59  ;;  %v3864_v29 = vmul.f32 %v6482_v1, %v3744_v18 }
 0x3e1   : > { %v3936_v52 = vmax.f32 %v3904_v12, 0.0  ;;  %v3905_v19 = vadd.f32 %v6487_v27, %v3866_v4 }
 0x3e2   : > { %v3934_v56 = vmax.f32 %v3902_v9, 0.0  ;;  %v3903_v45 = vadd.f32 %v6487_v27, %v3864_v29 }
 0x3e3   : > { %3968 = vst [vmem:[%s6498_s17 + $0x30] sm:$0xff] %v3936_v52  ;;  %v3937_v3 = vmax.f32 %v3905_v19, 0.0 }
 0x3e4   : > { %3966 = vst [vmem:[%s6498_s17 + $0x20] sm:$0xff] %v3934_v56  ;;  %v3935_v62 = vmax.f32 %v3903_v45, 0.0 }
 0x3e5   : > { %3969 = vst [vmem:[%s6498_s17 + $0x38] sm:$0xff] %v3937_v3 }
 0x3e6   : > { %3967 = vst [vmem:[%s6498_s17 + $0x28] sm:$0xff] %v3935_v62 }
 0x3ed   : > { %v4477_v49 = vpop.f32.mrb[48].mxu0 }
 0x3ee   : > { %v3869_v15 = vmul.f32 %v4477_v49, %v6482_v1  ;;  %v3757_v32 = vpop.f32.mrb[49].mxu0 }
 0x3ef   : > { %v3867_v43 = vmul.f32 %v6482_v1, %v3757_v32  ;;  %v4478_v57 = vpop.f32.mrb[50].mxu0 }
 0x3f0   : > { %v3908_v2 = vadd.f32 %v6487_v27, %v3869_v15  ;;  %v3870_v14 = vmul.f32 %v4478_v57, %v6482_v1  ;;  %v3760_v34 = vpop.f32.mrb[51].mxu0 }
 0x3f1   : > { %v3906_v55 = vadd.f32 %v6487_v27, %v3867_v43  ;;  %v3868_v10 = vmul.f32 %v6482_v1, %v3760_v34 }
 0x3f2   : > { %v3940_v6 = vmax.f32 %v3908_v2, 0.0  ;;  %v3909_v47 = vadd.f32 %v6487_v27, %v3870_v14 }
 0x3f3   : > { %v3938_v24 = vmax.f32 %v3906_v55, 0.0  ;;  %v3907_v46 = vadd.f32 %v6487_v27, %v3868_v10 }
 0x3f4   : > { %3972 = vst [vmem:[%s6498_s17 + $0x50] sm:$0xff] %v3940_v6  ;;  %v3941_v53 = vmax.f32 %v3909_v47, 0.0 }
 0x3f5   : > { %3970 = vst [vmem:[%s6498_s17 + $0x40] sm:$0xff] %v3938_v24  ;;  %v3939_v30 = vmax.f32 %v3907_v46, 0.0 }
 0x3f6   : > { %3973 = vst [vmem:[%s6498_s17 + $0x58] sm:$0xff] %v3941_v53 }
 0x3f7   : > { %3971 = vst [vmem:[%s6498_s17 + $0x48] sm:$0xff] %v3939_v30 }
 0x401   : > { %v4481_v8 = vpop.f32.mrb[52].mxu0 }
 0x402   : > { %v3873_v58 = vmul.f32 %v4481_v8, %v6482_v1  ;;  %v3773_v16 = vpop.f32.mrb[53].mxu0 }
 0x403   : > { %v3871_v38 = vmul.f32 %v6482_v1, %v3773_v16  ;;  %v4482_v40 = vpop.f32.mrb[54].mxu0 }
 0x404   : > { %v3912_v21 = vadd.f32 %v6487_v27, %v3873_v58  ;;  %v3874_v51 = vmul.f32 %v4482_v40, %v6482_v1  ;;  %v3776_v37 = vpop.f32.mrb[55].mxu0 }
 0x405   : > { %v3910_v22 = vadd.f32 %v6487_v27, %v3871_v38  ;;  %v3872_v35 = vmul.f32 %v6482_v1, %v3776_v37 }
 0x406   : > { %v3944_v0 = vmax.f32 %v3912_v21, 0.0  ;;  %v3913_v50 = vadd.f32 %v6487_v27, %v3874_v51 }
 0x407   : > { %v3942_v11 = vmax.f32 %v3910_v22, 0.0  ;;  %v3911_v7 = vadd.f32 %v6487_v27, %v3872_v35 }
 0x408   : > { %3976 = vst [vmem:[%s6498_s17 + $0x70] sm:$0xff] %v3944_v0  ;;  %v3945_v42 = vmax.f32 %v3913_v50, 0.0 }
 0x409   : > { %3974 = vst [vmem:[%s6498_s17 + $0x60] sm:$0xff] %v3942_v11  ;;  %v3943_v44 = vmax.f32 %v3911_v7, 0.0 }
 0x40a   : > { %3977 = vst [vmem:[%s6498_s17 + $0x78] sm:$0xff] %v3945_v42 }
 0x40b   : > { %3975 = vst [vmem:[%s6498_s17 + $0x68] sm:$0xff] %v3943_v44 }
 0x415   : > { %v4485_v26 = vpop.f32.mrb[56].mxu0 }
 0x416   : > { %v3877_v31 = vmul.f32 %v4485_v26, %v6482_v1  ;;  %v3789_v20 = vpop.f32.mrb[57].mxu0 }
 0x417   : > { %v3875_v41 = vmul.f32 %v6482_v1, %v3789_v20  ;;  %v4486_v13 = vpop.f32.mrb[58].mxu0 }
 0x418   : > { %v3916_v63 = vadd.f32 %v6487_v27, %v3877_v31  ;;  %v3878_v48 = vmul.f32 %v4486_v13, %v6482_v1  ;;  %v3792_v61 = vpop.f32.mrb[59].mxu0 }
 0x419   : > { %v3914_v36 = vadd.f32 %v6487_v27, %v3875_v41  ;;  %v3876_v54 = vmul.f32 %v6482_v1, %v3792_v61 }
 0x41a   : > { %v3948_v33 = vmax.f32 %v3916_v63, 0.0  ;;  %v3917_v60 = vadd.f32 %v6487_v27, %v3878_v48 }
 0x41b   : > { %v3946_v5 = vmax.f32 %v3914_v36, 0.0  ;;  %v3915_v17 = vadd.f32 %v6487_v27, %v3876_v54 }
 0x41c   : > { %3980 = vst [vmem:[%s6498_s17 + $0x90] sm:$0xff] %v3948_v33  ;;  %v3949_v39 = vmax.f32 %v3917_v60, 0.0 }
 0x41d   : > { %3978 = vst [vmem:[%s6498_s17 + $0x80] sm:$0xff] %v3946_v5  ;;  %v3947_v28 = vmax.f32 %v3915_v17, 0.0 }
 0x41e   : > { %3981 = vst [vmem:[%s6498_s17 + $0x98] sm:$0xff] %v3949_v39 }
 0x41f   : > { %3979 = vst [vmem:[%s6498_s17 + $0x88] sm:$0xff] %v3947_v28 }
 0x429   : > { %v4489_v25 = vpop.f32.mrb[60].mxu0 }
 0x42a   : > { %v3881_v59 = vmul.f32 %v4489_v25, %v6482_v1  ;;  %v3805_v23 = vpop.f32.mrb[61].mxu0 }
 0x42b   : > { %v3879_v12 = vmul.f32 %v6482_v1, %v3805_v23  ;;  %v4490_v4 = vpop.f32.mrb[62].mxu0 }
 0x42c   : > { %v3920_v18 = vadd.f32 %v6487_v27, %v3881_v59  ;;  %v3882_v9 = vmul.f32 %v4490_v4, %v6482_v1  ;;  %v3808_v29 = vpop.f32.mrb[63].mxu0 }
 0x42d   : > { %v3918_v52 = vadd.f32 %v6487_v27, %v3879_v12  ;;  %v3880_v19 = vmul.f32 %v6482_v1, %v3808_v29 }
 0x42e   : > { %v3952_v56 = vmax.f32 %v3920_v18, 0.0  ;;  %v3921_v45 = vadd.f32 %v6487_v27, %v3882_v9 }
 0x42f   : > { %v3950_v3 = vmax.f32 %v3918_v52, 0.0  ;;  %v3919_v62 = vadd.f32 %v6487_v27, %v3880_v19 }
 0x430   : > { %3984 = vst [vmem:[%s6498_s17 + $0xb0] sm:$0xff] %v3952_v56  ;;  %v3953_v49 = vmax.f32 %v3921_v45, 0.0 }
 0x431   : > { %3982 = vst [vmem:[%s6498_s17 + $0xa0] sm:$0xff] %v3950_v3  ;;  %v3951_v15 = vmax.f32 %v3919_v62, 0.0 }
 0x432   : > { %3985 = vst [vmem:[%s6498_s17 + $0xb8] sm:$0xff] %v3953_v49 }
 0x433   : > { %3983 = vst [vmem:[%s6498_s17 + $0xa8] sm:$0xff] %v3951_v15 }
 0x43d   : > { %v4493_v32 = vpop.f32.mrb[64].mxu0 }
 0x43e   : > { %v3885_v43 = vmul.f32 %v4493_v32, %v6482_v1  ;;  %v3821_v57 = vpop.f32.mrb[65].mxu0 }
 0x43f   : > { %v3883_v2 = vmul.f32 %v6482_v1, %v3821_v57  ;;  %v4494_v14 = vpop.f32.mrb[66].mxu0 }
 0x440   : > { %v3924_v34 = vadd.f32 %v6487_v27, %v3885_v43  ;;  %v3886_v55 = vmul.f32 %v4494_v14, %v6482_v1  ;;  %v3824_v10 = vpop.f32.mrb[67].mxu0 }
 0x441   : > { %v3922_v6 = vadd.f32 %v6487_v27, %v3883_v2  ;;  %v3884_v47 = vmul.f32 %v6482_v1, %v3824_v10 }
 0x442   : > { %v3956_v24 = vmax.f32 %v3924_v34, 0.0  ;;  %v3925_v46 = vadd.f32 %v6487_v27, %v3886_v55 }
 0x443   : > { %v3954_v53 = vmax.f32 %v3922_v6, 0.0  ;;  %v3923_v30 = vadd.f32 %v6487_v27, %v3884_v47 }
 0x444   : > { %3988 = vst [vmem:[%s6498_s17 + $0xd0] sm:$0xff] %v3956_v24  ;;  %v3957_v8 = vmax.f32 %v3925_v46, 0.0 }
 0x445   : > { %3986 = vst [vmem:[%s6498_s17 + $0xc0] sm:$0xff] %v3954_v53  ;;  %v3955_v58 = vmax.f32 %v3923_v30, 0.0 }
 0x446   : > { %3989 = vst [vmem:[%s6498_s17 + $0xd8] sm:$0xff] %v3957_v8 }
 0x447   : > { %3987 = vst [vmem:[%s6498_s17 + $0xc8] sm:$0xff] %v3955_v58 }
 0x44e   : > { %v4497_v16 = vpop.f32.mrb[68].mxu0 }
 0x44f   : > { %v3889_v38 = vmul.f32 %v4497_v16, %v6482_v1  ;;  %v3837_v40 = vpop.f32.mrb[69].mxu0 }
 0x450   : > { %v3887_v21 = vmul.f32 %v6482_v1, %v3837_v40  ;;  %v4498_v51 = vpop.f32.mrb[70].mxu0 }
 0x451   : > { %v3928_v37 = vadd.f32 %v6487_v27, %v3889_v38  ;;  %v3890_v22 = vmul.f32 %v4498_v51, %v6482_v1  ;;  %v3840_v35 = vpop.f32.mrb[71].mxu0 }
 0x452   : > { %v3926_v0 = vadd.f32 %v6487_v27, %v3887_v21  ;;  %v3888_v50 = vmul.f32 %v6482_v1, %v3840_v35 }
 0x453   : > { %v3960_v11 = vmax.f32 %v3928_v37, 0.0  ;;  %v3929_v7 = vadd.f32 %v6487_v27, %v3890_v22 }
 0x454   : > { %v3958_v42 = vmax.f32 %v3926_v0, 0.0  ;;  %v3927_v44 = vadd.f32 %v6487_v27, %v3888_v50 }
 0x455   : > { %3992 = vst [vmem:[%s6498_s17 + $0xf0] sm:$0xff] %v3960_v11  ;;  %v3961_v26 = vmax.f32 %v3929_v7, 0.0 }
 0x456   : > { %3990 = vst [vmem:[%s6498_s17 + $0xe0] sm:$0xff] %v3958_v42  ;;  %v3959_v31 = vmax.f32 %v3927_v44, 0.0 }
 0x457   : > { %3993 = vst [vmem:[%s6498_s17 + $0xf8] sm:$0xff] %v3961_v26 }
 0x458   : > { %3991 = vst [vmem:[%s6498_s17 + $0xe8] sm:$0xff] %v3959_v31 }
 0x459 PF: > { %s23_s25 = sadd.s32 1, %s4568_s25  }
 0x45a   : > { %p20_p4 = scmp.ge.s32.totalorder %s23_s25, 4  }
 0x45c   :  { %22 = sbr.rel (!%p20_p4) target bundleno = 1 (0x1), region = 111 }

// kernel: up_forward.1
= control target key start
LH: loop header
LB: loop body
LE: loop exit
PB: predicated region body
PF: predicated region fallthrough
CT: control target
= control target key end

     0   :  { %s4641_s25 = smov 0   ;;  %s6595_s0 = inlined_call_operand.vmem [shape: f32[2,8,8,4], index: 0, kind: input, shape index: {}]   ;;  %s6596_s1 = inlined_call_operand.vmem [shape: f32[2,16,16,4], index: 1, kind: input, shape index: {}]   ;;  %s6597_s2 = inlined_call_operand.vmem [shape: bf16[256,64], index: 2, kind: input, shape index: {}]   ;;  %s6598_s3 = inlined_call_operand.vmem [shape: f32[4,128], index: 3, kind: input, shape index: {}]   ;;  %s6599_s4 = inlined_call_operand.vmem [shape: f32[4,128], index: 4, kind: input, shape index: {}]   ;;  %s6600_s5 = inlined_call_operand.vmem [shape: bf16[128,128], index: 5, kind: input, shape index: {}]   ;;  %s6601_s6 = inlined_call_operand.vmem [shape: f32[1,128], index: 6, kind: input, shape index: {}]   ;;  %s6602_s7 = inlined_call_operand.vmem [shape: f32[1,128], index: 7, kind: input, shape index: {}]   ;;  %s6603_s8 = inlined_call_operand.vmem [shape: f32[9,128], index: 8, kind: input, shape index: {}]   ;;  %s6604_s9 = inlined_call_operand.vmem [shape: bf16[128,128], index: 9, kind: input, shape index: {}]   ;;  %s6605_s10 = inlined_call_operand.vmem [shape: f32[1,128], index: 10, kind: input, shape index: {}]   ;;  %s6606_s11 = inlined_call_operand.vmem [shape: f32[1,128], index: 11, kind: input, shape index: {}]   ;;  %s6607_s12 = inlined_call_operand.vmem [shape: f32[9,128], index: 12, kind: input, shape index: {}]   ;;  %s6608_s13 = inlined_call_operand.vmem [shape: f32[2,256,128], index: 13, kind: output, shape index: {}]  }
   0x1 LB: > { %s4061_s26 = sadd.s32 4294967295, %s4568_s25   ;;  %p4065_p0 = scmp.ge.s32.totalorder %s4568_s25, 1  ;;  %s4568_s25 = sphi %s4641_s25, %s23_s25  }
   0x2   : > { %p397_p1 = scmp.lt.s32.totalorder %s4568_s25, 3 }
   0x4   : > { %p398_p2 = pnand %p4065_p0, %p397_p1 }
   0x6   : > { %401 = sbr.rel (%p398_p2) target bundleno = 1113 (0x459), region = 72 }
   0xd   : > { %v589_v0 = vld [vmem:[%s6598_s3] sm:$0xf]  ;;  %vm615_vm0 = vcmask 1043456   ;;  %p446_p3 = scmp.lt.s32.totalorder %s4061_s26, 1  ;;  %vm590_vm1 = vcmask 31744   ;;  %vm840_vm2 = vcmask 523264  }
   0xe   : > { %4299 = vmatprep.subr.msk.mxu0 %vm615_vm0, %v589_v0  ;;  %v580_v9 = vld [vmem:[%s6599_s4] sm:$0xf]  ;;  %v4509_v56 = vld [vmem:[%s6597_s2 + $0x8] sm:$0xff]   ;;  %v4510_v57 = vld [vmem:[%s6597_s2 + $0x10] sm:$0xff]  }
   0xf   : > { %4300 = vmatpush3.msk.msra.mxu0 %vm615_vm0, %v589_v0  ;;  %s6644_s26 = smov (!%p446_p3, %s4061_s26), 1  ;;  %v4508_v13 = vld [vmem:[%s6597_s2] sm:$0xff]   ;;  %v4525_v58 = vld [vmem:[%s6600_s5 + $0x8] sm:$0xff]   ;;  %v4526_v59 = vld [vmem:[%s6600_s5 + $0x10] sm:$0xff]  }
  0x10   : > { %s4186_s29 = sshll.u32 %s6644_s26, 6  ;;  %s4187_s18 = sshll.u32 %s6644_s26, 8  ;;  %4353 = vmatprep.subr.msk.mxu0 %vm615_vm0, %v580_v9  ;;  %4321 = vmatprep.mubr.msk.bf16.mxu1 %vm840_vm2, %v4508_v13  ;;  %v4524_v55 = vld [vmem:[%s6600_s5] sm:$0xff]   ;;  %v4511_v60 = vld [vmem:[%s6597_s2 + $0x18] sm:$0xff]   ;;  %v4513_v63 = vld [vmem:[%s6597_s2 + $0x28] sm:$0xff]   ;;  %v4570_v13 = vmov 0.0  }
  0x11   : > { %s450_s15 = scalar_lea.vmem %s6595_s0, %s4186_s29  ;;  %s4679_s21 = scalar_lea.vmem %s6596_s1, %s4187_s18  ;;  %v4512_v61 = vld [vmem:[%s6597_s2 + $0x20] sm:$0xff]   ;;  %v4527_v62 = vld [vmem:[%s6600_s5 + $0x18] sm:$0xff]   ;;  %v4514_v0 = vld [vmem:[%s6597_s2 + $0x30] sm:$0xff]   ;;  %462 = vst [vmem:[#allocation2] sm:$0xff] %v4570_v13 }
  0x12   : > { %v581_v1 = vld [vmem:[%s450_s15] sm:$0xff]  ;;  %v582_v2 = vld [vmem:[%s450_s15 + $0x8] sm:$0xff]  ;;  %v583_v3 = vld [vmem:[%s450_s15 + $0x10] sm:$0xff]  ;;  %463 = vst [vmem:[#allocation2 + $0x8] sm:$0xff] %v4570_v13  ;;  %s6498_s17 = scalar_lea.vmem %s6608_s13, %s4187_s18 }
  0x13   : > { %4301 = vmatprep.mubr.msk.f32.mxu0 %vm590_vm1, %v581_v1  ;;  %v584_v4 = vld [vmem:[%s450_s15 + $0x18] sm:$0xff]  ;;  %v585_v5 = vld [vmem:[%s450_s15 + $0x20] sm:$0xff]  ;;  %v586_v6 = vld [vmem:[%s450_s15 + $0x28] sm:$0xff]  ;;  %464 = vst [vmem:[#allocation2 + $0x10] sm:$0xff] %v4570_v13 }
  0x14   : > { %4302 = vmatmul.mubr.msk.f32.vlgmr.msra.gmra.mrb[0].mxu0 %vm590_vm1, %v582_v2  ;;  %v587_v7 = vld [vmem:[%s450_s15 + $0x30] sm:$0xff]  ;;  %v588_v8 = vld [vmem:[%s450_s15 + $0x38] sm:$0xff]  ;;  %v548_v10 = vld [vmem:[%s4679_s21] sm:$0xff]  ;;  %470 = vst [vmem:[#allocation2 + $0x18] sm:$0x1] %v4570_v13 }
  0x15   : > { %4304 = vmatprep.mubr.msk.f32.mxu0 %vm590_vm1, %v583_v3  ;;  %4354 = vmatpush3.msk.msra.mxu0 %vm615_vm0, %v580_v9  ;;  %v549_v11 = vld [vmem:[%s4679_s21 + $0x8] sm:$0xff]  ;;  %v550_v12 = vld [vmem:[%s4679_s21 + $0x10] sm:$0xff]  ;;  %v551_v14 = vld [vmem:[%s4679_s21 + $0x18] sm:$0xff]  ;;  %471 = vst [vmem:[#allocation2 + $0x30] sm:$0x1] %v4570_v13 }
  0x16   : > { %v552_v15 = vld [vmem:[%s4679_s21 + $0x20] sm:$0xff]  ;;  %v553_v16 = vld [vmem:[%s4679_s21 + $0x28] sm:$0xff]  ;;  %v554_v17 = vld [vmem:[%s4679_s21 + $0x30] sm:$0xff]  ;;  %488 = vst [vmem:[#allocation2 + $0x29] sm:$0x7f] %v4570_v13 }
  0x17   : > { %v555_v18 = vld [vmem:[%s4679_s21 + $0x38] sm:$0xff]  ;;  %v556_v19 = vld [vmem:[%s4679_s21 + $0x40] sm:$0xff]  ;;  %v557_v20 = vld [vmem:[%s4679_s21 + $0x48] sm:$0xff]  ;;  %489 = vst [vmem:[#allocation2 + $0x41] sm:$0x7f] %v4570_v13 }
  0x18   : > { %4305 = vmatmul.mubr.msk.f32.gmra.mrb[2].mxu0 %vm590_vm1, %v584_v4  ;;  %v558_v21 = vld [vmem:[%s4679_s21 + $0x50] sm:$0xff]  ;;  %v559_v22 = vld [vmem:[%s4679_s21 + $0x58] sm:$0xff]  ;;  %v560_v23 = vld [vmem:[%s4679_s21 + $0x60] sm:$0xff]  ;;  %466 = vst [vmem:[#allocation2 + $0x198] sm:$0xff] %v4570_v13 }
  0x19   : > { %4307 = vmatprep.mubr.msk.f32.mxu0 %vm590_vm1, %v585_v5  ;;  %v561_v24 = vld [vmem:[%s4679_s21 + $0x68] sm:$0xff]  ;;  %v562_v25 = vld [vmem:[%s4679_s21 + $0x70] sm:$0xff]  ;;  %v563_v26 = vld [vmem:[%s4679_s21 + $0x78] sm:$0xff]  ;;  %467 = vst [vmem:[#allocation2 + $0x1a0] sm:$0xff] %v4570_v13 }
  0x1a   : > { %v564_v27 = vld [vmem:[%s4679_s21 + $0x80] sm:$0xff]  ;;  %v565_v28 = vld [vmem:[%s4679_s21 + $0x88] sm:$0xff]  ;;  %v566_v29 = vld [vmem:[%s4679_s21 + $0x90] sm:$0xff]  ;;  %468 = vst [vmem:[#allocation2 + $0x1a8] sm:$0xff] %v4570_v13 }
  0x1b   : > { %v567_v30 = vld [vmem:[%s4679_s21 + $0x98] sm:$0xff]  ;;  %v568_v31 = vld [vmem:[%s4679_s21 + $0xa0] sm:$0xff]  ;;  %v569_v32 = vld [vmem:[%s4679_s21 + $0xa8] sm:$0xff]  ;;  %472 = vst [vmem:[#allocation2 + $0x48] sm:$0x1] %v4570_v13 }
  0x1c   : > { %4308 = vmatmul.mubr.msk.f32.gmra.mrb[4].mxu0 %vm590_vm1, %v586_v6  ;;  %v570_v33 = vld [vmem:[%s4679_s21 + $0xb0] sm:$0xff]  ;;  %v571_v34 = vld [vmem:[%s4679_s21 + $0xb8] sm:$0xff]  ;;  %v572_v35 = vld [vmem:[%s4679_s21 + $0xc0] sm:$0xff]  ;;  %473 = vst [vmem:[#allocation2 + $0x60] sm:$0x1] %v4570_v13 }
  0x1d   : > { %4310 = vmatprep.mubr.msk.f32.mxu0 %vm590_vm1, %v587_v7  ;;  %v573_v36 = vld [vmem:[%s4679_s21 + $0xc8] sm:$0xff]  ;;  %v574_v37 = vld [vmem:[%s4679_s21 + $0xd0] sm:$0xff]  ;;  %v575_v38 = vld [vmem:[%s4679_s21 + $0xd8] sm:$0xff]  ;;  %474 = vst [vmem:[#allocation2 + $0x78] sm:$0x1] %v4570_v13 }
  0x1e   : > { %v576_v39 = vld [vmem:[%s4679_s21 + $0xe0] sm:$0xff]  ;;  %v577_v40 = vld [vmem:[%s4679_s21 + $0xe8] sm:$0xff]  ;;  %v578_v41 = vld [vmem:[%s4679_s21 + $0xf0] sm:$0xff]  ;;  %475 = vst [vmem:[#allocation2 + $0x90] sm:$0x1] %v4570_v13 }
  0x1f   : > { %v579_v42 = vld [vmem:[%s4679_s21 + $0xf8] sm:$0xff]  ;;  %v4516_v2 = vld [vmem:[%s6597_s2 + $0x40] sm:$0xff]   ;;  %v4517_v3 = vld [vmem:[%s6597_s2 + $0x48] sm:$0xff]   ;;  %476 = vst [vmem:[#allocation2 + $0xa8] sm:$0x1] %v4570_v13 }
  0x20   : > { %4311 = vmatmul.mubr.msk.f32.gmra.mrb[6].mxu0 %vm590_vm1, %v588_v8  ;;  %v4515_v1 = vld [vmem:[%s6597_s2 + $0x38] sm:$0xff]   ;;  %v4518_v4 = vld [vmem:[%s6597_s2 + $0x50] sm:$0xff]   ;;  %v4520_v6 = vld [vmem:[%s6597_s2 + $0x60] sm:$0xff]   ;;  %477 = vst [vmem:[#allocation2 + $0xc0] sm:$0x1] %v4570_v13 }
  0x21   : > { %4355 = vmatprep.mubr.msk.f32.mxu0 %vm590_vm1, %v548_v10  ;;  %v4519_v5 = vld [vmem:[%s6597_s2 + $0x58] sm:$0xff]   ;;  %v4521_v7 = vld [vmem:[%s6597_s2 + $0x68] sm:$0xff]   ;;  %v4522_v8 = vld [vmem:[%s6597_s2 + $0x70] sm:$0xff]   ;;  %478 = vst [vmem:[#allocation2 + $0xd8] sm:$0x1] %v4570_v13 }
  0x22   : > { %v4523_v9 = vld [vmem:[%s6597_s2 + $0x78] sm:$0xff]   ;;  %479 = vst [vmem:[#allocation2 + $0xf0] sm:$0x1] %v4570_v13  ;;  %480 = vst [vmem:[#allocation2 + $0x108] sm:$0x1] %v4570_v13 }
  0x23   : > { %481 = vst [vmem:[#allocation2 + $0x120] sm:$0x1] %v4570_v13  ;;  %482 = vst [vmem:[#allocation2 + $0x138] sm:$0x1] %v4570_v13 }
  0x24   : > { %4356 = vmatmul.mubr.msk.f32.vlgmr.msra.gmra.mrb[8].mxu0 %vm590_vm1, %v549_v11  ;;  %483 = vst [vmem:[#allocation2 + $0x150] sm:$0x1] %v4570_v13  ;;  %484 = vst [vmem:[#allocation2 + $0x168] sm:$0x1] %v4570_v13 }
  0x25   : > { %4358 = vmatprep.mubr.msk.f32.mxu0 %vm590_vm1, %v550_v12  ;;  %485 = vst [vmem:[#allocation2 + $0x180] sm:$0x1] %v4570_v13  ;;  %490 = vst [vmem:[#allocation2 + $0x59] sm:$0x7f] %v4570_v13 }
  0x26   : > { %491 = vst [vmem:[#allocation2 + $0x71] sm:$0x7f] %v4570_v13  ;;  %492 = vst [vmem:[#allocation2 + $0x89] sm:$0x7f] %v4570_v13 }
  0x27   : > { %493 = vst [vmem:[#allocation2 + $0xa1] sm:$0x7f] %v4570_v13  ;;  %494 = vst [vmem:[#allocation2 + $0xb9] sm:$0x7f] %v4570_v13 }
  0x28   : > { %4359 = vmatmul.mubr.msk.f32.gmra.mrb[10].mxu0 %vm590_vm1, %v551_v14  ;;  %495 = vst [vmem:[#allocation2 + $0xd1] sm:$0x7f] %v4570_v13  ;;  %496 = vst [vmem:[#allocation2 + $0xe9] sm:$0x7f] %v4570_v13 }
  0x29   : > { %4361 = vmatprep.mubr.msk.f32.mxu0 %vm590_vm1, %v552_v15  ;;  %497 = vst [vmem:[#allocation2 + $0x101] sm:$0x7f] %v4570_v13  ;;  %498 = vst [vmem:[#allocation2 + $0x119] sm:$0x7f] %v4570_v13  ;;  %v4528_v15 = vld [vmem:[%s6600_s5 + $0x20] sm:$0xff]  }
  0x2a   : > { %499 = vst [vmem:[#allocation2 + $0x131] sm:$0x7f] %v4570_v13  ;;  %500 = vst [vmem:[#allocation2 + $0x149] sm:$0x7f] %v4570_v13 }
  0x2b   : > { %501 = vst [vmem:[#allocation2 + $0x161] sm:$0x7f] %v4570_v13  ;;  %502 = vst [vmem:[#allocation2 + $0x179] sm:$0x7f] %v4570_v13 }
  0x2c   : > { %4362 = vmatmul.mubr.msk.f32.gmra.mrb[12].mxu0 %vm590_vm1, %v553_v16  ;;  %503 = vst [vmem:[#allocation2 + $0x191] sm:$0x7f] %v4570_v13  ;;  %505 = vst [vmem:[#allocation3] sm:$0xff] %v4570_v13 }
  0x2d   : > { %4364 = vmatprep.mubr.msk.f32.mxu0 %vm590_vm1, %v554_v17  ;;  %506 = vst [vmem:[#allocation3 + $0x8] sm:$0xff] %v4570_v13  ;;  %507 = vst [vmem:[#allocation3 + $0x10] sm:$0xff] %v4570_v13 }
  0x2e   : > { %509 = vst [vmem:[#allocation3 + $0x198] sm:$0xff] %v4570_v13  ;;  %510 = vst [vmem:[#allocation3 + $0x1a0] sm:$0xff] %v4570_v13 }
  0x2f   : > { %511 = vst [vmem:[#allocation3 + $0x1a8] sm:$0xff] %v4570_v13  ;;  %513 = vst [vmem:[#allocation3 + $0x18] sm:$0x1] %v4570_v13 }
  0x30   : > { %4365 = vmatmul.mubr.msk.f32.gmra.mrb[14].mxu0 %vm590_vm1, %v555_v18  ;;  %514 = vst [vmem:[#allocation3 + $0x30] sm:$0x1] %v4570_v13  ;;  %515 = vst [vmem:[#allocation3 + $0x48] sm:$0x1] %v4570_v13 }
  0x31   : > { %4367 = vmatprep.mubr.msk.f32.mxu0 %vm590_vm1, %v556_v19  ;;  %516 = vst [vmem:[#allocation3 + $0x60] sm:$0x1] %v4570_v13  ;;  %517 = vst [vmem:[#allocation3 + $0x78] sm:$0x1] %v4570_v13 }
  0x32   : > { %518 = vst [vmem:[#allocation3 + $0x90] sm:$0x1] %v4570_v13  ;;  %519 = vst [vmem:[#allocation3 + $0xa8] sm:$0x1] %v4570_v13 }
  0x33   : > { %520 = vst [vmem:[#allocation3 + $0xc0] sm:$0x1] %v4570_v13  ;;  %521 = vst [vmem:[#allocation3 + $0xd8] sm:$0x1] %v4570_v13 }
  0x34   : > { %4368 = vmatmul.mubr.msk.f32.gmra.mrb[16].mxu0 %vm590_vm1, %v557_v20  ;;  %522 = vst [vmem:[#allocation3 + $0xf0] sm:$0x1] %v4570_v13  ;;  %523 = vst [vmem:[#allocation3 + $0x108] sm:$0x1] %v4570_v13  ;;  %v4529_v20 = vld [vmem:[%s6600_s5 + $0x28] sm:$0xff]  }
  0x35   : > { %4370 = vmatprep.mubr.msk.f32.mxu0 %vm590_vm1, %v558_v21  ;;  %524 = vst [vmem:[#allocation3 + $0x120] sm:$0x1] %v4570_v13  ;;  %525 = vst [vmem:[#allocation3 + $0x138] sm:$0x1] %v4570_v13 }
  0x36   : > { %526 = vst [vmem:[#allocation3 + $0x150] sm:$0x1] %v4570_v13  ;;  %527 = vst [vmem:[#allocation3 + $0x168] sm:$0x1] %v4570_v13 }
  0x37   : > { %528 = vst [vmem:[#allocation3 + $0x180] sm:$0x1] %v4570_v13  ;;  %531 = vst [vmem:[#allocation3 + $0x29] sm:$0x7f] %v4570_v13 }
  0x38   : > { %4371 = vmatmul.mubr.msk.f32.gmra.mrb[18].mxu0 %vm590_vm1, %v559_v22  ;;  %532 = vst [vmem:[#allocation3 + $0x41] sm:$0x7f] %v4570_v13  ;;  %533 = vst [vmem:[#allocation3 + $0x59] sm:$0x7f] %v4570_v13 }
  0x39   : > { %4373 = vmatprep.mubr.msk.f32.mxu0 %vm590_vm1, %v560_v23  ;;  %534 = vst [vmem:[#allocation3 + $0x71] sm:$0x7f] %v4570_v13  ;;  %535 = vst [vmem:[#allocation3 + $0x89] sm:$0x7f] %v4570_v13 }
  0x3a   : > { %536 = vst [vmem:[#allocation3 + $0xa1] sm:$0x7f] %v4570_v13  ;;  %537 = vst [vmem:[#allocation3 + $0xb9] sm:$0x7f] %v4570_v13 }
  0x3b   : > { %538 = vst [vmem:[#allocation3 + $0xd1] sm:$0x7f] %v4570_v13  ;;  %539 = vst [vmem:[#allocation3 + $0xe9] sm:$0x7f] %v4570_v13 }
  0x3c   : > { %4374 = vmatmul.mubr.msk.f32.gmra.mrb[20].mxu0 %vm590_vm1, %v561_v24  ;;  %540 = vst [vmem:[#allocation3 + $0x101] sm:$0x7f] %v4570_v13  ;;  %541 = vst [vmem:[#allocation3 + $0x119] sm:$0x7f] %v4570_v13 }
  0x3d   : > { %4376 = vmatprep.mubr.msk.f32.mxu0 %vm590_vm1, %v562_v25  ;;  %542 = vst [vmem:[#allocation3 + $0x131] sm:$0x7f] %v4570_v13  ;;  %543 = vst [vmem:[#allocation3 + $0x149] sm:$0x7f] %v4570_v13  ;;  %v4530_v25 = vld [vmem:[%s6600_s5 + $0x30] sm:$0xff]  }
  0x3e   : > { %544 = vst [vmem:[#allocation3 + $0x161] sm:$0x7f] %v4570_v13  ;;  %545 = vst [vmem:[#allocation3 + $0x179] sm:$0x7f] %v4570_v13 }
  0x3f   : > { %546 = vst [vmem:[#allocation3 + $0x191] sm:$0x7f] %v4570_v13  ;;  %469 = vst [vmem:[#allocation2] sm:$0x1] %v4570_v13 }
  0x40   : > { %4377 = vmatmul.mubr.msk.f32.gmra.mrb[22].mxu0 %vm590_vm1, %v563_v26  ;;  %487 = vst [vmem:[#allocation2 + $0x11] sm:$0x7f] %v4570_v13  ;;  %486 = vst [vmem:[#allocation2 + $0x198] sm:$0x1] %v4570_v13 }
  0x41   : > { %4379 = vmatprep.mubr.msk.f32.mxu0 %vm590_vm1, %v564_v27  ;;  %504 = vst [vmem:[#allocation2 + $0x1a9] sm:$0x7f] %v4570_v13  ;;  %512 = vst [vmem:[#allocation3] sm:$0x1] %v4570_v13 }
  0x42   : > { %529 = vst [vmem:[#allocation3 + $0x198] sm:$0x1] %v4570_v13  ;;  %530 = vst [vmem:[#allocation3 + $0x11] sm:$0x7f] %v4570_v13 }
  0x43   : > { %547 = vst [vmem:[#allocation3 + $0x1a9] sm:$0x7f] %v4570_v13  ;;  %v5016_v13 = vld [vmem:[%s6603_s8 + $0x3] ss:$0 sm:$0xff] }
  0x44   : > { %4380 = vmatmul.mubr.msk.f32.gmra.mrb[24].mxu0 %vm590_vm1, %v565_v28 }
  0x45   : > { %4382 = vmatprep.mubr.msk.f32.mxu0 %vm590_vm1, %v566_v29 }
  0x48   : > { %4383 = vmatmul.mubr.msk.f32.gmra.mrb[26].mxu0 %vm590_vm1, %v567_v30  ;;  %v4531_v30 = vld [vmem:[%s6600_s5 + $0x38] sm:$0xff]  }
  0x49   : > { %4385 = vmatprep.mubr.msk.f32.mxu0 %vm590_vm1, %v568_v31 }
  0x4c   : > { %4386 = vmatmul.mubr.msk.f32.gmra.mrb[28].mxu0 %vm590_vm1, %v569_v32 }
  0x4d   : > { %4388 = vmatprep.mubr.msk.f32.mxu0 %vm590_vm1, %v570_v33 }
  0x50   : > { %4389 = vmatmul.mubr.msk.f32.gmra.mrb[30].mxu0 %vm590_vm1, %v571_v34 }
  0x51   : > { %4391 = vmatprep.mubr.msk.f32.mxu0 %vm590_vm1, %v572_v35 }
  0x54   : > { %4392 = vmatmul.mubr.msk.f32.gmra.mrb[32].mxu0 %vm590_vm1, %v573_v36 }
  0x55   : > { %4394 = vmatprep.mubr.msk.f32.mxu0 %vm590_vm1, %v574_v37 }
  0x58   : > { %4395 = vmatmul.mubr.msk.f32.gmra.mrb[34].mxu0 %vm590_vm1, %v575_v38 }
  0x59   : > { %4397 = vmatprep.mubr.msk.f32.mxu0 %vm590_vm1, %v576_v39 }
  0x5c   : > { %4398 = vmatmul.mubr.msk.f32.gmra.mrb[36].mxu0 %vm590_vm1, %v577_v40 }
  0x5d   : > { %4400 = vmatprep.mubr.msk.f32.mxu0 %vm590_vm1, %v578_v41 }
  0x60   : > { %4401 = vmatmul.mubr.msk.f32.gmra.mrb[38].mxu0 %vm590_vm1, %v579_v42 }
  0xe7   : > { %v4303_v43 = vpop.f32.mrb[0].mxu0 }
  0xe8   : > { %v685_v44 = vpop.f32.mrb[1].mxu0 }
  0xe9   : > { %v756_v45 = vpack.c.bf16 %v4303_v43, %v685_v44 }
  0xeb   : > { %v4306_v46 = vpop.f32.mrb[2].mxu0  ;;  %4313 = vmatprep.subr.bf16.mxu1 %v756_v45 }
  0xec   : > { %v695_v47 = vpop.f32.mrb[3].mxu0  ;;  %4314 = vmatpush3.bf16.msra.mxu1 %v756_v45 }
  0xed   : > { %v757_v48 = vpack.c.bf16 %v4306_v46, %v695_v47  ;;  %v1407_v47 = vld [vmem:[#allocation2] sm:$0xff] }
  0xef   : > { %v4309_v49 = vpop.f32.mrb[4].mxu0  ;;  %4315 = vmatprep.subr.bf16.mxu1 %v757_v48 }
  0xf0   : > { %v705_v50 = vpop.f32.mrb[5].mxu0  ;;  %4316 = vmatpush3.bf16.msra.mxu1 %v757_v48  ;;  %v4982_v48 = vld [vmem:[%s6603_s8] ss:$0 sm:$0xff] }
  0xf1   : > { %v758_v51 = vpack.c.bf16 %v4309_v49, %v705_v50  ;;  %v1508_v49 = vld [vmem:[#allocation2 + $0x1] sm:$0xff]  ;;  %v1509_v50 = vld [vmem:[#allocation2 + $0x9] sm:$0xff] }
  0xf3   : > { %v4312_v52 = vpop.f32.mrb[6].mxu0  ;;  %4317 = vmatprep.subr.bf16.mxu1 %v758_v51 }
  0xf4   : > { %v715_v53 = vpop.f32.mrb[7].mxu0  ;;  %4318 = vmatpush3.bf16.msra.mxu1 %v758_v51  ;;  %v4987_v51 = vld [vmem:[%s6603_s8 + $0x1] ss:$0 sm:$0xff] }
  0xf5   : > { %v759_v54 = vpack.c.bf16 %v4312_v52, %v715_v53  ;;  %6626 = vst [vmem:[#allocation19_spill] sm:$0xff] %v4987_v51  ;;  %v1444_v52 = vmul.f32 %v4982_v48, %v1407_v47  ;;  %v1545_v53 = vmul.f32 %v4987_v51, %v1508_v49 }
  0xf7   : > { %4319 = vmatprep.subr.bf16.mxu1 %v759_v54  ;;  %v4821_v10 = vpop.f32.mrb[8].mxu0 }
  0xf8   : > { %4320 = vmatpush3.bf16.msra.mxu1 %v759_v54  ;;  %v4823_v11 = vpop.f32.mrb[9].mxu0  ;;  %v1445_v54 = vmul.f32 0.0, %v4982_v48 }
  0xf9   : > { %4403 = vmatprep.subr.bf16.mxu1 %v4524_v55 }
  0xfb   : > { %4322 = vmatmul.mubr.msk.bf16.vlgmr.msra.gmra.mrb[0].mxu1 %vm840_vm2, %v4509_v56  ;;  %v4825_v12 = vpop.f32.mrb[10].mxu0 }
  0xfc   : > { %4325 = vmatprep.mubr.msk.bf16.mxu1 %vm840_vm2, %v4510_v57  ;;  %4404 = vmatpush3.bf16.msra.mxu1 %v4524_v55  ;;  %v1225_v14 = vpop.f32.mrb[11].mxu0  ;;  %v1546_v55 = vmul.f32 %v4987_v51, %v1509_v50  ;;  %v1609_v57 = vld [vmem:[#allocation2 + $0x2] sm:$0xff] }
  0xfd   : > { %4405 = vmatprep.subr.bf16.mxu1 %v4525_v58 }
  0xff   : > { %v4914_v16 = vpop.f32.mrb[12].mxu0 }
 0x100   : > { %4406 = vmatpush3.bf16.msra.mxu1 %v4525_v58  ;;  %v4916_v17 = vpop.f32.mrb[13].mxu0  ;;  %v1610_v58 = vld [vmem:[#allocation2 + $0xa] sm:$0xff] }
 0x101   : > { %4407 = vmatprep.subr.bf16.mxu1 %v4526_v59 }
 0x103   : > { %4326 = vmatmul.mubr.msk.bf16.gmra.mrb[4].mxu1 %vm840_vm2, %v4511_v60  ;;  %v4918_v18 = vpop.f32.mrb[14].mxu0 }
 0x104   : > { %4329 = vmatprep.mubr.msk.bf16.mxu1 %vm840_vm2, %v4512_v61  ;;  %4408 = vmatpush3.bf16.msra.mxu1 %v4526_v59  ;;  %v4920_v19 = vpop.f32.mrb[15].mxu0  ;;  %v4996_v59 = vld [vmem:[%s6603_s8 + $0x2] ss:$0 sm:$0xff] }
 0x105   : > { %4409 = vmatprep.subr.bf16.mxu1 %v4527_v62 }
 0x107   : > { %v4925_v21 = vpop.f32.mrb[16].mxu0 }
 0x108   : > { %4410 = vmatpush3.bf16.msra.mxu1 %v4527_v62  ;;  %v4927_v22 = vpop.f32.mrb[17].mxu0 }
 0x109   : > { %4411 = vmatprep.subr.bf16.mxu1 %v4528_v15 }
 0x10b   : > { %4330 = vmatmul.mubr.msk.bf16.gmra.mrb[8].mxu1 %vm840_vm2, %v4513_v63  ;;  %v4929_v23 = vpop.f32.mrb[18].mxu0 }
 0x10c   : > { %4333 = vmatprep.mubr.msk.bf16.mxu1 %vm840_vm2, %v4514_v0  ;;  %4412 = vmatpush3.bf16.msra.mxu1 %v4528_v15  ;;  %v4931_v24 = vpop.f32.mrb[19].mxu0  ;;  %v1577_v0 = vadd.f32 %v1545_v53, %v1444_v52 }
 0x10d   : > { %4413 = vmatprep.subr.bf16.mxu1 %v4529_v20 }
 0x10f   : > { %v4936_v26 = vpop.f32.mrb[20].mxu0 }
 0x110   : > { %4414 = vmatpush3.bf16.msra.mxu1 %v4529_v20  ;;  %v4938_v27 = vpop.f32.mrb[21].mxu0 }
 0x111   : > { %4415 = vmatprep.subr.bf16.mxu1 %v4530_v25 }
 0x113   : > { %4334 = vmatmul.mubr.msk.bf16.gmra.mrb[12].mxu1 %vm840_vm2, %v4515_v1  ;;  %v4940_v28 = vpop.f32.mrb[22].mxu0 }
 0x114   : > { %4337 = vmatprep.mubr.msk.bf16.mxu1 %vm840_vm2, %v4516_v2  ;;  %4416 = vmatpush3.bf16.msra.mxu1 %v4530_v25  ;;  %v4942_v29 = vpop.f32.mrb[23].mxu0 }
 0x115   : > { %4417 = vmatprep.subr.bf16.mxu1 %v4531_v30 }
 0x117   : > { %v4947_v31 = vpop.f32.mrb[24].mxu0 }
 0x118   : > { %6611 = vst [vmem:[#allocation4_spill] sm:$0xff] %v4947_v31  ;;  %v4949_v32 = vpop.f32.mrb[25].mxu0  ;;  %4418 = vmatpush3.bf16.msra.mxu1 %v4531_v30 }
 0x119   : > { %6612 = vst [vmem:[#allocation5_spill] sm:$0xff] %v4949_v32 }
 0x11b   : > { %4338 = vmatmul.mubr.msk.bf16.gmra.mrb[16].mxu1 %vm840_vm2, %v4517_v3  ;;  %v4951_v33 = vpop.f32.mrb[26].mxu0  ;;  %v1578_v3 = vadd.f32 %v1546_v55, %v1445_v54 }
 0x11c   : > { %4341 = vmatprep.mubr.msk.bf16.mxu1 %vm840_vm2, %v4518_v4  ;;  %6613 = vst [vmem:[#allocation6_spill] sm:$0xff] %v4951_v33  ;;  %v4953_v34 = vpop.f32.mrb[27].mxu0  ;;  %v1646_v4 = vmul.f32 %v4996_v59, %v1609_v57 }
 0x11f   : > { %v4955_v35 = vpop.f32.mrb[28].mxu0 }
 0x120   : > { %6614 = vst [vmem:[#allocation7_spill] sm:$0xff] %v4955_v35  ;;  %v4957_v36 = vpop.f32.mrb[29].mxu0 }
 0x121   : > { %6615 = vst [vmem:[#allocation8_spill] sm:$0xff] %v4957_v36 }
 0x123   : > { %4342 = vmatmul.mubr.msk.bf16.gmra.mrb[20].mxu1 %vm840_vm2, %v4519_v5  ;;  %v4959_v37 = vpop.f32.mrb[30].mxu0  ;;  %v1647_v5 = vmul.f32 %v4996_v59, %v1610_v58 }
 0x124   : > { %4345 = vmatprep.mubr.msk.bf16.mxu1 %vm840_vm2, %v4520_v6  ;;  %6616 = vst [vmem:[#allocation9_spill] sm:$0xff] %v4959_v37  ;;  %v4961_v38 = vpop.f32.mrb[31].mxu0 }
 0x125   : > { %6617 = vst [vmem:[#allocation10_spill] sm:$0xff] %v4961_v38 }
 0x127   : > { %v4963_v39 = vpop.f32.mrb[32].mxu0 }
 0x128   : > { %6618 = vst [vmem:[#allocation11_spill] sm:$0xff] %v4963_v39  ;;  %v4965_v40 = vpop.f32.mrb[33].mxu0 }
 0x129   : > { %6619 = vst [vmem:[#allocation12_spill] sm:$0xff] %v4965_v40 }
 0x12b   : > { %4346 = vmatmul.mubr.msk.bf16.gmra.mrb[24].mxu1 %vm840_vm2, %v4521_v7  ;;  %v4967_v41 = vpop.f32.mrb[34].mxu0  ;;  %v5006_v7 = vld [vmem:[%s6603_s8 + $0x4] ss:$0 sm:$0xff] }
 0x12c   : > { %4349 = vmatprep.mubr.msk.bf16.mxu1 %vm840_vm2, %v4522_v8  ;;  %6620 = vst [vmem:[#allocation13_spill] sm:$0xff] %v4967_v41  ;;  %v4969_v42 = vpop.f32.mrb[35].mxu0  ;;  %v5011_v8 = vld [vmem:[%s6603_s8 + $0x7] ss:$0 sm:$0xff] }
 0x12d   : > { %6621 = vst [vmem:[#allocation14_spill] sm:$0xff] %v4969_v42 }
 0x12f   : > { %v4971_v43 = vpop.f32.mrb[36].mxu0 }
 0x130   : > { %6622 = vst [vmem:[#allocation15_spill] sm:$0xff] %v4971_v43  ;;  %v4973_v44 = vpop.f32.mrb[37].mxu0 }
 0x131   : > { %6623 = vst [vmem:[#allocation16_spill] sm:$0xff] %v4973_v44 }
 0x133   : > { %4350 = vmatmul.mubr.msk.bf16.gmra.mrb[28].mxu1 %vm840_vm2, %v4523_v9  ;;  %v4975_v45 = vpop.f32.mrb[38].mxu0  ;;  %v1678_v9 = vadd.f32 %v1646_v4, %v1577_v0 }
 0x134   : > { %6624 = vst [vmem:[#allocation17_spill] sm:$0xff] %v4975_v45  ;;  %v4977_v46 = vpop.f32.mrb[39].mxu0 }
 0x135   : > { %6625 = vst [vmem:[#allocation18_spill] sm:$0xff] %v4977_v46 }
 0x1ce   : > { %v4323_v56 = vpop.f32.mrb[0].mxu1 }
 0x1cf   : > { %v1226_v60 = vadd.f32 %v4323_v56, %v1225_v14  ;;  %v923_v61 = vpop.f32.mrb[1].mxu1  ;;  %v5022_v14 = vld [vmem:[%s6603_s8 + $0x6] ss:$0 sm:$0xff] }
 0x1d0   : > { %v1216_v62 = vadd.f32 %v4823_v11, %v923_v61  ;;  %v4324_v63 = vpop.f32.mrb[2].mxu1  ;;  %v1679_v11 = vadd.f32 %v1647_v5, %v1578_v3 }
 0x1d1   : > { %1377 = vst [vmem:[#allocation2 + $0x31] sm:$0xff] %v1226_v60  ;;  %v1231_v1 = vadd.f32 %v4825_v12, %v4324_v63  ;;  %v926_v2 = vpop.f32.mrb[3].mxu1  ;;  %v5025_v15 = vmul.f32 %v5011_v8, %v1226_v60  ;;  %v5028_v20 = vmul.f32 %v5006_v7, %v1226_v60  ;;  %v5031_v25 = vmul.f32 %v4987_v51, %v1226_v60 }
 0x1d2   : > { %1375 = vst [vmem:[#allocation2 + $0x19] sm:$0xff] %v1216_v62  ;;  %v1221_v6 = vadd.f32 %v4821_v10, %v926_v2  ;;  %v1848_v10 = vmul.f32 %v5006_v7, %v1216_v62  ;;  %v1547_v50 = vmul.f32 %v4987_v51, %v1216_v62  ;;  %v5063_v62 = vld [vmem:[%s6603_s8 + $0x5] ss:$0 sm:$0xff] }
 0x1d3   : > { %1378 = vst [vmem:[#allocation2 + $0x39] sm:$0xff] %v1231_v1  ;;  %v5037_v49 = vmul.f32 %v5011_v8, %v1231_v1  ;;  %v5041_v52 = vmul.f32 %v5006_v7, %v1231_v1  ;;  %v5054_v58 = vmul.f32 %v4987_v51, %v1231_v1 }
 0x1d4   : > { %1376 = vst [vmem:[#allocation2 + $0x21] sm:$0xff] %v1221_v6  ;;  %v1849_v55 = vmul.f32 %v5006_v7, %v1221_v6  ;;  %v1548_v57 = vmul.f32 %v4987_v51, %v1221_v6 }
 0x1d6   : > { %v4327_v12 = vpop.f32.mrb[4].mxu1 }
 0x1d7   : > { %v5034_v30 = vadd.f32 %v4327_v12, %v4920_v19  ;;  %v939_v47 = vpop.f32.mrb[5].mxu1  ;;  %v5050_v19 = vld [vmem:[%s6603_s8 + $0x8] ss:$0 sm:$0xff] }
 0x1d8   : > { %v5044_v53 = vadd.f32 %v4916_v17, %v939_v47  ;;  %v4328_v54 = vpop.f32.mrb[6].mxu1  ;;  %v2014_v56 = vld [vmem:[#allocation2 + $0x30] sm:$0xff] }
 0x1d9   : > { %1381 = vst [vmem:[#allocation2 + $0x61] sm:$0xff] %v5034_v30  ;;  %v5058_v60 = vadd.f32 %v4918_v18, %v4328_v54  ;;  %v942_v17 = vpop.f32.mrb[7].mxu1  ;;  %v1710_v61 = vld [vmem:[#allocation2 + $0x18] sm:$0xff]  ;;  %v2051_v63 = vmul.f32 %v5022_v14, %v2014_v56  ;;  %v1749_v0 = vmul.f32 %v5016_v13, %v2014_v56  ;;  %v1448_v2 = vmul.f32 %v4982_v48, %v2014_v56 }
 0x1da   : > { %1379 = vst [vmem:[#allocation2 + $0x49] sm:$0xff] %v5044_v53  ;;  %v5070_v1 = vadd.f32 %v4914_v16, %v942_v17  ;;  %v1747_v18 = vmul.f32 %v5016_v13, %v1710_v61  ;;  %v2015_v3 = vld [vmem:[#allocation2 + $0x38] sm:$0xff]  ;;  %v1446_v6 = vmul.f32 %v4982_v48, %v1710_v61  ;;  %v5078_v12 = vmul.f32 %v5011_v8, %v5044_v53 }
 0x1db   : > { %v2216_v4 = vld [vmem:[#allocation2 + $0x32] sm:$0xff]  ;;  %v5073_v5 = vld [vmem:[#allocation2 + $0x3a] sm:$0xff]  ;;  %1382 = vst [vmem:[#allocation2 + $0x69] sm:$0xff] %v5058_v60  ;;  %v1913_v56 = vld [vmem:[#allocation2 + $0x22] sm:$0xff]  ;;  %v2052_v16 = vmul.f32 %v5022_v14, %v2015_v3  ;;  %v1750_v45 = vmul.f32 %v5016_v13, %v2015_v3 }
 0x1dc   : > { %v1711_v47 = vld [vmem:[#allocation2 + $0x20] sm:$0xff]  ;;  %v2253_v17 = vmul.f32 %v5050_v19, %v2216_v4  ;;  %v5085_v43 = vmul.f32 %v5050_v19, %v5073_v5  ;;  %1380 = vst [vmem:[#allocation2 + $0x51] sm:$0xff] %v5070_v1  ;;  %v1779_v44 = vadd.f32 %v1747_v18, %v1678_v9  ;;  %v1950_v39 = vmul.f32 %v5063_v62, %v1913_v56 }
 0x1dd   : > { %v1912_v54 = vld [vmem:[#allocation2 + $0x1a] sm:$0xff]  ;;  %v1748_v61 = vmul.f32 %v5016_v13, %v1711_v47  ;;  %v1447_v41 = vmul.f32 %v4982_v48, %v1711_v47  ;;  %v1579_v40 = vadd.f32 %v1547_v50, %v1446_v6  ;;  %v1649_v35 = vmul.f32 %v4996_v59, %v1913_v56 }
 0x1de   : > { %v1949_v46 = vmul.f32 %v5063_v62, %v1912_v54  ;;  %v1648_v42 = vmul.f32 %v4996_v59, %v1912_v54  ;;  %v4331_v37 = vpop.f32.mrb[8].mxu1  ;;  %v1880_v38 = vadd.f32 %v1848_v10, %v1779_v44  ;;  %v1951_v31 = vmul.f32 %v5063_v62, %v2216_v4 }
 0x1df   : > { %v1780_v36 = vadd.f32 %v1748_v61, %v1679_v11  ;;  %v1952_v33 = vmul.f32 %v5063_v62, %v5073_v5  ;;  %v5099_v9 = vadd.f32 %v4331_v37, %v4931_v24  ;;  %v955_v18 = vpop.f32.mrb[9].mxu1  ;;  %v1580_v51 = vadd.f32 %v1548_v57, %v1447_v41 }
 0x1e0   : > { %v1680_v32 = vadd.f32 %v1648_v42, %v1579_v40  ;;  %v5103_v50 = vmul.f32 %v5011_v8, %v5070_v1  ;;  %v5106_v6 = vadd.f32 %v4927_v22, %v955_v18  ;;  %v4332_v11 = vpop.f32.mrb[10].mxu1  ;;  %v1981_v10 = vadd.f32 %v1949_v46, %v1880_v38 }
 0x1e1   : > { %v1881_v44 = vadd.f32 %v1849_v55, %v1780_v36  ;;  %v1449_v47 = vmul.f32 %v4982_v48, %v2015_v3  ;;  %1385 = vst [vmem:[#allocation2 + $0x91] sm:$0xff] %v5099_v9  ;;  %v5111_v24 = vadd.f32 %v4929_v23, %v4332_v11  ;;  %v958_v37 = vpop.f32.mrb[11].mxu1  ;;  %v1681_v41 = vadd.f32 %v1649_v35, %v1580_v51  ;;  %v5113_v42 = vld [vmem:[#allocation2 + $0x48] sm:$0xff] }
 0x1e2   : > { %v1781_v40 = vadd.f32 %v1749_v0, %v1680_v32  ;;  %v1581_v57 = vadd.f32 %v5031_v25, %v1448_v2  ;;  %1383 = vst [vmem:[#allocation2 + $0x79] sm:$0xff] %v5106_v6  ;;  %v5118_v22 = vadd.f32 %v4925_v21, %v958_v37  ;;  %v2083_v38 = vadd.f32 %v2051_v63, %v1981_v10 }
 0x1e3   : > { %v1982_v36 = vadd.f32 %v1950_v39, %v1881_v44  ;;  %v2053_v46 = vmul.f32 %v5022_v14, %v5113_v42  ;;  %1386 = vst [vmem:[#allocation2 + $0x99] sm:$0xff] %v5111_v24  ;;  %v1782_v23 = vadd.f32 %v1750_v45, %v1681_v41  ;;  %v5124_v32 = vld [vmem:[#allocation2 + $0x50] sm:$0xff]  ;;  %v1582_v55 = vadd.f32 %v5054_v58, %v1449_v47 }
 0x1e4   : > { %v1882_v35 = vadd.f32 %v5028_v20, %v1781_v40  ;;  %v5126_v51 = vld [vmem:[#allocation2 + $0x4a] sm:$0xff]  ;;  %v5128_v25 = vld [vmem:[#allocation2 + $0x52] sm:$0xff]  ;;  %v1650_v21 = vmul.f32 %v4996_v59, %v2216_v4  ;;  %1384 = vst [vmem:[#allocation2 + $0x81] sm:$0xff] %v5118_v22  ;;  %v2184_v63 = vadd.f32 %v5025_v15, %v2083_v38  ;;  %v2054_v45 = vmul.f32 %v5022_v14, %v5124_v32  ;;  %v5157_v40 = vld [vmem:[#allocation2 + $0x60] sm:$0xff] }
 0x1e5   : > { %v2084_v39 = vadd.f32 %v2052_v16, %v1982_v36  ;;  %v2255_v20 = vmul.f32 %v5050_v19, %v5126_v51  ;;  %v1883_v0 = vadd.f32 %v5041_v52, %v1782_v23  ;;  %v2256_v3 = vmul.f32 %v5050_v19, %v5128_v25 }
 0x1e6   : > { %v1983_v2 = vadd.f32 %v1951_v31, %v1882_v35  ;;  %v1651_v58 = vmul.f32 %v4996_v59, %v5073_v5  ;;  %v4335_v4 = vpop.f32.mrb[12].mxu1  ;;  %v2285_v56 = vadd.f32 %v2253_v17, %v2184_v63  ;;  %v1682_v15 = vadd.f32 %v1650_v21, %v1581_v57  ;;  %v5170_v35 = vld [vmem:[#allocation2 + $0x62] sm:$0xff] }
 0x1e7   : > { %v2185_v54 = vadd.f32 %v5037_v49, %v2084_v39  ;;  %v1751_v16 = vmul.f32 %v5016_v13, %v5113_v42  ;;  %v1286_v61 = vadd.f32 %v4335_v4, %v4942_v29  ;;  %v971_v18 = vpop.f32.mrb[13].mxu1  ;;  %v1984_v11 = vadd.f32 %v1952_v33, %v1883_v0 }
 0x1e8   : > { %v2085_v52 = vadd.f32 %v2053_v46, %v1983_v2  ;;  %v1683_v31 = vadd.f32 %v1651_v58, %v1582_v55  ;;  %v5148_v44 = vadd.f32 %v4938_v27, %v971_v18  ;;  %v4336_v10 = vpop.f32.mrb[14].mxu1  ;;  %v1752_v49 = vmul.f32 %v5016_v13, %v5124_v32  ;;  %v5159_v27 = vld [vmem:[#allocation2 + $0x68] sm:$0xff] }
 0x1e9   : > { %v2286_v5 = vadd.f32 %v5085_v43, %v2185_v54  ;;  %v1783_v17 = vadd.f32 %v1751_v16, %v1682_v15  ;;  %1389 = vst [vmem:[#allocation2 + $0xc1] sm:$0xff] %v1286_v61  ;;  %v1291_v47 = vadd.f32 %v4940_v28, %v4336_v10  ;;  %v974_v37 = vpop.f32.mrb[15].mxu1  ;;  %v2086_v41 = vadd.f32 %v2054_v45, %v1984_v11  ;;  %v5172_v55 = vld [vmem:[#allocation2 + $0x6a] sm:$0xff] }
 0x1ea   : > { %v2186_v29 = vadd.f32 %v5078_v12, %v2085_v52  ;;  %v1852_v33 = vmul.f32 %v5006_v7, %v5044_v53  ;;  %1387 = vst [vmem:[#allocation2 + $0xa9] sm:$0xff] %v5148_v44  ;;  %v5163_v43 = vadd.f32 %v4936_v26, %v974_v37  ;;  %v1784_v36 = vadd.f32 %v1752_v49, %v1683_v31  ;;  %v6627_v11 = vld [vmem:[#allocation5_spill] sm:$0xff] }
 0x1eb   : > { %v2317_v57 = vpack.c.bf16 %v2286_v5, %v2285_v56  ;;  %v1853_v28 = vmul.f32 %v5006_v7, %v5070_v1  ;;  %1390 = vst [vmem:[#allocation2 + $0xc9] sm:$0xff] %v1291_v47  ;;  %v2187_v12 = vadd.f32 %v5103_v50, %v2086_v41  ;;  %v1953_v23 = vmul.f32 %v5063_v62, %v5126_v51  ;;  %v6628_v5 = vld [vmem:[#allocation19_spill] sm:$0xff] }
 0x1ec   : > { %v2287_v38 = vadd.f32 %v2255_v20, %v2186_v29  ;;  %v1884_v46 = vadd.f32 %v1852_v33, %v1783_v17  ;;  %1388 = vst [vmem:[#allocation2 + $0xb1] sm:$0xff] %v5163_v43  ;;  %v1954_v21 = vmul.f32 %v5063_v62, %v5128_v25  ;;  %v2055_v39 = vmul.f32 %v5022_v14, %v5157_v40  ;;  %v6629_v17 = vld [vmem:[#allocation6_spill] sm:$0xff]  ;;  %v6630_v29 = vld [vmem:[#allocation4_spill] sm:$0xff] }
 0x1ed   : > { %4419 = vmatprep.mubr.bf16.mxu1 %v2317_v57  ;;  %v1885_v26 = vadd.f32 %v1853_v28, %v1784_v36  ;;  %v2056_v50 = vmul.f32 %v5022_v14, %v5159_v27  ;;  %v2288_v63 = vadd.f32 %v2256_v3, %v2187_v12  ;;  %v2156_v20 = vmul.f32 %v5011_v8, %v5034_v30 }
 0x1ee   : > { %v1985_v45 = vadd.f32 %v1953_v23, %v1884_v46  ;;  %v2157_v0 = vmul.f32 %v5011_v8, %v5058_v60  ;;  %v4339_v2 = vpop.f32.mrb[16].mxu1  ;;  %v2257_v4 = vmul.f32 %v5050_v19, %v5170_v35  ;;  %v2258_v54 = vmul.f32 %v5050_v19, %v5172_v55 }
 0x1ef   : > { %v1986_v58 = vadd.f32 %v1954_v21, %v1885_v26  ;;  %v1450_v56 = vmul.f32 %v4982_v48, %v5113_v42  ;;  %v5192_v3 = vadd.f32 %v4339_v2, %v4953_v34  ;;  %v987_v15 = vpop.f32.mrb[17].mxu1  ;;  %v2318_v16 = vpack.c.bf16 %v2288_v63, %v2287_v38  ;;  %v4532_v34 = vld [vmem:[%s6604_s9] sm:$0xff]   ;;  %v5227_v26 = vld [vmem:[#allocation2 + $0x78] sm:$0xff] }
 0x1f0   : > { %v2087_v61 = vadd.f32 %v2055_v39, %v1985_v45  ;;  %v1451_v18 = vmul.f32 %v4982_v48, %v5124_v32  ;;  %v5197_v52 = vadd.f32 %v6627_v11, %v987_v15  ;;  %v4340_v31 = vpop.f32.mrb[18].mxu1  ;;  %v1551_v49 = vmul.f32 %v6628_v5, %v5044_v53  ;;  %4451 = vmatprep.subr.bf16.mxu0 %v4532_v34  ;;  %v5229_v21 = vld [vmem:[#allocation2 + $0x80] sm:$0xff]  ;;  %v4534_v45 = vld [vmem:[%s6604_s9 + $0x10] sm:$0xff]  }
 0x1f1   : > { %v2088_v10 = vadd.f32 %v2056_v50, %v1986_v58  ;;  %v1552_v42 = vmul.f32 %v6628_v5, %v5070_v1  ;;  %1393 = vst [vmem:[#allocation2 + $0xf1] sm:$0xff] %v5192_v3  ;;  %v5208_v47 = vadd.f32 %v6629_v17, %v4340_v31  ;;  %4420 = vmatmul.mubr.bf16.vlgmr.msra.gmra.mrb[32].mxu1 %v2318_v16  ;;  %v990_v32 = vpop.f32.mrb[19].mxu1  ;;  %v4533_v1 = vld [vmem:[%s6604_s9 + $0x8] sm:$0xff]   ;;  %v6632_v11 = vld [vmem:[#allocation8_spill] sm:$0xff]  ;;  %v4535_v17 = vld [vmem:[%s6604_s9 + $0x18] sm:$0xff]  }
 0x1f2   : > { %v2188_v37 = vadd.f32 %v2156_v20, %v2087_v61  ;;  %v1652_v41 = vmul.f32 %v4996_v59, %v5126_v51  ;;  %v1653_v53 = vmul.f32 %v4996_v59, %v5128_v25  ;;  %1391 = vst [vmem:[#allocation2 + $0xd9] sm:$0xff] %v5197_v52  ;;  %v5219_v33 = vadd.f32 %v6630_v29, %v990_v32  ;;  %v6633_v32 = vld [vmem:[#allocation9_spill] sm:$0xff] }
 0x1f3   : > { %v2189_v57 = vadd.f32 %v2157_v0, %v2088_v10  ;;  %v1583_v36 = vadd.f32 %v1551_v49, %v1450_v56  ;;  %v1584_v28 = vadd.f32 %v1552_v42, %v1451_v18  ;;  %1394 = vst [vmem:[#allocation2 + $0xf9] sm:$0xff] %v5208_v47  ;;  %v1753_v51 = vmul.f32 %v5016_v13, %v5157_v40 }
 0x1f4   : > { %v2289_v12 = vadd.f32 %v2257_v4, %v2188_v37  ;;  %4452 = vmatpush3.bf16.msra.mxu0 %v4532_v34  ;;  %1392 = vst [vmem:[#allocation2 + $0xe1] sm:$0xff] %v5219_v33  ;;  %v1754_v23 = vmul.f32 %v5016_v13, %v5159_v27  ;;  %v1854_v39 = vmul.f32 %v5006_v7, %v5034_v30 }
 0x1f5   : > { %v2290_v25 = vadd.f32 %v2258_v54, %v2189_v57  ;;  %v1684_v38 = vadd.f32 %v1652_v41, %v1583_v36  ;;  %v1685_v46 = vadd.f32 %v1653_v53, %v1584_v28  ;;  %4453 = vmatprep.subr.bf16.mxu0 %v4533_v1  ;;  %v1855_v50 = vmul.f32 %v5006_v7, %v5058_v60  ;;  %v6631_v54 = vld [vmem:[#allocation10_spill] sm:$0xff]  ;;  %v2222_v36 = vld [vmem:[#allocation2 + $0x7a] sm:$0xff]  ;;  %v5270_v28 = vld [vmem:[#allocation2 + $0x82] sm:$0xff] }
 0x1f6   : > { %v1955_v63 = vmul.f32 %v5063_v62, %v5170_v35  ;;  %v4343_v0 = vpop.f32.mrb[20].mxu1  ;;  %v1956_v4 = vmul.f32 %v5063_v62, %v5172_v55  ;;  %v2057_v16 = vmul.f32 %v5022_v14, %v5227_v26  ;;  %v2058_v61 = vmul.f32 %v5022_v14, %v5229_v21 }
 0x1f7   : > { %v2319_v20 = vpack.c.bf16 %v2290_v25, %v2289_v12  ;;  %v1785_v2 = vadd.f32 %v1753_v51, %v1684_v38  ;;  %v1786_v58 = vadd.f32 %v1754_v23, %v1685_v46  ;;  %v5243_v56 = vadd.f32 %v4343_v0, %v6631_v54  ;;  %v1003_v15 = vpop.f32.mrb[21].mxu1  ;;  %v6634_v12 = vld [vmem:[#allocation7_spill] sm:$0xff]  ;;  %v5290_v0 = vld [vmem:[#allocation2 + $0x90] sm:$0xff] }
 0x1f8   : > { %v2158_v18 = vmul.f32 %v5011_v8, %v5106_v6  ;;  %4454 = vmatpush3.bf16.msra.mxu0 %v4533_v1  ;;  %v5252_v31 = vadd.f32 %v6632_v11, %v1003_v15  ;;  %v4344_v10 = vpop.f32.mrb[22].mxu1  ;;  %v1452_v34 = vmul.f32 %v4982_v48, %v5157_v40  ;;  %v1453_v53 = vmul.f32 %v4982_v48, %v5159_v27 }
 0x1f9   : > { %4423 = vmatprep.mubr.bf16.mxu1 %v2319_v20  ;;  %v1886_v49 = vadd.f32 %v1854_v39, %v1785_v2  ;;  %v1887_v42 = vadd.f32 %v1855_v50, %v1786_v58  ;;  %1397 = vst [vmem:[#allocation2 + $0x121] sm:$0xff] %v5243_v56  ;;  %v5261_v37 = vadd.f32 %v6633_v32, %v4344_v10  ;;  %v1006_v41 = vpop.f32.mrb[23].mxu1 }
 0x1fa   : > { %v1553_v1 = vmul.f32 %v6628_v5, %v5034_v30  ;;  %v1554_v29 = vmul.f32 %v6628_v5, %v5058_v60  ;;  %4455 = vmatprep.subr.bf16.mxu0 %v4534_v45  ;;  %1395 = vst [vmem:[#allocation2 + $0x109] sm:$0xff] %v5252_v31  ;;  %v5273_v51 = vadd.f32 %v6634_v12, %v1006_v41 }
 0x1fb   : > { %v1987_v40 = vadd.f32 %v1955_v63, %v1886_v49  ;;  %v1988_v57 = vadd.f32 %v1956_v4, %v1887_v42  ;;  %v1654_v27 = vmul.f32 %v4996_v59, %v5170_v35  ;;  %1398 = vst [vmem:[#allocation2 + $0x129] sm:$0xff] %v5261_v37  ;;  %v1655_v60 = vmul.f32 %v4996_v59, %v5172_v55 }
 0x1fc   : > { %v1585_v30 = vadd.f32 %v1553_v1, %v1452_v34  ;;  %v1586_v25 = vadd.f32 %v1554_v29, %v1453_v53  ;;  %v1755_v38 = vmul.f32 %v5016_v13, %v5227_v26  ;;  %4456 = vmatpush3.bf16.msra.mxu0 %v4534_v45  ;;  %v2159_v39 = vmul.f32 %v5011_v8, %v5118_v22  ;;  %v5292_v45 = vld [vmem:[#allocation2 + $0x98] sm:$0xff] }
 0x1fd   : > { %v2089_v46 = vadd.f32 %v2057_v16, %v1987_v40  ;;  %v2090_v23 = vadd.f32 %v2058_v61, %v1988_v57  ;;  %1396 = vst [vmem:[#allocation2 + $0x111] sm:$0xff] %v5273_v51  ;;  %v1756_v35 = vmul.f32 %v5016_v13, %v5229_v21  ;;  %4457 = vmatprep.subr.bf16.mxu0 %v4535_v17  ;;  %v2224_v40 = vld [vmem:[#allocation2 + $0x92] sm:$0xff] }
 0x1fe   : > { %v2259_v50 = vmul.f32 %v5050_v19, %v2222_v36  ;;  %v2260_v55 = vmul.f32 %v5050_v19, %v5270_v28  ;;  %v1686_v63 = vadd.f32 %v1654_v27, %v1585_v30  ;;  %v1687_v20 = vadd.f32 %v1655_v60, %v1586_v25  ;;  %v4347_v15 = vpop.f32.mrb[24].mxu1  ;;  %v6635_v57 = vld [vmem:[#allocation14_spill] sm:$0xff]  ;;  %v2225_v30 = vld [vmem:[#allocation2 + $0x9a] sm:$0xff] }
 0x1ff   : > { %v2190_v2 = vadd.f32 %v2158_v18, %v2089_v46  ;;  %v2191_v58 = vadd.f32 %v2159_v39, %v2090_v23  ;;  %v1856_v4 = vmul.f32 %v5006_v7, %v5106_v6  ;;  %v1857_v54 = vmul.f32 %v5006_v7, %v5118_v22  ;;  %v1019_v49 = vpop.f32.mrb[25].mxu1  ;;  %v6636_v25 = vld [vmem:[#allocation12_spill] sm:$0xff] }
 0x200   : > { %v1787_v16 = vadd.f32 %v1755_v38, %v1686_v63  ;;  %v1788_v61 = vadd.f32 %v1756_v35, %v1687_v20  ;;  %v1957_v11 = vmul.f32 %v5063_v62, %v2222_v36  ;;  %v1958_v10 = vmul.f32 %v5063_v62, %v5270_v28  ;;  %4458 = vmatpush3.bf16.msra.mxu0 %v4535_v17  ;;  %v4348_v41 = vpop.f32.mrb[26].mxu1  ;;  %v6637_v38 = vld [vmem:[#allocation13_spill] sm:$0xff] }
 0x201   : > { %v2291_v42 = vadd.f32 %v2259_v50, %v2190_v2  ;;  %v2292_v34 = vadd.f32 %v2260_v55, %v2191_v58  ;;  %v2059_v18 = vmul.f32 %v5022_v14, %v5290_v0  ;;  %v2060_v32 = vmul.f32 %v5022_v14, %v5292_v45  ;;  %v1022_v27 = vpop.f32.mrb[27].mxu1 }
 0x202   : > { %v1888_v53 = vadd.f32 %v1856_v4, %v1787_v16  ;;  %v1889_v1 = vadd.f32 %v1857_v54, %v1788_v61  ;;  %v2160_v29 = vmul.f32 %v5011_v8, %v5099_v9  ;;  %v5308_v12 = vadd.f32 %v4347_v15, %v6635_v57 }
 0x203   : > { %v2320_v17 = vpack.c.bf16 %v2292_v34, %v2291_v42  ;;  %v5311_v60 = vadd.f32 %v6636_v25, %v1019_v49  ;;  %v5314_v46 = vadd.f32 %v6637_v38, %v4348_v41  ;;  %v1454_v23 = vmul.f32 %v4982_v48, %v5227_v26  ;;  %v5344_v34 = vld [vmem:[#allocation2 + $0xb0] sm:$0xff] }
 0x204   : > { %v1989_v39 = vadd.f32 %v1957_v11, %v1888_v53  ;;  %v1990_v35 = vadd.f32 %v1958_v10, %v1889_v1  ;;  %1401 = vst [vmem:[#allocation2 + $0x151] sm:$0xff] %v5308_v12  ;;  %v1455_v50 = vmul.f32 %v4982_v48, %v5229_v21  ;;  %v1555_v55 = vmul.f32 %v6628_v5, %v5106_v6  ;;  %v5338_v11 = vld [vmem:[#allocation2 + $0xa8] sm:$0xff] }
 0x205   : > { %4424 = vmatmul.mubr.bf16.gmra.mrb[36].mxu1 %v2320_v17  ;;  %v2161_v63 = vmul.f32 %v5011_v8, %v5111_v24  ;;  %v2261_v20 = vmul.f32 %v5050_v19, %v2224_v40  ;;  %1399 = vst [vmem:[#allocation2 + $0x139] sm:$0xff] %v5311_v60  ;;  %1402 = vst [vmem:[#allocation2 + $0x159] sm:$0xff] %v5314_v46  ;;  %v1556_v26 = vmul.f32 %v6628_v5, %v5118_v22 }
 0x206   : > { %v1656_v2 = vmul.f32 %v4996_v59, %v2222_v36  ;;  %v2091_v58 = vadd.f32 %v2059_v18, %v1989_v39  ;;  %v2092_v21 = vadd.f32 %v2060_v32, %v1990_v35  ;;  %v2262_v4 = vmul.f32 %v5050_v19, %v2225_v30  ;;  %v5340_v22 = vpop.f32.mrb[28].mxu1 }
 0x207   : > { %v1587_v6 = vadd.f32 %v1555_v55, %v1454_v23  ;;  %v1588_v54 = vadd.f32 %v1556_v26, %v1455_v50  ;;  %v1657_v15 = vmul.f32 %v4996_v59, %v5270_v28  ;;  %v1757_v16 = vmul.f32 %v5016_v13, %v5290_v0  ;;  %v1035_v18 = vpop.f32.mrb[29].mxu1  ;;  %v6638_v50 = vld [vmem:[#allocation11_spill] sm:$0xff] }
 0x208   : > { %v1758_v61 = vmul.f32 %v5016_v13, %v5292_v45  ;;  %v2192_v36 = vadd.f32 %v2160_v29, %v2091_v58  ;;  %v2193_v10 = vadd.f32 %v2161_v63, %v2092_v21  ;;  %v1858_v42 = vmul.f32 %v5006_v7, %v5099_v9  ;;  %v4352_v1 = vpop.f32.mrb[30].mxu1  ;;  %v2226_v21 = vld [vmem:[#allocation2 + $0xaa] sm:$0xff] }
 0x209   : > { %v1688_v49 = vadd.f32 %v1656_v2, %v1587_v6  ;;  %v1689_v28 = vadd.f32 %v1657_v15, %v1588_v54  ;;  %v1859_v32 = vmul.f32 %v5006_v7, %v5111_v24  ;;  %v1959_v41 = vmul.f32 %v5063_v62, %v2224_v40  ;;  %v5352_v38 = vpop.f32.mrb[31].mxu1 }
 0x20a   : > { %v1960_v53 = vmul.f32 %v5063_v62, %v2225_v30  ;;  %v2293_v57 = vadd.f32 %v2261_v20, %v2192_v36  ;;  %v2294_v17 = vadd.f32 %v2262_v4, %v2193_v10  ;;  %v2061_v25 = vmul.f32 %v5022_v14, %v5338_v11  ;;  %v2227_v4 = vld [vmem:[#allocation2 + $0xb2] sm:$0xff] }
 0x20b   : > { %v1789_v29 = vadd.f32 %v1757_v16, %v1688_v49  ;;  %v1790_v23 = vadd.f32 %v1758_v61, %v1689_v28  ;;  %v2062_v39 = vmul.f32 %v5022_v14, %v5344_v34  ;;  %v2162_v35 = vmul.f32 %v5011_v8, %v5148_v44  ;;  %v5378_v49 = vld [vmem:[#allocation2 + $0xc0] sm:$0xff] }
 0x20c   : > { %v5359_v55 = vadd.f32 %v6638_v50, %v1022_v27  ;;  %v2321_v63 = vpack.c.bf16 %v2294_v17, %v2293_v57  ;;  %v1456_v20 = vmul.f32 %v4982_v48, %v5290_v0  ;;  %v1457_v2 = vmul.f32 %v4982_v48, %v5292_v45  ;;  %v5388_v17 = vld [vmem:[#allocation2 + $0xc1] sm:$0xff] }
 0x20d   : > { %v1890_v26 = vadd.f32 %v1858_v42, %v1789_v29  ;;  %v1891_v58 = vadd.f32 %v1859_v32, %v1790_v23  ;;  %v1557_v6 = vmul.f32 %v6628_v5, %v5099_v9  ;;  %v1558_v27 = vmul.f32 %v6628_v5, %v5111_v24 }
 0x20e   : > { %1400 = vst [vmem:[#allocation2 + $0x141] sm:$0xff] %v5359_v55  ;;  %v1658_v54 = vmul.f32 %v4996_v59, %v2224_v40  ;;  %4427 = vmatprep.mubr.bf16.mxu1 %v2321_v63  ;;  %v2163_v0 = vmul.f32 %v5011_v8, %v5163_v43  ;;  %v1659_v45 = vmul.f32 %v4996_v59, %v2225_v30  ;;  %v5384_v30 = vld [vmem:[#allocation2 + $0xc8] sm:$0xff] }
 0x20f   : > { %v1991_v15 = vadd.f32 %v1959_v41, %v1890_v26  ;;  %v1759_v16 = vmul.f32 %v5016_v13, %v5338_v11  ;;  %v1992_v61 = vadd.f32 %v1960_v53, %v1891_v58  ;;  %v1589_v36 = vadd.f32 %v1557_v6, %v1456_v20  ;;  %v1522_v20 = vld [vmem:[#allocation2 + $0xa9] sm:$0xff] }
 0x210   : > { %v1590_v10 = vadd.f32 %v1558_v27, %v1457_v2  ;;  %v1760_v9 = vmul.f32 %v5016_v13, %v5344_v34  ;;  %v2263_v40 = vmul.f32 %v5050_v19, %v2226_v21  ;;  %v2264_v42 = vmul.f32 %v5050_v19, %v2227_v4  ;;  %v1523_v2 = vld [vmem:[#allocation2 + $0xb1] sm:$0xff]  ;;  %v6640_v27 = vld [vmem:[#allocation16_spill] sm:$0xff] }
 0x211   : > { %v2093_v24 = vadd.f32 %v2061_v25, %v1991_v15  ;;  %v1860_v28 = vmul.f32 %v5006_v7, %v5148_v44  ;;  %v2094_v32 = vadd.f32 %v2062_v39, %v1992_v61  ;;  %v1690_v41 = vadd.f32 %v1658_v54, %v1589_v36  ;;  %v6641_v61 = vld [vmem:[#allocation17_spill] sm:$0xff] }
 0x212   : > { %v1691_v53 = vadd.f32 %v1659_v45, %v1590_v10  ;;  %v1861_v57 = vmul.f32 %v5006_v7, %v5163_v43  ;;  %v1961_v25 = vmul.f32 %v5063_v62, %v2226_v21  ;;  %v1962_v23 = vmul.f32 %v5063_v62, %v2227_v4  ;;  %v2228_v10 = vld [vmem:[#allocation2 + $0xc2] sm:$0xff] }
 0x213   : > { %v2194_v29 = vadd.f32 %v2162_v35, %v2093_v24  ;;  %v2063_v50 = vmul.f32 %v5022_v14, %v5378_v49  ;;  %v2195_v63 = vadd.f32 %v2163_v0, %v2094_v32  ;;  %v1791_v44 = vadd.f32 %v1759_v16, %v1690_v41  ;;  %v6639_v35 = vld [vmem:[#allocation18_spill] sm:$0xff] }
 0x214   : > { %v1792_v26 = vadd.f32 %v1760_v9, %v1691_v53  ;;  %v2064_v39 = vmul.f32 %v5022_v14, %v5384_v30  ;;  %v2164_v43 = vmul.f32 %v5011_v8, %v5388_v17  ;;  %v5400_v6 = vadd.f32 %v5340_v22, %v6639_v35  ;;  %v2128_v16 = vld [vmem:[#allocation2 + $0xc9] sm:$0xff] }
 0x215   : > { %v2295_v58 = vadd.f32 %v2263_v40, %v2194_v29  ;;  %v5403_v54 = vadd.f32 %v6640_v27, %v1035_v18  ;;  %v2296_v15 = vadd.f32 %v2264_v42, %v2195_v63  ;;  %v1892_v0 = vadd.f32 %v1860_v28, %v1791_v44  ;;  %v2229_v9 = vld [vmem:[#allocation2 + $0xca] sm:$0xff] }
 0x216   : > { %v1893_v45 = vadd.f32 %v1861_v57, %v1792_v26  ;;  %v5406_v36 = vadd.f32 %v6641_v61, %v4352_v1  ;;  %1405 = vst [vmem:[#allocation2 + $0x181] sm:$0xff] %v5400_v6  ;;  %v1458_v22 = vmul.f32 %v4982_v48, %v5338_v11  ;;  %v1459_v18 = vmul.f32 %v4982_v48, %v5344_v34 }
 0x217   : > { %1403 = vst [vmem:[#allocation2 + $0x169] sm:$0xff] %v5403_v54  ;;  %v1559_v24 = vmul.f32 %v6628_v5, %v1522_v20  ;;  %v1560_v40 = vmul.f32 %v6628_v5, %v1523_v2  ;;  %v2322_v42 = vpack.c.bf16 %v2296_v15, %v2295_v58  ;;  %v1993_v28 = vadd.f32 %v1961_v25, %v1892_v0  ;;  %v2028_v20 = vld [vmem:[#allocation2 + $0xd8] sm:$0xff]  ;;  %v2029_v2 = vld [vmem:[#allocation2 + $0xe0] sm:$0xff] }
 0x218   : > { %v1994_v1 = vadd.f32 %v1962_v23, %v1893_v45  ;;  %1406 = vst [vmem:[#allocation2 + $0x189] sm:$0xff] %v5406_v36  ;;  %v1660_v32 = vmul.f32 %v4996_v59, %v2226_v21  ;;  %v2165_v41 = vmul.f32 %v5011_v8, %v2128_v16  ;;  %v1661_v11 = vmul.f32 %v4996_v59, %v2227_v4 }
 0x219   : > { %v1591_v53 = vadd.f32 %v1559_v24, %v1458_v22  ;;  %v1592_v57 = vadd.f32 %v1560_v40, %v1459_v18  ;;  %4428 = vmatmul.mubr.bf16.gmra.mrb[40].mxu1 %v2322_v42  ;;  %v2095_v29 = vadd.f32 %v2063_v50, %v1993_v28  ;;  %v2265_v63 = vmul.f32 %v5050_v19, %v2228_v10  ;;  %v6642_v42 = vld [vmem:[#allocation15_spill] sm:$0xff] }
 0x21a   : > { %v2096_v34 = vadd.f32 %v2064_v39, %v1994_v1  ;;  %v2266_v44 = vmul.f32 %v5050_v19, %v2229_v9  ;;  %v1761_v23 = vmul.f32 %v5016_v13, %v5378_v49  ;;  %v1762_v21 = vmul.f32 %v5016_v13, %v5384_v30 }
 0x21b   : > { %v1692_v26 = vadd.f32 %v1660_v32, %v1591_v53  ;;  %v1693_v25 = vadd.f32 %v1661_v11, %v1592_v57  ;;  %v2196_v58 = vadd.f32 %v2164_v43, %v2095_v29  ;;  %v1862_v4 = vmul.f32 %v5006_v7, %v5388_v17  ;;  %v2230_v29 = vld [vmem:[#allocation2 + $0xda] sm:$0xff] }
 0x21c   : > { %v2197_v35 = vadd.f32 %v2165_v41, %v2096_v34  ;;  %v1863_v50 = vmul.f32 %v5006_v7, %v2128_v16  ;;  %v1963_v15 = vmul.f32 %v5063_v62, %v2228_v10  ;;  %v1964_v0 = vmul.f32 %v5063_v62, %v2229_v9  ;;  %v2231_v34 = vld [vmem:[#allocation2 + $0xe2] sm:$0xff] }
 0x21d   : > { %v1793_v39 = vadd.f32 %v1761_v23, %v1692_v26  ;;  %v1794_v27 = vadd.f32 %v1762_v21, %v1693_v25  ;;  %v2297_v45 = vadd.f32 %v2265_v63, %v2196_v58  ;;  %v2065_v22 = vmul.f32 %v5022_v14, %v2028_v20 }
 0x21e   : > { %v2298_v61 = vadd.f32 %v2266_v44, %v2197_v35  ;;  %v2066_v18 = vmul.f32 %v5022_v14, %v2029_v2  ;;  %v2166_v40 = vmul.f32 %v5011_v8, %v5197_v52  ;;  %v5437_v28 = vadd.f32 %v6642_v42, %v5352_v38 }
 0x21f   : > { %v1894_v24 = vadd.f32 %v1862_v4, %v1793_v39  ;;  %v1895_v43 = vadd.f32 %v1863_v50, %v1794_v27  ;;  %v1460_v32 = vmul.f32 %v4982_v48, %v5378_v49  ;;  %v1461_v41 = vmul.f32 %v4982_v48, %v5384_v30 }
 0x220   : > { %v2323_v1 = vpack.c.bf16 %v2298_v61, %v2297_v45  ;;  %v1561_v53 = vmul.f32 %v6628_v5, %v5388_v17  ;;  %1404 = vst [vmem:[#allocation2 + $0x171] sm:$0xff] %v5437_v28  ;;  %v1562_v63 = vmul.f32 %v6628_v5, %v2128_v16  ;;  %v1662_v38 = vmul.f32 %v4996_v59, %v2228_v10  ;;  %v2030_v10 = vld [vmem:[#allocation2 + $0xf0] sm:$0xff] }
 0x221   : > { %v1995_v57 = vadd.f32 %v1963_v15, %v1894_v24  ;;  %v1996_v11 = vadd.f32 %v1964_v0, %v1895_v43  ;;  %v2167_v49 = vmul.f32 %v5011_v8, %v5219_v33  ;;  %v1663_v30 = vmul.f32 %v4996_v59, %v2229_v9  ;;  %v2031_v9 = vld [vmem:[#allocation2 + $0xf8] sm:$0xff] }
 0x222   : > { %4431 = vmatprep.mubr.bf16.mxu1 %v2323_v1  ;;  %v1593_v44 = vadd.f32 %v1561_v53, %v1460_v32  ;;  %v1763_v26 = vmul.f32 %v5016_v13, %v2028_v20  ;;  %v1594_v23 = vadd.f32 %v1562_v63, %v1461_v41  ;;  %v1764_v21 = vmul.f32 %v5016_v13, %v2029_v2 }
 0x223   : > { %v2097_v17 = vadd.f32 %v2065_v22, %v1995_v57  ;;  %v2098_v25 = vadd.f32 %v2066_v18, %v1996_v11  ;;  %v2267_v58 = vmul.f32 %v5050_v19, %v2230_v29  ;;  %v2268_v16 = vmul.f32 %v5050_v19, %v2231_v34  ;;  %v2232_v57 = vld [vmem:[#allocation2 + $0xf2] sm:$0xff]  ;;  %v2233_v11 = vld [vmem:[#allocation2 + $0xfa] sm:$0xff] }
 0x224   : > { %v1694_v35 = vadd.f32 %v1662_v38, %v1593_v44  ;;  %v1695_v39 = vadd.f32 %v1663_v30, %v1594_v23  ;;  %v1864_v27 = vmul.f32 %v5006_v7, %v5197_v52  ;;  %v1865_v0 = vmul.f32 %v5006_v7, %v5219_v33 }
 0x225   : > { %v2198_v4 = vadd.f32 %v2166_v40, %v2097_v17  ;;  %v2199_v50 = vadd.f32 %v2167_v49, %v2098_v25  ;;  %v1965_v45 = vmul.f32 %v5063_v62, %v2230_v29  ;;  %v1966_v61 = vmul.f32 %v5063_v62, %v2231_v34 }
 0x226   : > { %v1795_v15 = vadd.f32 %v1763_v26, %v1694_v35  ;;  %v1796_v24 = vadd.f32 %v1764_v21, %v1695_v39  ;;  %v2067_v43 = vmul.f32 %v5022_v14, %v2030_v10  ;;  %v2068_v42 = vmul.f32 %v5022_v14, %v2031_v9 }
 0x227   : > { %v2299_v22 = vadd.f32 %v2267_v58, %v2198_v4  ;;  %v2300_v18 = vadd.f32 %v2268_v16, %v2199_v50  ;;  %v1462_v1 = vmul.f32 %v4982_v48, %v2028_v20  ;;  %v1463_v32 = vmul.f32 %v4982_v48, %v2029_v2  ;;  %v2032_v4 = vld [vmem:[#allocation2 + $0x108] sm:$0xff] }
 0x228   : > { %v1896_v40 = vadd.f32 %v1864_v27, %v1795_v15  ;;  %v1897_v53 = vadd.f32 %v1865_v0, %v1796_v24  ;;  %v1563_v63 = vmul.f32 %v6628_v5, %v5197_v52  ;;  %v1564_v38 = vmul.f32 %v6628_v5, %v5219_v33 }
 0x229   : > { %v2324_v41 = vpack.c.bf16 %v2300_v18, %v2299_v22  ;;  %v2168_v44 = vmul.f32 %v5011_v8, %v5192_v3  ;;  %v2169_v30 = vmul.f32 %v5011_v8, %v5208_v47  ;;  %v1664_v20 = vmul.f32 %v4996_v59, %v2230_v29  ;;  %v5479_v29 = vld [vmem:[#allocation2 + $0x110] sm:$0xff]  ;;  %v1529_v18 = vld [vmem:[#allocation2 + $0xf9] sm:$0xff] }
 0x22a   : > { %v1997_v49 = vadd.f32 %v1965_v45, %v1896_v40  ;;  %v1998_v2 = vadd.f32 %v1966_v61, %v1897_v53  ;;  %v1595_v26 = vadd.f32 %v1563_v63, %v1462_v1  ;;  %v1596_v17 = vadd.f32 %v1564_v38, %v1463_v32  ;;  %v1528_v22 = vld [vmem:[#allocation2 + $0xf1] sm:$0xff] }
 0x22b   : > { %4432 = vmatmul.mubr.bf16.gmra.mrb[44].mxu1 %v2324_v41  ;;  %v1665_v25 = vmul.f32 %v4996_v59, %v2231_v34  ;;  %v2269_v52 = vmul.f32 %v5050_v19, %v2232_v57  ;;  %v2270_v5 = vmul.f32 %v5050_v19, %v2233_v11  ;;  %v1765_v33 = vmul.f32 %v5016_v13, %v2030_v10  ;;  %v2234_v53 = vld [vmem:[#allocation2 + $0x10a] sm:$0xff] }
 0x22c   : > { %v2099_v23 = vadd.f32 %v2067_v43, %v1997_v49  ;;  %v2100_v21 = vadd.f32 %v2068_v42, %v1998_v2  ;;  %v1696_v58 = vadd.f32 %v1664_v20, %v1595_v26  ;;  %v1766_v35 = vmul.f32 %v5016_v13, %v2031_v9 }
 0x22d   : > { %v1697_v16 = vadd.f32 %v1665_v25, %v1596_v17  ;;  %v1866_v39 = vmul.f32 %v5006_v7, %v5192_v3  ;;  %v1867_v34 = vmul.f32 %v5006_v7, %v5208_v47  ;;  %v1967_v27 = vmul.f32 %v5063_v62, %v2232_v57  ;;  %v5494_v47 = vld [vmem:[%s6603_s8] ss:$0 sm:$0xff] }
 0x22e   : > { %v2200_v50 = vadd.f32 %v2168_v44, %v2099_v23  ;;  %v2201_v15 = vadd.f32 %v2169_v30, %v2100_v21  ;;  %v1797_v0 = vadd.f32 %v1765_v33, %v1696_v58  ;;  %v1968_v61 = vmul.f32 %v5063_v62, %v2233_v11  ;;  %v2235_v30 = vld [vmem:[#allocation2 + $0x112] sm:$0xff]  ;;  %v5525_v58 = vld [vmem:[%s6603_s8 + $0x4] ss:$0 sm:$0xff] }
 0x22f   : > { %v1798_v45 = vadd.f32 %v1766_v35, %v1697_v16  ;;  %v2069_v43 = vmul.f32 %v5022_v14, %v2032_v4  ;;  %v2070_v40 = vmul.f32 %v5022_v14, %v5479_v29  ;;  %v1464_v3 = vmul.f32 %v4982_v48, %v2030_v10  ;;  %v5502_v14 = vld [vmem:[%s6603_s8 + $0x1] ss:$0 sm:$0xff]  ;;  %v2035_v16 = vld [vmem:[#allocation2 + $0x128] sm:$0xff] }
 0x230   : > { %v2301_v24 = vadd.f32 %v2269_v52, %v2200_v50  ;;  %v2302_v42 = vadd.f32 %v2270_v5, %v2201_v15  ;;  %v1898_v1 = vadd.f32 %v1866_v39, %v1797_v0  ;;  %v1465_v32 = vmul.f32 %v5494_v47, %v2031_v9  ;;  %v5510_v9 = vld [vmem:[%s6603_s8 + $0x2] ss:$0 sm:$0xff]  ;;  %v5536_v15 = vld [vmem:[%s6603_s8 + $0x6] ss:$0 sm:$0xff] }
 0x231   : > { %v1899_v7 = vadd.f32 %v1867_v34, %v1798_v45  ;;  %v2170_v41 = vmul.f32 %v5011_v8, %v5252_v31  ;;  %v1565_v48 = vmul.f32 %v5502_v14, %v1528_v22  ;;  %v1566_v10 = vmul.f32 %v5502_v14, %v1529_v18  ;;  %v5519_v5 = vld [vmem:[#allocation2 + $0x120] sm:$0xff] }
 0x232   : > { %v1666_v63 = vmul.f32 %v4996_v59, %v2232_v57  ;;  %v2325_v38 = vpack.c.bf16 %v2302_v42, %v2301_v24  ;;  %v1999_v49 = vadd.f32 %v1967_v27, %v1898_v1  ;;  %v1667_v20 = vmul.f32 %v5510_v9, %v2233_v11 }
 0x233   : > { %v2000_v44 = vadd.f32 %v1968_v61, %v1899_v7  ;;  %v1597_v2 = vadd.f32 %v1565_v48, %v1464_v3  ;;  %v1598_v26 = vadd.f32 %v1566_v10, %v1465_v32  ;;  %v1767_v17 = vmul.f32 %v5016_v13, %v2032_v4  ;;  %v2237_v3 = vld [vmem:[#allocation2 + $0x12a] sm:$0xff]  ;;  %v5549_v7 = vld [vmem:[%s6603_s8 + $0x7] ss:$0 sm:$0xff] }
 0x234   : > { %v1768_v25 = vmul.f32 %v5016_v13, %v5479_v29  ;;  %4435 = vmatprep.mubr.bf16.mxu1 %v2325_v38  ;;  %v2101_v59 = vadd.f32 %v2069_v43, %v1999_v49  ;;  %v2171_v23 = vmul.f32 %v5011_v8, %v5273_v51  ;;  %v2271_v52 = vmul.f32 %v5050_v19, %v2234_v53 }
 0x235   : > { %v2102_v57 = vadd.f32 %v2070_v40, %v2000_v44  ;;  %v2272_v33 = vmul.f32 %v5050_v19, %v2235_v30  ;;  %v1698_v11 = vadd.f32 %v1666_v63, %v1597_v2  ;;  %v1699_v21 = vadd.f32 %v1667_v20, %v1598_v26  ;;  %v2236_v40 = vld [vmem:[#allocation2 + $0x122] sm:$0xff] }
 0x236   : > { %v1868_v13 = vmul.f32 %v5525_v58, %v5252_v31  ;;  %v2202_v35 = vadd.f32 %v2170_v41, %v2101_v59  ;;  %v1869_v8 = vmul.f32 %v5525_v58, %v5273_v51  ;;  %v1969_v39 = vmul.f32 %v5063_v62, %v2234_v53  ;;  %v5561_v63 = vld [vmem:[%s6603_s8 + $0x8] ss:$0 sm:$0xff]  ;;  %v5569_v26 = vld [vmem:[%s6603_s8 + $0x3] ss:$0 sm:$0xff] }
 0x237   : > { %v2203_v50 = vadd.f32 %v2171_v23, %v2102_v57  ;;  %v1799_v34 = vadd.f32 %v1767_v17, %v1698_v11  ;;  %v1800_v19 = vadd.f32 %v1768_v25, %v1699_v21  ;;  %v1970_v27 = vmul.f32 %v5063_v62, %v2235_v30  ;;  %v2036_v25 = vld [vmem:[#allocation2 + $0x138] sm:$0xff]  ;;  %v2037_v59 = vld [vmem:[#allocation2 + $0x140] sm:$0xff] }
 0x238   : > { %v2071_v0 = vmul.f32 %v5536_v15, %v5519_v5  ;;  %v2303_v45 = vadd.f32 %v2271_v52, %v2202_v35  ;;  %v2072_v22 = vmul.f32 %v5536_v15, %v2035_v16  ;;  %v1466_v18 = vmul.f32 %v5494_v47, %v2032_v4 }
 0x239   : > { %v2304_v61 = vadd.f32 %v2272_v33, %v2203_v50  ;;  %v1900_v24 = vadd.f32 %v1868_v13, %v1799_v34  ;;  %v1901_v43 = vadd.f32 %v1869_v8, %v1800_v19  ;;  %v1467_v62 = vmul.f32 %v5494_v47, %v5479_v29  ;;  %v5581_v13 = vld [vmem:[%s6603_s8 + $0x5] ss:$0 sm:$0xff]  ;;  %v1533_v8 = vld [vmem:[#allocation2 + $0x129] sm:$0xff] }
 0x23a   : > { %v1567_v42 = vmul.f32 %v5502_v14, %v5252_v31  ;;  %v2172_v32 = vmul.f32 %v5549_v7, %v5243_v56  ;;  %v1568_v4 = vmul.f32 %v5502_v14, %v5273_v51  ;;  %v1668_v41 = vmul.f32 %v5510_v9, %v2234_v53  ;;  %v1532_v50 = vld [vmem:[#allocation2 + $0x121] sm:$0xff] }
 0x23b   : > { %v2326_v1 = vpack.c.bf16 %v2304_v61, %v2303_v45  ;;  %v2001_v48 = vadd.f32 %v1969_v39, %v1900_v24  ;;  %v2002_v10 = vadd.f32 %v1970_v27, %v1901_v43  ;;  %v2173_v29 = vmul.f32 %v5549_v7, %v5261_v37 }
 0x23c   : > { %v1599_v31 = vadd.f32 %v1567_v42, %v1466_v18  ;;  %v2273_v38 = vmul.f32 %v5561_v63, %v2236_v40  ;;  %v2274_v49 = vmul.f32 %v5561_v63, %v2237_v3  ;;  %v1600_v44 = vadd.f32 %v1568_v4, %v1467_v62  ;;  %v2238_v4 = vld [vmem:[#allocation2 + $0x13a] sm:$0xff] }
 0x23d   : > { %4436 = vmatmul.mubr.bf16.gmra.mrb[48].mxu1 %v2326_v1  ;;  %v1669_v51 = vmul.f32 %v5510_v9, %v2235_v30  ;;  %v2103_v53 = vadd.f32 %v2071_v0, %v2001_v48  ;;  %v2104_v20 = vadd.f32 %v2072_v22, %v2002_v10  ;;  %v1769_v17 = vmul.f32 %v5569_v26, %v5519_v5 }
 0x23e   : > { %v1700_v2 = vadd.f32 %v1668_v41, %v1599_v31  ;;  %v1770_v23 = vmul.f32 %v5569_v26, %v2035_v16  ;;  %v1870_v52 = vmul.f32 %v5525_v58, %v5243_v56  ;;  %v1871_v30 = vmul.f32 %v5525_v58, %v5261_v37  ;;  %v2239_v41 = vld [vmem:[#allocation2 + $0x142] sm:$0xff] }
 0x23f   : > { %v1701_v57 = vadd.f32 %v1669_v51, %v1600_v44  ;;  %v2204_v33 = vadd.f32 %v2172_v32, %v2103_v53  ;;  %v2205_v11 = vadd.f32 %v2173_v29, %v2104_v20  ;;  %v1971_v35 = vmul.f32 %v5581_v13, %v2236_v40  ;;  %v2038_v44 = vld [vmem:[#allocation2 + $0x150] sm:$0xff] }
 0x240   : > { %v1801_v21 = vadd.f32 %v1769_v17, %v1700_v2  ;;  %v1972_v34 = vmul.f32 %v5581_v13, %v2237_v3  ;;  %v2073_v56 = vmul.f32 %v5536_v15, %v2036_v25  ;;  %v2074_v19 = vmul.f32 %v5536_v15, %v2037_v59 }
 0x241   : > { %v1802_v39 = vadd.f32 %v1770_v23, %v1701_v57  ;;  %v2305_v37 = vadd.f32 %v2273_v38, %v2204_v33  ;;  %v2306_v27 = vadd.f32 %v2274_v49, %v2205_v11  ;;  %v1468_v45 = vmul.f32 %v5494_v47, %v5519_v5 }
 0x242   : > { %v1902_v0 = vadd.f32 %v1870_v52, %v1801_v21  ;;  %v1469_v22 = vmul.f32 %v5494_v47, %v2035_v16  ;;  %v1569_v18 = vmul.f32 %v5502_v14, %v1532_v50  ;;  %v1570_v24 = vmul.f32 %v5502_v14, %v1533_v8  ;;  %v2039_v21 = vld [vmem:[#allocation2 + $0x158] sm:$0xff] }
 0x243   : > { %v1903_v61 = vadd.f32 %v1871_v30, %v1802_v39  ;;  %v2327_v43 = vpack.c.bf16 %v2306_v27, %v2305_v37  ;;  %v1670_v42 = vmul.f32 %v5510_v9, %v2236_v40  ;;  %v1671_v1 = vmul.f32 %v5510_v9, %v2237_v3 }
 0x244   : > { %v2003_v62 = vadd.f32 %v1971_v35, %v1902_v0  ;;  %v1601_v48 = vadd.f32 %v1569_v18, %v1468_v45  ;;  %v1602_v10 = vadd.f32 %v1570_v24, %v1469_v22  ;;  %v1771_v5 = vmul.f32 %v5569_v26, %v2036_v25 }
 0x245   : > { %v2004_v32 = vadd.f32 %v1972_v34, %v1903_v61  ;;  %4439 = vmatprep.mubr.bf16.mxu1 %v2327_v43  ;;  %v2174_v16 = vmul.f32 %v5549_v7, %v5311_v60  ;;  %v1772_v31 = vmul.f32 %v5569_v26, %v2037_v59  ;;  %v2175_v40 = vmul.f32 %v5549_v7, %v5359_v55 }
 0x246   : > { %v2105_v29 = vadd.f32 %v2073_v56, %v2003_v62  ;;  %v1702_v49 = vadd.f32 %v1670_v42, %v1601_v48  ;;  %v1703_v3 = vadd.f32 %v1671_v1, %v1602_v10  ;;  %v2275_v53 = vmul.f32 %v5561_v63, %v2238_v4  ;;  %v2240_v56 = vld [vmem:[#allocation2 + $0x152] sm:$0xff] }
 0x247   : > { %v2106_v38 = vadd.f32 %v2074_v19, %v2004_v32  ;;  %v2276_v20 = vmul.f32 %v5561_v63, %v2239_v41  ;;  %v1872_v2 = vmul.f32 %v5525_v58, %v5311_v60  ;;  %v1873_v52 = vmul.f32 %v5525_v58, %v5359_v55 }
 0x248   : > { %v2206_v51 = vadd.f32 %v2174_v16, %v2105_v29  ;;  %v1803_v57 = vadd.f32 %v1771_v5, %v1702_v49  ;;  %v1804_v23 = vadd.f32 %v1772_v31, %v1703_v3  ;;  %v1973_v33 = vmul.f32 %v5581_v13, %v2238_v4  ;;  %v2040_v5 = vld [vmem:[#allocation2 + $0x168] sm:$0xff]  ;;  %v4536_v29 = vld [vmem:[%s6604_s9 + $0x20] sm:$0xff]  }
 0x249   : > { %v2207_v17 = vadd.f32 %v2175_v40, %v2106_v38  ;;  %v1974_v11 = vmul.f32 %v5581_v13, %v2239_v41  ;;  %v2075_v35 = vmul.f32 %v5536_v15, %v2038_v44  ;;  %v1470_v34 = vmul.f32 %v5494_v47, %v2036_v25  ;;  %v2241_v25 = vld [vmem:[#allocation2 + $0x15a] sm:$0xff]  ;;  %4459 = vmatprep.subr.bf16.mxu0 %v4536_v29 }
 0x24a   : > { %v2307_v30 = vadd.f32 %v2275_v53, %v2206_v51  ;;  %v1904_v8 = vadd.f32 %v1872_v2, %v1803_v57  ;;  %v1905_v39 = vadd.f32 %v1873_v52, %v1804_v23  ;;  %v1471_v19 = vmul.f32 %v5494_v47, %v2037_v59  ;;  %v1536_v53 = vld [vmem:[#allocation2 + $0x151] sm:$0xff]  ;;  %4460 = vmatpush3.bf16.msra.mxu0 %v4536_v29 }
 0x24b   : > { %v2308_v50 = vadd.f32 %v2276_v20, %v2207_v17  ;;  %v1571_v37 = vmul.f32 %v5502_v14, %v5311_v60  ;;  %v1572_v27 = vmul.f32 %v5502_v14, %v5359_v55  ;;  %v1672_v0 = vmul.f32 %v5510_v9, %v2238_v4  ;;  %v2041_v57 = vld [vmem:[#allocation2 + $0x170] sm:$0xff] }
 0x24c   : > { %v2005_v61 = vadd.f32 %v1973_v33, %v1904_v8  ;;  %v2006_v22 = vadd.f32 %v1974_v11, %v1905_v39  ;;  %v2076_v18 = vmul.f32 %v5536_v15, %v2039_v21  ;;  %v2176_v24 = vmul.f32 %v5549_v7, %v5308_v12 }
 0x24d   : > { %v2328_v45 = vpack.c.bf16 %v2308_v50, %v2307_v30  ;;  %v1603_v43 = vadd.f32 %v1571_v37, %v1470_v34  ;;  %v1604_v62 = vadd.f32 %v1572_v27, %v1471_v19  ;;  %v1673_v59 = vmul.f32 %v5510_v9, %v2239_v41  ;;  %v2242_v37 = vld [vmem:[#allocation2 + $0x16a] sm:$0xff] }
 0x24e   : > { %v2107_v60 = vadd.f32 %v2075_v35, %v2005_v61  ;;  %v2108_v42 = vadd.f32 %v2076_v18, %v2006_v22  ;;  %v2177_v55 = vmul.f32 %v5549_v7, %v5314_v46  ;;  %v2277_v1 = vmul.f32 %v5561_v63, %v2240_v56 }
 0x24f   : > { %4440 = vmatmul.mubr.bf16.gmra.mrb[52].mxu1 %v2328_v45  ;;  %v1704_v32 = vadd.f32 %v1672_v0, %v1603_v43  ;;  %v1705_v4 = vadd.f32 %v1673_v59, %v1604_v62  ;;  %v1773_v48 = vmul.f32 %v5569_v26, %v2038_v44  ;;  %v1774_v10 = vmul.f32 %v5569_v26, %v2039_v21  ;;  %v2243_v0 = vld [vmem:[#allocation2 + $0x172] sm:$0xff] }
 0x250   : > { %v2208_v41 = vadd.f32 %v2176_v24, %v2107_v60  ;;  %v2209_v16 = vadd.f32 %v2177_v55, %v2108_v42  ;;  %v2278_v31 = vmul.f32 %v5561_v63, %v2241_v25  ;;  %v1874_v38 = vmul.f32 %v5525_v58, %v5308_v12 }
 0x251   : > { %v1805_v40 = vadd.f32 %v1773_v48, %v1704_v32  ;;  %v1806_v49 = vadd.f32 %v1774_v10, %v1705_v4  ;;  %v1875_v3 = vmul.f32 %v5525_v58, %v5314_v46  ;;  %v1975_v51 = vmul.f32 %v5581_v13, %v2240_v56  ;;  %v2042_v48 = vld [vmem:[#allocation2 + $0x180] sm:$0xff] }
 0x252   : > { %v2309_v20 = vadd.f32 %v2277_v1, %v2208_v41  ;;  %v2310_v2 = vadd.f32 %v2278_v31, %v2209_v16  ;;  %v1976_v17 = vmul.f32 %v5581_v13, %v2241_v25  ;;  %v2077_v23 = vmul.f32 %v5536_v15, %v2040_v5  ;;  %v2043_v16 = vld [vmem:[#allocation2 + $0x188] sm:$0xff] }
 0x253   : > { %v1906_v52 = vadd.f32 %v1874_v38, %v1805_v40  ;;  %v1907_v30 = vadd.f32 %v1875_v3, %v1806_v49  ;;  %v1472_v12 = vmul.f32 %v5494_v47, %v2038_v44  ;;  %v1473_v33 = vmul.f32 %v5494_v47, %v2039_v21 }
 0x254   : > { %v2329_v11 = vpack.c.bf16 %v2310_v2, %v2309_v20  ;;  %v1573_v35 = vmul.f32 %v5502_v14, %v1536_v53  ;;  %v1574_v50 = vmul.f32 %v5502_v14, %v5314_v46  ;;  %v1674_v8 = vmul.f32 %v5510_v9, %v2240_v56 }
 0x255   : > { %v2007_v39 = vadd.f32 %v1975_v51, %v1906_v52  ;;  %v2008_v34 = vadd.f32 %v1976_v17, %v1907_v30  ;;  %v2078_v19 = vmul.f32 %v5536_v15, %v2041_v57  ;;  %v1675_v27 = vmul.f32 %v5510_v9, %v2241_v25  ;;  %v2245_v30 = vld [vmem:[#allocation2 + $0x18a] sm:$0xff] }
 0x256   : > { %4443 = vmatprep.mubr.bf16.mxu1 %v2329_v11  ;;  %v1605_v44 = vadd.f32 %v1573_v35, %v1472_v12  ;;  %v1606_v45 = vadd.f32 %v1574_v50, %v1473_v33  ;;  %v1775_v21 = vmul.f32 %v5569_v26, %v2040_v5  ;;  %v1776_v61 = vmul.f32 %v5569_v26, %v2041_v57 }
 0x257   : > { %v2109_v22 = vadd.f32 %v2077_v23, %v2007_v39  ;;  %v2110_v18 = vadd.f32 %v2078_v19, %v2008_v34  ;;  %v2178_v46 = vmul.f32 %v5549_v7, %v5403_v54  ;;  %v2179_v56 = vmul.f32 %v5549_v7, %v5437_v28  ;;  %v2044_v19 = vld [vmem:[#allocation2 + $0x198] sm:$0xff] }
 0x258   : > { %v2279_v24 = vmul.f32 %v5561_v63, %v2242_v37  ;;  %v1706_v43 = vadd.f32 %v1674_v8, %v1605_v44  ;;  %v1707_v25 = vadd.f32 %v1675_v27, %v1606_v45  ;;  %v2280_v60 = vmul.f32 %v5561_v63, %v2243_v0 }
 0x259   : > { %v2210_v62 = vadd.f32 %v2178_v46, %v2109_v22  ;;  %v2211_v59 = vadd.f32 %v2179_v56, %v2110_v18  ;;  %v1876_v42 = vmul.f32 %v5525_v58, %v5403_v54  ;;  %v1877_v32 = vmul.f32 %v5525_v58, %v5437_v28  ;;  %v2145_v22 = vld [vmem:[#allocation2 + $0x199] sm:$0xff] }
 0x25a   : > { %v1807_v55 = vadd.f32 %v1775_v21, %v1706_v43  ;;  %v1808_v1 = vadd.f32 %v1776_v61, %v1707_v25  ;;  %v1977_v4 = vmul.f32 %v5581_v13, %v2242_v37  ;;  %v1978_v41 = vmul.f32 %v5581_v13, %v2243_v0  ;;  %v4549_v25 = vld [vmem:[#allocation2 + $0x8] sm:$0xff] }
 0x25b   : > { %v2311_v10 = vadd.f32 %v2279_v24, %v2210_v62  ;;  %v2312_v29 = vadd.f32 %v2280_v60, %v2211_v59  ;;  %v1474_v31 = vmul.f32 %v5494_v47, %v2040_v5  ;;  %v1475_v49 = vmul.f32 %v5494_v47, %v2041_v57  ;;  %v2244_v5 = vld [vmem:[#allocation2 + $0x182] sm:$0xff] }
 0x25c   : > { %v1908_v38 = vadd.f32 %v1876_v42, %v1807_v55  ;;  %v1909_v40 = vadd.f32 %v1877_v32, %v1808_v1  ;;  %v1575_v3 = vmul.f32 %v5502_v14, %v5403_v54  ;;  %v2079_v53 = vmul.f32 %v5536_v15, %v2042_v48  ;;  %v2146_v24 = vld [vmem:[#allocation2 + $0x1a1] sm:$0xff] }
 0x25d   : > { %v2330_v51 = vpack.c.bf16 %v2312_v29, %v2311_v10  ;;  %v1576_v20 = vmul.f32 %v5502_v14, %v5437_v28  ;;  %v1676_v2 = vmul.f32 %v5510_v9, %v2242_v37  ;;  %v2080_v52 = vmul.f32 %v5536_v15, %v2043_v16  ;;  %v2247_v42 = vld [vmem:[#allocation2 + $0x1a2] sm:$0xff] }
 0x25e   : > { %v2009_v17 = vadd.f32 %v1977_v4, %v1908_v38  ;;  %v2010_v23 = vadd.f32 %v1978_v41, %v1909_v40  ;;  %v1607_v12 = vadd.f32 %v1575_v3, %v1474_v31  ;;  %v2180_v47 = vmul.f32 %v5549_v7, %v5400_v6  ;;  %v4538_v31 = vld [vmem:[%s6604_s9 + $0x30] sm:$0xff]   ;;  %v5705_v40 = vld [vmem:[%s6602_s7] ss:$0 sm:$0xff] }
 0x25f   : > { %4444 = vmatmul.mubr.bf16.gmra.mrb[56].mxu1 %v2330_v51  ;;  %v2181_v54 = vmul.f32 %v5549_v7, %v5406_v36  ;;  %v1608_v57 = vadd.f32 %v1576_v20, %v1475_v49  ;;  %v1677_v33 = vmul.f32 %v5510_v9, %v2243_v0  ;;  %v1777_v35 = vmul.f32 %v5569_v26, %v2042_v48  ;;  %v4537_v9 = vld [vmem:[%s6604_s9 + $0x28] sm:$0xff]   ;;  %v2701_v51 = vld [vmem:[#allocation3] sm:$0xff] }
 0x260   : > { %v2111_v28 = vadd.f32 %v2079_v53, %v2009_v17  ;;  %v2112_v14 = vadd.f32 %v2080_v52, %v2010_v23  ;;  %v1708_v11 = vadd.f32 %v1676_v2, %v1607_v12  ;;  %v2281_v50 = vmul.f32 %v5561_v63, %v2244_v5  ;;  %4461 = vmatprep.subr.bf16.mxu0 %v4537_v9  ;;  %v5711_v53 = vld [vmem:[%s6607_s12] ss:$0 sm:$0xff]  ;;  %v2802_v17 = vld [vmem:[#allocation3 + $0x1] sm:$0xff] }
 0x261   : > { %v2282_v8 = vmul.f32 %v5561_v63, %v2245_v30  ;;  %v1709_v39 = vadd.f32 %v1677_v33, %v1608_v57  ;;  %v1778_v34 = vmul.f32 %v5569_v26, %v2043_v16  ;;  %v1878_v45 = vmul.f32 %v5525_v58, %v5400_v6  ;;  %4462 = vmatpush3.bf16.msra.mxu0 %v4537_v9  ;;  %v2803_v23 = vld [vmem:[#allocation3 + $0x9] sm:$0xff]  ;;  %v5723_v33 = vld [vmem:[%s6607_s12 + $0x1] ss:$0 sm:$0xff] }
 0x262   : > { %v2212_v37 = vadd.f32 %v2180_v47, %v2111_v28  ;;  %v2213_v27 = vadd.f32 %v2181_v54, %v2112_v14  ;;  %v1809_v44 = vadd.f32 %v1777_v35, %v1708_v11  ;;  %v1879_v21 = vmul.f32 %v5525_v58, %v5406_v36  ;;  %v2246_v58 = vld [vmem:[#allocation2 + $0x19a] sm:$0xff]  ;;  %4463 = vmatprep.subr.bf16.mxu0 %v4538_v31 }
 0x263   : > { %v1810_v0 = vadd.f32 %v1778_v34, %v1709_v39  ;;  %v1979_v61 = vmul.f32 %v5581_v13, %v2244_v5  ;;  %v2081_v56 = vmul.f32 %v5536_v15, %v2044_v19  ;;  %v1980_v6 = vmul.f32 %v5581_v13, %v2245_v30  ;;  %v2903_v39 = vld [vmem:[#allocation3 + $0x2] sm:$0xff]  ;;  %v2904_v34 = vld [vmem:[#allocation3 + $0xa] sm:$0xff]  ;;  %v5732_v19 = vld [vmem:[%s6607_s12 + $0x2] ss:$0 sm:$0xff] }
 0x264   : > { %v2313_v18 = vadd.f32 %v2281_v50, %v2212_v37  ;;  %v2314_v26 = vadd.f32 %v2282_v8, %v2213_v27  ;;  %v1910_v46 = vadd.f32 %v1878_v45, %v1809_v44  ;;  %v2082_v62 = vmul.f32 %v4549_v25, %v5536_v15 }
 0x265   : > { %v1911_v43 = vadd.f32 %v1879_v21, %v1810_v0  ;;  %v2182_v36 = vmul.f32 %v5549_v7, %v2145_v22  ;;  %v2183_v1 = vmul.f32 %v5549_v7, %v2146_v24  ;;  %v2283_v48 = vmul.f32 %v5561_v63, %v2246_v58  ;;  %4464 = vmatpush3.bf16.msra.mxu0 %v4538_v31  ;;  %v4539_v7 = vld [vmem:[%s6604_s9 + $0x38] sm:$0xff]   ;;  %v5739_v21 = vld [vmem:[%s6607_s12 + $0x4] ss:$0 sm:$0xff]  ;;  %v5755_v24 = vld [vmem:[%s6607_s12 + $0x6] ss:$0 sm:$0xff] }
 0x266   : > { %v2331_v59 = vpack.c.bf16 %v2314_v26, %v2313_v18  ;;  %v2011_v60 = vadd.f32 %v1979_v61, %v1910_v46  ;;  %v2284_v13 = vmul.f32 %v5561_v63, %v2247_v42  ;;  %4465 = vmatprep.subr.bf16.mxu0 %v4539_v7  ;;  %v5700_v63 = vld [vmem:[%s6601_s6] ss:$0 sm:$0xff]  ;;  %v2738_v54 = vmul.f32 %v5711_v53, %v2701_v51  ;;  %v5744_v61 = vld [vmem:[%s6607_s12 + $0x7] ss:$0 sm:$0xff]  ;;  %v5749_v26 = vld [vmem:[%s6607_s12 + $0x3] ss:$0 sm:$0xff] }
 0x267   : > { %v2012_v55 = vadd.f32 %v1980_v6, %v1911_v43  ;;  %v2739_v57 = vmul.f32 %v4549_v25, %v5711_v53  ;;  %v2839_v11 = vmul.f32 %v5723_v33, %v2802_v17  ;;  %v2840_v35 = vmul.f32 %v5723_v33, %v2803_v23 }
 0x268   : > { %4447 = vmatprep.mubr.bf16.mxu1 %v2331_v59  ;;  %v2113_v32 = vadd.f32 %v2081_v56, %v2011_v60  ;;  %v2940_v9 = vmul.f32 %v5732_v19, %v2903_v39  ;;  %v2941_v0 = vmul.f32 %v5732_v19, %v2904_v34  ;;  %v5770_v60 = vld [vmem:[%s6607_s12 + $0x8] ss:$0 sm:$0xff] }
 0x269   : > { %v2114_v4 = vadd.f32 %v2082_v62, %v2012_v55  ;;  %4466 = vmatpush3.bf16.msra.mxu0 %v4539_v7  ;;  %v2871_v44 = vadd.f32 %v2839_v11, %v2738_v54  ;;  %v2872_v45 = vadd.f32 %v2840_v35, %v2739_v57 }
 0x26a   : > { %v2214_v10 = vadd.f32 %v2182_v36, %v2113_v32  ;;  %v5782_v32 = vld [vmem:[%s6607_s12 + $0x5] ss:$0 sm:$0xff] }
 0x26b   : > { %v2215_v29 = vadd.f32 %v2183_v1, %v2114_v4  ;;  %v2972_v22 = vadd.f32 %v2940_v9, %v2871_v44  ;;  %v2973_v18 = vadd.f32 %v2941_v0, %v2872_v45 }
 0x26c   : > { %v2315_v15 = vadd.f32 %v2283_v48, %v2214_v10 }
 0x26d   : > { %v2316_v41 = vadd.f32 %v2284_v13, %v2215_v29 }
 0x26f   : > { %v2332_v16 = vpack.c.bf16 %v2316_v41, %v2315_v15 }
 0x271   : > { %4448 = vmatmul.mubr.bf16.gmra.mrb[60].mxu1 %v2332_v16 }
 0x2c4   : > { %v4421_v38 = vpop.f32.mrb[32].mxu1 }
 0x2c5   : > { %v2567_v49 = vmul.f32 %v4421_v38, %v5700_v63  ;;  %v2431_v3 = vpop.f32.mrb[33].mxu1 }
 0x2c6   : > { %v2565_v20 = vmul.f32 %v5700_v63, %v2431_v3  ;;  %v4422_v2 = vpop.f32.mrb[34].mxu1 }
 0x2c7   : > { %v2606_v52 = vadd.f32 %v5705_v40, %v2567_v49  ;;  %v2568_v5 = vmul.f32 %v4422_v2, %v5700_v63  ;;  %v2434_v30 = vpop.f32.mrb[35].mxu1 }
 0x2c8   : > { %v2604_v12 = vadd.f32 %v5705_v40, %v2565_v20  ;;  %v2566_v47 = vmul.f32 %v5700_v63, %v2434_v30 }
 0x2c9   : > { %v2638_v28 = vmax.f32 %v2606_v52, 0.0  ;;  %v2607_v14 = vadd.f32 %v5705_v40, %v2568_v5 }
 0x2ca   : > { %v2636_v50 = vmax.f32 %v2604_v12, 0.0  ;;  %v2605_v8 = vadd.f32 %v5705_v40, %v2566_v47 }
 0x2cb   : > { %2671 = vst [vmem:[#allocation3 + $0x31] sm:$0xff] %v2638_v28  ;;  %v2639_v37 = vmax.f32 %v2607_v14, 0.0  ;;  %v5758_v43 = vmul.f32 %v5744_v61, %v2638_v28  ;;  %v3144_v6 = vmul.f32 %v5739_v21, %v2638_v28  ;;  %v5762_v25 = vmul.f32 %v5723_v33, %v2638_v28 }
 0x2cc   : > { %2669 = vst [vmem:[#allocation3 + $0x19] sm:$0xff] %v2636_v50  ;;  %v2637_v27 = vmax.f32 %v2605_v8, 0.0  ;;  %v3142_v46 = vmul.f32 %v5739_v21, %v2636_v50  ;;  %v2841_v36 = vmul.f32 %v5723_v33, %v2636_v50 }
 0x2cd   : > { %2672 = vst [vmem:[#allocation3 + $0x39] sm:$0xff] %v2639_v37  ;;  %v5765_v59 = vmul.f32 %v5744_v61, %v2639_v37  ;;  %v3145_v58 = vmul.f32 %v5739_v21, %v2639_v37  ;;  %v5775_v42 = vmul.f32 %v5723_v33, %v2639_v37 }
 0x2ce   : > { %2670 = vst [vmem:[#allocation3 + $0x21] sm:$0xff] %v2637_v27  ;;  %v3143_v1 = vmul.f32 %v5739_v21, %v2637_v27  ;;  %v2842_v10 = vmul.f32 %v5723_v33, %v2637_v27 }
 0x2d2   : > { %v3308_v56 = vld [vmem:[#allocation3 + $0x30] sm:$0xff] }
 0x2d3   : > { %v3004_v62 = vld [vmem:[#allocation3 + $0x18] sm:$0xff]  ;;  %v3345_v16 = vmul.f32 %v5755_v24, %v3308_v56  ;;  %v3043_v7 = vmul.f32 %v5749_v26, %v3308_v56  ;;  %v2742_v38 = vmul.f32 %v5711_v53, %v3308_v56 }
 0x2d4   : > { %v3041_v55 = vmul.f32 %v5749_v26, %v3004_v62  ;;  %v3309_v4 = vld [vmem:[#allocation3 + $0x38] sm:$0xff]  ;;  %v2740_v13 = vmul.f32 %v5711_v53, %v3004_v62 }
 0x2d5   : > { %v5784_v48 = vld [vmem:[#allocation3 + $0x32] sm:$0xff]  ;;  %v3005_v29 = vld [vmem:[#allocation3 + $0x20] sm:$0xff]  ;;  %v3346_v31 = vmul.f32 %v5755_v24, %v3309_v4  ;;  %v3044_v20 = vmul.f32 %v5749_v26, %v3309_v4 }
 0x2d6   : > { %v3206_v15 = vld [vmem:[#allocation3 + $0x1a] sm:$0xff]  ;;  %v3207_v41 = vld [vmem:[#allocation3 + $0x22] sm:$0xff]  ;;  %v3042_v49 = vmul.f32 %v5749_v26, %v3005_v29  ;;  %v3073_v3 = vadd.f32 %v3041_v55, %v2972_v22  ;;  %v3547_v51 = vmul.f32 %v5770_v60, %v5784_v48  ;;  %v2741_v23 = vmul.f32 %v5711_v53, %v3005_v29 }
 0x2d7   : > { %v3243_v17 = vmul.f32 %v5782_v32, %v3206_v15  ;;  %v2873_v52 = vadd.f32 %v2841_v36, %v2740_v13  ;;  %v2942_v5 = vmul.f32 %v5732_v19, %v3206_v15  ;;  %v3244_v57 = vmul.f32 %v5782_v32, %v3207_v41  ;;  %v3511_v62 = vld [vmem:[#allocation3 + $0x3a] sm:$0xff] }
 0x2d8   : > { %v4425_v2 = vpop.f32.mrb[36].mxu1  ;;  %v3074_v47 = vadd.f32 %v3042_v49, %v2973_v18  ;;  %v3174_v54 = vadd.f32 %v3142_v46, %v3073_v3  ;;  %v2874_v11 = vadd.f32 %v2842_v10, %v2741_v23  ;;  %v2943_v35 = vmul.f32 %v5732_v19, %v3207_v41 }
 0x2d9   : > { %v2571_v30 = vmul.f32 %v4425_v2, %v5700_v63  ;;  %v2447_v12 = vpop.f32.mrb[37].mxu1  ;;  %v2974_v50 = vadd.f32 %v2942_v5, %v2873_v52  ;;  %v2743_v41 = vmul.f32 %v5711_v53, %v3309_v4  ;;  %v3548_v49 = vmul.f32 %v5770_v60, %v3511_v62 }
 0x2da   : > { %v2569_v28 = vmul.f32 %v5700_v63, %v2447_v12  ;;  %v4426_v14 = vpop.f32.mrb[38].mxu1  ;;  %v3175_v37 = vadd.f32 %v3143_v1, %v3074_v47  ;;  %v3275_v27 = vadd.f32 %v3243_v17, %v3174_v54  ;;  %v2975_v9 = vadd.f32 %v2943_v35, %v2874_v11 }
 0x2db   : > { %v2610_v8 = vadd.f32 %v5705_v40, %v2571_v30  ;;  %v2572_v39 = vmul.f32 %v4426_v14, %v5700_v63  ;;  %v2450_v34 = vpop.f32.mrb[39].mxu1  ;;  %v3075_v0 = vadd.f32 %v3043_v7, %v2974_v50  ;;  %v2944_v17 = vmul.f32 %v5732_v19, %v5784_v48 }
 0x2dc   : > { %v2608_v44 = vadd.f32 %v5705_v40, %v2569_v28  ;;  %v2570_v45 = vmul.f32 %v5700_v63, %v2450_v34  ;;  %v3276_v46 = vadd.f32 %v3244_v57, %v3175_v37  ;;  %v3377_v56 = vadd.f32 %v3345_v16, %v3275_v27 }
 0x2dd   : > { %v2642_v22 = vmax.f32 %v2610_v8, 0.0  ;;  %v2611_v18 = vadd.f32 %v5705_v40, %v2572_v39  ;;  %v3076_v13 = vadd.f32 %v3044_v20, %v2975_v9  ;;  %v3176_v10 = vadd.f32 %v3144_v6, %v3075_v0 }
 0x2de   : > { %v2640_v36 = vmax.f32 %v2608_v44, 0.0  ;;  %v2609_v55 = vadd.f32 %v5705_v40, %v2570_v45  ;;  %v3378_v29 = vadd.f32 %v3346_v31, %v3276_v46  ;;  %v3478_v15 = vadd.f32 %v5758_v43, %v3377_v56 }
 0x2df   : > { %2675 = vst [vmem:[#allocation3 + $0x61] sm:$0xff] %v2642_v22  ;;  %v2643_v1 = vmax.f32 %v2611_v18, 0.0  ;;  %v3177_v3 = vadd.f32 %v3145_v58, %v3076_v13  ;;  %v3245_v16 = vmul.f32 %v5782_v32, %v5784_v48  ;;  %v3246_v6 = vmul.f32 %v5782_v32, %v3511_v62 }
 0x2e0   : > { %2673 = vst [vmem:[#allocation3 + $0x49] sm:$0xff] %v2640_v36  ;;  %v2641_v7 = vmax.f32 %v2609_v55, 0.0  ;;  %v3479_v2 = vadd.f32 %v5765_v59, %v3378_v29  ;;  %v2875_v20 = vadd.f32 %v5762_v25, %v2742_v38  ;;  %v2876_v31 = vadd.f32 %v5775_v42, %v2743_v41 }
 0x2e1   : > { %2676 = vst [vmem:[#allocation3 + $0x69] sm:$0xff] %v2643_v1  ;;  %v3277_v43 = vadd.f32 %v3245_v16, %v3176_v10  ;;  %v3448_v4 = vmul.f32 %v5744_v61, %v2640_v36  ;;  %v3579_v58 = vadd.f32 %v3547_v51, %v3478_v15  ;;  %v3278_v52 = vadd.f32 %v3246_v6, %v3177_v3 }
 0x2e2   : > { %2674 = vst [vmem:[#allocation3 + $0x51] sm:$0xff] %v2641_v7  ;;  %v3580_v23 = vadd.f32 %v3548_v49, %v3479_v2  ;;  %v2945_v5 = vmul.f32 %v5732_v19, %v3511_v62  ;;  %v3449_v59 = vmul.f32 %v5744_v61, %v2641_v7  ;;  %v3146_v30 = vmul.f32 %v5739_v21, %v2640_v36 }
 0x2e3   : > { %v3147_v25 = vmul.f32 %v5739_v21, %v2641_v7  ;;  %v5826_v42 = vmul.f32 %v5744_v61, %v2642_v22  ;;  %v2976_v12 = vadd.f32 %v2944_v17, %v2875_v20  ;;  %v5829_v54 = vmul.f32 %v5744_v61, %v2643_v1 }
 0x2e4   : > { %v3611_v38 = vpack.c.bf16 %v3580_v23, %v3579_v58  ;;  %v2977_v47 = vadd.f32 %v2945_v5, %v2876_v31  ;;  %v2845_v51 = vmul.f32 %v5723_v33, %v2640_v36  ;;  %v2846_v57 = vmul.f32 %v5723_v33, %v2641_v7 }
 0x2e5   : > { %v5834_v28 = vmul.f32 %v5739_v21, %v2642_v22  ;;  %v5837_v14 = vmul.f32 %v5739_v21, %v2643_v1  ;;  %v5844_v8 = vmul.f32 %v5723_v33, %v2642_v22  ;;  %v5847_v39 = vmul.f32 %v5723_v33, %v2643_v1 }
 0x2e6   : > { %v3312_v48 = vld [vmem:[#allocation3 + $0x60] sm:$0xff]  ;;  %4467 = vmatprep.mubr.bf16.mxu0 %v3611_v38 }
 0x2e7   : > { %v3310_v11 = vld [vmem:[#allocation3 + $0x48] sm:$0xff]  ;;  %v3349_v35 = vmul.f32 %v5755_v24, %v3312_v48  ;;  %v5841_v50 = vmul.f32 %v5749_v26, %v3312_v48  ;;  %v5859_v0 = vmul.f32 %v5711_v53, %v3312_v48 }
 0x2e8   : > { %v3347_v34 = vmul.f32 %v5755_v24, %v3310_v11  ;;  %v3045_v37 = vmul.f32 %v5749_v26, %v3310_v11  ;;  %v5851_v27 = vld [vmem:[#allocation3 + $0x68] sm:$0xff]  ;;  %v2744_v9 = vmul.f32 %v5711_v53, %v3310_v11 }
 0x2e9   : > { %v5853_v44 = vld [vmem:[#allocation3 + $0x62] sm:$0xff]  ;;  %v5855_v45 = vld [vmem:[#allocation3 + $0x6a] sm:$0xff]  ;;  %v3513_v46 = vld [vmem:[#allocation3 + $0x52] sm:$0xff]  ;;  %v3350_v56 = vmul.f32 %v5755_v24, %v5851_v27  ;;  %v3048_v55 = vmul.f32 %v5749_v26, %v5851_v27 }
 0x2ea   : > { %v3311_v22 = vld [vmem:[#allocation3 + $0x50] sm:$0xff]  ;;  %v3551_v62 = vmul.f32 %v5770_v60, %v5853_v44  ;;  %v5867_v36 = vmul.f32 %v5770_v60, %v5855_v45  ;;  %v3379_v10 = vadd.f32 %v3347_v34, %v3277_v43  ;;  %v3550_v29 = vmul.f32 %v5770_v60, %v3513_v46 }
 0x2eb   : > { %v3512_v18 = vld [vmem:[#allocation3 + $0x4a] sm:$0xff]  ;;  %v3348_v13 = vmul.f32 %v5755_v24, %v3311_v22  ;;  %v3046_v15 = vmul.f32 %v5749_v26, %v3311_v22  ;;  %v3077_v41 = vadd.f32 %v3045_v37, %v2976_v12  ;;  %v3248_v49 = vmul.f32 %v5782_v32, %v3513_v46 }
 0x2ec   : > { %v3549_v1 = vmul.f32 %v5770_v60, %v3512_v18  ;;  %v3247_v7 = vmul.f32 %v5782_v32, %v3512_v18  ;;  %v4429_v3 = vpop.f32.mrb[40].mxu1  ;;  %v3480_v2 = vadd.f32 %v3448_v4, %v3379_v10  ;;  %v2745_v6 = vmul.f32 %v5711_v53, %v3311_v22 }
 0x2ed   : > { %v3380_v16 = vadd.f32 %v3348_v13, %v3278_v52  ;;  %v2877_v20 = vadd.f32 %v2845_v51, %v2744_v9  ;;  %v2575_v31 = vmul.f32 %v4429_v3, %v5700_v63  ;;  %v2463_v43 = vpop.f32.mrb[41].mxu1  ;;  %v3078_v17 = vadd.f32 %v3046_v15, %v2977_v47 }
 0x2ee   : > { %v3178_v58 = vadd.f32 %v3146_v30, %v3077_v41  ;;  %v2946_v23 = vmul.f32 %v5732_v19, %v3512_v18  ;;  %v2573_v5 = vmul.f32 %v5700_v63, %v2463_v43  ;;  %v4430_v38 = vpop.f32.mrb[42].mxu1  ;;  %v3581_v48 = vadd.f32 %v3549_v1, %v3480_v2 }
 0x2ef   : > { %v3481_v12 = vadd.f32 %v3449_v59, %v3380_v16  ;;  %v2878_v11 = vadd.f32 %v2846_v57, %v2745_v6  ;;  %v2614_v34 = vadd.f32 %v5705_v40, %v2575_v31  ;;  %v2576_v4 = vmul.f32 %v4430_v38, %v5700_v63  ;;  %v2466_v52 = vpop.f32.mrb[43].mxu1 }
 0x2f0   : > { %v3179_v37 = vadd.f32 %v3147_v25, %v3078_v17  ;;  %v3279_v51 = vadd.f32 %v3247_v7, %v3178_v58  ;;  %v2612_v9 = vadd.f32 %v5705_v40, %v2573_v5  ;;  %v2574_v47 = vmul.f32 %v5700_v63, %v2466_v52 }
 0x2f1   : > { %v3582_v30 = vadd.f32 %v3550_v29, %v3481_v12  ;;  %v2947_v22 = vmul.f32 %v5732_v19, %v3513_v46  ;;  %v5886_v18 = vmax.f32 %v2614_v34, 0.0  ;;  %v2615_v59 = vadd.f32 %v5705_v40, %v2576_v4 }
 0x2f2   : > { %v3280_v13 = vadd.f32 %v3248_v49, %v3179_v37  ;;  %v3381_v57 = vadd.f32 %v3349_v35, %v3279_v51  ;;  %v2644_v10 = vmax.f32 %v2612_v9, 0.0  ;;  %v2613_v1 = vadd.f32 %v5705_v40, %v2574_v47 }
 0x2f3   : > { %v3612_v15 = vpack.c.bf16 %v3582_v30, %v3581_v48  ;;  %v2978_v41 = vadd.f32 %v2946_v23, %v2877_v20  ;;  %2679 = vst [vmem:[#allocation3 + $0x91] sm:$0xff] %v5886_v18  ;;  %v5891_v25 = vmax.f32 %v2615_v59, 0.0  ;;  %v2979_v3 = vadd.f32 %v2947_v22, %v2878_v11 }
 0x2f4   : > { %v3382_v7 = vadd.f32 %v3350_v56, %v3280_v13  ;;  %v3482_v29 = vadd.f32 %v5826_v42, %v3381_v57  ;;  %2677 = vst [vmem:[#allocation3 + $0x79] sm:$0xff] %v2644_v10  ;;  %v2645_v46 = vmax.f32 %v2613_v1, 0.0  ;;  %v3249_v35 = vmul.f32 %v5782_v32, %v5853_v44 }
 0x2f5   : > { %4468 = vmatmul.mubr.bf16.vlgmr.msra.gmra.mrb[40].mxu0 %v3612_v15  ;;  %v3079_v16 = vadd.f32 %v5841_v50, %v2978_v41  ;;  %v3250_v49 = vmul.f32 %v5782_v32, %v5855_v45  ;;  %2680 = vst [vmem:[#allocation3 + $0x99] sm:$0xff] %v5891_v25  ;;  %v3080_v56 = vadd.f32 %v3048_v55, %v2979_v3 }
 0x2f6   : > { %v3483_v2 = vadd.f32 %v5829_v54, %v3382_v7  ;;  %v3583_v6 = vadd.f32 %v3551_v62, %v3482_v29  ;;  %v3452_v42 = vmul.f32 %v5744_v61, %v2644_v10  ;;  %2678 = vst [vmem:[#allocation3 + $0x81] sm:$0xff] %v2645_v46  ;;  %v3453_v31 = vmul.f32 %v5744_v61, %v2645_v46 }
 0x2f7   : > { %v3180_v20 = vadd.f32 %v5834_v28, %v3079_v16  ;;  %v2747_v50 = vmul.f32 %v5711_v53, %v5851_v27  ;;  %v2879_v43 = vadd.f32 %v5844_v8, %v5859_v0  ;;  %v3181_v58 = vadd.f32 %v5837_v14, %v3080_v56 }
 0x2f8   : > { %v3584_v17 = vadd.f32 %v5867_v36, %v3483_v2  ;;  %v2948_v54 = vmul.f32 %v5732_v19, %v5853_v44  ;;  %v2949_v62 = vmul.f32 %v5732_v19, %v5855_v45  ;;  %v3150_v23 = vmul.f32 %v5739_v21, %v2644_v10 }
 0x2f9   : > { %v3281_v55 = vadd.f32 %v3249_v35, %v3180_v20  ;;  %v2880_v28 = vadd.f32 %v5847_v39, %v2747_v50  ;;  %v3151_v27 = vmul.f32 %v5739_v21, %v2645_v46  ;;  %v3282_v38 = vadd.f32 %v3250_v49, %v3181_v58 }
 0x2fa   : > { %v3613_v5 = vpack.c.bf16 %v3584_v17, %v3583_v6  ;;  %v2980_v8 = vadd.f32 %v2948_v54, %v2879_v43  ;;  %v5919_v0 = vmul.f32 %v5744_v61, %v5886_v18  ;;  %v3316_v36 = vld [vmem:[#allocation3 + $0x90] sm:$0xff]  ;;  %v5923_v44 = vmul.f32 %v5744_v61, %v5891_v25 }
 0x2fb   : > { %v2981_v14 = vadd.f32 %v2949_v62, %v2880_v28  ;;  %v2849_v45 = vmul.f32 %v5723_v33, %v2644_v10  ;;  %v2850_v39 = vmul.f32 %v5723_v33, %v2645_v46  ;;  %v3314_v12 = vld [vmem:[#allocation3 + $0x78] sm:$0xff]  ;;  %v3353_v48 = vmul.f32 %v5755_v24, %v3316_v36 }
 0x2fc   : > { %4471 = vmatprep.mubr.bf16.mxu0 %v3613_v5  ;;  %v5929_v11 = vmul.f32 %v5749_v26, %v3316_v36  ;;  %v5933_v34 = vmul.f32 %v5739_v21, %v5886_v18  ;;  %v5937_v4 = vmul.f32 %v5739_v21, %v5891_v25  ;;  %v3351_v52 = vmul.f32 %v5755_v24, %v3314_v12  ;;  %v5941_v51 = vld [vmem:[#allocation3 + $0x98] sm:$0xff] }
 0x2fd   : > { %v3049_v37 = vmul.f32 %v5749_v26, %v3314_v12  ;;  %v5943_v9 = vld [vmem:[#allocation3 + $0x92] sm:$0xff]  ;;  %v5945_v47 = vld [vmem:[#allocation3 + $0x9a] sm:$0xff]  ;;  %v2748_v30 = vmul.f32 %v5711_v53, %v3314_v12  ;;  %v5949_v22 = vmul.f32 %v5711_v53, %v3316_v36  ;;  %v3517_v10 = vld [vmem:[#allocation3 + $0x82] sm:$0xff]  ;;  %v3354_v1 = vmul.f32 %v5755_v24, %v5941_v51 }
 0x2fe   : > { %v4433_v59 = vpop.f32.mrb[44].mxu1  ;;  %v3315_v13 = vld [vmem:[#allocation3 + $0x80] sm:$0xff]  ;;  %v5955_v15 = vmul.f32 %v5770_v60, %v5943_v9  ;;  %v5959_v41 = vmul.f32 %v5770_v60, %v5945_v47  ;;  %v3052_v7 = vmul.f32 %v5749_v26, %v5941_v51  ;;  %v3383_v16 = vadd.f32 %v3351_v52, %v3281_v55 }
 0x2ff   : > { %v3516_v57 = vld [vmem:[#allocation3 + $0x7a] sm:$0xff]  ;;  %v2579_v29 = vmul.f32 %v4433_v59, %v5700_v63  ;;  %v2479_v3 = vpop.f32.mrb[45].mxu1  ;;  %v3352_v46 = vmul.f32 %v5755_v24, %v3315_v13  ;;  %v3554_v6 = vmul.f32 %v5770_v60, %v3517_v10  ;;  %v3050_v56 = vmul.f32 %v5749_v26, %v3315_v13 }
 0x300   : > { %v3553_v35 = vmul.f32 %v5770_v60, %v3516_v57  ;;  %v2577_v49 = vmul.f32 %v5700_v63, %v2479_v3  ;;  %v4434_v2 = vpop.f32.mrb[46].mxu1  ;;  %v3081_v20 = vadd.f32 %v3049_v37, %v2980_v8  ;;  %v3484_v54 = vadd.f32 %v3452_v42, %v3383_v16 }
 0x301   : > { %v2618_v50 = vadd.f32 %v5705_v40, %v2579_v29  ;;  %v2580_v43 = vmul.f32 %v4434_v2, %v5700_v63  ;;  %v2482_v17 = vpop.f32.mrb[47].mxu1  ;;  %v3384_v58 = vadd.f32 %v3352_v46, %v3282_v38  ;;  %v3082_v28 = vadd.f32 %v3050_v56, %v2981_v14 }
 0x302   : > { %v2616_v62 = vadd.f32 %v5705_v40, %v2577_v49  ;;  %v2578_v55 = vmul.f32 %v5700_v63, %v2482_v17  ;;  %v3182_v5 = vadd.f32 %v3150_v23, %v3081_v20  ;;  %v3585_v59 = vadd.f32 %v3553_v35, %v3484_v54 }
 0x303   : > { %v5973_v36 = vmax.f32 %v2618_v50, 0.0  ;;  %v2619_v12 = vadd.f32 %v5705_v40, %v2580_v43  ;;  %v3485_v52 = vadd.f32 %v3453_v31, %v3384_v58  ;;  %v3183_v29 = vadd.f32 %v3151_v27, %v3082_v28 }
 0x304   : > { %v5976_v8 = vmax.f32 %v2616_v62, 0.0  ;;  %v2617_v37 = vadd.f32 %v5705_v40, %v2578_v55  ;;  %v3251_v38 = vmul.f32 %v5782_v32, %v3516_v57  ;;  %v3252_v23 = vmul.f32 %v5782_v32, %v3517_v10 }
 0x305   : > { %2683 = vst [vmem:[#allocation3 + $0xc1] sm:$0xff] %v5973_v36  ;;  %v5981_v42 = vmax.f32 %v2619_v12, 0.0  ;;  %v3586_v3 = vadd.f32 %v3554_v6, %v3485_v52  ;;  %v2749_v14 = vmul.f32 %v5711_v53, %v3315_v13  ;;  %v2881_v16 = vadd.f32 %v2849_v45, %v2748_v30 }
 0x306   : > { %2681 = vst [vmem:[#allocation3 + $0xa9] sm:$0xff] %v5976_v8  ;;  %v5986_v31 = vmax.f32 %v2617_v37, 0.0  ;;  %v3283_v46 = vadd.f32 %v3251_v38, %v3182_v5  ;;  %v2950_v35 = vmul.f32 %v5732_v19, %v3516_v57  ;;  %v3284_v49 = vadd.f32 %v3252_v23, %v3183_v29 }
 0x307   : > { %2684 = vst [vmem:[#allocation3 + $0xc9] sm:$0xff] %v5981_v42  ;;  %v3614_v27 = vpack.c.bf16 %v3586_v3, %v3585_v59  ;;  %v2882_v2 = vadd.f32 %v2850_v39, %v2749_v14  ;;  %v2951_v56 = vmul.f32 %v5732_v19, %v3517_v10  ;;  %v3253_v13 = vmul.f32 %v5782_v32, %v5943_v9 }
 0x308   : > { %2682 = vst [vmem:[#allocation3 + $0xb1] sm:$0xff] %v5986_v31  ;;  %v3385_v6 = vadd.f32 %v3353_v48, %v3283_v46  ;;  %v2982_v20 = vadd.f32 %v2950_v35, %v2881_v16  ;;  %v3254_v50 = vmul.f32 %v5782_v32, %v5945_v47  ;;  %v3386_v45 = vadd.f32 %v3354_v1, %v3284_v49 }
 0x309   : > { %4472 = vmatmul.mubr.bf16.gmra.mrb[44].mxu0 %v3614_v27  ;;  %v2983_v30 = vadd.f32 %v2951_v56, %v2882_v2  ;;  %v3456_v57 = vmul.f32 %v5744_v61, %v5976_v8  ;;  %v3457_v39 = vmul.f32 %v5744_v61, %v5986_v31  ;;  %v2751_v43 = vmul.f32 %v5711_v53, %v5941_v51 }
 0x30a   : > { %v3486_v10 = vadd.f32 %v5919_v0, %v3385_v6  ;;  %v3083_v48 = vadd.f32 %v5929_v11, %v2982_v20  ;;  %v2851_v17 = vmul.f32 %v5723_v33, %v5886_v18  ;;  %v3487_v58 = vadd.f32 %v5923_v44, %v3386_v45 }
 0x30b   : > { %v3084_v1 = vadd.f32 %v3052_v7, %v2983_v30  ;;  %v2852_v54 = vmul.f32 %v5723_v33, %v5891_v25  ;;  %v2952_v62 = vmul.f32 %v5732_v19, %v5943_v9  ;;  %v2953_v51 = vmul.f32 %v5732_v19, %v5945_v47 }
 0x30c   : > { %v3587_v55 = vadd.f32 %v5955_v15, %v3486_v10  ;;  %v3184_v0 = vadd.f32 %v5933_v34, %v3083_v48  ;;  %v2883_v11 = vadd.f32 %v2851_v17, %v5949_v22  ;;  %v3588_v18 = vadd.f32 %v5959_v41, %v3487_v58  ;;  %v3320_v48 = vld [vmem:[#allocation3 + $0xc0] sm:$0xff] }
 0x30d   : > { %v3185_v44 = vadd.f32 %v5937_v4, %v3084_v1  ;;  %v6018_v7 = vld [vmem:[#allocation3 + $0xa8] sm:$0xff]  ;;  %v2884_v28 = vadd.f32 %v2852_v54, %v2751_v43  ;;  %v3154_v25 = vmul.f32 %v5739_v21, %v5976_v8  ;;  %v3155_v59 = vmul.f32 %v5739_v21, %v5986_v31 }
 0x30e   : > { %v3285_v9 = vadd.f32 %v3253_v13, %v3184_v0  ;;  %v3355_v15 = vmul.f32 %v5755_v24, %v6018_v7  ;;  %v2984_v34 = vadd.f32 %v2952_v62, %v2883_v11  ;;  %v3053_v22 = vmul.f32 %v5749_v26, %v6018_v7  ;;  %v3321_v54 = vld [vmem:[#allocation3 + $0xc8] sm:$0xff] }
 0x30f   : > { %v3615_v5 = vpack.c.bf16 %v3588_v18, %v3587_v55  ;;  %v3286_v47 = vadd.f32 %v3254_v50, %v3185_v44  ;;  %v3319_v12 = vld [vmem:[#allocation3 + $0xb0] sm:$0xff]  ;;  %v2985_v52 = vadd.f32 %v2953_v51, %v2884_v28  ;;  %v3357_v44 = vmul.f32 %v5755_v24, %v3320_v48  ;;  %v3522_v28 = vld [vmem:[#allocation3 + $0xc2] sm:$0xff] }
 0x310   : > { %v6026_v41 = vld [vmem:[#allocation3 + $0xaa] sm:$0xff]  ;;  %v6028_v4 = vld [vmem:[#allocation3 + $0xb2] sm:$0xff]  ;;  %v4437_v37 = vpop.f32.mrb[48].mxu1  ;;  %v3356_v29 = vmul.f32 %v5755_v24, %v3319_v12  ;;  %v3387_v38 = vadd.f32 %v3355_v15, %v3285_v9  ;;  %v3054_v16 = vmul.f32 %v5749_v26, %v3319_v12  ;;  %v3085_v35 = vadd.f32 %v3053_v22, %v2984_v34 }
 0x311   : > { %v3557_v3 = vmul.f32 %v5770_v60, %v6026_v41  ;;  %v3558_v23 = vmul.f32 %v5770_v60, %v6028_v4  ;;  %v2583_v14 = vmul.f32 %v4437_v37, %v5700_v63  ;;  %v2495_v46 = vpop.f32.mrb[49].mxu1  ;;  %4475 = vmatprep.mubr.bf16.mxu0 %v3615_v5  ;;  %v3255_v27 = vmul.f32 %v5782_v32, %v6026_v41 }
 0x312   : > { %v2581_v49 = vmul.f32 %v5700_v63, %v2495_v46  ;;  %v4438_v2 = vpop.f32.mrb[50].mxu1  ;;  %v3388_v56 = vadd.f32 %v3356_v29, %v3286_v47  ;;  %v3488_v6 = vadd.f32 %v3456_v57, %v3387_v38  ;;  %v3256_v20 = vmul.f32 %v5782_v32, %v6028_v4 }
 0x313   : > { %v2622_v13 = vadd.f32 %v5705_v40, %v2583_v14  ;;  %v2584_v50 = vmul.f32 %v4438_v2, %v5700_v63  ;;  %v2498_v45 = vpop.f32.mrb[51].mxu1  ;;  %v3086_v30 = vadd.f32 %v3054_v16, %v2985_v52  ;;  %v3186_v10 = vadd.f32 %v3154_v25, %v3085_v35  ;;  %v3523_v25 = vld [vmem:[#allocation3 + $0xca] sm:$0xff] }
 0x314   : > { %v2620_v43 = vadd.f32 %v5705_v40, %v2581_v49  ;;  %v2582_v17 = vmul.f32 %v5700_v63, %v2498_v45  ;;  %v3489_v58 = vadd.f32 %v3457_v39, %v3388_v56  ;;  %v3589_v1 = vadd.f32 %v3557_v3, %v3488_v6 }
 0x315   : > { %v2654_v62 = vmax.f32 %v2622_v13, 0.0  ;;  %v2623_v57 = vadd.f32 %v5705_v40, %v2584_v50  ;;  %v3187_v55 = vadd.f32 %v3155_v59, %v3086_v30  ;;  %v3287_v0 = vadd.f32 %v3255_v27, %v3186_v10  ;;  %v2819_v30 = vld [vmem:[#allocation3 + $0xc9] sm:$0xff] }
 0x316   : > { %v2652_v11 = vmax.f32 %v2620_v43, 0.0  ;;  %v2621_v51 = vadd.f32 %v5705_v40, %v2582_v17  ;;  %v3590_v18 = vadd.f32 %v3558_v23, %v3489_v58  ;;  %v3358_v39 = vmul.f32 %v5755_v24, %v3321_v54 }
 0x317   : > { %2687 = vst [vmem:[#allocation3 + $0xf1] sm:$0xff] %v2654_v62  ;;  %v2655_v9 = vmax.f32 %v2623_v57, 0.0  ;;  %v3288_v15 = vadd.f32 %v3256_v20, %v3187_v55  ;;  %v3458_v34 = vmul.f32 %v5744_v61, %v5973_v36  ;;  %v3389_v47 = vadd.f32 %v3357_v44, %v3287_v0 }
 0x318   : > { %2685 = vst [vmem:[#allocation3 + $0xd9] sm:$0xff] %v2652_v11  ;;  %v6054_v22 = vmax.f32 %v2621_v51, 0.0  ;;  %v3616_v5 = vpack.c.bf16 %v3590_v18, %v3589_v1  ;;  %v3459_v52 = vmul.f32 %v5744_v61, %v5981_v42  ;;  %v3559_v37 = vmul.f32 %v5770_v60, %v3522_v28 }
 0x319   : > { %2688 = vst [vmem:[#allocation3 + $0xf9] sm:$0xff] %v2655_v9  ;;  %v3390_v59 = vadd.f32 %v3358_v39, %v3288_v15  ;;  %v3560_v29 = vmul.f32 %v5770_v60, %v3523_v25  ;;  %v2752_v38 = vmul.f32 %v5711_v53, %v6018_v7  ;;  %v3490_v3 = vadd.f32 %v3458_v34, %v3389_v47 }
 0x31a   : > { %2686 = vst [vmem:[#allocation3 + $0xe1] sm:$0xff] %v6054_v22  ;;  %4476 = vmatmul.mubr.bf16.gmra.mrb[48].mxu0 %v3616_v5  ;;  %v2753_v23 = vmul.f32 %v5711_v53, %v3319_v12  ;;  %v2853_v14 = vmul.f32 %v5723_v33, %v5976_v8  ;;  %v2854_v46 = vmul.f32 %v5723_v33, %v5986_v31 }
 0x31b   : > { %v3491_v16 = vadd.f32 %v3459_v52, %v3390_v59  ;;  %v2954_v35 = vmul.f32 %v5732_v19, %v6026_v41  ;;  %v2955_v27 = vmul.f32 %v5732_v19, %v6028_v4  ;;  %v3055_v7 = vmul.f32 %v5749_v26, %v3320_v48  ;;  %v2818_v41 = vld [vmem:[#allocation3 + $0xc1] sm:$0xff] }
 0x31c   : > { %v3591_v49 = vadd.f32 %v3559_v37, %v3490_v3  ;;  %v2885_v2 = vadd.f32 %v2853_v14, %v2752_v38  ;;  %v2886_v56 = vadd.f32 %v2854_v46, %v2753_v23  ;;  %v3056_v12 = vmul.f32 %v5749_v26, %v3321_v54 }
 0x31d   : > { %v3592_v6 = vadd.f32 %v3560_v29, %v3491_v16  ;;  %v3156_v8 = vmul.f32 %v5739_v21, %v5973_v36  ;;  %v3157_v31 = vmul.f32 %v5739_v21, %v5981_v42  ;;  %v3257_v20 = vmul.f32 %v5782_v32, %v3522_v28 }
 0x31e   : > { %v2986_v13 = vadd.f32 %v2954_v35, %v2885_v2  ;;  %v2987_v50 = vadd.f32 %v2955_v27, %v2886_v56  ;;  %v3258_v4 = vmul.f32 %v5782_v32, %v3523_v25  ;;  %v3460_v45 = vmul.f32 %v5744_v61, %v2652_v11 }
 0x31f   : > { %v3617_v10 = vpack.c.bf16 %v3592_v6, %v3591_v49  ;;  %v6081_v43 = vld [vmem:[#allocation3 + $0xd8] sm:$0xff]  ;;  %v3461_v17 = vmul.f32 %v5744_v61, %v6054_v22  ;;  %v2754_v36 = vmul.f32 %v5711_v53, %v3320_v48  ;;  %v2755_v42 = vmul.f32 %v5711_v53, %v3321_v54 }
 0x320   : > { %v3087_v58 = vadd.f32 %v3055_v7, %v2986_v13  ;;  %v3088_v1 = vadd.f32 %v3056_v12, %v2987_v50  ;;  %v3359_v62 = vmul.f32 %v5755_v24, %v6081_v43  ;;  %v2855_v57 = vmul.f32 %v5723_v33, %v2818_v41  ;;  %v3121_v56 = vld [vmem:[#allocation3 + $0xd9] sm:$0xff] }
 0x321   : > { %4479 = vmatprep.mubr.bf16.mxu0 %v3617_v10  ;;  %v6090_v55 = vld [vmem:[#allocation3 + $0xe0] sm:$0xff]  ;;  %v2856_v51 = vmul.f32 %v5723_v33, %v2819_v30  ;;  %v2956_v48 = vmul.f32 %v5732_v19, %v3522_v28  ;;  %v2957_v54 = vmul.f32 %v5732_v19, %v3523_v25  ;;  %v3057_v18 = vmul.f32 %v5749_v26, %v6081_v43  ;;  %v6121_v30 = vld [vmem:[#allocation3 + $0xf8] sm:$0xff] }
 0x322   : > { %v6092_v0 = vld [vmem:[#allocation3 + $0xda] sm:$0xff]  ;;  %v6094_v11 = vld [vmem:[#allocation3 + $0xe2] sm:$0xff]  ;;  %v4441_v44 = vpop.f32.mrb[52].mxu1  ;;  %v3188_v9 = vadd.f32 %v3156_v8, %v3087_v58  ;;  %v3189_v15 = vadd.f32 %v3157_v31, %v3088_v1  ;;  %v3360_v39 = vmul.f32 %v5755_v24, %v6090_v55  ;;  %v2887_v52 = vadd.f32 %v2855_v57, %v2754_v36  ;;  %v6128_v58 = vld [vmem:[#allocation3 + $0xf1] sm:$0xff] }
 0x323   : > { %v3561_v34 = vmul.f32 %v5770_v60, %v6092_v0  ;;  %v2587_v5 = vmul.f32 %v4441_v44, %v5700_v63  ;;  %v2511_v47 = vpop.f32.mrb[53].mxu1  ;;  %v3562_v28 = vmul.f32 %v5770_v60, %v6094_v11  ;;  %v2888_v25 = vadd.f32 %v2856_v51, %v2755_v42  ;;  %v6130_v1 = vld [vmem:[#allocation3 + $0xf9] sm:$0xff] }
 0x324   : > { %v2585_v59 = vmul.f32 %v5700_v63, %v2511_v47  ;;  %v4442_v37 = vpop.f32.mrb[54].mxu1  ;;  %v3289_v29 = vadd.f32 %v3257_v20, %v3188_v9  ;;  %v3290_v38 = vadd.f32 %v3258_v4, %v3189_v15  ;;  %v3058_v3 = vmul.f32 %v5749_v26, %v6090_v55  ;;  %v6119_v4 = vld [vmem:[#allocation3 + $0xf0] sm:$0xff]  ;;  %v6139_v51 = vld [vmem:[#allocation3 + $0xfa] sm:$0xff] }
 0x325   : > { %v2626_v23 = vadd.f32 %v5705_v40, %v2587_v5  ;;  %v2588_v14 = vmul.f32 %v4442_v37, %v5700_v63  ;;  %v2514_v46 = vpop.f32.mrb[55].mxu1  ;;  %v2988_v16 = vadd.f32 %v2956_v48, %v2887_v52  ;;  %v2989_v35 = vadd.f32 %v2957_v54, %v2888_v25 }
 0x326   : > { %v2624_v27 = vadd.f32 %v5705_v40, %v2585_v59  ;;  %v2586_v7 = vmul.f32 %v5700_v63, %v2514_v46  ;;  %v3391_v49 = vadd.f32 %v3359_v62, %v3289_v29  ;;  %v3392_v2 = vadd.f32 %v3360_v39, %v3290_v38 }
 0x327   : > { %v2658_v12 = vmax.f32 %v2626_v23, 0.0  ;;  %v2627_v6 = vadd.f32 %v5705_v40, %v2588_v14  ;;  %v3089_v8 = vadd.f32 %v3057_v18, %v2988_v16  ;;  %v3090_v31 = vadd.f32 %v3058_v3, %v2989_v35 }
 0x328   : > { %v6116_v20 = vmax.f32 %v2624_v27, 0.0  ;;  %v2625_v41 = vadd.f32 %v5705_v40, %v2586_v7  ;;  %v3492_v13 = vadd.f32 %v3460_v45, %v3391_v49  ;;  %v3493_v50 = vadd.f32 %v3461_v17, %v3392_v2  ;;  %v6132_v40 = vld [vmem:[#allocation3 + $0xf2] sm:$0xff] }
 0x329   : > { %2691 = vst [vmem:[#allocation3 + $0x121] sm:$0xff] %v2658_v12  ;;  %v2659_v63 = vmax.f32 %v2627_v6, 0.0  ;;  %v3158_v10 = vmul.f32 %v5739_v21, %v3121_v56  ;;  %v3159_v36 = vmul.f32 %v5739_v21, %v6054_v22  ;;  %v3259_v42 = vmul.f32 %v5782_v32, %v6092_v0 }
 0x32a   : > { %2689 = vst [vmem:[#allocation3 + $0x109] sm:$0xff] %v6116_v20  ;;  %v6135_v45 = vmax.f32 %v2625_v41, 0.0  ;;  %v3593_v17 = vadd.f32 %v3561_v34, %v3492_v13  ;;  %v3594_v62 = vadd.f32 %v3562_v28, %v3493_v50  ;;  %v3260_v57 = vmul.f32 %v5782_v32, %v6094_v11 }
 0x32b   : > { %2692 = vst [vmem:[#allocation3 + $0x129] sm:$0xff] %v2659_v63  ;;  %v3190_v48 = vadd.f32 %v3158_v10, %v3089_v8  ;;  %v3191_v54 = vadd.f32 %v3159_v36, %v3090_v31  ;;  %v3361_v18 = vmul.f32 %v5755_v24, %v6119_v4  ;;  %v3362_v44 = vmul.f32 %v5755_v24, %v6121_v30 }
 0x32c   : > { %2690 = vst [vmem:[#allocation3 + $0x111] sm:$0xff] %v6135_v45  ;;  %v3618_v9 = vpack.c.bf16 %v3594_v62, %v3593_v17  ;;  %v3462_v15 = vmul.f32 %v5744_v61, %v6128_v58  ;;  %v3463_v39 = vmul.f32 %v5744_v61, %v6130_v1  ;;  %v3563_v34 = vmul.f32 %v5770_v60, %v6132_v40  ;;  %v6207_v62 = vld [vmem:[%s6602_s7] ss:$0 sm:$0xff] }
 0x32d   : > { %v3291_v5 = vadd.f32 %v3259_v42, %v3190_v48  ;;  %v3292_v47 = vadd.f32 %v3260_v57, %v3191_v54  ;;  %v3564_v28 = vmul.f32 %v5770_v60, %v6139_v51  ;;  %v2756_v52 = vmul.f32 %v5711_v53, %v6081_v43 }
 0x32e   : > { %4480 = vmatmul.mubr.bf16.gmra.mrb[52].mxu0 %v3618_v9  ;;  %v2757_v25 = vmul.f32 %v5711_v53, %v6090_v55  ;;  %v2857_v59 = vmul.f32 %v5723_v33, %v3121_v56  ;;  %v2858_v37 = vmul.f32 %v5723_v33, %v6054_v22  ;;  %v2958_v29 = vmul.f32 %v5732_v19, %v6092_v0 }
 0x32f   : > { %v3393_v38 = vadd.f32 %v3361_v18, %v3291_v5  ;;  %v3394_v3 = vadd.f32 %v3362_v44, %v3292_v47  ;;  %v2959_v23 = vmul.f32 %v5732_v19, %v6094_v11  ;;  %v3059_v43 = vmul.f32 %v5749_v26, %v6119_v4 }
 0x330   : > { %v2889_v14 = vadd.f32 %v2857_v59, %v2756_v52  ;;  %v2890_v46 = vadd.f32 %v2858_v37, %v2757_v25  ;;  %v3060_v53 = vmul.f32 %v5749_v26, %v6121_v30  ;;  %v3160_v55 = vmul.f32 %v5739_v21, %v6128_v58  ;;  %v6234_v59 = vld [vmem:[%s6607_s12 + $0x1] ss:$0 sm:$0xff] }
 0x331   : > { %v3494_v33 = vadd.f32 %v3462_v15, %v3393_v38  ;;  %v3495_v22 = vadd.f32 %v3463_v39, %v3394_v3  ;;  %v3161_v0 = vmul.f32 %v5739_v21, %v6130_v1  ;;  %v3261_v16 = vmul.f32 %v5782_v32, %v6132_v40  ;;  %v6175_v19 = vld [vmem:[#allocation3 + $0x108] sm:$0xff]  ;;  %v6246_v3 = vld [vmem:[%s6607_s12 + $0x2] ss:$0 sm:$0xff] }
 0x332   : > { %v2990_v11 = vadd.f32 %v2958_v29, %v2889_v14  ;;  %v2991_v35 = vadd.f32 %v2959_v23, %v2890_v46  ;;  %v3262_v27 = vmul.f32 %v5782_v32, %v6139_v51  ;;  %v3363_v26 = vmul.f32 %v5755_v24, %v6175_v19  ;;  %v4445_v7 = vpop.f32.mrb[56].mxu1  ;;  %v6194_v32 = vld [vmem:[%s6601_s6] ss:$0 sm:$0xff] }
 0x333   : > { %v3595_v49 = vadd.f32 %v3563_v34, %v3494_v33  ;;  %v3596_v2 = vadd.f32 %v3564_v28, %v3495_v22  ;;  %v6181_v56 = vld [vmem:[#allocation3 + $0x110] sm:$0xff]  ;;  %v3464_v21 = vmul.f32 %v5744_v61, %v6116_v20  ;;  %v3465_v12 = vmul.f32 %v5744_v61, %v6135_v45  ;;  %v2527_v41 = vpop.f32.mrb[57].mxu1  ;;  %v6266_v22 = vld [vmem:[#allocation3 + $0x120] sm:$0xff] }
 0x334   : > { %v6187_v6 = vld [vmem:[#allocation3 + $0x10a] sm:$0xff]  ;;  %v6189_v8 = vld [vmem:[#allocation3 + $0x112] sm:$0xff]  ;;  %v2591_v31 = vmul.f32 %v6194_v32, %v4445_v7  ;;  %v3091_v13 = vadd.f32 %v3059_v43, %v2990_v11  ;;  %v3092_v50 = vadd.f32 %v3060_v53, %v2991_v35  ;;  %v3364_v63 = vmul.f32 %v5755_v24, %v6181_v56  ;;  %v4446_v61 = vpop.f32.mrb[58].mxu1 }
 0x335   : > { %v2589_v10 = vmul.f32 %v6194_v32, %v2527_v41  ;;  %v3619_v36 = vpack.c.bf16 %v3596_v2, %v3595_v49  ;;  %v3565_v42 = vmul.f32 %v5770_v60, %v6187_v6  ;;  %v3566_v17 = vmul.f32 %v5770_v60, %v6189_v8  ;;  %v2530_v48 = vpop.f32.mrb[59].mxu1  ;;  %v6218_v60 = vld [vmem:[%s6607_s12] ss:$0 sm:$0xff]  ;;  %v6276_v35 = vld [vmem:[#allocation3 + $0x128] sm:$0xff] }
 0x336   : > { %v6210_v57 = vadd.f32 %v6207_v62, %v2591_v31  ;;  %v2592_v24 = vmul.f32 %v6194_v32, %v4446_v61  ;;  %v3192_v54 = vadd.f32 %v3160_v55, %v3091_v13  ;;  %v3193_v18 = vadd.f32 %v3161_v0, %v3092_v50  ;;  %v6260_v55 = vld [vmem:[%s6607_s12 + $0x3] ss:$0 sm:$0xff]  ;;  %v6298_v50 = vld [vmem:[%s6607_s12 + $0x6] ss:$0 sm:$0xff] }
 0x337   : > { %v2628_v44 = vadd.f32 %v6207_v62, %v2589_v10  ;;  %v2590_v9 = vmul.f32 %v6194_v32, %v2530_v48  ;;  %4483 = vmatprep.mubr.bf16.mxu0 %v3619_v36  ;;  %v2758_v15 = vmul.f32 %v6218_v60, %v6119_v4  ;;  %v2759_v39 = vmul.f32 %v6218_v60, %v6121_v30  ;;  %v2824_v10 = vld [vmem:[#allocation3 + $0x109] sm:$0xff] }
 0x338   : > { %v2662_v34 = vmax.f32 %v6210_v57, 0.0  ;;  %v6226_v5 = vadd.f32 %v6207_v62, %v2592_v24  ;;  %v3293_v47 = vadd.f32 %v3261_v16, %v3192_v54  ;;  %v3294_v28 = vadd.f32 %v3262_v27, %v3193_v18  ;;  %v6272_v16 = vld [vmem:[%s6607_s12 + $0x4] ss:$0 sm:$0xff]  ;;  %v6278_v27 = vld [vmem:[#allocation3 + $0x121] sm:$0xff]  ;;  %v6313_v48 = vld [vmem:[#allocation3 + $0x12a] sm:$0xff] }
 0x339   : > { %v6228_v52 = vmax.f32 %v2628_v44, 0.0  ;;  %v2629_v25 = vadd.f32 %v6207_v62, %v2590_v9  ;;  %v2859_v4 = vmul.f32 %v6234_v59, %v6128_v58  ;;  %v2860_v30 = vmul.f32 %v6234_v59, %v6130_v1  ;;  %v6318_v44 = vld [vmem:[%s6607_s12 + $0x8] ss:$0 sm:$0xff] }
 0x33a   : > { %2695 = vst [vmem:[#allocation3 + $0x151] sm:$0xff] %v2662_v34  ;;  %v2663_v37 = vmax.f32 %v6226_v5, 0.0  ;;  %v3395_v29 = vadd.f32 %v3363_v26, %v3293_v47  ;;  %v3396_v38 = vadd.f32 %v3364_v63, %v3294_v28  ;;  %v2960_v23 = vmul.f32 %v6246_v3, %v6132_v40  ;;  %v6280_v26 = vld [vmem:[#allocation3 + $0x129] sm:$0xff] }
 0x33b   : > { %2693 = vst [vmem:[#allocation3 + $0x139] sm:$0xff] %v6228_v52  ;;  %v6251_v58 = vmax.f32 %v2629_v25, 0.0  ;;  %v2891_v1 = vadd.f32 %v2859_v4, %v2758_v15  ;;  %v2892_v43 = vadd.f32 %v2860_v30, %v2759_v39  ;;  %v2961_v14 = vmul.f32 %v6246_v3, %v6139_v51 }
 0x33c   : > { %2696 = vst [vmem:[#allocation3 + $0x159] sm:$0xff] %v2663_v37  ;;  %v3496_v46 = vadd.f32 %v3464_v21, %v3395_v29  ;;  %v3497_v53 = vadd.f32 %v3465_v12, %v3396_v38  ;;  %v3061_v40 = vmul.f32 %v6260_v55, %v6175_v19  ;;  %v3062_v33 = vmul.f32 %v6260_v55, %v6181_v56  ;;  %v6287_v21 = vld [vmem:[%s6607_s12 + $0x5] ss:$0 sm:$0xff] }
 0x33d   : > { %2694 = vst [vmem:[#allocation3 + $0x141] sm:$0xff] %v6251_v58  ;;  %v2992_v51 = vadd.f32 %v2960_v23, %v2891_v1  ;;  %v2993_v0 = vadd.f32 %v2961_v14, %v2892_v43  ;;  %v3162_v11 = vmul.f32 %v6272_v16, %v6116_v20  ;;  %v3163_v2 = vmul.f32 %v6272_v16, %v6135_v45  ;;  %v6291_v20 = vld [vmem:[#allocation3 + $0x122] sm:$0xff] }
 0x33e   : > { %v3597_v7 = vadd.f32 %v3565_v42, %v3496_v46  ;;  %v3598_v49 = vadd.f32 %v3566_v17, %v3497_v53  ;;  %v3263_v12 = vmul.f32 %v6287_v21, %v6187_v6  ;;  %v3264_v13 = vmul.f32 %v6287_v21, %v6189_v8  ;;  %v6307_v42 = vld [vmem:[%s6607_s12 + $0x7] ss:$0 sm:$0xff] }
 0x33f   : > { %v3093_v31 = vadd.f32 %v3061_v40, %v2992_v51  ;;  %v3094_v41 = vadd.f32 %v3062_v33, %v2993_v0  ;;  %v3365_v63 = vmul.f32 %v6298_v50, %v6266_v22  ;;  %v3366_v36 = vmul.f32 %v6298_v50, %v6276_v35 }
 0x340   : > { %v3620_v61 = vpack.c.bf16 %v3598_v49, %v3597_v7  ;;  %v3466_v17 = vmul.f32 %v6307_v42, %v6278_v27  ;;  %v3467_v24 = vmul.f32 %v6307_v42, %v6280_v26  ;;  %v3567_v9 = vmul.f32 %v6318_v44, %v6291_v20 }
 0x341   : > { %v3194_v54 = vadd.f32 %v3162_v11, %v3093_v31  ;;  %v3195_v18 = vadd.f32 %v3163_v2, %v3094_v41  ;;  %v2760_v15 = vmul.f32 %v6218_v60, %v6175_v19  ;;  %v2761_v39 = vmul.f32 %v6218_v60, %v6181_v56 }
 0x342   : > { %4484 = vmatmul.mubr.bf16.gmra.mrb[56].mxu0 %v3620_v61  ;;  %v2861_v47 = vmul.f32 %v6234_v59, %v2824_v10  ;;  %v2862_v28 = vmul.f32 %v6234_v59, %v6135_v45  ;;  %v2962_v25 = vmul.f32 %v6246_v3, %v6187_v6  ;;  %v3568_v29 = vmul.f32 %v6318_v44, %v6313_v48  ;;  %v6353_v10 = vld [vmem:[#allocation3 + $0x138] sm:$0xff] }
 0x343   : > { %v3295_v4 = vadd.f32 %v3263_v12, %v3194_v54  ;;  %v3296_v30 = vadd.f32 %v3264_v13, %v3195_v18  ;;  %v2963_v19 = vmul.f32 %v6246_v3, %v6189_v8  ;;  %v3063_v56 = vmul.f32 %v6260_v55, %v6266_v22 }
 0x344   : > { %v2893_v38 = vadd.f32 %v2861_v47, %v2760_v15  ;;  %v2894_v23 = vadd.f32 %v2862_v28, %v2761_v39  ;;  %v3064_v1 = vmul.f32 %v6260_v55, %v6276_v35  ;;  %v4449_v45 = vpop.f32.mrb[60].mxu1  ;;  %v3164_v6 = vmul.f32 %v6272_v16, %v6278_v27 }
 0x345   : > { %v3397_v43 = vadd.f32 %v3365_v63, %v3295_v4  ;;  %v3398_v14 = vadd.f32 %v3366_v36, %v3296_v30  ;;  %v3165_v46 = vmul.f32 %v6272_v16, %v6280_v26  ;;  %v2595_v53 = vmul.f32 %v6194_v32, %v4449_v45  ;;  %v2543_v8 = vpop.f32.mrb[61].mxu1 }
 0x346   : > { %v2994_v40 = vadd.f32 %v2962_v25, %v2893_v38  ;;  %v2995_v33 = vadd.f32 %v2963_v19, %v2894_v23  ;;  %v3265_v51 = vmul.f32 %v6287_v21, %v6291_v20  ;;  %v2593_v0 = vmul.f32 %v6194_v32, %v2543_v8  ;;  %v4450_v11 = vpop.f32.mrb[62].mxu1  ;;  %v3532_v38 = vld [vmem:[#allocation3 + $0x13a] sm:$0xff] }
 0x347   : > { %v3498_v7 = vadd.f32 %v3466_v17, %v3397_v43  ;;  %v3499_v49 = vadd.f32 %v3467_v24, %v3398_v14  ;;  %v3266_v2 = vmul.f32 %v6287_v21, %v6313_v48  ;;  %v6350_v12 = vadd.f32 %v6207_v62, %v2595_v53  ;;  %v2546_v41 = vpop.f32.mrb[63].mxu1  ;;  %v3331_v24 = vld [vmem:[#allocation3 + $0x140] sm:$0xff] }
 0x348   : > { %v2596_v31 = vmul.f32 %v6194_v32, %v4450_v11  ;;  %v3095_v13 = vadd.f32 %v3063_v56, %v2994_v40  ;;  %v3096_v63 = vadd.f32 %v3064_v1, %v2995_v33  ;;  %v2632_v61 = vadd.f32 %v6207_v62, %v2593_v0  ;;  %v3533_v1 = vld [vmem:[#allocation3 + $0x142] sm:$0xff] }
 0x349   : > { %v2594_v36 = vmul.f32 %v6194_v32, %v2546_v41  ;;  %v3599_v54 = vadd.f32 %v3567_v9, %v3498_v7  ;;  %v3600_v17 = vadd.f32 %v3568_v29, %v3499_v49  ;;  %v2666_v18 = vmax.f32 %v6350_v12, 0.0  ;;  %v3332_v49 = vld [vmem:[#allocation3 + $0x150] sm:$0xff] }
 0x34a   : > { %v6359_v15 = vadd.f32 %v6207_v62, %v2596_v31  ;;  %v3196_v39 = vadd.f32 %v3164_v6, %v3095_v13  ;;  %v3197_v47 = vadd.f32 %v3165_v46, %v3096_v63  ;;  %v6361_v28 = vmax.f32 %v2632_v61, 0.0  ;;  %v2828_v61 = vld [vmem:[#allocation3 + $0x139] sm:$0xff] }
 0x34b   : > { %v2633_v25 = vadd.f32 %v6207_v62, %v2594_v36  ;;  %v3621_v4 = vpack.c.bf16 %v3600_v17, %v3599_v54  ;;  %v3367_v30 = vmul.f32 %v6298_v50, %v6353_v10  ;;  %2699 = vst [vmem:[#allocation3 + $0x181] sm:$0xff] %v2666_v18  ;;  %v3368_v19 = vmul.f32 %v6298_v50, %v3331_v24 }
 0x34c   : > { %v2667_v32 = vmax.f32 %v6359_v15, 0.0  ;;  %v3297_v9 = vadd.f32 %v3265_v51, %v3196_v39  ;;  %v3298_v29 = vadd.f32 %v3266_v2, %v3197_v47  ;;  %2697 = vst [vmem:[#allocation3 + $0x169] sm:$0xff] %v6361_v28  ;;  %v3468_v62 = vmul.f32 %v6307_v42, %v6228_v52  ;;  %v3333_v2 = vld [vmem:[#allocation3 + $0x158] sm:$0xff] }
 0x34d   : > { %v6371_v23 = vmax.f32 %v2633_v25, 0.0  ;;  %4487 = vmatprep.mubr.bf16.mxu0 %v3621_v4  ;;  %v3469_v56 = vmul.f32 %v6307_v42, %v6251_v58  ;;  %v2762_v14 = vmul.f32 %v6218_v60, %v6266_v22  ;;  %v2763_v6 = vmul.f32 %v6218_v60, %v6276_v35  ;;  %v3534_v47 = vld [vmem:[#allocation3 + $0x152] sm:$0xff] }
 0x34e   : > { %2700 = vst [vmem:[#allocation3 + $0x189] sm:$0xff] %v2667_v32  ;;  %v3399_v45 = vadd.f32 %v3367_v30, %v3297_v9  ;;  %v3400_v43 = vadd.f32 %v3368_v19, %v3298_v29  ;;  %v3569_v46 = vmul.f32 %v6318_v44, %v3532_v38  ;;  %v2863_v53 = vmul.f32 %v6234_v59, %v6278_v27  ;;  %v3535_v30 = vld [vmem:[#allocation3 + $0x15a] sm:$0xff] }
 0x34f   : > { %2698 = vst [vmem:[#allocation3 + $0x171] sm:$0xff] %v6371_v23  ;;  %v2864_v8 = vmul.f32 %v6234_v59, %v6280_v26  ;;  %v2964_v40 = vmul.f32 %v6246_v3, %v6291_v20  ;;  %v3570_v22 = vmul.f32 %v6318_v44, %v3533_v1  ;;  %v2965_v35 = vmul.f32 %v6246_v3, %v6313_v48 }
 0x350   : > { %v3500_v33 = vadd.f32 %v3468_v62, %v3399_v45  ;;  %v3501_v51 = vadd.f32 %v3469_v56, %v3400_v43  ;;  %v2895_v0 = vadd.f32 %v2863_v53, %v2762_v14  ;;  %v3065_v7 = vmul.f32 %v6260_v55, %v6353_v10  ;;  %v3131_v14 = vld [vmem:[#allocation3 + $0x151] sm:$0xff] }
 0x351   : > { %v2896_v11 = vadd.f32 %v2864_v8, %v2763_v6  ;;  %v3066_v27 = vmul.f32 %v6260_v55, %v3331_v24  ;;  %v3166_v20 = vmul.f32 %v6272_v16, %v6228_v52  ;;  %v3167_v63 = vmul.f32 %v6272_v16, %v6251_v58 }
 0x352   : > { %v3601_v26 = vadd.f32 %v3569_v46, %v3500_v33  ;;  %v3602_v31 = vadd.f32 %v3570_v22, %v3501_v51  ;;  %v2996_v41 = vadd.f32 %v2964_v40, %v2895_v0  ;;  %v3267_v48 = vmul.f32 %v6287_v21, %v3532_v38  ;;  %v3135_v12 = vld [vmem:[#allocation3 + $0x181] sm:$0xff] }
 0x353   : > { %v2997_v13 = vadd.f32 %v2965_v35, %v2896_v11  ;;  %v3268_v54 = vmul.f32 %v6287_v21, %v3533_v1  ;;  %v3369_v17 = vmul.f32 %v6298_v50, %v3332_v49  ;;  %v3370_v39 = vmul.f32 %v6298_v50, %v3333_v2  ;;  %v3334_v33 = vld [vmem:[#allocation3 + $0x168] sm:$0xff] }
 0x354   : > { %v3622_v36 = vpack.c.bf16 %v3602_v31, %v3601_v26  ;;  %v3097_v25 = vadd.f32 %v3065_v7, %v2996_v41  ;;  %v3470_v52 = vmul.f32 %v6307_v42, %v2662_v34  ;;  %v2764_v9 = vmul.f32 %v6218_v60, %v6353_v10  ;;  %v3132_v10 = vld [vmem:[#allocation3 + $0x159] sm:$0xff] }
 0x355   : > { %v3098_v4 = vadd.f32 %v3066_v27, %v2997_v13  ;;  %v2765_v29 = vmul.f32 %v6218_v60, %v3331_v24  ;;  %v2865_v19 = vmul.f32 %v6234_v59, %v2828_v61  ;;  %v2866_v62 = vmul.f32 %v6234_v59, %v6251_v58 }
 0x356   : > { %4488 = vmatmul.mubr.bf16.gmra.mrb[60].mxu0 %v3622_v36  ;;  %v2966_v56 = vmul.f32 %v6246_v3, %v3532_v38  ;;  %v3198_v45 = vadd.f32 %v3166_v20, %v3097_v25  ;;  %v3471_v57 = vmul.f32 %v6307_v42, %v2663_v37  ;;  %v3571_v34 = vmul.f32 %v6318_v44, %v3534_v47  ;;  %v3335_v5 = vld [vmem:[#allocation3 + $0x170] sm:$0xff] }
 0x357   : > { %v3199_v43 = vadd.f32 %v3167_v63, %v3098_v4  ;;  %v3572_v6 = vmul.f32 %v6318_v44, %v3535_v30  ;;  %v2897_v24 = vadd.f32 %v2865_v19, %v2764_v9  ;;  %v2898_v46 = vadd.f32 %v2866_v62, %v2765_v29  ;;  %v3536_v19 = vld [vmem:[#allocation3 + $0x16a] sm:$0xff]  ;;  %v3537_v62 = vld [vmem:[#allocation3 + $0x172] sm:$0xff] }
 0x358   : > { %v2967_v53 = vmul.f32 %v6246_v3, %v3533_v1  ;;  %v3299_v8 = vadd.f32 %v3267_v48, %v3198_v45  ;;  %v3067_v38 = vmul.f32 %v6260_v55, %v3332_v49  ;;  %v3068_v40 = vmul.f32 %v6260_v55, %v3333_v2 }
 0x359   : > { %v3300_v58 = vadd.f32 %v3268_v54, %v3199_v43  ;;  %v2998_v51 = vadd.f32 %v2966_v56, %v2897_v24  ;;  %v3168_v22 = vmul.f32 %v6272_v16, %v3131_v14  ;;  %v3169_v35 = vmul.f32 %v6272_v16, %v3132_v10 }
 0x35a   : > { %v2999_v37 = vadd.f32 %v2967_v53, %v2898_v46  ;;  %v3401_v0 = vadd.f32 %v3369_v17, %v3299_v8  ;;  %v3269_v7 = vmul.f32 %v6287_v21, %v3534_v47  ;;  %v3270_v1 = vmul.f32 %v6287_v21, %v3535_v30 }
 0x35b   : > { %v3402_v11 = vadd.f32 %v3370_v39, %v3300_v58  ;;  %v3099_v27 = vadd.f32 %v3067_v38, %v2998_v51  ;;  %v3371_v31 = vmul.f32 %v6298_v50, %v3334_v33  ;;  %v3372_v20 = vmul.f32 %v6298_v50, %v3335_v5  ;;  %v3336_v38 = vld [vmem:[#allocation3 + $0x180] sm:$0xff] }
 0x35c   : > { %v3100_v26 = vadd.f32 %v3068_v40, %v2999_v37  ;;  %v3502_v41 = vadd.f32 %v3470_v52, %v3401_v0  ;;  %v3472_v63 = vmul.f32 %v6307_v42, %v6361_v28  ;;  %v2766_v48 = vmul.f32 %v6218_v60, %v3332_v49 }
 0x35d   : > { %v3503_v13 = vadd.f32 %v3471_v57, %v3402_v11  ;;  %v3200_v61 = vadd.f32 %v3168_v22, %v3099_v27  ;;  %v2767_v54 = vmul.f32 %v6218_v60, %v3333_v2  ;;  %v2867_v17 = vmul.f32 %v6234_v59, %v3131_v14 }
 0x35e   : > { %v3201_v36 = vadd.f32 %v3169_v35, %v3100_v26  ;;  %v3603_v39 = vadd.f32 %v3571_v34, %v3502_v41  ;;  %v2868_v4 = vmul.f32 %v6234_v59, %v3132_v10  ;;  %v2968_v9 = vmul.f32 %v6246_v3, %v3534_v47 }
 0x35f   : > { %v3604_v25 = vadd.f32 %v3572_v6, %v3503_v13  ;;  %v3301_v29 = vadd.f32 %v3269_v7, %v3200_v61  ;;  %v2899_v56 = vadd.f32 %v2867_v17, %v2766_v48  ;;  %v2969_v45 = vmul.f32 %v6246_v3, %v3535_v30  ;;  %v3337_v7 = vld [vmem:[#allocation3 + $0x188] sm:$0xff] }
 0x360   : > { %v3302_v52 = vadd.f32 %v3270_v1, %v3201_v36  ;;  %v2900_v43 = vadd.f32 %v2868_v4, %v2767_v54  ;;  %v3069_v57 = vmul.f32 %v6260_v55, %v3334_v33  ;;  %v3070_v2 = vmul.f32 %v6260_v55, %v3335_v5  ;;  %v3136_v4 = vld [vmem:[#allocation3 + $0x189] sm:$0xff] }
 0x361   : > { %v3623_v49 = vpack.c.bf16 %v3604_v25, %v3603_v39  ;;  %v3403_v14 = vadd.f32 %v3371_v31, %v3301_v29  ;;  %v3473_v10 = vmul.f32 %v6307_v42, %v6371_v23  ;;  %v3000_v6 = vadd.f32 %v2968_v9, %v2899_v56 }
 0x362   : > { %v3404_v34 = vadd.f32 %v3372_v20, %v3302_v52  ;;  %v3573_v47 = vmul.f32 %v6318_v44, %v3536_v19  ;;  %v3574_v24 = vmul.f32 %v6318_v44, %v3537_v62  ;;  %v3001_v46 = vadd.f32 %v2969_v45, %v2900_v43 }
 0x363   : > { %4491 = vmatprep.mubr.bf16.mxu0 %v3623_v49  ;;  %v3504_v53 = vadd.f32 %v3472_v63, %v3403_v14  ;;  %v3101_v8 = vadd.f32 %v3069_v57, %v3000_v6  ;;  %v3170_v58 = vmul.f32 %v6272_v16, %v6361_v28  ;;  %v3171_v51 = vmul.f32 %v6272_v16, %v6371_v23 }
 0x364   : > { %v3505_v30 = vadd.f32 %v3473_v10, %v3404_v34  ;;  %v3102_v40 = vadd.f32 %v3070_v2, %v3001_v46  ;;  %v3271_v37 = vmul.f32 %v6287_v21, %v3536_v19  ;;  %v3272_v11 = vmul.f32 %v6287_v21, %v3537_v62  ;;  %v3439_v34 = vld [vmem:[#allocation3 + $0x199] sm:$0xff] }
 0x365   : > { %v3605_v22 = vadd.f32 %v3573_v47, %v3504_v53  ;;  %v3202_v0 = vadd.f32 %v3170_v58, %v3101_v8  ;;  %v3373_v27 = vmul.f32 %v6298_v50, %v3336_v38  ;;  %v2768_v26 = vmul.f32 %v6218_v60, %v3334_v33  ;;  %v3541_v8 = vld [vmem:[#allocation3 + $0x1a2] sm:$0xff] }
 0x366   : > { %v3606_v35 = vadd.f32 %v3574_v24, %v3505_v30  ;;  %v3203_v1 = vadd.f32 %v3171_v51, %v3102_v40  ;;  %v2769_v31 = vmul.f32 %v6218_v60, %v3335_v5  ;;  %v2869_v13 = vmul.f32 %v6234_v59, %v6361_v28  ;;  %v3538_v60 = vld [vmem:[#allocation3 + $0x182] sm:$0xff]  ;;  %v3539_v5 = vld [vmem:[#allocation3 + $0x18a] sm:$0xff]  ;;  %v4561_v24 = vld [vmem:[#allocation2 + $0x8] sm:$0xff] }
 0x367   : > { %v3303_v41 = vadd.f32 %v3271_v37, %v3202_v0  ;;  %v2870_v63 = vmul.f32 %v6234_v59, %v6371_v23  ;;  %v3374_v61 = vmul.f32 %v6298_v50, %v3337_v7  ;;  %v3474_v36 = vmul.f32 %v6307_v42, %v2666_v18  ;;  %v3540_v30 = vld [vmem:[#allocation3 + $0x19a] sm:$0xff] }
 0x368   : > { %v3624_v20 = vpack.c.bf16 %v3606_v35, %v3605_v22  ;;  %v3304_v48 = vadd.f32 %v3272_v11, %v3203_v1  ;;  %v2970_v54 = vmul.f32 %v6246_v3, %v3536_v19  ;;  %v2901_v17 = vadd.f32 %v2869_v13, %v2768_v26  ;;  %v6482_v1 = vld [vmem:[%s6605_s10] ss:$0 sm:$0xff] }
 0x369   : > { %v3405_v33 = vadd.f32 %v3373_v27, %v3303_v41  ;;  %v2902_v39 = vadd.f32 %v2870_v63, %v2769_v31  ;;  %v2971_v28 = vmul.f32 %v6246_v3, %v3537_v62  ;;  %v3475_v59 = vmul.f32 %v6307_v42, %v2667_v32  ;;  %v3338_v3 = vld [vmem:[#allocation3 + $0x198] sm:$0xff]  ;;  %v6487_v27 = vld [vmem:[%s6606_s11] ss:$0 sm:$0xff] }
 0x36a   : > { %4492 = vmatmul.mubr.bf16.gmra.mrb[64].mxu0 %v3624_v20  ;;  %v3406_v25 = vadd.f32 %v3374_v61, %v3304_v48  ;;  %v3071_v23 = vmul.f32 %v6260_v55, %v3336_v38  ;;  %v3002_v9 = vadd.f32 %v2970_v54, %v2901_v17  ;;  %v3072_v52 = vmul.f32 %v6260_v55, %v3337_v7  ;;  %v3440_v55 = vld [vmem:[#allocation3 + $0x1a1] sm:$0xff] }
 0x36b   : > { %v3506_v18 = vadd.f32 %v3474_v36, %v3405_v33  ;;  %v3003_v29 = vadd.f32 %v2971_v28, %v2902_v39  ;;  %v3575_v56 = vmul.f32 %v6318_v44, %v3538_v60  ;;  %v3576_v45 = vmul.f32 %v6318_v44, %v3539_v5 }
 0x36c   : > { %v3507_v19 = vadd.f32 %v3475_v59, %v3406_v25  ;;  %v3103_v62 = vadd.f32 %v3071_v23, %v3002_v9  ;;  %v3172_v15 = vmul.f32 %v6272_v16, %v3135_v12  ;;  %v3173_v32 = vmul.f32 %v6272_v16, %v3136_v4 }
 0x36d   : > { %v3104_v49 = vadd.f32 %v3072_v52, %v3003_v29  ;;  %v3607_v43 = vadd.f32 %v3575_v56, %v3506_v18  ;;  %v3273_v2 = vmul.f32 %v6287_v21, %v3538_v60  ;;  %v3274_v14 = vmul.f32 %v6287_v21, %v3539_v5 }
 0x36e   : > { %v3608_v57 = vadd.f32 %v3576_v45, %v3507_v19  ;;  %v3204_v10 = vadd.f32 %v3172_v15, %v3103_v62  ;;  %v3375_v47 = vmul.f32 %v6298_v50, %v3338_v3  ;;  %v3376_v46 = vmul.f32 %v4561_v24, %v6298_v50 }
 0x36f   : > { %v3205_v6 = vadd.f32 %v3173_v32, %v3104_v49  ;;  %v3476_v38 = vmul.f32 %v6307_v42, %v3439_v34  ;;  %v3477_v40 = vmul.f32 %v6307_v42, %v3440_v55  ;;  %v3577_v37 = vmul.f32 %v6318_v44, %v3540_v30 }
 0x370   : > { %v3625_v53 = vpack.c.bf16 %v3608_v57, %v3607_v43  ;;  %v3305_v58 = vadd.f32 %v3273_v2, %v3204_v10  ;;  %v3578_v22 = vmul.f32 %v6318_v44, %v3541_v8 }
 0x371   : > { %v3306_v16 = vadd.f32 %v3274_v14, %v3205_v6 }
 0x372   : > { %4495 = vmatprep.mubr.bf16.mxu0 %v3625_v53  ;;  %v3407_v21 = vadd.f32 %v3375_v47, %v3305_v58 }
 0x373   : > { %v3408_v51 = vadd.f32 %v3376_v46, %v3306_v16 }
 0x374   : > { %v3508_v35 = vadd.f32 %v3476_v38, %v3407_v21 }
 0x375   : > { %v3509_v0 = vadd.f32 %v3477_v40, %v3408_v51 }
 0x376   : > { %v3609_v50 = vadd.f32 %v3577_v37, %v3508_v35 }
 0x377   : > { %v3610_v11 = vadd.f32 %v3578_v22, %v3509_v0 }
 0x379   : > { %v3626_v7 = vpack.c.bf16 %v3610_v11, %v3609_v50 }
 0x37b   : > { %4496 = vmatmul.mubr.bf16.gmra.mrb[68].mxu0 %v3626_v7 }
 0x3c8   : > { %v4469_v42 = vpop.f32.mrb[40].mxu0 }
 0x3c9   : > { %v3861_v44 = vmul.f32 %v4469_v42, %v6482_v1  ;;  %v3725_v26 = vpop.f32.mrb[41].mxu0 }
 0x3ca   : > { %v3859_v31 = vmul.f32 %v6482_v1, %v3725_v26  ;;  %v4470_v20 = vpop.f32.mrb[42].mxu0 }
 0x3cb   : > { %v3900_v41 = vadd.f32 %v6487_v27, %v3861_v44  ;;  %v3862_v13 = vmul.f32 %v4470_v20, %v6482_v1  ;;  %v3728_v63 = vpop.f32.mrb[43].mxu0 }
 0x3cc   : > { %v3898_v48 = vadd.f32 %v6487_v27, %v3859_v31  ;;  %v3860_v61 = vmul.f32 %v6482_v1, %v3728_v63 }
 0x3cd   : > { %v3932_v36 = vmax.f32 %v3900_v41, 0.0  ;;  %v3901_v54 = vadd.f32 %v6487_v27, %v3862_v13 }
 0x3ce   : > { %v3930_v33 = vmax.f32 %v3898_v48, 0.0  ;;  %v3899_v60 = vadd.f32 %v6487_v27, %v3860_v61 }
 0x3cf   : > { %3964 = vst [vmem:[%s6498_s17 + $0x10] sm:$0xff] %v3932_v36  ;;  %v3933_v5 = vmax.f32 %v3901_v54, 0.0 }
 0x3d0   : > { %3962 = vst [vmem:[%s6498_s17] sm:$0xff] %v3930_v33  ;;  %v3931_v17 = vmax.f32 %v3899_v60, 0.0 }
 0x3d1   : > { %3965 = vst [vmem:[%s6498_s17 + $0x18] sm:$0xff] %v3933_v5 }
 0x3d2   : > { %3963 = vst [vmem:[%s6498_s17 + $0x8] sm:$0xff] %v3931_v17 }
 0x3dc   : > { %v4473_v39 = vpop.f32.mrb[44].mxu0 }
 0x3dd   : > { %v3865_v28 = vmul.f32 %v4473_v39, %v6482_v1  ;;  %v3741_v25 = vpop.f32.mrb[45].mxu0 }
 0x3de   : > { %v3863_v59 = vmul.f32 %v6482_v1, %v3741_v25  ;;  %v4474_v23 = vpop.f32.mrb[46].mxu0 }
 0x3df   : > { %v3904_v12 = vadd.f32 %v6487_v27, %v3865_v28  ;;  %v3866_v4 = vmul.f32 %v4474_v23, %v6482_v1  ;;  %v3744_v18 = vpop.f32.mrb[47].mxu0 }
 0x3e0   : > { %v3902_v9 = vadd.f32 %v6487_v27, %v3863_v59  ;;  %v3864_v29 = vmul.f32 %v6482_v1, %v3744_v18 }
 0x3e1   : > { %v3936_v52 = vmax.f32 %v3904_v12, 0.0  ;;  %v3905_v19 = vadd.f32 %v6487_v27, %v3866_v4 }
 0x3e2   : > { %v3934_v56 = vmax.f32 %v3902_v9, 0.0  ;;  %v3903_v45 = vadd.f32 %v6487_v27, %v3864_v29 }
 0x3e3   : > { %3968 = vst [vmem:[%s6498_s17 + $0x30] sm:$0xff] %v3936_v52  ;;  %v3937_v3 = vmax.f32 %v3905_v19, 0.0 }
 0x3e4   : > { %3966 = vst [vmem:[%s6498_s17 + $0x20] sm:$0xff] %v3934_v56  ;;  %v3935_v62 = vmax.f32 %v3903_v45, 0.0 }
 0x3e5   : > { %3969 = vst [vmem:[%s6498_s17 + $0x38] sm:$0xff] %v3937_v3 }
 0x3e6   : > { %3967 = vst [vmem:[%s6498_s17 + $0x28] sm:$0xff] %v3935_v62 }
 0x3ed   : > { %v4477_v49 = vpop.f32.mrb[48].mxu0 }
 0x3ee   : > { %v3869_v15 = vmul.f32 %v4477_v49, %v6482_v1  ;;  %v3757_v32 = vpop.f32.mrb[49].mxu0 }
 0x3ef   : > { %v3867_v43 = vmul.f32 %v6482_v1, %v3757_v32  ;;  %v4478_v57 = vpop.f32.mrb[50].mxu0 }
 0x3f0   : > { %v3908_v2 = vadd.f32 %v6487_v27, %v3869_v15  ;;  %v3870_v14 = vmul.f32 %v4478_v57, %v6482_v1  ;;  %v3760_v34 = vpop.f32.mrb[51].mxu0 }
 0x3f1   : > { %v3906_v55 = vadd.f32 %v6487_v27, %v3867_v43  ;;  %v3868_v10 = vmul.f32 %v6482_v1, %v3760_v34 }
 0x3f2   : > { %v3940_v6 = vmax.f32 %v3908_v2, 0.0  ;;  %v3909_v47 = vadd.f32 %v6487_v27, %v3870_v14 }
 0x3f3   : > { %v3938_v24 = vmax.f32 %v3906_v55, 0.0  ;;  %v3907_v46 = vadd.f32 %v6487_v27, %v3868_v10 }
 0x3f4   : > { %3972 = vst [vmem:[%s6498_s17 + $0x50] sm:$0xff] %v3940_v6  ;;  %v3941_v53 = vmax.f32 %v3909_v47, 0.0 }
 0x3f5   : > { %3970 = vst [vmem:[%s6498_s17 + $0x40] sm:$0xff] %v3938_v24  ;;  %v3939_v30 = vmax.f32 %v3907_v46, 0.0 }
 0x3f6   : > { %3973 = vst [vmem:[%s6498_s17 + $0x58] sm:$0xff] %v3941_v53 }
 0x3f7   : > { %3971 = vst [vmem:[%s6498_s17 + $0x48] sm:$0xff] %v3939_v30 }
 0x401   : > { %v4481_v8 = vpop.f32.mrb[52].mxu0 }
 0x402   : > { %v3873_v58 = vmul.f32 %v4481_v8, %v6482_v1  ;;  %v3773_v16 = vpop.f32.mrb[53].mxu0 }
 0x403   : > { %v3871_v38 = vmul.f32 %v6482_v1, %v3773_v16  ;;  %v4482_v40 = vpop.f32.mrb[54].mxu0 }
 0x404   : > { %v3912_v21 = vadd.f32 %v6487_v27, %v3873_v58  ;;  %v3874_v51 = vmul.f32 %v4482_v40, %v6482_v1  ;;  %v3776_v37 = vpop.f32.mrb[55].mxu0 }
 0x405   : > { %v3910_v22 = vadd.f32 %v6487_v27, %v3871_v38  ;;  %v3872_v35 = vmul.f32 %v6482_v1, %v3776_v37 }
 0x406   : > { %v3944_v0 = vmax.f32 %v3912_v21, 0.0  ;;  %v3913_v50 = vadd.f32 %v6487_v27, %v3874_v51 }
 0x407   : > { %v3942_v11 = vmax.f32 %v3910_v22, 0.0  ;;  %v3911_v7 = vadd.f32 %v6487_v27, %v3872_v35 }
 0x408   : > { %3976 = vst [vmem:[%s6498_s17 + $0x70] sm:$0xff] %v3944_v0  ;;  %v3945_v42 = vmax.f32 %v3913_v50, 0.0 }
 0x409   : > { %3974 = vst [vmem:[%s6498_s17 + $0x60] sm:$0xff] %v3942_v11  ;;  %v3943_v44 = vmax.f32 %v3911_v7, 0.0 }
 0x40a   : > { %3977 = vst [vmem:[%s6498_s17 + $0x78] sm:$0xff] %v3945_v42 }
 0x40b   : > { %3975 = vst [vmem:[%s6498_s17 + $0x68] sm:$0xff] %v3943_v44 }
 0x415   : > { %v4485_v26 = vpop.f32.mrb[56].mxu0 }
 0x416   : > { %v3877_v31 = vmul.f32 %v4485_v26, %v6482_v1  ;;  %v3789_v20 = vpop.f32.mrb[57].mxu0 }
 0x417   : > { %v3875_v41 = vmul.f32 %v6482_v1, %v3789_v20  ;;  %v4486_v13 = vpop.f32.mrb[58].mxu0 }
 0x418   : > { %v3916_v63 = vadd.f32 %v6487_v27, %v3877_v31  ;;  %v3878_v48 = vmul.f32 %v4486_v13, %v6482_v1  ;;  %v3792_v61 = vpop.f32.mrb[59].mxu0 }
 0x419   : > { %v3914_v36 = vadd.f32 %v6487_v27, %v3875_v41  ;;  %v3876_v54 = vmul.f32 %v6482_v1, %v3792_v61 }
 0x41a   : > { %v3948_v33 = vmax.f32 %v3916_v63, 0.0  ;;  %v3917_v60 = vadd.f32 %v6487_v27, %v3878_v48 }
 0x41b   : > { %v3946_v5 = vmax.f32 %v3914_v36, 0.0  ;;  %v3915_v17 = vadd.f32 %v6487_v27, %v3876_v54 }
 0x41c   : > { %3980 = vst [vmem:[%s6498_s17 + $0x90] sm:$0xff] %v3948_v33  ;;  %v3949_v39 = vmax.f32 %v3917_v60, 0.0 }
 0x41d   : > { %3978 = vst [vmem:[%s6498_s17 + $0x80] sm:$0xff] %v3946_v5  ;;  %v3947_v28 = vmax.f32 %v3915_v17, 0.0 }
 0x41e   : > { %3981 = vst [vmem:[%s6498_s17 + $0x98] sm:$0xff] %v3949_v39 }
 0x41f   : > { %3979 = vst [vmem:[%s6498_s17 + $0x88] sm:$0xff] %v3947_v28 }
 0x429   : > { %v4489_v25 = vpop.f32.mrb[60].mxu0 }
 0x42a   : > { %v3881_v59 = vmul.f32 %v4489_v25, %v6482_v1  ;;  %v3805_v23 = vpop.f32.mrb[61].mxu0 }
 0x42b   : > { %v3879_v12 = vmul.f32 %v6482_v1, %v3805_v23  ;;  %v4490_v4 = vpop.f32.mrb[62].mxu0 }
 0x42c   : > { %v3920_v18 = vadd.f32 %v6487_v27, %v3881_v59  ;;  %v3882_v9 = vmul.f32 %v4490_v4, %v6482_v1  ;;  %v3808_v29 = vpop.f32.mrb[63].mxu0 }
 0x42d   : > { %v3918_v52 = vadd.f32 %v6487_v27, %v3879_v12  ;;  %v3880_v19 = vmul.f32 %v6482_v1, %v3808_v29 }
 0x42e   : > { %v3952_v56 = vmax.f32 %v3920_v18, 0.0  ;;  %v3921_v45 = vadd.f32 %v6487_v27, %v3882_v9 }
 0x42f   : > { %v3950_v3 = vmax.f32 %v3918_v52, 0.0  ;;  %v3919_v62 = vadd.f32 %v6487_v27, %v3880_v19 }
 0x430   : > { %3984 = vst [vmem:[%s6498_s17 + $0xb0] sm:$0xff] %v3952_v56  ;;  %v3953_v49 = vmax.f32 %v3921_v45, 0.0 }
 0x431   : > { %3982 = vst [vmem:[%s6498_s17 + $0xa0] sm:$0xff] %v3950_v3  ;;  %v3951_v15 = vmax.f32 %v3919_v62, 0.0 }
 0x432   : > { %3985 = vst [vmem:[%s6498_s17 + $0xb8] sm:$0xff] %v3953_v49 }
 0x433   : > { %3983 = vst [vmem:[%s6498_s17 + $0xa8] sm:$0xff] %v3951_v15 }
 0x43d   : > { %v4493_v32 = vpop.f32.mrb[64].mxu0 }
 0x43e   : > { %v3885_v43 = vmul.f32 %v4493_v32, %v6482_v1  ;;  %v3821_v57 = vpop.f32.mrb[65].mxu0 }
 0x43f   : > { %v3883_v2 = vmul.f32 %v6482_v1, %v3821_v57  ;;  %v4494_v14 = vpop.f32.mrb[66].mxu0 }
 0x440   : > { %v3924_v34 = vadd.f32 %v6487_v27, %v3885_v43  ;;  %v3886_v55 = vmul.f32 %v4494_v14, %v6482_v1  ;;  %v3824_v10 = vpop.f32.mrb[67].mxu0 }
 0x441   : > { %v3922_v6 = vadd.f32 %v6487_v27, %v3883_v2  ;;  %v3884_v47 = vmul.f32 %v6482_v1, %v3824_v10 }
 0x442   : > { %v3956_v24 = vmax.f32 %v3924_v34, 0.0  ;;  %v3925_v46 = vadd.f32 %v6487_v27, %v3886_v55 }
 0x443   : > { %v3954_v53 = vmax.f32 %v3922_v6, 0.0  ;;  %v3923_v30 = vadd.f32 %v6487_v27, %v3884_v47 }
 0x444   : > { %3988 = vst [vmem:[%s6498_s17 + $0xd0] sm:$0xff] %v3956_v24  ;;  %v3957_v8 = vmax.f32 %v3925_v46, 0.0 }
 0x445   : > { %3986 = vst [vmem:[%s6498_s17 + $0xc0] sm:$0xff] %v3954_v53  ;;  %v3955_v58 = vmax.f32 %v3923_v30, 0.0 }
 0x446   : > { %3989 = vst [vmem:[%s6498_s17 + $0xd8] sm:$0xff] %v3957_v8 }
 0x447   : > { %3987 = vst [vmem:[%s6498_s17 + $0xc8] sm:$0xff] %v3955_v58 }
 0x44e   : > { %v4497_v16 = vpop.f32.mrb[68].mxu0 }
 0x44f   : > { %v3889_v38 = vmul.f32 %v4497_v16, %v6482_v1  ;;  %v3837_v40 = vpop.f32.mrb[69].mxu0 }
 0x450   : > { %v3887_v21 = vmul.f32 %v6482_v1, %v3837_v40  ;;  %v4498_v51 = vpop.f32.mrb[70].mxu0 }
 0x451   : > { %v3928_v37 = vadd.f32 %v6487_v27, %v3889_v38  ;;  %v3890_v22 = vmul.f32 %v4498_v51, %v6482_v1  ;;  %v3840_v35 = vpop.f32.mrb[71].mxu0 }
 0x452   : > { %v3926_v0 = vadd.f32 %v6487_v27, %v3887_v21  ;;  %v3888_v50 = vmul.f32 %v6482_v1, %v3840_v35 }
 0x453   : > { %v3960_v11 = vmax.f32 %v3928_v37, 0.0  ;;  %v3929_v7 = vadd.f32 %v6487_v27, %v3890_v22 }
 0x454   : > { %v3958_v42 = vmax.f32 %v3926_v0, 0.0  ;;  %v3927_v44 = vadd.f32 %v6487_v27, %v3888_v50 }
 0x455   : > { %3992 = vst [vmem:[%s6498_s17 + $0xf0] sm:$0xff] %v3960_v11  ;;  %v3961_v26 = vmax.f32 %v3929_v7, 0.0 }
 0x456   : > { %3990 = vst [vmem:[%s6498_s17 + $0xe0] sm:$0xff] %v3958_v42  ;;  %v3959_v31 = vmax.f32 %v3927_v44, 0.0 }
 0x457   : > { %3993 = vst [vmem:[%s6498_s17 + $0xf8] sm:$0xff] %v3961_v26 }
 0x458   : > { %3991 = vst [vmem:[%s6498_s17 + $0xe8] sm:$0xff] %v3959_v31 }
 0x459 PF: > { %s23_s25 = sadd.s32 1, %s4568_s25  }
 0x45a   : > { %p20_p4 = scmp.ge.s32.totalorder %s23_s25, 4  }
 0x45c   :  { %22 = sbr.rel (!%p20_p4) target bundleno = 1 (0x1), region = 111 }

</bundles_post_ra>
